<compile_context>
chip_gen: v5e
topology: v5e:2x2
jax: 0.10.0
libtpu: 0.0.40
codegen_flags: <defaults>
</compile_context>

<pallas_src>
import jax
import jax.numpy as jnp
from jax import lax
from jax.experimental import pallas as pl
from jax.experimental.pallas import tpu as pltpu

BN_EPS = 1e-5   # nn.BatchNorm2d default eps
LANE = 128


def _round_up(x, m):
    return (x + m - 1) // m * m


# --------------------------------------------------------------------------
# In-kernel helpers
# --------------------------------------------------------------------------
def _conv3x3_from_padded(xpad_ref, w_ref):
    """(H+2, W+2, Cp) zero-padded VMEM tile x (9, Cp, Cop) weights -> (H*W, Cop) f32."""
    Hp, Wp, Cp = xpad_ref.shape
    H, W = Hp - 2, Wp - 2
    Cop = w_ref.shape[2]
    acc = jnp.zeros((H * W, Cop), jnp.float32)
    for kh in range(3):
        for kw in range(3):
            xs = xpad_ref[kh:kh + H, kw:kw + W, :].reshape(H * W, Cp)
            acc = acc + jnp.dot(xs, w_ref[kh * 3 + kw],
                                preferred_element_type=jnp.float32)
    return acc


def _store_stats(st_ref, acc):
    """Per-block partial BN statistics: row0 = sum, row1 = sum of squares."""
    Cop = acc.shape[1]
    st_ref[0, 0:1, :] = jnp.sum(acc, axis=0, keepdims=True)
    st_ref[0, 1:2, :] = jnp.sum(acc * acc, axis=0, keepdims=True)
    st_ref[0, 2:8, :] = jnp.zeros((6, Cop), jnp.float32)


# --------------------------------------------------------------------------
# Kernels
# --------------------------------------------------------------------------
def conv_stats_kernel(x_ref, w_ref, y_ref, st_ref, xpad_ref):
    """y = conv3x3(x) (pre-BN); also emit partial batch statistics of y."""
    _, H, W, _ = x_ref.shape
    Cop = w_ref.shape[2]
    xpad_ref[...] = jnp.zeros(xpad_ref.shape, xpad_ref.dtype)
    xpad_ref[1:H + 1, 1:W + 1, :] = x_ref[0]
    acc = _conv3x3_from_padded(xpad_ref, w_ref)
    y_ref[0] = acc.reshape(H, W, Cop)
    _store_stats(st_ref, acc)


def bn_relu_conv_stats_kernel(y1_ref, s_ref, b_ref, w_ref, y2_ref, st_ref,
                              hpad_ref):
    """h = relu(bn1(y1)); y2 = conv3x3(h); partial batch statistics of y2."""
    _, H, W, _ = y1_ref.shape
    Cop = w_ref.shape[2]
    h = jnp.maximum(y1_ref[0] * s_ref[0] + b_ref[0], 0.0).astype(jnp.bfloat16)
    hpad_ref[...] = jnp.zeros(hpad_ref.shape, hpad_ref.dtype)
    hpad_ref[1:H + 1, 1:W + 1, :] = h
    acc = _conv3x3_from_padded(hpad_ref, w_ref)
    y2_ref[0] = acc.reshape(H, W, Cop)
    _store_stats(st_ref, acc)


def bn_add_relu_kernel(y2_ref, r_ref, s_ref, b_ref, o_ref):
    """out = relu(bn2(y2) + residual)."""
    o_ref[0] = jnp.maximum(y2_ref[0] * s_ref[0] + b_ref[0] + r_ref[0], 0.0)


# --------------------------------------------------------------------------
# pallas_call wrappers (grid over batch, "parallel" for megacore)
# --------------------------------------------------------------------------
def _cparams():
    return pltpu.CompilerParams(dimension_semantics=("parallel",))


def _conv1_pass(x_in, wmat):
    N, H, W, Cp = x_in.shape
    Cop = wmat.shape[2]
    return pl.pallas_call(
        conv_stats_kernel,
        grid=(N,),
        in_specs=[
            pl.BlockSpec((1, H, W, Cp), lambda n: (n, 0, 0, 0)),
            pl.BlockSpec((9, Cp, Cop), lambda n: (0, 0, 0)),
        ],
        out_specs=(
            pl.BlockSpec((1, H, W, Cop), lambda n: (n, 0, 0, 0)),
            pl.BlockSpec((1, 8, Cop), lambda n: (n, 0, 0)),
        ),
        out_shape=(
            jax.ShapeDtypeStruct((N, H, W, Cop), jnp.float32),
            jax.ShapeDtypeStruct((N, 8, Cop), jnp.float32),
        ),
        scratch_shapes=[pltpu.VMEM((H + 2, W + 2, Cp), jnp.bfloat16)],
        compiler_params=_cparams(),
    )(x_in, wmat)


def _bn_relu_conv2_pass(y1, scale1, shift1, wmat):
    N, H, W, Cop = y1.shape
    return pl.pallas_call(
        bn_relu_conv_stats_kernel,
        grid=(N,),
        in_specs=[
            pl.BlockSpec((1, H, W, Cop), lambda n: (n, 0, 0, 0)),
            pl.BlockSpec((1, Cop), lambda n: (0, 0)),
            pl.BlockSpec((1, Cop), lambda n: (0, 0)),
            pl.BlockSpec((9, Cop, Cop), lambda n: (0, 0, 0)),
        ],
        out_specs=(
            pl.BlockSpec((1, H, W, Cop), lambda n: (n, 0, 0, 0)),
            pl.BlockSpec((1, 8, Cop), lambda n: (n, 0, 0)),
        ),
        out_shape=(
            jax.ShapeDtypeStruct((N, H, W, Cop), jnp.float32),
            jax.ShapeDtypeStruct((N, 8, Cop), jnp.float32),
        ),
        scratch_shapes=[pltpu.VMEM((H + 2, W + 2, Cop), jnp.bfloat16)],
        compiler_params=_cparams(),
    )(y1, scale1, shift1, wmat)


def _bn_add_relu_pass(y2, res, scale2, shift2):
    N, H, W, Cop = y2.shape
    return pl.pallas_call(
        bn_add_relu_kernel,
        grid=(N,),
        in_specs=[
            pl.BlockSpec((1, H, W, Cop), lambda n: (n, 0, 0, 0)),
            pl.BlockSpec((1, H, W, Cop), lambda n: (n, 0, 0, 0)),
            pl.BlockSpec((1, Cop), lambda n: (0, 0)),
            pl.BlockSpec((1, Cop), lambda n: (0, 0)),
        ],
        out_specs=pl.BlockSpec((1, H, W, Cop), lambda n: (n, 0, 0, 0)),
        out_shape=jax.ShapeDtypeStruct((N, H, W, Cop), jnp.float32),
        compiler_params=_cparams(),
    )(y2, res, scale2, shift2)


# --------------------------------------------------------------------------
# Forward wrapper
# --------------------------------------------------------------------------
def residual_block_forward(x_nchw, params):
    """Pallas forward of ResidualBlock (stride=1, downsample=None), train-mode BN."""
    w1, g1, b1 = params["w1"], params["g1"], params["b1"]
    w2, g2, b2 = params["w2"], params["g2"], params["b2"]
    N, Cin, H, W = x_nchw.shape
    Cout = w1.shape[0]
    assert Cin == Cout, "identity residual requires in_channels == out_channels"
    Cp = _round_up(Cin, LANE)
    Cop = _round_up(Cout, LANE)

    x_nhwc = jnp.transpose(x_nchw, (0, 2, 3, 1)).astype(jnp.float32)
    # conv1 input: channel-padded, bf16 MXU operand
    x_in = jnp.pad(x_nhwc, ((0, 0), (0, 0), (0, 0), (0, Cp - Cin))
                   ).astype(jnp.bfloat16)
    # identity residual: channel-padded, f32 (added in f32 after bn2)
    res = jnp.pad(x_nhwc, ((0, 0), (0, 0), (0, 0), (0, Cop - Cin)))

    def prep_w(w, cin_pad):
        # OIHW -> (kh, kw, cin, cout), zero-pad channels -> (9, cin_pad, Cop) bf16
        wm = jnp.transpose(w, (2, 3, 1, 0)).astype(jnp.float32)
        wm = jnp.pad(wm, ((0, 0), (0, 0),
                          (0, cin_pad - wm.shape[2]), (0, Cop - wm.shape[3])))
        return wm.reshape(9, cin_pad, Cop).astype(jnp.bfloat16)

    w1m = prep_w(w1, Cp)
    w2m = prep_w(w2, Cop)

    def pad_c(v):
        return jnp.pad(v.astype(jnp.float32), (0, Cop - Cout))

    count = float(N * H * W)

    def finalize(stats, gamma, beta):
        # reduce per-block partial sums -> biased batch mean/var -> scale/shift
        total = jnp.sum(stats, axis=0)                 # (8, Cop)
        mean = total[0] / count
        var = jnp.maximum(total[1] / count - mean * mean, 0.0)
        scale = gamma * lax.rsqrt(var + BN_EPS)
        shift = beta - mean * scale
        return scale.reshape(1, Cop), shift.reshape(1, Cop)

    # pass 1: conv1 (+ BN1 partial stats)
    y1, st1 = _conv1_pass(x_in, w1m)
    scale1, shift1 = finalize(st1, pad_c(g1), pad_c(b1))

    # pass 2: bn1 + relu + conv2 (+ BN2 partial stats)
    y2, st2 = _bn_relu_conv2_pass(y1, scale1, shift1, w2m)
    scale2, shift2 = finalize(st2, pad_c(g2), pad_c(b2))

    # pass 3: bn2 + residual + relu
    out = _bn_add_relu_pass(y2, res, scale2, shift2)

    out = out[..., :Cout]
    return jnp.transpose(out, (0, 3, 1, 2)).astype(x_nchw.dtype)


# --------------------------------------------------------------------------
# Pure-JAX reference (matches PyTorch training-mode forward)
# --------------------------------------------------------------------------
def _ref_forward(x_nchw, params):
    def conv(x, w):
        return lax.conv_general_dilated(
            x, w, window_strides=(1, 1), padding=((1, 1), (1, 1)),
            dimension_numbers=("NCHW", "OIHW", "NCHW"),
            precision=lax.Precision.HIGHEST)

    def bn(x, g, b):
        mean = jnp.mean(x, axis=(0, 2, 3), keepdims=True)
        var = jnp.mean((x - mean) ** 2, axis=(0, 2, 3), keepdims=True)
        return ((x - mean) * lax.rsqrt(var + BN_EPS) * g.reshape(1, -1, 1, 1)
                + b.reshape(1, -1, 1, 1))

    h = jnp.maximum(bn(conv(x_nchw, params["w1"]), params["g1"], params["b1"]), 0.0)
    h = bn(conv(h, params["w2"]), params["g2"], params["b2"])
    return jnp.maximum(h + x_nchw, 0.0)


if __name__ == "__main__":
    key = jax.random.PRNGKey(0)
    N, C, H, W = 2, 8, 16, 16          # in_channels == out_channels (downsample=None)
    ks = jax.random.split(key, 7)

    x = jax.random.normal(ks[0], (N, C, H, W), jnp.float32)
    fan_in = C * 9
    params = {
        "w1": jax.random.normal(ks[1], (C, C, 3, 3), jnp.float32) / jnp.sqrt(fan_in),
        "g1": 1.0 + 0.1 * jax.random.normal(ks[2], (C,), jnp.float32),
        "b1": 0.1 * jax.random.normal(ks[3], (C,), jnp.float32),
        "w2": jax.random.normal(ks[4], (C, C, 3, 3), jnp.float32) / jnp.sqrt(fan_in),
        "g2": 1.0 + 0.1 * jax.random.normal(ks[5], (C,), jnp.float32),
        "b2": 0.1 * jax.random.normal(ks[6], (C,), jnp.float32),
    }

    fwd = jax.jit(residual_block_forward)
    out = jax.block_until_ready(fwd(x, params))
    ref = _ref_forward(x, params)

    assert out.shape == (N, C, H, W)
    max_err = float(jnp.max(jnp.abs(out - ref)))
    mean_err = float(jnp.mean(jnp.abs(out - ref)))
    # bf16 MXU operands (f32 accumulation) -> slightly looser tolerance than f32
    assert max_err < 5e-2 and mean_err < 1e-2, f"max_err={max_err} mean_err={mean_err}"

    print("KERNEL_OK")
</pallas_src>

<mosaic_0001>
module attributes {stable_mosaic.version = 11 : i64} {
  func.func @conv_stats_kernel(%arg0: i32, %arg1: memref<1x16x16x128xbf16, #tpu.memory_space<vmem>>, %arg2: memref<9x128x128xbf16, #tpu.memory_space<vmem>>, %arg3: memref<1x16x16x128xf32, #tpu.memory_space<vmem>>, %arg4: memref<1x8x128xf32, #tpu.memory_space<vmem>>, %arg5: memref<18x18x128xbf16, #tpu.memory_space<vmem>>) attributes {dimension_semantics = [#tpu.dimension_semantics<parallel>], iteration_bounds = array<i64: 2>, scalar_prefetch = 0 : i64, scratch_operands = 1 : i64, tpu.core_type = #tpu.core_type<tc>, window_params = [{transform_indices = @transform_0, window_bounds = array<i64: 1, 16, 16, 128>}, {pipeline_mode = #tpu.pipeline_mode<synchronous>, transform_indices = @transform_1, window_bounds = array<i64: 9, 128, 128>}, {transform_indices = @transform_2, window_bounds = array<i64: 1, 16, 16, 128>}, {transform_indices = @transform_3, window_bounds = array<i64: 1, 8, 128>}]} {
    %cst = arith.constant 0.000000e+00 : bf16
    %0 = vector.broadcast %cst : bf16 to vector<18x18x128xbf16>
    %c0 = arith.constant 0 : index
    %c0_0 = arith.constant 0 : index
    %c0_1 = arith.constant 0 : index
    %1 = vector.load %arg5[%c0, %c0_0, %c0_1] : memref<18x18x128xbf16, #tpu.memory_space<vmem>>, vector<18x18x128xbf16>
    tpu.vector_store %arg5[%c0, %c0_0, %c0_1], %0 {strides = array<i32>} : memref<18x18x128xbf16, #tpu.memory_space<vmem>>, vector<18x18x128xbf16>,
    %c0_2 = arith.constant 0 : index
    %c0_3 = arith.constant 0 : index
    %c0_4 = arith.constant 0 : index
    %c0_5 = arith.constant 0 : index
    %2 = vector.load %arg1[%c0_2, %c0_3, %c0_4, %c0_5] : memref<1x16x16x128xbf16, #tpu.memory_space<vmem>>, vector<1x16x16x128xbf16>
    %3 = vector.shape_cast %2 : vector<1x16x16x128xbf16> to vector<16x16x128xbf16>
    %c1 = arith.constant 1 : index
    %c1_6 = arith.constant 1 : index
    %c0_7 = arith.constant 0 : index
    %4 = vector.load %arg5[%c1, %c1_6, %c0_7] : memref<18x18x128xbf16, #tpu.memory_space<vmem>>, vector<16x16x128xbf16>
    tpu.vector_store %arg5[%c1, %c1_6, %c0_7], %3 {strides = array<i32>} : memref<18x18x128xbf16, #tpu.memory_space<vmem>>, vector<16x16x128xbf16>,
    %cst_8 = arith.constant 0.000000e+00 : f32
    %5 = vector.broadcast %cst_8 : f32 to vector<256x128xf32>
    %c0_9 = arith.constant 0 : index
    %c0_10 = arith.constant 0 : index
    %c0_11 = arith.constant 0 : index
    %6 = vector.load %arg5[%c0_9, %c0_10, %c0_11] : memref<18x18x128xbf16, #tpu.memory_space<vmem>>, vector<16x16x128xbf16>
    %7 = vector.shape_cast %6 : vector<16x16x128xbf16> to vector<256x128xbf16>
    %c0_12 = arith.constant 0 : index
    %c0_13 = arith.constant 0 : index
    %c0_14 = arith.constant 0 : index
    %8 = vector.load %arg2[%c0_12, %c0_13, %c0_14] : memref<9x128x128xbf16, #tpu.memory_space<vmem>>, vector<1x128x128xbf16>
    %9 = vector.shape_cast %8 : vector<1x128x128xbf16> to vector<128x128xbf16>
    %cst_15 = arith.constant dense<0.000000e+00> : vector<256x128xf32>
    %10 = tpu.matmul %7, %9, %cst_15 {dimension_numbers = #tpu.dot_dimension_numbers<[1], [0], [0], [1], [0, 0, 1, 1], [], []>} : vector<256x128xbf16>, vector<128x128xbf16>, vector<256x128xf32> -> vector<256x128xf32>
    %11 = arith.addf %5, %10 : vector<256x128xf32>
    %c0_16 = arith.constant 0 : index
    %c1_17 = arith.constant 1 : index
    %c0_18 = arith.constant 0 : index
    %12 = vector.load %arg5[%c0_16, %c1_17, %c0_18] : memref<18x18x128xbf16, #tpu.memory_space<vmem>>, vector<16x16x128xbf16>
    %13 = vector.shape_cast %12 : vector<16x16x128xbf16> to vector<256x128xbf16>
    %c1_19 = arith.constant 1 : index
    %c0_20 = arith.constant 0 : index
    %c0_21 = arith.constant 0 : index
    %14 = vector.load %arg2[%c1_19, %c0_20, %c0_21] : memref<9x128x128xbf16, #tpu.memory_space<vmem>>, vector<1x128x128xbf16>
    %15 = vector.shape_cast %14 : vector<1x128x128xbf16> to vector<128x128xbf16>
    %cst_22 = arith.constant dense<0.000000e+00> : vector<256x128xf32>
    %16 = tpu.matmul %13, %15, %cst_22 {dimension_numbers = #tpu.dot_dimension_numbers<[1], [0], [0], [1], [0, 0, 1, 1], [], []>} : vector<256x128xbf16>, vector<128x128xbf16>, vector<256x128xf32> -> vector<256x128xf32>
    %17 = arith.addf %11, %16 : vector<256x128xf32>
    %c0_23 = arith.constant 0 : index
    %c2 = arith.constant 2 : index
    %c0_24 = arith.constant 0 : index
    %18 = vector.load %arg5[%c0_23, %c2, %c0_24] : memref<18x18x128xbf16, #tpu.memory_space<vmem>>, vector<16x16x128xbf16>
    %19 = vector.shape_cast %18 : vector<16x16x128xbf16> to vector<256x128xbf16>
    %c2_25 = arith.constant 2 : index
    %c0_26 = arith.constant 0 : index
    %c0_27 = arith.constant 0 : index
    %20 = vector.load %arg2[%c2_25, %c0_26, %c0_27] : memref<9x128x128xbf16, #tpu.memory_space<vmem>>, vector<1x128x128xbf16>
    %21 = vector.shape_cast %20 : vector<1x128x128xbf16> to vector<128x128xbf16>
    %cst_28 = arith.constant dense<0.000000e+00> : vector<256x128xf32>
    %22 = tpu.matmul %19, %21, %cst_28 {dimension_numbers = #tpu.dot_dimension_numbers<[1], [0], [0], [1], [0, 0, 1, 1], [], []>} : vector<256x128xbf16>, vector<128x128xbf16>, vector<256x128xf32> -> vector<256x128xf32>
    %23 = arith.addf %17, %22 : vector<256x128xf32>
    %c1_29 = arith.constant 1 : index
    %c0_30 = arith.constant 0 : index
    %c0_31 = arith.constant 0 : index
    %24 = vector.load %arg5[%c1_29, %c0_30, %c0_31] : memref<18x18x128xbf16, #tpu.memory_space<vmem>>, vector<16x16x128xbf16>
    %25 = vector.shape_cast %24 : vector<16x16x128xbf16> to vector<256x128xbf16>
    %c3 = arith.constant 3 : index
    %c0_32 = arith.constant 0 : index
    %c0_33 = arith.constant 0 : index
    %26 = vector.load %arg2[%c3, %c0_32, %c0_33] : memref<9x128x128xbf16, #tpu.memory_space<vmem>>, vector<1x128x128xbf16>
    %27 = vector.shape_cast %26 : vector<1x128x128xbf16> to vector<128x128xbf16>
    %cst_34 = arith.constant dense<0.000000e+00> : vector<256x128xf32>
    %28 = tpu.matmul %25, %27, %cst_34 {dimension_numbers = #tpu.dot_dimension_numbers<[1], [0], [0], [1], [0, 0, 1, 1], [], []>} : vector<256x128xbf16>, vector<128x128xbf16>, vector<256x128xf32> -> vector<256x128xf32>
    %29 = arith.addf %23, %28 : vector<256x128xf32>
    %c1_35 = arith.constant 1 : index
    %c1_36 = arith.constant 1 : index
    %c0_37 = arith.constant 0 : index
    %30 = vector.load %arg5[%c1_35, %c1_36, %c0_37] : memref<18x18x128xbf16, #tpu.memory_space<vmem>>, vector<16x16x128xbf16>
    %31 = vector.shape_cast %30 : vector<16x16x128xbf16> to vector<256x128xbf16>
    %c4 = arith.constant 4 : index
    %c0_38 = arith.constant 0 : index
    %c0_39 = arith.constant 0 : index
    %32 = vector.load %arg2[%c4, %c0_38, %c0_39] : memref<9x128x128xbf16, #tpu.memory_space<vmem>>, vector<1x128x128xbf16>
    %33 = vector.shape_cast %32 : vector<1x128x128xbf16> to vector<128x128xbf16>
    %cst_40 = arith.constant dense<0.000000e+00> : vector<256x128xf32>
    %34 = tpu.matmul %31, %33, %cst_40 {dimension_numbers = #tpu.dot_dimension_numbers<[1], [0], [0], [1], [0, 0, 1, 1], [], []>} : vector<256x128xbf16>, vector<128x128xbf16>, vector<256x128xf32> -> vector<256x128xf32>
    %35 = arith.addf %29, %34 : vector<256x128xf32>
    %c1_41 = arith.constant 1 : index
    %c2_42 = arith.constant 2 : index
    %c0_43 = arith.constant 0 : index
    %36 = vector.load %arg5[%c1_41, %c2_42, %c0_43] : memref<18x18x128xbf16, #tpu.memory_space<vmem>>, vector<16x16x128xbf16>
    %37 = vector.shape_cast %36 : vector<16x16x128xbf16> to vector<256x128xbf16>
    %c5 = arith.constant 5 : index
    %c0_44 = arith.constant 0 : index
    %c0_45 = arith.constant 0 : index
    %38 = vector.load %arg2[%c5, %c0_44, %c0_45] : memref<9x128x128xbf16, #tpu.memory_space<vmem>>, vector<1x128x128xbf16>
    %39 = vector.shape_cast %38 : vector<1x128x128xbf16> to vector<128x128xbf16>
    %cst_46 = arith.constant dense<0.000000e+00> : vector<256x128xf32>
    %40 = tpu.matmul %37, %39, %cst_46 {dimension_numbers = #tpu.dot_dimension_numbers<[1], [0], [0], [1], [0, 0, 1, 1], [], []>} : vector<256x128xbf16>, vector<128x128xbf16>, vector<256x128xf32> -> vector<256x128xf32>
    %41 = arith.addf %35, %40 : vector<256x128xf32>
    %c2_47 = arith.constant 2 : index
    %c0_48 = arith.constant 0 : index
    %c0_49 = arith.constant 0 : index
    %42 = vector.load %arg5[%c2_47, %c0_48, %c0_49] : memref<18x18x128xbf16, #tpu.memory_space<vmem>>, vector<16x16x128xbf16>
    %43 = vector.shape_cast %42 : vector<16x16x128xbf16> to vector<256x128xbf16>
    %c6 = arith.constant 6 : index
    %c0_50 = arith.constant 0 : index
    %c0_51 = arith.constant 0 : index
    %44 = vector.load %arg2[%c6, %c0_50, %c0_51] : memref<9x128x128xbf16, #tpu.memory_space<vmem>>, vector<1x128x128xbf16>
    %45 = vector.shape_cast %44 : vector<1x128x128xbf16> to vector<128x128xbf16>
    %cst_52 = arith.constant dense<0.000000e+00> : vector<256x128xf32>
    %46 = tpu.matmul %43, %45, %cst_52 {dimension_numbers = #tpu.dot_dimension_numbers<[1], [0], [0], [1], [0, 0, 1, 1], [], []>} : vector<256x128xbf16>, vector<128x128xbf16>, vector<256x128xf32> -> vector<256x128xf32>
    %47 = arith.addf %41, %46 : vector<256x128xf32>
    %c2_53 = arith.constant 2 : index
    %c1_54 = arith.constant 1 : index
    %c0_55 = arith.constant 0 : index
    %48 = vector.load %arg5[%c2_53, %c1_54, %c0_55] : memref<18x18x128xbf16, #tpu.memory_space<vmem>>, vector<16x16x128xbf16>
    %49 = vector.shape_cast %48 : vector<16x16x128xbf16> to vector<256x128xbf16>
    %c7 = arith.constant 7 : index
    %c0_56 = arith.constant 0 : index
    %c0_57 = arith.constant 0 : index
    %50 = vector.load %arg2[%c7, %c0_56, %c0_57] : memref<9x128x128xbf16, #tpu.memory_space<vmem>>, vector<1x128x128xbf16>
    %51 = vector.shape_cast %50 : vector<1x128x128xbf16> to vector<128x128xbf16>
    %cst_58 = arith.constant dense<0.000000e+00> : vector<256x128xf32>
    %52 = tpu.matmul %49, %51, %cst_58 {dimension_numbers = #tpu.dot_dimension_numbers<[1], [0], [0], [1], [0, 0, 1, 1], [], []>} : vector<256x128xbf16>, vector<128x128xbf16>, vector<256x128xf32> -> vector<256x128xf32>
    %53 = arith.addf %47, %52 : vector<256x128xf32>
    %c2_59 = arith.constant 2 : index
    %c2_60 = arith.constant 2 : index
    %c0_61 = arith.constant 0 : index
    %54 = vector.load %arg5[%c2_59, %c2_60, %c0_61] : memref<18x18x128xbf16, #tpu.memory_space<vmem>>, vector<16x16x128xbf16>
    %55 = vector.shape_cast %54 : vector<16x16x128xbf16> to vector<256x128xbf16>
    %c8 = arith.constant 8 : index
    %c0_62 = arith.constant 0 : index
    %c0_63 = arith.constant 0 : index
    %56 = vector.load %arg2[%c8, %c0_62, %c0_63] : memref<9x128x128xbf16, #tpu.memory_space<vmem>>, vector<1x128x128xbf16>
    %57 = vector.shape_cast %56 : vector<1x128x128xbf16> to vector<128x128xbf16>
    %cst_64 = arith.constant dense<0.000000e+00> : vector<256x128xf32>
    %58 = tpu.matmul %55, %57, %cst_64 {dimension_numbers = #tpu.dot_dimension_numbers<[1], [0], [0], [1], [0, 0, 1, 1], [], []>} : vector<256x128xbf16>, vector<128x128xbf16>, vector<256x128xf32> -> vector<256x128xf32>
    %59 = arith.addf %53, %58 : vector<256x128xf32>
    %60 = vector.shape_cast %59 : vector<256x128xf32> to vector<16x16x128xf32>
    %c0_65 = arith.constant 0 : index
    %c0_66 = arith.constant 0 : index
    %c0_67 = arith.constant 0 : index
    %c0_68 = arith.constant 0 : index
    %61 = vector.load %arg3[%c0_65, %c0_66, %c0_67, %c0_68] : memref<1x16x16x128xf32, #tpu.memory_space<vmem>>, vector<1x16x16x128xf32>
    %62 = vector.shape_cast %61 : vector<1x16x16x128xf32> to vector<16x16x128xf32>
    %63 = vector.shape_cast %60 : vector<16x16x128xf32> to vector<1x16x16x128xf32>
    tpu.vector_store %arg3[%c0_65, %c0_66, %c0_67, %c0_68], %63 {strides = array<i32>} : memref<1x16x16x128xf32, #tpu.memory_space<vmem>>, vector<1x16x16x128xf32>,
    %cst_69 = arith.constant dense<0.000000e+00> : vector<128xf32>
    %64 = vector.multi_reduction <add>, %59, %cst_69 [0] : vector<256x128xf32> to vector<128xf32>
    %65 = vector.shape_cast %64 : vector<128xf32> to vector<1x128xf32>
    %c0_70 = arith.constant 0 : index
    %c0_71 = arith.constant 0 : index
    %c0_72 = arith.constant 0 : index
    %66 = vector.load %arg4[%c0_70, %c0_71, %c0_72] : memref<1x8x128xf32, #tpu.memory_space<vmem>>, vector<1x1x128xf32>
    %67 = vector.shape_cast %66 : vector<1x1x128xf32> to vector<1x128xf32>
    %68 = vector.shape_cast %65 : vector<1x128xf32> to vector<1x1x128xf32>
    tpu.vector_store %arg4[%c0_70, %c0_71, %c0_72], %68 {strides = array<i32>} : memref<1x8x128xf32, #tpu.memory_space<vmem>>, vector<1x1x128xf32>,
    %69 = arith.mulf %59, %59 : vector<256x128xf32>
    %cst_73 = arith.constant dense<0.000000e+00> : vector<128xf32>
    %70 = vector.multi_reduction <add>, %69, %cst_73 [0] : vector<256x128xf32> to vector<128xf32>
    %71 = vector.shape_cast %70 : vector<128xf32> to vector<1x128xf32>
    %c0_74 = arith.constant 0 : index
    %c1_75 = arith.constant 1 : index
    %c0_76 = arith.constant 0 : index
    %72 = vector.load %arg4[%c0_74, %c1_75, %c0_76] : memref<1x8x128xf32, #tpu.memory_space<vmem>>, vector<1x1x128xf32>
    %73 = vector.shape_cast %72 : vector<1x1x128xf32> to vector<1x128xf32>
    %74 = vector.shape_cast %71 : vector<1x128xf32> to vector<1x1x128xf32>
    tpu.vector_store %arg4[%c0_74, %c1_75, %c0_76], %74 {strides = array<i32>} : memref<1x8x128xf32, #tpu.memory_space<vmem>>, vector<1x1x128xf32>,
    %cst_77 = arith.constant 0.000000e+00 : f32
    %75 = vector.broadcast %cst_77 : f32 to vector<6x128xf32>
    %c0_78 = arith.constant 0 : index
    %c2_79 = arith.constant 2 : index
    %c0_80 = arith.constant 0 : index
    %76 = vector.load %arg4[%c0_78, %c2_79, %c0_80] : memref<1x8x128xf32, #tpu.memory_space<vmem>>, vector<1x6x128xf32>
    %77 = vector.shape_cast %76 : vector<1x6x128xf32> to vector<6x128xf32>
    %78 = vector.shape_cast %75 : vector<6x128xf32> to vector<1x6x128xf32>
    tpu.vector_store %arg4[%c0_78, %c2_79, %c0_80], %78 {strides = array<i32>} : memref<1x8x128xf32, #tpu.memory_space<vmem>>, vector<1x6x128xf32>,
    return
  }
  func.func @transform_0(%arg0: i32) -> (i32, i32, i32, i32) {
    %c0_i32 = arith.constant 0 : i32
    %c0_i32_0 = arith.constant 0 : i32
    %c0_i32_1 = arith.constant 0 : i32
    %c0_i32_2 = arith.constant 0 : i32
    return %arg0, %c0_i32, %c0_i32_0, %c0_i32_1 : i32, i32, i32, i32
  }
  func.func @transform_1(%arg0: i32) -> (i32, i32, i32) {
    %c0_i32 = arith.constant 0 : i32
    %c0_i32_0 = arith.constant 0 : i32
    %c0_i32_1 = arith.constant 0 : i32
    %c0_i32_2 = arith.constant 0 : i32
    return %c0_i32, %c0_i32_0, %c0_i32_1 : i32, i32, i32
  }
  func.func @transform_2(%arg0: i32) -> (i32, i32, i32, i32) {
    %c0_i32 = arith.constant 0 : i32
    %c0_i32_0 = arith.constant 0 : i32
    %c0_i32_1 = arith.constant 0 : i32
    %c0_i32_2 = arith.constant 0 : i32
    return %arg0, %c0_i32, %c0_i32_0, %c0_i32_1 : i32, i32, i32, i32
  }
  func.func @transform_3(%arg0: i32) -> (i32, i32, i32) {
    %c0_i32 = arith.constant 0 : i32
    %c0_i32_0 = arith.constant 0 : i32
    %c0_i32_1 = arith.constant 0 : i32
    return %arg0, %c0_i32, %c0_i32_0 : i32, i32, i32
  }
}

module attributes {stable_mosaic.version = 11 : i64} {
  func.func @bn_add_relu_kernel(%arg0: i32, %arg1: memref<1x16x16x128xf32, #tpu.memory_space<vmem>>, %arg2: memref<1x16x16x128xf32, #tpu.memory_space<vmem>>, %arg3: memref<1x128xf32, #tpu.memory_space<vmem>>, %arg4: memref<1x128xf32, #tpu.memory_space<vmem>>, %arg5: memref<1x16x16x128xf32, #tpu.memory_space<vmem>>) attributes {dimension_semantics = [#tpu.dimension_semantics<parallel>], iteration_bounds = array<i64: 2>, scalar_prefetch = 0 : i64, scratch_operands = 0 : i64, tpu.core_type = #tpu.core_type<tc>, window_params = [{transform_indices = @transform_0, window_bounds = array<i64: 1, 16, 16, 128>}, {transform_indices = @transform_1, window_bounds = array<i64: 1, 16, 16, 128>}, {pipeline_mode = #tpu.pipeline_mode<synchronous>, transform_indices = @transform_2, window_bounds = array<i64: 1, 128>}, {pipeline_mode = #tpu.pipeline_mode<synchronous>, transform_indices = @transform_3, window_bounds = array<i64: 1, 128>}, {transform_indices = @transform_4, window_bounds = array<i64: 1, 16, 16, 128>}]} {
    %c0 = arith.constant 0 : index
    %c0_0 = arith.constant 0 : index
    %c0_1 = arith.constant 0 : index
    %c0_2 = arith.constant 0 : index
    %0 = vector.load %arg1[%c0, %c0_0, %c0_1, %c0_2] : memref<1x16x16x128xf32, #tpu.memory_space<vmem>>, vector<1x16x16x128xf32>
    %1 = vector.shape_cast %0 : vector<1x16x16x128xf32> to vector<16x16x128xf32>
    %c0_3 = arith.constant 0 : index
    %c0_4 = arith.constant 0 : index
    %2 = vector.load %arg3[%c0_3, %c0_4] : memref<1x128xf32, #tpu.memory_space<vmem>>, vector<1x128xf32>
    %3 = vector.shape_cast %2 : vector<1x128xf32> to vector<128xf32>
    %4 = vector.shape_cast %3 : vector<128xf32> to vector<1x1x128xf32>
    %5 = vector.broadcast %4 : vector<1x1x128xf32> to vector<16x16x128xf32>
    %6 = arith.mulf %1, %5 : vector<16x16x128xf32>
    %c0_5 = arith.constant 0 : index
    %c0_6 = arith.constant 0 : index
    %7 = vector.load %arg4[%c0_5, %c0_6] : memref<1x128xf32, #tpu.memory_space<vmem>>, vector<1x128xf32>
    %8 = vector.shape_cast %7 : vector<1x128xf32> to vector<128xf32>
    %9 = vector.shape_cast %8 : vector<128xf32> to vector<1x1x128xf32>
    %10 = vector.broadcast %9 : vector<1x1x128xf32> to vector<16x16x128xf32>
    %11 = arith.addf %6, %10 : vector<16x16x128xf32>
    %c0_7 = arith.constant 0 : index
    %c0_8 = arith.constant 0 : index
    %c0_9 = arith.constant 0 : index
    %c0_10 = arith.constant 0 : index
    %12 = vector.load %arg2[%c0_7, %c0_8, %c0_9, %c0_10] : memref<1x16x16x128xf32, #tpu.memory_space<vmem>>, vector<1x16x16x128xf32>
    %13 = vector.shape_cast %12 : vector<1x16x16x128xf32> to vector<16x16x128xf32>
    %14 = arith.addf %11, %13 : vector<16x16x128xf32>
    %cst = arith.constant 0.000000e+00 : f32
    %15 = vector.broadcast %cst : f32 to vector<16x16x128xf32>
    %16 = arith.maximumf %14, %15 : vector<16x16x128xf32>
    %c0_11 = arith.constant 0 : index
    %c0_12 = arith.constant 0 : index
    %c0_13 = arith.constant 0 : index
    %c0_14 = arith.constant 0 : index
    %17 = vector.load %arg5[%c0_11, %c0_12, %c0_13, %c0_14] : memref<1x16x16x128xf32, #tpu.memory_space<vmem>>, vector<1x16x16x128xf32>
    %18 = vector.shape_cast %17 : vector<1x16x16x128xf32> to vector<16x16x128xf32>
    %19 = vector.shape_cast %16 : vector<16x16x128xf32> to vector<1x16x16x128xf32>
    tpu.vector_store %arg5[%c0_11, %c0_12, %c0_13, %c0_14], %19 {strides = array<i32>} : memref<1x16x16x128xf32, #tpu.memory_space<vmem>>, vector<1x16x16x128xf32>,
    return
  }
  func.func @transform_0(%arg0: i32) -> (i32, i32, i32, i32) {
    %c0_i32 = arith.constant 0 : i32
    %c0_i32_0 = arith.constant 0 : i32
    %c0_i32_1 = arith.constant 0 : i32
    %c0_i32_2 = arith.constant 0 : i32
    return %arg0, %c0_i32, %c0_i32_0, %c0_i32_1 : i32, i32, i32, i32
  }
  func.func @transform_1(%arg0: i32) -> (i32, i32, i32, i32) {
    %c0_i32 = arith.constant 0 : i32
    %c0_i32_0 = arith.constant 0 : i32
    %c0_i32_1 = arith.constant 0 : i32
    %c0_i32_2 = arith.constant 0 : i32
    return %arg0, %c0_i32, %c0_i32_0, %c0_i32_1 : i32, i32, i32, i32
  }
  func.func @transform_2(%arg0: i32) -> (i32, i32) {
    %c0_i32 = arith.constant 0 : i32
    %c0_i32_0 = arith.constant 0 : i32
    %c0_i32_1 = arith.constant 0 : i32
    return %c0_i32, %c0_i32_0 : i32, i32
  }
  func.func @transform_3(%arg0: i32) -> (i32, i32) {
    %c0_i32 = arith.constant 0 : i32
    %c0_i32_0 = arith.constant 0 : i32
    %c0_i32_1 = arith.constant 0 : i32
    return %c0_i32, %c0_i32_0 : i32, i32
  }
  func.func @transform_4(%arg0: i32) -> (i32, i32, i32, i32) {
    %c0_i32 = arith.constant 0 : i32
    %c0_i32_0 = arith.constant 0 : i32
    %c0_i32_1 = arith.constant 0 : i32
    %c0_i32_2 = arith.constant 0 : i32
    return %arg0, %c0_i32, %c0_i32_0, %c0_i32_1 : i32, i32, i32, i32
  }
}

module attributes {stable_mosaic.version = 11 : i64} {
  func.func @bn_relu_conv_stats_kernel(%arg0: i32, %arg1: memref<1x16x16x128xf32, #tpu.memory_space<vmem>>, %arg2: memref<1x128xf32, #tpu.memory_space<vmem>>, %arg3: memref<1x128xf32, #tpu.memory_space<vmem>>, %arg4: memref<9x128x128xbf16, #tpu.memory_space<vmem>>, %arg5: memref<1x16x16x128xf32, #tpu.memory_space<vmem>>, %arg6: memref<1x8x128xf32, #tpu.memory_space<vmem>>, %arg7: memref<18x18x128xbf16, #tpu.memory_space<vmem>>) attributes {dimension_semantics = [#tpu.dimension_semantics<parallel>], iteration_bounds = array<i64: 2>, scalar_prefetch = 0 : i64, scratch_operands = 1 : i64, tpu.core_type = #tpu.core_type<tc>, window_params = [{transform_indices = @transform_0, window_bounds = array<i64: 1, 16, 16, 128>}, {pipeline_mode = #tpu.pipeline_mode<synchronous>, transform_indices = @transform_1, window_bounds = array<i64: 1, 128>}, {pipeline_mode = #tpu.pipeline_mode<synchronous>, transform_indices = @transform_2, window_bounds = array<i64: 1, 128>}, {pipeline_mode = #tpu.pipeline_mode<synchronous>, transform_indices = @transform_3, window_bounds = array<i64: 9, 128, 128>}, {transform_indices = @transform_4, window_bounds = array<i64: 1, 16, 16, 128>}, {transform_indices = @transform_5, window_bounds = array<i64: 1, 8, 128>}]} {
    %c0 = arith.constant 0 : index
    %c0_0 = arith.constant 0 : index
    %c0_1 = arith.constant 0 : index
    %c0_2 = arith.constant 0 : index
    %0 = vector.load %arg1[%c0, %c0_0, %c0_1, %c0_2] : memref<1x16x16x128xf32, #tpu.memory_space<vmem>>, vector<1x16x16x128xf32>
    %1 = vector.shape_cast %0 : vector<1x16x16x128xf32> to vector<16x16x128xf32>
    %c0_3 = arith.constant 0 : index
    %c0_4 = arith.constant 0 : index
    %2 = vector.load %arg2[%c0_3, %c0_4] : memref<1x128xf32, #tpu.memory_space<vmem>>, vector<1x128xf32>
    %3 = vector.shape_cast %2 : vector<1x128xf32> to vector<128xf32>
    %4 = vector.shape_cast %3 : vector<128xf32> to vector<1x1x128xf32>
    %5 = vector.broadcast %4 : vector<1x1x128xf32> to vector<16x16x128xf32>
    %6 = arith.mulf %1, %5 : vector<16x16x128xf32>
    %c0_5 = arith.constant 0 : index
    %c0_6 = arith.constant 0 : index
    %7 = vector.load %arg3[%c0_5, %c0_6] : memref<1x128xf32, #tpu.memory_space<vmem>>, vector<1x128xf32>
    %8 = vector.shape_cast %7 : vector<1x128xf32> to vector<128xf32>
    %9 = vector.shape_cast %8 : vector<128xf32> to vector<1x1x128xf32>
    %10 = vector.broadcast %9 : vector<1x1x128xf32> to vector<16x16x128xf32>
    %11 = arith.addf %6, %10 : vector<16x16x128xf32>
    %cst = arith.constant 0.000000e+00 : f32
    %12 = vector.broadcast %cst : f32 to vector<16x16x128xf32>
    %13 = arith.maximumf %11, %12 : vector<16x16x128xf32>
    %14 = arith.truncf %13 : vector<16x16x128xf32> to vector<16x16x128xbf16>
    %cst_7 = arith.constant 0.000000e+00 : bf16
    %15 = vector.broadcast %cst_7 : bf16 to vector<18x18x128xbf16>
    %c0_8 = arith.constant 0 : index
    %c0_9 = arith.constant 0 : index
    %c0_10 = arith.constant 0 : index
    %16 = vector.load %arg7[%c0_8, %c0_9, %c0_10] : memref<18x18x128xbf16, #tpu.memory_space<vmem>>, vector<18x18x128xbf16>
    tpu.vector_store %arg7[%c0_8, %c0_9, %c0_10], %15 {strides = array<i32>} : memref<18x18x128xbf16, #tpu.memory_space<vmem>>, vector<18x18x128xbf16>,
    %c1 = arith.constant 1 : index
    %c1_11 = arith.constant 1 : index
    %c0_12 = arith.constant 0 : index
    %17 = vector.load %arg7[%c1, %c1_11, %c0_12] : memref<18x18x128xbf16, #tpu.memory_space<vmem>>, vector<16x16x128xbf16>
    tpu.vector_store %arg7[%c1, %c1_11, %c0_12], %14 {strides = array<i32>} : memref<18x18x128xbf16, #tpu.memory_space<vmem>>, vector<16x16x128xbf16>,
    %cst_13 = arith.constant 0.000000e+00 : f32
    %18 = vector.broadcast %cst_13 : f32 to vector<256x128xf32>
    %c0_14 = arith.constant 0 : index
    %c0_15 = arith.constant 0 : index
    %c0_16 = arith.constant 0 : index
    %19 = vector.load %arg7[%c0_14, %c0_15, %c0_16] : memref<18x18x128xbf16, #tpu.memory_space<vmem>>, vector<16x16x128xbf16>
    %20 = vector.shape_cast %19 : vector<16x16x128xbf16> to vector<256x128xbf16>
    %c0_17 = arith.constant 0 : index
    %c0_18 = arith.constant 0 : index
    %c0_19 = arith.constant 0 : index
    %21 = vector.load %arg4[%c0_17, %c0_18, %c0_19] : memref<9x128x128xbf16, #tpu.memory_space<vmem>>, vector<1x128x128xbf16>
    %22 = vector.shape_cast %21 : vector<1x128x128xbf16> to vector<128x128xbf16>
    %cst_20 = arith.constant dense<0.000000e+00> : vector<256x128xf32>
    %23 = tpu.matmul %20, %22, %cst_20 {dimension_numbers = #tpu.dot_dimension_numbers<[1], [0], [0], [1], [0, 0, 1, 1], [], []>} : vector<256x128xbf16>, vector<128x128xbf16>, vector<256x128xf32> -> vector<256x128xf32>
    %24 = arith.addf %18, %23 : vector<256x128xf32>
    %c0_21 = arith.constant 0 : index
    %c1_22 = arith.constant 1 : index
    %c0_23 = arith.constant 0 : index
    %25 = vector.load %arg7[%c0_21, %c1_22, %c0_23] : memref<18x18x128xbf16, #tpu.memory_space<vmem>>, vector<16x16x128xbf16>
    %26 = vector.shape_cast %25 : vector<16x16x128xbf16> to vector<256x128xbf16>
    %c1_24 = arith.constant 1 : index
    %c0_25 = arith.constant 0 : index
    %c0_26 = arith.constant 0 : index
    %27 = vector.load %arg4[%c1_24, %c0_25, %c0_26] : memref<9x128x128xbf16, #tpu.memory_space<vmem>>, vector<1x128x128xbf16>
    %28 = vector.shape_cast %27 : vector<1x128x128xbf16> to vector<128x128xbf16>
    %cst_27 = arith.constant dense<0.000000e+00> : vector<256x128xf32>
    %29 = tpu.matmul %26, %28, %cst_27 {dimension_numbers = #tpu.dot_dimension_numbers<[1], [0], [0], [1], [0, 0, 1, 1], [], []>} : vector<256x128xbf16>, vector<128x128xbf16>, vector<256x128xf32> -> vector<256x128xf32>
    %30 = arith.addf %24, %29 : vector<256x128xf32>
    %c0_28 = arith.constant 0 : index
    %c2 = arith.constant 2 : index
    %c0_29 = arith.constant 0 : index
    %31 = vector.load %arg7[%c0_28, %c2, %c0_29] : memref<18x18x128xbf16, #tpu.memory_space<vmem>>, vector<16x16x128xbf16>
    %32 = vector.shape_cast %31 : vector<16x16x128xbf16> to vector<256x128xbf16>
    %c2_30 = arith.constant 2 : index
    %c0_31 = arith.constant 0 : index
    %c0_32 = arith.constant 0 : index
    %33 = vector.load %arg4[%c2_30, %c0_31, %c0_32] : memref<9x128x128xbf16, #tpu.memory_space<vmem>>, vector<1x128x128xbf16>
    %34 = vector.shape_cast %33 : vector<1x128x128xbf16> to vector<128x128xbf16>
    %cst_33 = arith.constant dense<0.000000e+00> : vector<256x128xf32>
    %35 = tpu.matmul %32, %34, %cst_33 {dimension_numbers = #tpu.dot_dimension_numbers<[1], [0], [0], [1], [0, 0, 1, 1], [], []>} : vector<256x128xbf16>, vector<128x128xbf16>, vector<256x128xf32> -> vector<256x128xf32>
    %36 = arith.addf %30, %35 : vector<256x128xf32>
    %c1_34 = arith.constant 1 : index
    %c0_35 = arith.constant 0 : index
    %c0_36 = arith.constant 0 : index
    %37 = vector.load %arg7[%c1_34, %c0_35, %c0_36] : memref<18x18x128xbf16, #tpu.memory_space<vmem>>, vector<16x16x128xbf16>
    %38 = vector.shape_cast %37 : vector<16x16x128xbf16> to vector<256x128xbf16>
    %c3 = arith.constant 3 : index
    %c0_37 = arith.constant 0 : index
    %c0_38 = arith.constant 0 : index
    %39 = vector.load %arg4[%c3, %c0_37, %c0_38] : memref<9x128x128xbf16, #tpu.memory_space<vmem>>, vector<1x128x128xbf16>
    %40 = vector.shape_cast %39 : vector<1x128x128xbf16> to vector<128x128xbf16>
    %cst_39 = arith.constant dense<0.000000e+00> : vector<256x128xf32>
    %41 = tpu.matmul %38, %40, %cst_39 {dimension_numbers = #tpu.dot_dimension_numbers<[1], [0], [0], [1], [0, 0, 1, 1], [], []>} : vector<256x128xbf16>, vector<128x128xbf16>, vector<256x128xf32> -> vector<256x128xf32>
    %42 = arith.addf %36, %41 : vector<256x128xf32>
    %c1_40 = arith.constant 1 : index
    %c1_41 = arith.constant 1 : index
    %c0_42 = arith.constant 0 : index
    %43 = vector.load %arg7[%c1_40, %c1_41, %c0_42] : memref<18x18x128xbf16, #tpu.memory_space<vmem>>, vector<16x16x128xbf16>
    %44 = vector.shape_cast %43 : vector<16x16x128xbf16> to vector<256x128xbf16>
    %c4 = arith.constant 4 : index
    %c0_43 = arith.constant 0 : index
    %c0_44 = arith.constant 0 : index
    %45 = vector.load %arg4[%c4, %c0_43, %c0_44] : memref<9x128x128xbf16, #tpu.memory_space<vmem>>, vector<1x128x128xbf16>
    %46 = vector.shape_cast %45 : vector<1x128x128xbf16> to vector<128x128xbf16>
    %cst_45 = arith.constant dense<0.000000e+00> : vector<256x128xf32>
    %47 = tpu.matmul %44, %46, %cst_45 {dimension_numbers = #tpu.dot_dimension_numbers<[1], [0], [0], [1], [0, 0, 1, 1], [], []>} : vector<256x128xbf16>, vector<128x128xbf16>, vector<256x128xf32> -> vector<256x128xf32>
    %48 = arith.addf %42, %47 : vector<256x128xf32>
    %c1_46 = arith.constant 1 : index
    %c2_47 = arith.constant 2 : index
    %c0_48 = arith.constant 0 : index
    %49 = vector.load %arg7[%c1_46, %c2_47, %c0_48] : memref<18x18x128xbf16, #tpu.memory_space<vmem>>, vector<16x16x128xbf16>
    %50 = vector.shape_cast %49 : vector<16x16x128xbf16> to vector<256x128xbf16>
    %c5 = arith.constant 5 : index
    %c0_49 = arith.constant 0 : index
    %c0_50 = arith.constant 0 : index
    %51 = vector.load %arg4[%c5, %c0_49, %c0_50] : memref<9x128x128xbf16, #tpu.memory_space<vmem>>, vector<1x128x128xbf16>
    %52 = vector.shape_cast %51 : vector<1x128x128xbf16> to vector<128x128xbf16>
    %cst_51 = arith.constant dense<0.000000e+00> : vector<256x128xf32>
    %53 = tpu.matmul %50, %52, %cst_51 {dimension_numbers = #tpu.dot_dimension_numbers<[1], [0], [0], [1], [0, 0, 1, 1], [], []>} : vector<256x128xbf16>, vector<128x128xbf16>, vector<256x128xf32> -> vector<256x128xf32>
    %54 = arith.addf %48, %53 : vector<256x128xf32>
    %c2_52 = arith.constant 2 : index
    %c0_53 = arith.constant 0 : index
    %c0_54 = arith.constant 0 : index
    %55 = vector.load %arg7[%c2_52, %c0_53, %c0_54] : memref<18x18x128xbf16, #tpu.memory_space<vmem>>, vector<16x16x128xbf16>
    %56 = vector.shape_cast %55 : vector<16x16x128xbf16> to vector<256x128xbf16>
    %c6 = arith.constant 6 : index
    %c0_55 = arith.constant 0 : index
    %c0_56 = arith.constant 0 : index
    %57 = vector.load %arg4[%c6, %c0_55, %c0_56] : memref<9x128x128xbf16, #tpu.memory_space<vmem>>, vector<1x128x128xbf16>
    %58 = vector.shape_cast %57 : vector<1x128x128xbf16> to vector<128x128xbf16>
    %cst_57 = arith.constant dense<0.000000e+00> : vector<256x128xf32>
    %59 = tpu.matmul %56, %58, %cst_57 {dimension_numbers = #tpu.dot_dimension_numbers<[1], [0], [0], [1], [0, 0, 1, 1], [], []>} : vector<256x128xbf16>, vector<128x128xbf16>, vector<256x128xf32> -> vector<256x128xf32>
    %60 = arith.addf %54, %59 : vector<256x128xf32>
    %c2_58 = arith.constant 2 : index
    %c1_59 = arith.constant 1 : index
    %c0_60 = arith.constant 0 : index
    %61 = vector.load %arg7[%c2_58, %c1_59, %c0_60] : memref<18x18x128xbf16, #tpu.memory_space<vmem>>, vector<16x16x128xbf16>
    %62 = vector.shape_cast %61 : vector<16x16x128xbf16> to vector<256x128xbf16>
    %c7 = arith.constant 7 : index
    %c0_61 = arith.constant 0 : index
    %c0_62 = arith.constant 0 : index
    %63 = vector.load %arg4[%c7, %c0_61, %c0_62] : memref<9x128x128xbf16, #tpu.memory_space<vmem>>, vector<1x128x128xbf16>
    %64 = vector.shape_cast %63 : vector<1x128x128xbf16> to vector<128x128xbf16>
    %cst_63 = arith.constant dense<0.000000e+00> : vector<256x128xf32>
    %65 = tpu.matmul %62, %64, %cst_63 {dimension_numbers = #tpu.dot_dimension_numbers<[1], [0], [0], [1], [0, 0, 1, 1], [], []>} : vector<256x128xbf16>, vector<128x128xbf16>, vector<256x128xf32> -> vector<256x128xf32>
    %66 = arith.addf %60, %65 : vector<256x128xf32>
    %c2_64 = arith.constant 2 : index
    %c2_65 = arith.constant 2 : index
    %c0_66 = arith.constant 0 : index
    %67 = vector.load %arg7[%c2_64, %c2_65, %c0_66] : memref<18x18x128xbf16, #tpu.memory_space<vmem>>, vector<16x16x128xbf16>
    %68 = vector.shape_cast %67 : vector<16x16x128xbf16> to vector<256x128xbf16>
    %c8 = arith.constant 8 : index
    %c0_67 = arith.constant 0 : index
    %c0_68 = arith.constant 0 : index
    %69 = vector.load %arg4[%c8, %c0_67, %c0_68] : memref<9x128x128xbf16, #tpu.memory_space<vmem>>, vector<1x128x128xbf16>
    %70 = vector.shape_cast %69 : vector<1x128x128xbf16> to vector<128x128xbf16>
    %cst_69 = arith.constant dense<0.000000e+00> : vector<256x128xf32>
    %71 = tpu.matmul %68, %70, %cst_69 {dimension_numbers = #tpu.dot_dimension_numbers<[1], [0], [0], [1], [0, 0, 1, 1], [], []>} : vector<256x128xbf16>, vector<128x128xbf16>, vector<256x128xf32> -> vector<256x128xf32>
    %72 = arith.addf %66, %71 : vector<256x128xf32>
    %73 = vector.shape_cast %72 : vector<256x128xf32> to vector<16x16x128xf32>
    %c0_70 = arith.constant 0 : index
    %c0_71 = arith.constant 0 : index
    %c0_72 = arith.constant 0 : index
    %c0_73 = arith.constant 0 : index
    %74 = vector.load %arg5[%c0_70, %c0_71, %c0_72, %c0_73] : memref<1x16x16x128xf32, #tpu.memory_space<vmem>>, vector<1x16x16x128xf32>
    %75 = vector.shape_cast %74 : vector<1x16x16x128xf32> to vector<16x16x128xf32>
    %76 = vector.shape_cast %73 : vector<16x16x128xf32> to vector<1x16x16x128xf32>
    tpu.vector_store %arg5[%c0_70, %c0_71, %c0_72, %c0_73], %76 {strides = array<i32>} : memref<1x16x16x128xf32, #tpu.memory_space<vmem>>, vector<1x16x16x128xf32>,
    %cst_74 = arith.constant dense<0.000000e+00> : vector<128xf32>
    %77 = vector.multi_reduction <add>, %72, %cst_74 [0] : vector<256x128xf32> to vector<128xf32>
    %78 = vector.shape_cast %77 : vector<128xf32> to vector<1x128xf32>
    %c0_75 = arith.constant 0 : index
    %c0_76 = arith.constant 0 : index
    %c0_77 = arith.constant 0 : index
    %79 = vector.load %arg6[%c0_75, %c0_76, %c0_77] : memref<1x8x128xf32, #tpu.memory_space<vmem>>, vector<1x1x128xf32>
    %80 = vector.shape_cast %79 : vector<1x1x128xf32> to vector<1x128xf32>
    %81 = vector.shape_cast %78 : vector<1x128xf32> to vector<1x1x128xf32>
    tpu.vector_store %arg6[%c0_75, %c0_76, %c0_77], %81 {strides = array<i32>} : memref<1x8x128xf32, #tpu.memory_space<vmem>>, vector<1x1x128xf32>,
    %82 = arith.mulf %72, %72 : vector<256x128xf32>
    %cst_78 = arith.constant dense<0.000000e+00> : vector<128xf32>
    %83 = vector.multi_reduction <add>, %82, %cst_78 [0] : vector<256x128xf32> to vector<128xf32>
    %84 = vector.shape_cast %83 : vector<128xf32> to vector<1x128xf32>
    %c0_79 = arith.constant 0 : index
    %c1_80 = arith.constant 1 : index
    %c0_81 = arith.constant 0 : index
    %85 = vector.load %arg6[%c0_79, %c1_80, %c0_81] : memref<1x8x128xf32, #tpu.memory_space<vmem>>, vector<1x1x128xf32>
    %86 = vector.shape_cast %85 : vector<1x1x128xf32> to vector<1x128xf32>
    %87 = vector.shape_cast %84 : vector<1x128xf32> to vector<1x1x128xf32>
    tpu.vector_store %arg6[%c0_79, %c1_80, %c0_81], %87 {strides = array<i32>} : memref<1x8x128xf32, #tpu.memory_space<vmem>>, vector<1x1x128xf32>,
    %cst_82 = arith.constant 0.000000e+00 : f32
    %88 = vector.broadcast %cst_82 : f32 to vector<6x128xf32>
    %c0_83 = arith.constant 0 : index
    %c2_84 = arith.constant 2 : index
    %c0_85 = arith.constant 0 : index
    %89 = vector.load %arg6[%c0_83, %c2_84, %c0_85] : memref<1x8x128xf32, #tpu.memory_space<vmem>>, vector<1x6x128xf32>
    %90 = vector.shape_cast %89 : vector<1x6x128xf32> to vector<6x128xf32>
    %91 = vector.shape_cast %88 : vector<6x128xf32> to vector<1x6x128xf32>
    tpu.vector_store %arg6[%c0_83, %c2_84, %c0_85], %91 {strides = array<i32>} : memref<1x8x128xf32, #tpu.memory_space<vmem>>, vector<1x6x128xf32>,
    return
  }
  func.func @transform_0(%arg0: i32) -> (i32, i32, i32, i32) {
    %c0_i32 = arith.constant 0 : i32
    %c0_i32_0 = arith.constant 0 : i32
    %c0_i32_1 = arith.constant 0 : i32
    %c0_i32_2 = arith.constant 0 : i32
    return %arg0, %c0_i32, %c0_i32_0, %c0_i32_1 : i32, i32, i32, i32
  }
  func.func @transform_1(%arg0: i32) -> (i32, i32) {
    %c0_i32 = arith.constant 0 : i32
    %c0_i32_0 = arith.constant 0 : i32
    %c0_i32_1 = arith.constant 0 : i32
    return %c0_i32, %c0_i32_0 : i32, i32
  }
  func.func @transform_2(%arg0: i32) -> (i32, i32) {
    %c0_i32 = arith.constant 0 : i32
    %c0_i32_0 = arith.constant 0 : i32
    %c0_i32_1 = arith.constant 0 : i32
    return %c0_i32, %c0_i32_0 : i32, i32
  }
  func.func @transform_3(%arg0: i32) -> (i32, i32, i32) {
    %c0_i32 = arith.constant 0 : i32
    %c0_i32_0 = arith.constant 0 : i32
    %c0_i32_1 = arith.constant 0 : i32
    %c0_i32_2 = arith.constant 0 : i32
    return %c0_i32, %c0_i32_0, %c0_i32_1 : i32, i32, i32
  }
  func.func @transform_4(%arg0: i32) -> (i32, i32, i32, i32) {
    %c0_i32 = arith.constant 0 : i32
    %c0_i32_0 = arith.constant 0 : i32
    %c0_i32_1 = arith.constant 0 : i32
    %c0_i32_2 = arith.constant 0 : i32
    return %arg0, %c0_i32, %c0_i32_0, %c0_i32_1 : i32, i32, i32, i32
  }
  func.func @transform_5(%arg0: i32) -> (i32, i32, i32) {
    %c0_i32 = arith.constant 0 : i32
    %c0_i32_0 = arith.constant 0 : i32
    %c0_i32_1 = arith.constant 0 : i32
    return %arg0, %c0_i32, %c0_i32_0 : i32, i32, i32
  }
}

</mosaic_0001>

<bundles_post_ra>
// kernel: residual_block_forward.5
= control target key start
LH: loop header
LB: loop body
LE: loop exit
PB: predicated region body
PF: predicated region fallthrough
CT: control target
= control target key end

     0   :  { %s576_s15 = smov 0   ;;  %s777_s0 = inlined_call_operand.vmem [shape: f32[2,16,16,128], index: 0, kind: input, shape index: {}]   ;;  %s778_s1 = inlined_call_operand.vmem [shape: f32[2,16,16,128], index: 1, kind: input, shape index: {}]   ;;  %s779_s2 = inlined_call_operand.vmem [shape: f32[1,128], index: 2, kind: input, shape index: {}]   ;;  %s780_s3 = inlined_call_operand.vmem [shape: f32[1,128], index: 3, kind: input, shape index: {}]   ;;  %s781_s4 = inlined_call_operand.vmem [shape: f32[2,16,16,128], index: 4, kind: output, shape index: {}]  }
   0x1 LB: > { %s517_s16 = sadd.s32 4294967295, %s549_s15   ;;  %p521_p0 = scmp.ge.s32.totalorder %s549_s15, 1  ;;  %s549_s15 = sphi %s576_s15, %s14_s15  }
   0x2   : > { %p172_p1 = scmp.lt.s32.totalorder %s549_s15, 3 }
   0x4   : > { %p173_p2 = pnand %p521_p0, %p172_p1 }
   0x5   : > { %p203_p3 = scmp.lt.s32.totalorder (!%p173_p2), %s517_s16, 1 }
   0x6   : > { %176 = sbr.rel (%p173_p2) target bundleno = 55 (0x37), region = 36 }
   0xb   : > { %s783_s16 = smov (!%p203_p3, %s517_s16), 1  ;;  %v587_v0 = vld [vmem:[%s779_s2] ss:$0 sm:$0xff] }
   0xc   : > { %s589_s19 = sshll.u32 %s783_s16, 8  ;;  %v606_v1 = vld [vmem:[%s780_s3] ss:$0 sm:$0xff] }
   0xd   : > { %s595_s22 = scalar_lea.vmem %s777_s0, %s589_s19  ;;  %s601_s25 = scalar_lea.vmem %s778_s1, %s589_s19 }
   0xe   : > { %v218_v2 = vld [vmem:[%s595_s22] sm:$0xff]  ;;  %v219_v3 = vld [vmem:[%s595_s22 + $0x8] sm:$0xff]  ;;  %v220_v7 = vld [vmem:[%s595_s22 + $0x10] sm:$0xff]  ;;  %s637_s30 = scalar_lea.vmem %s781_s4, %s589_s19 }
   0xf   : > { %v254_v4 = vmul.f32 %v587_v0, %v218_v2  ;;  %v322_v5 = vld [vmem:[%s601_s25] sm:$0xff]  ;;  %v255_v6 = vmul.f32 %v587_v0, %v219_v3  ;;  %v323_v8 = vld [vmem:[%s601_s25 + $0x8] sm:$0xff]  ;;  %v256_v9 = vmul.f32 %v587_v0, %v220_v7  ;;  %v221_v10 = vld [vmem:[%s595_s22 + $0x18] sm:$0xff] }
  0x10   : > { %v222_v11 = vld [vmem:[%s595_s22 + $0x20] sm:$0xff]  ;;  %v324_v14 = vld [vmem:[%s601_s25 + $0x10] sm:$0xff]  ;;  %v257_v15 = vmul.f32 %v587_v0, %v221_v10  ;;  %v325_v16 = vld [vmem:[%s601_s25 + $0x18] sm:$0xff] }
  0x11   : > { %v290_v12 = vadd.f32 %v606_v1, %v254_v4  ;;  %v291_v13 = vadd.f32 %v606_v1, %v255_v6  ;;  %v258_v17 = vmul.f32 %v587_v0, %v222_v11  ;;  %v223_v18 = vld [vmem:[%s595_s22 + $0x28] sm:$0xff]  ;;  %v292_v19 = vadd.f32 %v606_v1, %v256_v9  ;;  %v326_v20 = vld [vmem:[%s601_s25 + $0x20] sm:$0xff]  ;;  %v224_v22 = vld [vmem:[%s595_s22 + $0x30] sm:$0xff] }
  0x12   : > { %v259_v21 = vmul.f32 %v587_v0, %v223_v18  ;;  %v225_v23 = vld [vmem:[%s595_s22 + $0x38] sm:$0xff]  ;;  %v293_v26 = vadd.f32 %v606_v1, %v257_v15  ;;  %v327_v28 = vld [vmem:[%s601_s25 + $0x28] sm:$0xff]  ;;  %v260_v31 = vmul.f32 %v587_v0, %v224_v22  ;;  %v226_v33 = vld [vmem:[%s595_s22 + $0x40] sm:$0xff] }
  0x13   : > { %v354_v24 = vadd.f32 %v322_v5, %v290_v12  ;;  %v355_v25 = vadd.f32 %v323_v8, %v291_v13  ;;  %v294_v27 = vadd.f32 %v606_v1, %v258_v17  ;;  %v356_v29 = vadd.f32 %v324_v14, %v292_v19  ;;  %v227_v34 = vld [vmem:[%s595_s22 + $0x48] sm:$0xff]  ;;  %v328_v39 = vld [vmem:[%s601_s25 + $0x30] sm:$0xff]  ;;  %v329_v40 = vld [vmem:[%s601_s25 + $0x38] sm:$0xff] }
  0x14   : > { %v295_v30 = vadd.f32 %v606_v1, %v259_v21  ;;  %v261_v32 = vmul.f32 %v587_v0, %v225_v23  ;;  %v357_v37 = vadd.f32 %v325_v16, %v293_v26  ;;  %v228_v41 = vld [vmem:[%s595_s22 + $0x50] sm:$0xff]  ;;  %v296_v44 = vadd.f32 %v606_v1, %v260_v31  ;;  %v229_v46 = vld [vmem:[%s595_s22 + $0x58] sm:$0xff]  ;;  %v230_v47 = vld [vmem:[%s595_s22 + $0x60] sm:$0xff] }
  0x15   : > { %v386_v35 = vmax.f32 %v354_v24, 0.0  ;;  %v387_v36 = vmax.f32 %v355_v25, 0.0  ;;  %v358_v38 = vadd.f32 %v326_v20, %v294_v27  ;;  %v388_v42 = vmax.f32 %v356_v29, 0.0  ;;  %v231_v52 = vld [vmem:[%s595_s22 + $0x68] sm:$0xff]  ;;  %v330_v56 = vld [vmem:[%s601_s25 + $0x40] sm:$0xff]  ;;  %v332_v61 = vld [vmem:[%s601_s25 + $0x50] sm:$0xff] }
  0x16   : > { %v359_v43 = vadd.f32 %v327_v28, %v295_v30  ;;  %v297_v45 = vadd.f32 %v606_v1, %v261_v32  ;;  %v389_v48 = vmax.f32 %v357_v37, 0.0  ;;  %v262_v50 = vmul.f32 %v587_v0, %v226_v33  ;;  %v331_v57 = vld [vmem:[%s601_s25 + $0x48] sm:$0xff]  ;;  %v232_v2 = vld [vmem:[%s595_s22 + $0x70] sm:$0xff]  ;;  %v233_v3 = vld [vmem:[%s595_s22 + $0x78] sm:$0xff] }
  0x17   : > { %418 = vst [vmem:[%s637_s30] sm:$0xff] %v386_v35  ;;  %v390_v49 = vmax.f32 %v358_v38, 0.0  ;;  %v263_v51 = vmul.f32 %v587_v0, %v227_v34  ;;  %v360_v54 = vadd.f32 %v328_v39, %v296_v44  ;;  %v264_v58 = vmul.f32 %v587_v0, %v228_v41  ;;  %v333_v7 = vld [vmem:[%s601_s25 + $0x58] sm:$0xff]  ;;  %v334_v8 = vld [vmem:[%s601_s25 + $0x60] sm:$0xff]  ;;  %v335_v14 = vld [vmem:[%s601_s25 + $0x68] sm:$0xff] }
  0x18   : > { %419 = vst [vmem:[%s637_s30 + $0x8] sm:$0xff] %v387_v36  ;;  %v391_v53 = vmax.f32 %v359_v43, 0.0  ;;  %v361_v55 = vadd.f32 %v329_v40, %v297_v45  ;;  %v298_v59 = vadd.f32 %v606_v1, %v262_v50  ;;  %v265_v62 = vmul.f32 %v587_v0, %v229_v46  ;;  %v234_v19 = vld [vmem:[%s595_s22 + $0x80] sm:$0xff]  ;;  %v235_v20 = vld [vmem:[%s595_s22 + $0x88] sm:$0xff]  ;;  %v336_v25 = vld [vmem:[%s601_s25 + $0x70] sm:$0xff] }
  0x19   : > { %420 = vst [vmem:[%s637_s30 + $0x10] sm:$0xff] %v388_v42  ;;  %v299_v60 = vadd.f32 %v606_v1, %v263_v51  ;;  %v266_v63 = vmul.f32 %v587_v0, %v230_v47  ;;  %v392_v4 = vmax.f32 %v360_v54, 0.0  ;;  %v300_v6 = vadd.f32 %v606_v1, %v264_v58  ;;  %v337_v26 = vld [vmem:[%s601_s25 + $0x78] sm:$0xff]  ;;  %v236_v27 = vld [vmem:[%s595_s22 + $0x90] sm:$0xff]  ;;  %v238_v33 = vld [vmem:[%s595_s22 + $0xa0] sm:$0xff] }
  0x1a   : > { %421 = vst [vmem:[%s637_s30 + $0x18] sm:$0xff] %v389_v48  ;;  %v393_v5 = vmax.f32 %v361_v55, 0.0  ;;  %v267_v9 = vmul.f32 %v587_v0, %v231_v52  ;;  %v362_v10 = vadd.f32 %v330_v56, %v298_v59  ;;  %v301_v12 = vadd.f32 %v606_v1, %v265_v62  ;;  %v237_v32 = vld [vmem:[%s595_s22 + $0x98] sm:$0xff]  ;;  %v239_v38 = vld [vmem:[%s595_s22 + $0xa8] sm:$0xff]  ;;  %v338_v42 = vld [vmem:[%s601_s25 + $0x80] sm:$0xff] }
  0x1b   : > { %422 = vst [vmem:[%s637_s30 + $0x20] sm:$0xff] %v390_v49  ;;  %v363_v11 = vadd.f32 %v331_v57, %v299_v60  ;;  %v302_v13 = vadd.f32 %v606_v1, %v266_v63  ;;  %v364_v15 = vadd.f32 %v332_v61, %v300_v6  ;;  %v268_v17 = vmul.f32 %v587_v0, %v232_v2  ;;  %v339_v43 = vld [vmem:[%s601_s25 + $0x88] sm:$0xff]  ;;  %v340_v47 = vld [vmem:[%s601_s25 + $0x90] sm:$0xff]  ;;  %v241_v51 = vld [vmem:[%s595_s22 + $0xb8] sm:$0xff] }
  0x1c   : > { %423 = vst [vmem:[%s637_s30 + $0x28] sm:$0xff] %v391_v53  ;;  %v303_v16 = vadd.f32 %v606_v1, %v267_v9  ;;  %v269_v18 = vmul.f32 %v587_v0, %v233_v3  ;;  %v394_v21 = vmax.f32 %v362_v10, 0.0  ;;  %v365_v23 = vadd.f32 %v333_v7, %v301_v12  ;;  %v240_v50 = vld [vmem:[%s595_s22 + $0xb0] sm:$0xff]  ;;  %v341_v55 = vld [vmem:[%s601_s25 + $0x98] sm:$0xff]  ;;  %v342_v56 = vld [vmem:[%s601_s25 + $0xa0] sm:$0xff] }
  0x1d   : > { %424 = vst [vmem:[%s637_s30 + $0x30] sm:$0xff] %v392_v4  ;;  %v395_v22 = vmax.f32 %v363_v11, 0.0  ;;  %v366_v24 = vadd.f32 %v334_v8, %v302_v13  ;;  %v396_v28 = vmax.f32 %v364_v15, 0.0  ;;  %v304_v30 = vadd.f32 %v606_v1, %v268_v17  ;;  %v343_v62 = vld [vmem:[%s601_s25 + $0xa8] sm:$0xff]  ;;  %v344_v11 = vld [vmem:[%s601_s25 + $0xb0] sm:$0xff]  ;;  %v345_v12 = vld [vmem:[%s601_s25 + $0xb8] sm:$0xff] }
  0x1e   : > { %425 = vst [vmem:[%s637_s30 + $0x38] sm:$0xff] %v393_v5  ;;  %v367_v29 = vadd.f32 %v335_v14, %v303_v16  ;;  %v305_v31 = vadd.f32 %v606_v1, %v269_v18  ;;  %v397_v34 = vmax.f32 %v365_v23, 0.0  ;;  %v270_v36 = vmul.f32 %v587_v0, %v234_v19  ;;  %v242_v5 = vld [vmem:[%s595_s22 + $0xc0] sm:$0xff]  ;;  %v243_v6 = vld [vmem:[%s595_s22 + $0xc8] sm:$0xff]  ;;  %v244_v13 = vld [vmem:[%s595_s22 + $0xd0] sm:$0xff] }
  0x1f   : > { %426 = vst [vmem:[%s637_s30 + $0x40] sm:$0xff] %v394_v21  ;;  %v398_v35 = vmax.f32 %v366_v24, 0.0  ;;  %v271_v37 = vmul.f32 %v587_v0, %v235_v20  ;;  %v368_v40 = vadd.f32 %v336_v25, %v304_v30  ;;  %v272_v44 = vmul.f32 %v587_v0, %v236_v27  ;;  %v245_v18 = vld [vmem:[%s595_s22 + $0xd8] sm:$0xff]  ;;  %v246_v19 = vld [vmem:[%s595_s22 + $0xe0] sm:$0xff]  ;;  %v247_v24 = vld [vmem:[%s595_s22 + $0xe8] sm:$0xff] }
  0x20   : > { %427 = vst [vmem:[%s637_s30 + $0x48] sm:$0xff] %v395_v22  ;;  %v399_v39 = vmax.f32 %v367_v29, 0.0  ;;  %v369_v41 = vadd.f32 %v337_v26, %v305_v31  ;;  %v306_v45 = vadd.f32 %v606_v1, %v270_v36  ;;  %v273_v48 = vmul.f32 %v587_v0, %v237_v32  ;;  %v347_v29 = vld [vmem:[%s601_s25 + $0xc8] sm:$0xff]  ;;  %v248_v36 = vld [vmem:[%s595_s22 + $0xf0] sm:$0xff] }
  0x21   : > { %428 = vst [vmem:[%s637_s30 + $0x50] sm:$0xff] %v396_v28  ;;  %v307_v46 = vadd.f32 %v606_v1, %v271_v37  ;;  %v274_v49 = vmul.f32 %v587_v0, %v238_v33  ;;  %v400_v52 = vmax.f32 %v368_v40, 0.0  ;;  %v308_v54 = vadd.f32 %v606_v1, %v272_v44  ;;  %v346_v28 = vld [vmem:[%s601_s25 + $0xc0] sm:$0xff]  ;;  %v348_v33 = vld [vmem:[%s601_s25 + $0xd0] sm:$0xff]  ;;  %v249_v37 = vld [vmem:[%s595_s22 + $0xf8] sm:$0xff] }
  0x22   : > { %429 = vst [vmem:[%s637_s30 + $0x58] sm:$0xff] %v397_v34  ;;  %v401_v53 = vmax.f32 %v369_v41, 0.0  ;;  %v275_v57 = vmul.f32 %v587_v0, %v239_v38  ;;  %v370_v58 = vadd.f32 %v338_v42, %v306_v45  ;;  %v309_v60 = vadd.f32 %v606_v1, %v273_v48  ;;  %v349_v41 = vld [vmem:[%s601_s25 + $0xd8] sm:$0xff]  ;;  %v350_v42 = vld [vmem:[%s601_s25 + $0xe0] sm:$0xff]  ;;  %v351_v48 = vld [vmem:[%s601_s25 + $0xe8] sm:$0xff] }
  0x23   : > { %430 = vst [vmem:[%s637_s30 + $0x60] sm:$0xff] %v398_v35  ;;  %v371_v59 = vadd.f32 %v339_v43, %v307_v46  ;;  %v310_v61 = vadd.f32 %v606_v1, %v274_v49  ;;  %v372_v63 = vadd.f32 %v340_v47, %v308_v54  ;;  %v276_v3 = vmul.f32 %v587_v0, %v240_v50 }
  0x24   : > { %431 = vst [vmem:[%s637_s30 + $0x68] sm:$0xff] %v399_v39  ;;  %v311_v2 = vadd.f32 %v606_v1, %v275_v57  ;;  %v277_v4 = vmul.f32 %v587_v0, %v241_v51  ;;  %v402_v7 = vmax.f32 %v370_v58, 0.0  ;;  %v373_v9 = vadd.f32 %v341_v55, %v309_v60  ;;  %v352_v57 = vld [vmem:[%s601_s25 + $0xf0] sm:$0xff]  ;;  %v353_v58 = vld [vmem:[%s601_s25 + $0xf8] sm:$0xff] }
  0x25   : > { %432 = vst [vmem:[%s637_s30 + $0x70] sm:$0xff] %v400_v52  ;;  %v403_v8 = vmax.f32 %v371_v59, 0.0  ;;  %v374_v10 = vadd.f32 %v342_v56, %v310_v61  ;;  %v404_v14 = vmax.f32 %v372_v63, 0.0  ;;  %v312_v16 = vadd.f32 %v606_v1, %v276_v3 }
  0x26   : > { %433 = vst [vmem:[%s637_s30 + $0x78] sm:$0xff] %v401_v53  ;;  %v375_v15 = vadd.f32 %v343_v62, %v311_v2  ;;  %v313_v17 = vadd.f32 %v606_v1, %v277_v4  ;;  %v405_v20 = vmax.f32 %v373_v9, 0.0  ;;  %v278_v22 = vmul.f32 %v587_v0, %v242_v5 }
  0x27   : > { %434 = vst [vmem:[%s637_s30 + $0x80] sm:$0xff] %v402_v7  ;;  %v406_v21 = vmax.f32 %v374_v10, 0.0  ;;  %v279_v23 = vmul.f32 %v587_v0, %v243_v6  ;;  %v376_v26 = vadd.f32 %v344_v11, %v312_v16  ;;  %v280_v30 = vmul.f32 %v587_v0, %v244_v13 }
  0x28   : > { %435 = vst [vmem:[%s637_s30 + $0x88] sm:$0xff] %v403_v8  ;;  %v407_v25 = vmax.f32 %v375_v15, 0.0  ;;  %v377_v27 = vadd.f32 %v345_v12, %v313_v17  ;;  %v314_v31 = vadd.f32 %v606_v1, %v278_v22  ;;  %v281_v34 = vmul.f32 %v587_v0, %v245_v18 }
  0x29   : > { %436 = vst [vmem:[%s637_s30 + $0x90] sm:$0xff] %v404_v14  ;;  %v315_v32 = vadd.f32 %v606_v1, %v279_v23  ;;  %v282_v35 = vmul.f32 %v587_v0, %v246_v19  ;;  %v408_v38 = vmax.f32 %v376_v26, 0.0  ;;  %v316_v40 = vadd.f32 %v606_v1, %v280_v30 }
  0x2a   : > { %437 = vst [vmem:[%s637_s30 + $0x98] sm:$0xff] %v405_v20  ;;  %v409_v39 = vmax.f32 %v377_v27, 0.0  ;;  %v283_v43 = vmul.f32 %v587_v0, %v247_v24  ;;  %v378_v44 = vadd.f32 %v346_v28, %v314_v31  ;;  %v317_v46 = vadd.f32 %v606_v1, %v281_v34 }
  0x2b   : > { %438 = vst [vmem:[%s637_s30 + $0xa0] sm:$0xff] %v406_v21  ;;  %v379_v45 = vadd.f32 %v347_v29, %v315_v32  ;;  %v318_v47 = vadd.f32 %v606_v1, %v282_v35  ;;  %v380_v49 = vadd.f32 %v348_v33, %v316_v40  ;;  %v284_v51 = vmul.f32 %v587_v0, %v248_v36 }
  0x2c   : > { %439 = vst [vmem:[%s637_s30 + $0xa8] sm:$0xff] %v407_v25  ;;  %v319_v50 = vadd.f32 %v606_v1, %v283_v43  ;;  %v285_v52 = vmul.f32 %v587_v0, %v249_v37  ;;  %v410_v53 = vmax.f32 %v378_v44, 0.0  ;;  %v381_v55 = vadd.f32 %v349_v41, %v317_v46 }
  0x2d   : > { %440 = vst [vmem:[%s637_s30 + $0xb0] sm:$0xff] %v408_v38  ;;  %v411_v54 = vmax.f32 %v379_v45, 0.0  ;;  %v382_v56 = vadd.f32 %v350_v42, %v318_v47  ;;  %v412_v59 = vmax.f32 %v380_v49, 0.0  ;;  %v320_v61 = vadd.f32 %v606_v1, %v284_v51 }
  0x2e   : > { %441 = vst [vmem:[%s637_s30 + $0xb8] sm:$0xff] %v409_v39  ;;  %v383_v60 = vadd.f32 %v351_v48, %v319_v50  ;;  %v321_v0 = vadd.f32 %v606_v1, %v285_v52  ;;  %v413_v62 = vmax.f32 %v381_v55, 0.0 }
  0x2f   : > { %442 = vst [vmem:[%s637_s30 + $0xc0] sm:$0xff] %v410_v53  ;;  %v414_v63 = vmax.f32 %v382_v56, 0.0  ;;  %v384_v3 = vadd.f32 %v352_v57, %v320_v61 }
  0x30   : > { %443 = vst [vmem:[%s637_s30 + $0xc8] sm:$0xff] %v411_v54  ;;  %v415_v2 = vmax.f32 %v383_v60, 0.0  ;;  %v385_v4 = vadd.f32 %v353_v58, %v321_v0 }
  0x31   : > { %444 = vst [vmem:[%s637_s30 + $0xd0] sm:$0xff] %v412_v59  ;;  %v416_v5 = vmax.f32 %v384_v3, 0.0 }
  0x32   : > { %445 = vst [vmem:[%s637_s30 + $0xd8] sm:$0xff] %v413_v62  ;;  %v417_v6 = vmax.f32 %v385_v4, 0.0 }
  0x33   : > { %446 = vst [vmem:[%s637_s30 + $0xe0] sm:$0xff] %v414_v63 }
  0x34   : > { %447 = vst [vmem:[%s637_s30 + $0xe8] sm:$0xff] %v415_v2 }
  0x35   : > { %448 = vst [vmem:[%s637_s30 + $0xf0] sm:$0xff] %v416_v5 }
  0x36   : > { %449 = vst [vmem:[%s637_s30 + $0xf8] sm:$0xff] %v417_v6 }
  0x37 PF: > { %s14_s15 = sadd.s32 1, %s549_s15  }
  0x38   : > { %p11_p4 = scmp.ge.s32.totalorder %s14_s15, 4  }
  0x3a   :  { %13 = sbr.rel (!%p11_p4) target bundleno = 1 (0x1), region = 69 }

// kernel: residual_block_forward.3
= control target key start
LH: loop header
LB: loop body
LE: loop exit
PB: predicated region body
PF: predicated region fallthrough
CT: control target
= control target key end

     0   :  { %s6007_s12 = smov 0   ;;  %s7414_s0 = inlined_call_operand.vmem [shape: bf16[2,16,16,128], index: 0, kind: input, shape index: {}]   ;;  %s7415_s1 = inlined_call_operand.vmem [shape: bf16[9,128,128], index: 1, kind: input, shape index: {}]   ;;  %s7416_s2 = inlined_call_operand.vmem [shape: f32[2,16,16,128], index: 2, kind: output, shape index: {0}]   ;;  %s7417_s3 = inlined_call_operand.vmem [shape: f32[2,8,128], index: 3, kind: output, shape index: {1}]  }
   0x1 LB: > { %s5097_s13 = sadd.s32 4294967295, %s5983_s12   ;;  %p5101_p0 = scmp.ge.s32.totalorder %s5983_s12, 1  ;;  %s5983_s12 = sphi %s6007_s12, %s14_s12  }
   0x2   : > { %p140_p1 = scmp.lt.s32.totalorder %s5983_s12, 3 }
   0x4   : > { %p141_p2 = pnand %p5101_p0, %p140_p1 }
   0x6   : > { %144 = sbr.rel (%p141_p2) target bundleno = 849 (0x351), region = 28 }
   0xb   : > { %v5798_v0 = vld [vmem:[%s7415_s1 + $0x78] sm:$0xff]  ;;  %p168_p3 = scmp.lt.s32.totalorder %s5097_s13, 1  ;;  %v5985_v1 = vmov 0   ;;  %v5797_v2 = vld [vmem:[%s7415_s1 + $0x70] sm:$0xff]  ;;  %v5796_v3 = vld [vmem:[%s7415_s1 + $0x68] sm:$0xff]  ;;  %vm593_vm1 = vcmask 1043456  }
   0xc   : > { %195 = vst [vmem:[#allocation2 + $0x30] sm:$0xf] %v5985_v1  ;;  %5887 = vmatpush.bf16.msra.mxu1 %v5798_v0  ;;  %5888 = vmatpush.bf16.msra.mxu2 %v5798_v0  ;;  %vm269_vm0 = vsmask.f32 256  ;;  %vm600_vm2 = vcmask 1040384   ;;  %v5795_v11 = vld [vmem:[%s7415_s1 + $0x60] sm:$0xff] }
   0xd   : > { %s7443_s13 = smov (!%p168_p3, %s5097_s13), 1  ;;  %196 = vst [vmem:[#allocation2 + $0x34] sm:$0xf] %v5985_v1  ;;  %5889 = vmatpush.bf16.msra.mxu3 %v5798_v0  ;;  %1290 = vmatpush.bf16.msra.mxu0 %v5798_v0  ;;  %vm270_vm3 = vsmask.f32 4368  ;;  %vm6059_vm7 = vmand %vm600_vm2, %vm269_vm0  ;;  %v5794_v25 = vld [vmem:[%s7415_s1 + $0x58] sm:$0xff] }
   0xe   : > { %197 = vst [vmem:[#allocation2 + $0x38] sm:$0x1] %v5985_v1  ;;  %s5765_s20 = sshll.u32 %s7443_s13, 7  ;;  %vm594_vm4 = vsmask.f32 7938  ;;  %vm6042_vm5 = vmor %vm269_vm0, %vm270_vm3  ;;  %v5793_v26 = vld [vmem:[%s7415_s1 + $0x50] sm:$0xff] }
   0xf   : > { %s6033_s23 = scalar_lea.vmem %s7414_s0, %s5765_s20  ;;  %183 = vst [vmem:[#allocation2] sm:$0xf] %v5985_v1  ;;  %vm6052_vm6 = vmand %vm593_vm1, %vm594_vm4  ;;  %v5792_v27 = vld [vmem:[%s7415_s1 + $0x48] sm:$0xff]  ;;  %vm774_vm8 = vsmask.f32 3328  ;;  %v5791_v40 = vld [vmem:[%s7415_s1 + $0x40] sm:$0xff] }
  0x10   : > { %5890 = vmatpush.bf16.msra.mxu1 %v5797_v2  ;;  %5891 = vmatpush.bf16.msra.mxu2 %v5797_v2  ;;  %v243_v4 = vld [vmem:[%s6033_s23 + $0x18] sm:$0xf]  ;;  %v244_v5 = vld [vmem:[%s6033_s23 + $0x1c] sm:$0xf]  ;;  %184 = vst [vmem:[#allocation2 + $0x4] sm:$0xf] %v5985_v1 }
  0x11   : > { %5892 = vmatpush.bf16.msra.mxu3 %v5797_v2  ;;  %1291 = vmatpush.bf16.msra.mxu0 %v5797_v2  ;;  %v324_v6 = vshrl.u32 %v243_v4, 16  ;;  %v327_v7 = vshll.u32 %v243_v4, 16  ;;  %v332_v8 = vshrl.u32 %v244_v5, 16  ;;  %v335_v9 = vshll.u32 %v244_v5, 16  ;;  %185 = vst [vmem:[#allocation2 + $0x8] sm:$0x1] %v5985_v1 }
  0x12   : > { %186 = vst [vmem:[#allocation2 + $0xc] sm:$0xf] %v5985_v1  ;;  %vm775_vm9 = vsmask.f32 7440  ;;  %v6115_v52 = vld [vmem:[%s6033_s23 + $0x38] sm:$0xf] }
  0x13   : > { %v326_v12 = vrot.slane %v324_v6, 7  ;;  %v334_v13 = vrot.slane %v332_v8, 7  ;;  %187 = vst [vmem:[#allocation2 + $0x10] sm:$0xf] %v5985_v1  ;;  %v619_v16 = vld [vmem:[#allocation2 + $0x30] sm:$0xf]  ;;  %vm6097_vm10 = vmor %vm774_vm8, %vm775_vm9 }
  0x14   : > { %5893 = vmatpush.bf16.msra.mxu1 %v5796_v3  ;;  %5894 = vmatpush.bf16.msra.mxu2 %v5796_v3  ;;  %188 = vst [vmem:[#allocation2 + $0x14] sm:$0x1] %v5985_v1  ;;  %v252_v53 = vld [vmem:[%s6033_s23 + $0x3c] sm:$0xf]  ;;  %v6120_v54 = vld [vmem:[%s6033_s23 + $0x58] sm:$0xf] }
  0x15   : > { %v623_v17 = vld [vmem:[#allocation2 + $0x38] sm:$0x1]  ;;  %5895 = vmatpush.bf16.msra.mxu3 %v5796_v3  ;;  %1292 = vmatpush.bf16.msra.mxu0 %v5796_v3  ;;  %v329_v18 = vor.u32 %v327_v7, %v326_v12  ;;  %v330_v19 = vrot.slane %v326_v12, 4  ;;  %v337_v20 = vor.u32 %v335_v9, %v334_v13  ;;  %v339_v21 = vrot.slane %v334_v13, 4  ;;  %189 = vst [vmem:[#allocation2 + $0x18] sm:$0xf] %v5985_v1 }
  0x16   : > { %190 = vst [vmem:[#allocation2 + $0x1c] sm:$0xf] %v5985_v1  ;;  %v6123_v55 = vld [vmem:[%s6033_s23 + $0x5c] sm:$0xf]  ;;  %v392_v56 = vshrl.u32 %v6115_v52, 16  ;;  %v400_v57 = vshrl.u32 %v252_v53, 16 }
  0x17   : > { %v338_v22 = vsel %vm6042_vm5, %v330_v19, %v337_v20  ;;  %v620_v23 = vsel %vm6052_vm6, %v329_v18, %v619_v16  ;;  %v624_v24 = vsel %vm6059_vm7, %v339_v21, %v623_v17  ;;  %191 = vst [vmem:[#allocation2 + $0x20] sm:$0x1] %v5985_v1  ;;  %v460_v58 = vshrl.u32 %v6120_v54, 16  ;;  %v710_v60 = vld [vmem:[#allocation2] sm:$0xf]  ;;  %s5766_s16 = sshll.u32 %s7443_s13, 8 }
  0x18   : > { %5896 = vmatpush.bf16.msra.mxu1 %v5795_v11  ;;  %5897 = vmatpush.bf16.msra.mxu2 %v5795_v11  ;;  %621 = vst [vmem:[#allocation2 + $0x30] sm:$0xf] %v620_v23  ;;  %v468_v59 = vshrl.u32 %v6123_v55, 16  ;;  %v711_v61 = vld [vmem:[#allocation2 + $0x4] sm:$0xf]  ;;  %v778_v62 = vshrl.u32 %v710_v60, 16  ;;  %s7193_s19 = scalar_lea.vmem %s7416_s2, %s5766_s16 }
  0x19   : > { %5898 = vmatpush.bf16.msra.mxu3 %v5795_v11  ;;  %1293 = vmatpush.bf16.msra.mxu0 %v5795_v11  ;;  %622 = vst [vmem:[#allocation2 + $0x34] sm:$0xf] %v338_v22  ;;  %v781_v63 = vshll.u32 %v710_v60, 16  ;;  %v787_v0 = vshll.u32 %v711_v61, 16  ;;  %v791_v2 = vshrl.u32 %v711_v61, 16  ;;  %v6134_v3 = vrot.slane %v392_v56, 7 }
  0x1a   : > { %625 = vst [vmem:[#allocation2 + $0x38] sm:$0x1] %v624_v24  ;;  %v395_v4 = vshll.u32 %v6115_v52, 16  ;;  %v6137_v5 = vrot.slane %v400_v57, 7  ;;  %v780_v6 = vrot.slane %v778_v62, 4  ;;  %v403_v11 = vshll.u32 %v252_v53, 16 }
  0x1b   : > { %192 = vst [vmem:[#allocation2 + $0x24] sm:$0xf] %v5985_v1  ;;  %v783_v7 = vrot.slane %v781_v63, 5  ;;  %v789_v8 = vrot.slane %v787_v0, 5  ;;  %v793_v9 = vrot.slane %v791_v2, 4  ;;  %v462_v12 = vrot.slane %v460_v58, 7 }
  0x1c   : > { %5899 = vmatpush.bf16.msra.mxu1 %v5794_v25  ;;  %5900 = vmatpush.bf16.msra.mxu2 %v5794_v25  ;;  %193 = vst [vmem:[#allocation2 + $0x28] sm:$0xf] %v5985_v1  ;;  %v758_v13 = vld [vmem:[#allocation2 + $0x8] sm:$0x1]  ;;  %v6142_v16 = vrot.slane %v468_v59, 7  ;;  %v471_v23 = vshll.u32 %v6123_v55, 16 }
  0x1d   : > { %5901 = vmatpush.bf16.msra.mxu3 %v5794_v25  ;;  %1294 = vmatpush.bf16.msra.mxu0 %v5794_v25  ;;  %194 = vst [vmem:[#allocation2 + $0x2c] sm:$0x1] %v5985_v1  ;;  %v784_v17 = vor.u32 %v783_v7, %v780_v6  ;;  %v794_v18 = vor.u32 %v793_v9, %v789_v8  ;;  %v797_v19 = vshll.u32 %v758_v13, 16  ;;  %v6145_v20 = vld [vmem:[%s6033_s23 + $0x20] sm:$0xf]  ;;  %v5838_v52 = vld [vmem:[%s7415_s1 + $0x138] sm:$0xff] }
  0x1e   : > { %198 = vst [vmem:[#allocation2 + $0x3c] sm:$0xf] %v5985_v1  ;;  %v6149_v21 = vld [vmem:[%s6033_s23 + $0x24] sm:$0xf]  ;;  %v6152_v22 = vld [vmem:[%s6033_s23 + $0x40] sm:$0xf] }
  0x1f   : > { %v718_v28 = vld [vmem:[#allocation2 + $0x30] sm:$0xf]  ;;  %199 = vst [vmem:[#allocation2 + $0x40] sm:$0xf] %v5985_v1  ;;  %v785_v24 = vrot.slane %v784_v17, 4  ;;  %v795_v25 = vrot.slane %v794_v18, 4 }
  0x20   : > { %5902 = vmatpush.bf16.msra.mxu1 %v5793_v26  ;;  %5903 = vmatpush.bf16.msra.mxu2 %v5793_v26  ;;  %v719_v29 = vld [vmem:[#allocation2 + $0x34] sm:$0xf]  ;;  %v874_v30 = vshrl.u32 %v718_v28, 16  ;;  %v877_v31 = vshll.u32 %v718_v28, 16  ;;  %200 = vst [vmem:[#allocation2 + $0x44] sm:$0x1] %v5985_v1  ;;  %v405_v28 = vor.u32 %v403_v11, %v6137_v5 }
  0x21   : > { %5904 = vmatpush.bf16.msra.mxu3 %v5793_v26  ;;  %1295 = vmatpush.bf16.msra.mxu0 %v5793_v26  ;;  %v762_v32 = vld [vmem:[#allocation2 + $0x38] sm:$0x1]  ;;  %v883_v33 = vshll.u32 %v719_v29, 16  ;;  %v887_v34 = vshrl.u32 %v719_v29, 16  ;;  %201 = vst [vmem:[#allocation2 + $0x48] sm:$0xf] %v5985_v1 }
  0x22   : > { %v876_v35 = vrot.slane %v874_v30, 4  ;;  %v879_v36 = vrot.slane %v877_v31, 5  ;;  %v893_v37 = vshll.u32 %v762_v32, 16  ;;  %202 = vst [vmem:[#allocation2 + $0x4c] sm:$0xf] %v5985_v1  ;;  %v799_v26 = vrot.slane %v797_v19, 5 }
  0x23   : > { %v885_v38 = vrot.slane %v883_v33, 5  ;;  %v889_v39 = vrot.slane %v887_v34, 4  ;;  %203 = vst [vmem:[#allocation2 + $0x50] sm:$0x1] %v5985_v1  ;;  %v407_v29 = vrot.slane %v6137_v5, 4  ;;  %v341_v30 = vshrl.u32 %v6145_v20, 16 }
  0x24   : > { %5905 = vmatpush.bf16.msra.mxu1 %v5792_v27  ;;  %5906 = vmatpush.bf16.msra.mxu2 %v5792_v27  ;;  %v880_v41 = vor.u32 %v879_v36, %v876_v35  ;;  %204 = vst [vmem:[#allocation2 + $0x54] sm:$0xf] %v5985_v1  ;;  %v895_v44 = vrot.slane %v893_v37, 5  ;;  %v463_v31 = vshll.u32 %v6120_v54, 16  ;;  %v790_v32 = vsel %vm6097_vm10, %v785_v24, %v789_v8  ;;  %v5805_v58 = vld [vmem:[%s7415_s1 + $0xb0] sm:$0xff]  ;;  %v5871_v14 = vld [vmem:[%s7415_s1 + $0x1c0] sm:$0xff] }
  0x25   : > { %5907 = vmatpush.bf16.msra.mxu3 %v5792_v27  ;;  %1296 = vmatpush.bf16.msra.mxu0 %v5792_v27  ;;  %v890_v43 = vor.u32 %v889_v39, %v885_v38  ;;  %205 = vst [vmem:[#allocation2 + $0x58] sm:$0xf] %v5985_v1  ;;  %v398_v27 = vrot.slane %v6134_v3, 4  ;;  %v800_v33 = vsel %vm6097_vm10, %v795_v25, %v799_v26  ;;  %v349_v34 = vshrl.u32 %v6149_v21, 16  ;;  %v6170_v39 = vld [vmem:[%s6033_s23 + $0x44] sm:$0xf] }
  0x26   : > { %v881_v45 = vrot.slane %v880_v41, 4  ;;  %206 = vst [vmem:[#allocation2 + $0x5c] sm:$0x1] %v5985_v1  ;;  %v466_v36 = vrot.slane %v462_v12, 4  ;;  %v1178_v37 = vunpack.c.l.b16 %v790_v32  ;;  %v397_v41 = vor.u32 %v395_v4, %v6134_v3  ;;  %v5829_v0 = vld [vmem:[%s7415_s1 + $0xf0] sm:$0xff]  ;;  %s5106_s20 = sshll.u32 %s7443_s13, 3 }
  0x27   : > { %v891_v46 = vrot.slane %v890_v43, 4  ;;  %207 = vst [vmem:[#allocation2 + $0x60] sm:$0xf] %v5985_v1  ;;  %v6194_v53 = vrot.slane %v349_v34, 7  ;;  %v352_v54 = vshll.u32 %v6149_v21, 16  ;;  %v417_v55 = vshrl.u32 %v6170_v39, 16  ;;  %s7403_s24 = scalar_lea.vmem %s7417_s3, %s5106_s20 }
  0x28   : > { %5908 = vmatpush.bf16.msra.mxu1 %v5791_v40  ;;  %5909 = vmatpush.bf16.msra.mxu2 %v5791_v40  ;;  %v886_v47 = vsel %vm6097_vm10, %v881_v45, %v885_v38  ;;  %208 = vst [vmem:[#allocation2 + $0x64] sm:$0xf] %v5985_v1  ;;  %v1179_v38 = vunpack.c.l.b16 %v800_v33  ;;  %v475_v45 = vrot.slane %v6142_v16, 4  ;;  %v406_v56 = vsel %vm6042_vm5, %v398_v27, %v405_v28  ;;  %v5789_v2 = vld [vmem:[%s7415_s1 + $0x30] sm:$0xff]  ;;  %v626_v3 = vld [vmem:[#allocation2 + $0x3c] sm:$0xf] }
  0x29   : > { %5910 = vmatpush.bf16.msra.mxu3 %v5791_v40  ;;  %1297 = vmatpush.bf16.msra.mxu0 %v5791_v40  ;;  %v896_v48 = vsel %vm6097_vm10, %v891_v46, %v895_v44  ;;  %v1186_v49 = vunpack.c.l.b16 %v886_v47  ;;  %209 = vst [vmem:[#allocation2 + $0x68] sm:$0x1] %v5985_v1  ;;  %v409_v40 = vshrl.u32 %v6152_v22, 16  ;;  %v473_v44 = vor.u32 %v471_v23, %v6142_v16  ;;  %v5806_v47 = vld [vmem:[%s7415_s1 + $0xb8] sm:$0xff]  ;;  %v261_v4 = vld [vmem:[%s6033_s23 + $0x60] sm:$0xf] }
  0x2a   : > { %v1187_v50 = vunpack.c.l.b16 %v896_v48  ;;  %210 = vst [vmem:[#allocation2 + $0x6c] sm:$0xf] %v5985_v1  ;;  %v344_v46 = vshll.u32 %v6145_v20, 16  ;;  %v1210_v48 = vpack.c.b16 %v1179_v38, %v1178_v37  ;;  %v465_v61 = vor.u32 %v463_v31, %v462_v12  ;;  %v262_v8 = vld [vmem:[%s6033_s23 + $0x64] sm:$0xf] }
  0x2b   : > { %211 = vst [vmem:[#allocation2 + $0x70] sm:$0xf] %v5985_v1  ;;  %v6204_v59 = vrot.slane %v409_v40, 7  ;;  %v474_v62 = vsel %vm6042_vm5, %v466_v36, %v473_v44  ;;  %v477_v9 = vshrl.u32 %v261_v4, 16  ;;  %v412_v11 = vshll.u32 %v6152_v22, 16 }
  0x2c   : > { %v1214_v51 = vpack.c.b16 %v1187_v50, %v1186_v49  ;;  %212 = vst [vmem:[#allocation2 + $0x74] sm:$0x1] %v5985_v1  ;;  %v5830_v49 = vld [vmem:[%s7415_s1 + $0xf8] sm:$0xff]  ;;  %1904 = vmatpush.bf16.msrb.mxu2 %v5806_v47  ;;  %1298 = vmatmul.bf16.vlgmr.msra.gmra.mxu0 %v1210_v48  ;;  %v419_v12 = vrot.slane %v417_v55, 7  ;;  %v420_v13 = vshll.u32 %v6170_v39, 16  ;;  %v485_v16 = vshrl.u32 %v262_v8, 16 }
  0x2d   : > { %213 = vst [vmem:[#allocation2 + $0x78] sm:$0xf] %v5985_v1  ;;  %v5790_v50 = vld [vmem:[%s7415_s1 + $0x38] sm:$0xff]  ;;  %2218 = vmatpush.bf16.msrb.mxu3 %v5830_v49  ;;  %2900 = vmatpush.bf16.msrb.mxu0 %v5838_v52  ;;  %v356_v17 = vrot.slane %v6194_v53, 4  ;;  %v415_v18 = vrot.slane %v6204_v59, 4  ;;  %v479_v19 = vrot.slane %v477_v9, 7  ;;  %v354_v22 = vor.u32 %v352_v54, %v6194_v53 }
  0x2e   : > { %1318 = vmatmul.bf16.vlgmr.msra.gmra.mxu1 %v1214_v51  ;;  %214 = vst [vmem:[#allocation2 + $0x7c] sm:$0xf] %v5985_v1  ;;  %v647_v35 = vld [vmem:[#allocation2 + $0x60] sm:$0xf]  ;;  %v6188_v51 = vrot.slane %v341_v30, 7  ;;  %v480_v20 = vshll.u32 %v261_v4, 16  ;;  %v414_v32 = vor.u32 %v412_v11, %v6204_v59  ;;  %v422_v33 = vor.u32 %v420_v13, %v419_v12 }
  0x2f   : > { %215 = vst [vmem:[#allocation2 + $0x80] sm:$0x1] %v5985_v1  ;;  %v648_v60 = vsel %vm6052_vm6, %v397_v41, %v647_v35  ;;  %1523 = vmatpush.bf16.msrb.mxu1 %v5790_v50  ;;  %v630_v23 = vld [vmem:[#allocation2 + $0x44] sm:$0x1]  ;;  %v487_v24 = vrot.slane %v485_v16, 7  ;;  %v488_v25 = vshll.u32 %v262_v8, 16 }
  0x30   : > { %216 = vst [vmem:[#allocation2 + $0x84] sm:$0xf] %v5985_v1  ;;  %v651_v43 = vld [vmem:[#allocation2 + $0x68] sm:$0x1]  ;;  %v346_v6 = vor.u32 %v344_v46, %v6188_v51  ;;  %v347_v7 = vrot.slane %v6188_v51, 4  ;;  %1905 = vmatpush.bf16.msrb.mxu2 %v5805_v58  ;;  %v424_v28 = vrot.slane %v419_v12, 4  ;;  %v6242_v38 = vor.u32 %v480_v20, %v479_v19 }
  0x31   : > { %217 = vst [vmem:[#allocation2 + $0x88] sm:$0xf] %v5985_v1  ;;  %v652_v5 = vsel %vm6059_vm7, %v407_v29, %v651_v43  ;;  %2219 = vmatpush.bf16.msrb.mxu3 %v5829_v0  ;;  %v654_v29 = vld [vmem:[#allocation2 + $0x6c] sm:$0xf]  ;;  %v238_v30 = vld [vmem:[%s6033_s23 + $0x4] sm:$0xf]  ;;  %v631_v49 = vsel %vm6059_vm7, %v356_v17, %v630_v23  ;;  %v423_v54 = vsel %vm6042_vm5, %v415_v18, %v422_v33 }
  0x32   : > { %218 = vst [vmem:[#allocation2 + $0x8c] sm:$0x1] %v5985_v1  ;;  %v627_v27 = vsel %vm6052_vm6, %v346_v6, %v626_v3  ;;  %v281_v37 = vshrl.u32 %v238_v30, 16  ;;  %v483_v39 = vrot.slane %v479_v19, 4  ;;  %v284_v43 = vshll.u32 %v238_v30, 16  ;;  %v5804_v18 = vld [vmem:[%s7415_s1 + $0xa8] sm:$0xff] }
  0x33   : > { %219 = vst [vmem:[#allocation2 + $0x90] sm:$0xf] %v5985_v1  ;;  %1524 = vmatpush.bf16.msrb.mxu1 %v5789_v2  ;;  %v658_v34 = vld [vmem:[#allocation2 + $0x74] sm:$0x1]  ;;  %v355_v44 = vsel %vm6042_vm5, %v347_v7, %v354_v22  ;;  %v492_v46 = vrot.slane %v487_v24, 4  ;;  %v655_v55 = vsel %vm6052_vm6, %v414_v32, %v654_v29  ;;  %vm1660_vm11 = vcmask 1042432  }
  0x34   : > { %220 = vst [vmem:[#allocation2 + $0x94] sm:$0xf] %v5985_v1  ;;  %v283_v47 = vrot.slane %v281_v37, 7  ;;  %v6246_v48 = vld [vmem:[#allocation2 + $0xc] sm:$0xf]  ;;  %1906 = vmatpush.bf16.msrb.mxu2 %v5804_v18  ;;  %vm1661_vm12 = vcmask 1046532  }
  0x35   : > { %221 = vst [vmem:[#allocation2 + $0x98] sm:$0x1] %v5985_v1  ;;  %v602_v52 = vld [vmem:[#allocation2 + $0x14] sm:$0x1]  ;;  %v6253_v53 = vld [vmem:[%s6033_s23 + $0x28] sm:$0xf]  ;;  %vm6563_vm13 = vmor %vm1660_vm11, %vm1661_vm12 }
  0x36   : > { %222 = vst [vmem:[#allocation2 + $0x9c] sm:$0xf] %v5985_v1  ;;  %v6260_v58 = vld [vmem:[%s6033_s23 + $0x2c] sm:$0xf] }
  0x37   : > { %223 = vst [vmem:[#allocation2 + $0xa0] sm:$0xf] %v5985_v1 }
  0x38   : > { %224 = vst [vmem:[#allocation2 + $0xa4] sm:$0x1] %v5985_v1 }
  0x39   : > { %225 = vst [vmem:[#allocation2 + $0xa8] sm:$0xf] %v5985_v1 }
  0x3a   : > { %226 = vst [vmem:[#allocation2 + $0xac] sm:$0xf] %v5985_v1  ;;  %v675_v57 = vld [vmem:[#allocation2 + $0x90] sm:$0xf] }
  0x3b   : > { %227 = vst [vmem:[#allocation2 + $0xb0] sm:$0x1] %v5985_v1  ;;  %v676_v21 = vsel %vm6052_vm6, %v465_v61, %v675_v57  ;;  %v288_v57 = vrot.slane %v283_v47, 4 }
  0x3c   : > { %228 = vst [vmem:[#allocation2 + $0xb4] sm:$0xf] %v5985_v1  ;;  %v679_v63 = vld [vmem:[#allocation2 + $0x98] sm:$0x1] }
  0x3d   : > { %229 = vst [vmem:[#allocation2 + $0xb8] sm:$0xf] %v5985_v1  ;;  %v680_v26 = vsel %vm6059_vm7, %v475_v45, %v679_v63  ;;  %v6240_v35 = vld [vmem:[#allocation2 + $0x9c] sm:$0xf]  ;;  %v490_v45 = vor.u32 %v488_v25, %v487_v24  ;;  %v366_v63 = vshrl.u32 %v6260_v58, 16  ;;  %v6291_v19 = vsel %vm6059_vm7, %v288_v57, %v602_v52 }
  0x3e   : > { %230 = vst [vmem:[#allocation2 + $0xbc] sm:$0x1] %v5985_v1  ;;  %v683_v61 = vsel %vm6052_vm6, %v6242_v38, %v6240_v35  ;;  %v5836_v35 = vld [vmem:[%s7415_s1 + $0x128] sm:$0xff] }
  0x3f   : > { %231 = vst [vmem:[#allocation2 + $0xc0] sm:$0xf] %v5985_v1  ;;  %v686_v40 = vld [vmem:[#allocation2 + $0xa4] sm:$0x1]  ;;  %v6272_v4 = vsel %vm6042_vm5, %v483_v39, %v490_v45 }
  0x40   : > { %232 = vst [vmem:[#allocation2 + $0xc4] sm:$0xf] %v5985_v1 }
  0x41   : > { %233 = vst [vmem:[#allocation2 + $0xc8] sm:$0x1] %v5985_v1 }
  0x42   : > { %234 = vst [vmem:[#allocation2 + $0xcc] sm:$0xf] %v5985_v1 }
  0x43   : > { %235 = vst [vmem:[#allocation2 + $0xd0] sm:$0xf] %v5985_v1 }
  0x44   : > { %236 = vst [vmem:[#allocation2 + $0xd4] sm:$0x1] %v5985_v1  ;;  %v237_v1 = vld [vmem:[%s6033_s23] sm:$0xf] }
  0x45   : > { %649 = vst [vmem:[#allocation2 + $0x60] sm:$0xf] %v648_v60  ;;  %v273_v31 = vshrl.u32 %v237_v1, 16  ;;  %v276_v36 = vshll.u32 %v237_v1, 16  ;;  %v659_v60 = vsel %vm6059_vm7, %v424_v28, %v658_v34 }
  0x46   : > { %650 = vst [vmem:[#allocation2 + $0x64] sm:$0xf] %v406_v56  ;;  %v286_v56 = vor.u32 %v284_v43, %v283_v47  ;;  %v5828_v47 = vld [vmem:[%s7415_s1 + $0xe8] sm:$0xff] }
  0x47   : > { %653 = vst [vmem:[#allocation2 + $0x68] sm:$0x1] %v652_v5  ;;  %v275_v41 = vrot.slane %v273_v31, 7  ;;  %v6276_v5 = vsel %vm6059_vm7, %v492_v46, %v686_v40  ;;  %2220 = vmatpush.bf16.msrb.mxu3 %v5828_v47 }
  0x48   : > { %677 = vst [vmem:[#allocation2 + $0x90] sm:$0xf] %v676_v21 }
  0x49   : > { %678 = vst [vmem:[#allocation2 + $0x94] sm:$0xf] %v474_v62  ;;  %v6250_v50 = vor.u32 %v276_v36, %v275_v41  ;;  %v279_v51 = vrot.slane %v275_v41, 4  ;;  %v358_v62 = vshrl.u32 %v6253_v53, 16 }
  0x4a   : > { %681 = vst [vmem:[#allocation2 + $0x98] sm:$0x1] %v680_v26 }
  0x4b   : > { %628 = vst [vmem:[#allocation2 + $0x3c] sm:$0xf] %v627_v27  ;;  %v6280_v9 = vsel %vm6042_vm5, %v279_v51, %v286_v56  ;;  %v597_v11 = vsel %vm6052_vm6, %v6250_v50, %v6246_v48  ;;  %v6345_v48 = vrot.slane %v366_v63, 7  ;;  %v369_v50 = vshll.u32 %v6260_v58, 16 }
  0x4c   : > { %v726_v59 = vld [vmem:[#allocation2 + $0x60] sm:$0xf]  ;;  %629 = vst [vmem:[#allocation2 + $0x40] sm:$0xf] %v355_v44 }
  0x4d   : > { %v727_v0 = vld [vmem:[#allocation2 + $0x64] sm:$0xf]  ;;  %v970_v2 = vshrl.u32 %v726_v59, 16  ;;  %v973_v3 = vshll.u32 %v726_v59, 16  ;;  %632 = vst [vmem:[#allocation2 + $0x44] sm:$0x1] %v631_v49 }
  0x4e   : > { %v766_v6 = vld [vmem:[#allocation2 + $0x68] sm:$0x1]  ;;  %v979_v7 = vshll.u32 %v727_v0, 16  ;;  %v983_v8 = vshrl.u32 %v727_v0, 16  ;;  %656 = vst [vmem:[#allocation2 + $0x6c] sm:$0xf] %v655_v55 }
  0x4f   : > { %v972_v12 = vrot.slane %v970_v2, 4  ;;  %v975_v13 = vrot.slane %v973_v3, 5  ;;  %v989_v16 = vshll.u32 %v766_v6, 16  ;;  %v734_v17 = vld [vmem:[#allocation2 + $0x90] sm:$0xf]  ;;  %v5788_v6 = vld [vmem:[%s7415_s1 + $0x28] sm:$0xff] }
  0x50   : > { %v981_v20 = vrot.slane %v979_v7, 5  ;;  %v985_v21 = vrot.slane %v983_v8, 4  ;;  %v735_v22 = vld [vmem:[#allocation2 + $0x94] sm:$0xf]  ;;  %v1066_v23 = vshrl.u32 %v734_v17, 16  ;;  %v1069_v24 = vshll.u32 %v734_v17, 16  ;;  %1525 = vmatpush.bf16.msrb.mxu1 %v5788_v6 }
  0x51   : > { %v976_v25 = vor.u32 %v975_v13, %v972_v12  ;;  %v991_v1 = vrot.slane %v989_v16, 5  ;;  %v770_v26 = vld [vmem:[#allocation2 + $0x98] sm:$0x1]  ;;  %v1075_v27 = vshll.u32 %v735_v22, 16  ;;  %v1079_v28 = vshrl.u32 %v735_v22, 16  ;;  %v5837_v3 = vld [vmem:[%s7415_s1 + $0x130] sm:$0xff] }
  0x52   : > { %v986_v29 = vor.u32 %v985_v21, %v981_v20  ;;  %v1068_v30 = vrot.slane %v1066_v23, 4  ;;  %v1071_v31 = vrot.slane %v1069_v24, 5  ;;  %v1085_v32 = vshll.u32 %v770_v26, 16  ;;  %v720_v33 = vld [vmem:[#allocation2 + $0x3c] sm:$0xf]  ;;  %2901 = vmatpush.bf16.msrb.mxu0 %v5837_v3 }
  0x53   : > { %v977_v34 = vrot.slane %v976_v25, 4  ;;  %v1077_v36 = vrot.slane %v1075_v27, 5  ;;  %v1081_v37 = vrot.slane %v1079_v28, 4  ;;  %v721_v39 = vld [vmem:[#allocation2 + $0x40] sm:$0xf]  ;;  %v898_v40 = vshrl.u32 %v720_v33, 16 }
  0x54   : > { %v987_v41 = vrot.slane %v986_v29, 4  ;;  %v1072_v43 = vor.u32 %v1071_v31, %v1068_v30  ;;  %v1087_v44 = vrot.slane %v1085_v32, 5  ;;  %v763_v45 = vld [vmem:[#allocation2 + $0x44] sm:$0x1]  ;;  %v901_v46 = vshll.u32 %v720_v33, 16 }
  0x55   : > { %v982_v49 = vsel %vm6097_vm10, %v977_v34, %v981_v20  ;;  %v1082_v51 = vor.u32 %v1081_v37, %v1077_v36  ;;  %v900_v52 = vrot.slane %v898_v40, 4  ;;  %v907_v55 = vshll.u32 %v721_v39, 16  ;;  %657 = vst [vmem:[#allocation2 + $0x70] sm:$0xf] %v423_v54  ;;  %v728_v56 = vld [vmem:[#allocation2 + $0x6c] sm:$0xf] }
  0x56   : > { %v992_v57 = vsel %vm6097_vm10, %v987_v41, %v991_v1  ;;  %v1194_v59 = vunpack.c.l.b16 %v982_v49  ;;  %v1073_v0 = vrot.slane %v1072_v43, 4  ;;  %v903_v2 = vrot.slane %v901_v46, 5  ;;  %660 = vst [vmem:[#allocation2 + $0x74] sm:$0x1] %v659_v60  ;;  %v5803_v60 = vld [vmem:[%s7415_s1 + $0xa0] sm:$0xff]  ;;  %2902 = vmatpush.bf16.msrb.mxu0 %v5836_v35 }
  0x57   : > { %v1195_v7 = vunpack.c.l.b16 %v992_v57  ;;  %v1083_v8 = vrot.slane %v1082_v51, 4  ;;  %v909_v54 = vrot.slane %v907_v55, 5  ;;  %v911_v12 = vshrl.u32 %v721_v39, 16  ;;  %684 = vst [vmem:[#allocation2 + $0x9c] sm:$0xf] %v683_v61  ;;  %v5827_v20 = vld [vmem:[%s7415_s1 + $0xe0] sm:$0xff]  ;;  %1907 = vmatpush.bf16.msrb.mxu2 %v5803_v60 }
  0x58   : > { %v1078_v13 = vsel %vm6097_vm10, %v1073_v0, %v1077_v36  ;;  %v904_v16 = vor.u32 %v903_v2, %v900_v52  ;;  %v917_v17 = vshll.u32 %v763_v45, 16  ;;  %v994_v18 = vshrl.u32 %v728_v56, 16  ;;  %685 = vst [vmem:[#allocation2 + $0xa0] sm:$0xf] %v6272_v4  ;;  %v5787_v4 = vld [vmem:[%s7415_s1 + $0x20] sm:$0xff]  ;;  %2221 = vmatpush.bf16.msrb.mxu3 %v5827_v20 }
  0x59   : > { %v1218_v38 = vpack.c.b16 %v1195_v7, %v1194_v59  ;;  %v1088_v61 = vsel %vm6097_vm10, %v1083_v8, %v1087_v44  ;;  %v1202_v21 = vunpack.c.l.b16 %v1078_v13  ;;  %v913_v22 = vrot.slane %v911_v12, 4  ;;  %688 = vst [vmem:[#allocation2 + $0xa4] sm:$0x1] %v6276_v5  ;;  %1526 = vmatpush.bf16.msrb.mxu1 %v5787_v4 }
  0x5a   : > { %v1203_v23 = vunpack.c.l.b16 %v1088_v61  ;;  %v905_v24 = vrot.slane %v904_v16, 4  ;;  %v919_v25 = vrot.slane %v917_v17, 5  ;;  %598 = vst [vmem:[#allocation2 + $0xc] sm:$0xf] %v597_v11  ;;  %v361_v1 = vshll.u32 %v6253_v53, 16 }
  0x5b   : > { %1338 = vmatmul.bf16.vlgmr.msra.gmra.mxu2 %v1218_v38  ;;  %v914_v26 = vor.u32 %v913_v22, %v909_v54  ;;  %v996_v5 = vrot.slane %v994_v18, 4  ;;  %v997_v27 = vshll.u32 %v728_v56, 16  ;;  %599 = vst [vmem:[#allocation2 + $0x10] sm:$0xf] %v6280_v9  ;;  %v6338_v28 = vrot.slane %v358_v62, 7 }
  0x5c   : > { %v1222_v29 = vpack.c.b16 %v1203_v23, %v1202_v21  ;;  %v910_v30 = vsel %vm6097_vm10, %v905_v24, %v909_v54  ;;  %v729_v31 = vld [vmem:[#allocation2 + $0x70] sm:$0xf]  ;;  %604 = vst [vmem:[#allocation2 + $0x14] sm:$0x1] %v6291_v19 }
  0x5d   : > { %v915_v9 = vrot.slane %v914_v26, 4  ;;  %v1188_v11 = vunpack.c.l.b16 %v910_v30  ;;  %v767_v53 = vld [vmem:[#allocation2 + $0x74] sm:$0x1]  ;;  %v999_v62 = vrot.slane %v997_v27, 5  ;;  %v1003_v32 = vshll.u32 %v729_v31, 16 }
  0x5e   : > { %1358 = vmatmul.bf16.vlgmr.msra.gmra.mxu3 %v1222_v29  ;;  %v1007_v33 = vshrl.u32 %v729_v31, 16  ;;  %v1013_v34 = vshll.u32 %v767_v53, 16  ;;  %v736_v36 = vld [vmem:[#allocation2 + $0x9c] sm:$0xf]  ;;  %v6349_v37 = vor.u32 %v361_v1, %v6338_v28  ;;  %v364_v19 = vrot.slane %v6338_v28, 4 }
  0x5f   : > { %v920_v63 = vsel %vm6097_vm10, %v915_v9, %v919_v25  ;;  %v1000_v39 = vor.u32 %v999_v62, %v996_v5  ;;  %v1005_v40 = vrot.slane %v1003_v32, 5  ;;  %v737_v58 = vld [vmem:[#allocation2 + $0xa0] sm:$0xf]  ;;  %v1090_v41 = vshrl.u32 %v736_v36, 16  ;;  %v633_v29 = vld [vmem:[#allocation2 + $0x48] sm:$0xf] }
  0x60   : > { %v1189_v43 = vunpack.c.l.b16 %v920_v63  ;;  %v1009_v44 = vrot.slane %v1007_v33, 4  ;;  %v1015_v45 = vrot.slane %v1013_v34, 5  ;;  %v771_v46 = vld [vmem:[#allocation2 + $0xa4] sm:$0x1]  ;;  %v1093_v47 = vshll.u32 %v736_v36, 16 }
  0x61   : > { %v1001_v49 = vrot.slane %v1000_v39, 4  ;;  %v1092_v51 = vrot.slane %v1090_v41, 4  ;;  %v1099_v52 = vshll.u32 %v737_v58, 16  ;;  %v1103_v55 = vshrl.u32 %v737_v58, 16  ;;  %v712_v56 = vld [vmem:[#allocation2 + $0xc] sm:$0xf] }
  0x62   : > { %v1215_v57 = vpack.c.b16 %v1189_v43, %v1188_v11  ;;  %v1010_v59 = vor.u32 %v1009_v44, %v1005_v40  ;;  %v1095_v0 = vrot.slane %v1093_v47, 5  ;;  %v1109_v2 = vshll.u32 %v771_v46, 16  ;;  %v6354_v3 = vld [vmem:[#allocation2 + $0x10] sm:$0xf]  ;;  %v255_v30 = vld [vmem:[%s6033_s23 + $0x48] sm:$0xf] }
  0x63   : > { %v1006_v6 = vsel %vm6097_vm10, %v1001_v49, %v1005_v40  ;;  %v1101_v7 = vrot.slane %v1099_v52, 5  ;;  %v1105_v8 = vrot.slane %v1103_v55, 4  ;;  %v6358_v54 = vld [vmem:[#allocation2 + $0x14] sm:$0x1]  ;;  %v802_v12 = vshrl.u32 %v712_v56, 16 }
  0x64   : > { %1323 = vmatmul.bf16.gmra.mxu1 %v1215_v57  ;;  %v1011_v60 = vrot.slane %v1010_v59, 4  ;;  %v1196_v13 = vunpack.c.l.b16 %v1006_v6  ;;  %v1096_v16 = vor.u32 %v1095_v0, %v1092_v51  ;;  %v1111_v17 = vrot.slane %v1109_v2, 5  ;;  %v637_v62 = vld [vmem:[#allocation2 + $0x50] sm:$0x1]  ;;  %v256_v32 = vld [vmem:[%s6033_s23 + $0x4c] sm:$0xf] }
  0x65   : > { %v1106_v18 = vor.u32 %v1105_v8, %v1101_v7  ;;  %v804_v20 = vrot.slane %v802_v12, 4  ;;  %v805_v35 = vshll.u32 %v712_v56, 16  ;;  %v811_v38 = vshll.u32 %v6354_v3, 16  ;;  %v263_v39 = vld [vmem:[%s6033_s23 + $0x68] sm:$0xf] }
  0x66   : > { %v1016_v61 = vsel %vm6097_vm10, %v1011_v60, %v1015_v45  ;;  %v1097_v21 = vrot.slane %v1096_v16, 4  ;;  %v815_v22 = vshrl.u32 %v6354_v3, 16  ;;  %v821_v4 = vshll.u32 %v6358_v54, 16  ;;  %v661_v57 = vld [vmem:[#allocation2 + $0x78] sm:$0xf] }
  0x67   : > { %v1197_v23 = vunpack.c.l.b16 %v1016_v61  ;;  %v1107_v24 = vrot.slane %v1106_v18, 4  ;;  %v807_v25 = vrot.slane %v805_v35, 5  ;;  %v813_v1 = vrot.slane %v811_v38, 5  ;;  %v239_v12 = vld [vmem:[%s6033_s23 + $0x8] sm:$0xf] }
  0x68   : > { %v1102_v26 = vsel %vm6097_vm10, %v1097_v21, %v1101_v7  ;;  %v817_v5 = vrot.slane %v815_v22, 4  ;;  %v823_v27 = vrot.slane %v821_v4, 5  ;;  %v371_v28 = vor.u32 %v369_v50, %v6345_v48  ;;  %v665_v7 = vld [vmem:[#allocation2 + $0x80] sm:$0x1]  ;;  %v689_v18 = vld [vmem:[#allocation2 + $0xa8] sm:$0xf] }
  0x69   : > { %v1219_v31 = vpack.c.b16 %v1197_v23, %v1196_v13  ;;  %v1112_v9 = vsel %vm6097_vm10, %v1107_v24, %v1111_v17  ;;  %v1204_v11 = vunpack.c.l.b16 %v1102_v26  ;;  %v808_v53 = vor.u32 %v807_v25, %v804_v20  ;;  %v693_v24 = vld [vmem:[#allocation2 + $0xb0] sm:$0x1] }
  0x6a   : > { %v1205_v33 = vunpack.c.l.b16 %v1112_v9  ;;  %v818_v34 = vor.u32 %v817_v5, %v813_v1  ;;  %v372_v36 = vsel %vm6042_vm5, %v364_v19, %v371_v28  ;;  %v373_v63 = vrot.slane %v6345_v48, 4  ;;  %v264_v19 = vld [vmem:[%s6033_s23 + $0x6c] sm:$0xf] }
  0x6b   : > { %1343 = vmatmul.bf16.gmra.mxu2 %v1219_v31  ;;  %v809_v50 = vrot.slane %v808_v53, 4  ;;  %v634_v40 = vsel %vm6052_vm6, %v6349_v37, %v633_v29  ;;  %636 = vst [vmem:[#allocation2 + $0x4c] sm:$0xf] %v372_v36  ;;  %v426_v58 = vshrl.u32 %v255_v30, 16  ;;  %v429_v41 = vshll.u32 %v255_v30, 16  ;;  %v5802_v37 = vld [vmem:[%s7415_s1 + $0x98] sm:$0xff] }
  0x6c   : > { %v1223_v43 = vpack.c.b16 %v1205_v33, %v1204_v11  ;;  %v819_v44 = vrot.slane %v818_v34, 4  ;;  %635 = vst [vmem:[#allocation2 + $0x48] sm:$0xf] %v634_v40  ;;  %v638_v45 = vsel %vm6059_vm7, %v373_v63, %v637_v62  ;;  %v434_v46 = vshrl.u32 %v256_v32, 16  ;;  %1908 = vmatpush.bf16.msrb.mxu2 %v5802_v37  ;;  %v6399_v28 = vld [vmem:[%s6033_s23 + $0xc] sm:$0xf] }
  0x6d   : > { %v814_v48 = vsel %vm6097_vm10, %v809_v50, %v813_v1  ;;  %639 = vst [vmem:[#allocation2 + $0x50] sm:$0x1] %v638_v45  ;;  %v428_v47 = vrot.slane %v426_v58, 7  ;;  %v437_v49 = vshll.u32 %v256_v32, 16  ;;  %v494_v51 = vshrl.u32 %v263_v39, 16  ;;  %v5835_v45 = vld [vmem:[%s7415_s1 + $0x120] sm:$0xff] }
  0x6e   : > { %1363 = vmatmul.bf16.gmra.mxu3 %v1223_v43  ;;  %v824_v52 = vsel %vm6097_vm10, %v819_v44, %v823_v27  ;;  %v1180_v55 = vunpack.c.l.b16 %v814_v48  ;;  %v436_v56 = vrot.slane %v434_v46, 7  ;;  %v497_v59 = vshll.u32 %v263_v39, 16  ;;  %v605_v39 = vld [vmem:[#allocation2 + $0x18] sm:$0xf]  ;;  %v6406_v50 = vld [vmem:[%s6033_s23 + $0x30] sm:$0xf]  ;;  %2903 = vmatpush.bf16.msrb.mxu0 %v5835_v45 }
  0x6f   : > { %v1181_v0 = vunpack.c.l.b16 %v824_v52  ;;  %v431_v2 = vor.u32 %v429_v41, %v428_v47  ;;  %v432_v6 = vrot.slane %v428_v47, 4  ;;  %v496_v8 = vrot.slane %v494_v51, 7  ;;  %v5826_v44 = vld [vmem:[%s7415_s1 + $0xd8] sm:$0xff] }
  0x70   : > { %v439_v60 = vor.u32 %v437_v49, %v436_v56  ;;  %v441_v13 = vrot.slane %v436_v56, 4  ;;  %v502_v16 = vshrl.u32 %v264_v19, 16  ;;  %v505_v17 = vshll.u32 %v264_v19, 16  ;;  %v5786_v49 = vld [vmem:[%s7415_s1 + $0x18] sm:$0xff]  ;;  %2222 = vmatpush.bf16.msrb.mxu3 %v5826_v44  ;;  %v5825_v56 = vld [vmem:[%s7415_s1 + $0xd0] sm:$0xff] }
  0x71   : > { %v1211_v20 = vpack.c.b16 %v1181_v0, %v1180_v55  ;;  %v662_v35 = vsel %vm6052_vm6, %v431_v2, %v661_v57  ;;  %v499_v38 = vor.u32 %v497_v59, %v496_v8  ;;  %v500_v61 = vrot.slane %v496_v8, 4  ;;  %v5801_v55 = vld [vmem:[%s7415_s1 + $0x90] sm:$0xff]  ;;  %1527 = vmatpush.bf16.msrb.mxu1 %v5786_v49 }
  0x72   : > { %v723_v21 = vld [vmem:[#allocation2 + $0x4c] sm:$0xf]  ;;  %v440_v22 = vsel %vm6042_vm5, %v432_v6, %v439_v60  ;;  %663 = vst [vmem:[#allocation2 + $0x78] sm:$0xf] %v662_v35  ;;  %v666_v4 = vsel %vm6059_vm7, %v441_v13, %v665_v7  ;;  %v504_v23 = vrot.slane %v502_v16, 7  ;;  %v290_v25 = vshrl.u32 %v239_v12, 16  ;;  %1909 = vmatpush.bf16.msrb.mxu2 %v5801_v55 }
  0x73   : > { %1303 = vmatmul.bf16.gmra.mxu0 %v1211_v20  ;;  %v722_v1 = vld [vmem:[#allocation2 + $0x48] sm:$0xf]  ;;  %v931_v26 = vshll.u32 %v723_v21, 16  ;;  %v935_v5 = vshrl.u32 %v723_v21, 16  ;;  %664 = vst [vmem:[#allocation2 + $0x7c] sm:$0xf] %v440_v22  ;;  %v690_v27 = vsel %vm6052_vm6, %v499_v38, %v689_v18 }
  0x74   : > { %v764_v29 = vld [vmem:[#allocation2 + $0x50] sm:$0x1]  ;;  %v922_v30 = vshrl.u32 %v722_v1, 16  ;;  %v925_v31 = vshll.u32 %v722_v1, 16  ;;  %667 = vst [vmem:[#allocation2 + $0x80] sm:$0x1] %v666_v4  ;;  %v507_v9 = vor.u32 %v505_v17, %v504_v23  ;;  %2223 = vmatpush.bf16.msrb.mxu3 %v5825_v56 }
  0x75   : > { %v933_v11 = vrot.slane %v931_v26, 5  ;;  %v937_v53 = vrot.slane %v935_v5, 4  ;;  %v941_v62 = vshll.u32 %v764_v29, 16  ;;  %v509_v32 = vrot.slane %v504_v23, 4  ;;  %691 = vst [vmem:[#allocation2 + $0xa8] sm:$0xf] %v690_v27 }
  0x76   : > { %v924_v33 = vrot.slane %v922_v30, 4  ;;  %v927_v34 = vrot.slane %v925_v31, 5  ;;  %v508_v36 = vsel %vm6042_vm5, %v500_v61, %v507_v9  ;;  %v6403_v63 = vrot.slane %v290_v25, 7  ;;  %v5834_v17 = vld [vmem:[%s7415_s1 + $0x118] sm:$0xff]  ;;  %v5785_v18 = vld [vmem:[%s7415_s1 + $0x10] sm:$0xff] }
  0x77   : > { %v938_v40 = vor.u32 %v937_v53, %v933_v11  ;;  %v943_v58 = vrot.slane %v941_v62, 5  ;;  %692 = vst [vmem:[#allocation2 + $0xac] sm:$0xf] %v508_v36  ;;  %v694_v41 = vsel %vm6059_vm7, %v509_v32, %v693_v24  ;;  %v293_v43 = vshll.u32 %v239_v12, 16  ;;  %2904 = vmatpush.bf16.msrb.mxu0 %v5834_v17  ;;  %1528 = vmatpush.bf16.msrb.mxu1 %v5785_v18  ;;  %v257_v55 = vld [vmem:[%s6033_s23 + $0x50] sm:$0xf] }
  0x78   : > { %v928_v46 = vor.u32 %v927_v34, %v924_v33  ;;  %695 = vst [vmem:[#allocation2 + $0xb0] sm:$0x1] %v694_v41  ;;  %v296_v19 = vrot.slane %v6403_v63, 4  ;;  %v298_v48 = vshrl.u32 %v6399_v28, 16  ;;  %v301_v47 = vshll.u32 %v6399_v28, 16 }
  0x79   : > { %v939_v51 = vrot.slane %v938_v40, 4  ;;  %v730_v37 = vld [vmem:[#allocation2 + $0x78] sm:$0xf]  ;;  %v295_v52 = vor.u32 %v293_v43, %v6403_v63  ;;  %v375_v57 = vshrl.u32 %v6406_v50, 16 }
  0x7a   : > { %v929_v59 = vrot.slane %v928_v46, 4  ;;  %v731_v0 = vld [vmem:[#allocation2 + $0x7c] sm:$0xf]  ;;  %v1018_v2 = vshrl.u32 %v730_v37, 16  ;;  %v1021_v6 = vshll.u32 %v730_v37, 16  ;;  %v300_v7 = vrot.slane %v298_v48, 7 }
  0x7b   : > { %v944_v8 = vsel %vm6097_vm10, %v939_v51, %v943_v58  ;;  %v768_v12 = vld [vmem:[#allocation2 + $0x80] sm:$0x1]  ;;  %v1027_v60 = vshll.u32 %v731_v0, 16  ;;  %v1031_v13 = vshrl.u32 %v731_v0, 16  ;;  %v606_v16 = vsel %vm6052_vm6, %v295_v52, %v605_v39 }
  0x7c   : > { %v934_v20 = vsel %vm6097_vm10, %v929_v59, %v933_v11  ;;  %v1191_v35 = vunpack.c.l.b16 %v944_v8  ;;  %v1020_v38 = vrot.slane %v1018_v2, 4  ;;  %v1023_v61 = vrot.slane %v1021_v6, 5  ;;  %v738_v21 = vld [vmem:[#allocation2 + $0xa8] sm:$0xf]  ;;  %607 = vst [vmem:[#allocation2 + $0x18] sm:$0xf] %v606_v16 }
  0x7d   : > { %v1190_v22 = vunpack.c.l.b16 %v934_v20  ;;  %v1029_v4 = vrot.slane %v1027_v60, 5  ;;  %v1033_v23 = vrot.slane %v1031_v13, 4  ;;  %v1037_v24 = vshll.u32 %v768_v12, 16  ;;  %v609_v39 = vld [vmem:[#allocation2 + $0x20] sm:$0x1] }
  0x7e   : > { %v1024_v25 = vor.u32 %v1023_v61, %v1020_v38  ;;  %v739_v1 = vld [vmem:[#allocation2 + $0xac] sm:$0xf]  ;;  %v1114_v26 = vshrl.u32 %v738_v21, 16  ;;  %v1117_v5 = vshll.u32 %v738_v21, 16  ;;  %v303_v27 = vor.u32 %v301_v47, %v300_v7  ;;  %v250_v47 = vld [vmem:[%s6033_s23 + $0x34] sm:$0xf] }
  0x7f   : > { %v1216_v28 = vpack.c.b16 %v1191_v35, %v1190_v22  ;;  %v1034_v29 = vor.u32 %v1033_v23, %v1029_v4  ;;  %v1039_v30 = vrot.slane %v1037_v24, 5  ;;  %v772_v31 = vld [vmem:[#allocation2 + $0xb0] sm:$0x1]  ;;  %v1123_v9 = vshll.u32 %v739_v1, 16  ;;  %v640_v12 = vld [vmem:[#allocation2 + $0x54] sm:$0xf] }
  0x80   : > { %v1025_v11 = vrot.slane %v1024_v25, 4  ;;  %v1116_v53 = vrot.slane %v1114_v26, 4  ;;  %v1119_v62 = vrot.slane %v1117_v5, 5  ;;  %v1127_v32 = vshrl.u32 %v739_v1, 16  ;;  %v644_v23 = vld [vmem:[#allocation2 + $0x5c] sm:$0x1] }
  0x81   : > { %1328 = vmatmul.bf16.gmra.mxu1 %v1216_v28  ;;  %v1035_v33 = vrot.slane %v1034_v29, 4  ;;  %v1125_v34 = vrot.slane %v1123_v9, 5  ;;  %v1133_v36 = vshll.u32 %v772_v31, 16  ;;  %v304_v63 = vsel %vm6042_vm5, %v296_v19, %v303_v27  ;;  %v265_v25 = vld [vmem:[%s6033_s23 + $0x70] sm:$0xf] }
  0x82   : > { %v1030_v40 = vsel %vm6097_vm10, %v1025_v11, %v1029_v4  ;;  %v1120_v58 = vor.u32 %v1119_v62, %v1116_v53  ;;  %v1129_v41 = vrot.slane %v1127_v32, 4  ;;  %v305_v43 = vrot.slane %v300_v7, 4  ;;  %608 = vst [vmem:[#allocation2 + $0x1c] sm:$0xf] %v304_v63  ;;  %v668_v9 = vld [vmem:[#allocation2 + $0x84] sm:$0xf] }
  0x83   : > { %v1040_v44 = vsel %vm6097_vm10, %v1035_v33, %v1039_v30  ;;  %v1198_v45 = vunpack.c.l.b16 %v1030_v40  ;;  %v1135_v46 = vrot.slane %v1133_v36, 5  ;;  %v714_v48 = vld [vmem:[#allocation2 + $0x18] sm:$0xf]  ;;  %v377_v49 = vrot.slane %v375_v57, 7  ;;  %v266_v36 = vld [vmem:[%s6033_s23 + $0x74] sm:$0xf] }
  0x84   : > { %v1199_v51 = vunpack.c.l.b16 %v1040_v44  ;;  %v1121_v37 = vrot.slane %v1120_v58, 4  ;;  %v1130_v19 = vor.u32 %v1129_v41, %v1125_v34  ;;  %v610_v52 = vsel %vm6059_vm7, %v305_v43, %v609_v39  ;;  %v5800_v41 = vld [vmem:[%s7415_s1 + $0x88] sm:$0xff] }
  0x85   : > { %611 = vst [vmem:[#allocation2 + $0x20] sm:$0x1] %v610_v52  ;;  %v826_v56 = vshrl.u32 %v714_v48, 16  ;;  %v829_v59 = vshll.u32 %v714_v48, 16  ;;  %v378_v0 = vshll.u32 %v6406_v50, 16  ;;  %v381_v2 = vrot.slane %v377_v49, 4  ;;  %1910 = vmatpush.bf16.msrb.mxu2 %v5800_v41 }
  0x86   : > { %v1220_v6 = vpack.c.b16 %v1199_v51, %v1198_v45  ;;  %v1126_v7 = vsel %vm6097_vm10, %v1121_v37, %v1125_v34  ;;  %v1131_v8 = vrot.slane %v1130_v19, 4  ;;  %v383_v57 = vshrl.u32 %v250_v47, 16  ;;  %v258_v50 = vld [vmem:[%s6033_s23 + $0x54] sm:$0xf]  ;;  %v672_v34 = vld [vmem:[#allocation2 + $0x8c] sm:$0x1] }
  0x87   : > { %v1206_v60 = vunpack.c.l.b16 %v1126_v7  ;;  %v828_v13 = vrot.slane %v826_v56, 4  ;;  %v831_v16 = vrot.slane %v829_v59, 5  ;;  %v380_v17 = vor.u32 %v378_v0, %v377_v49  ;;  %v241_v48 = vld [vmem:[%s6033_s23 + $0x10] sm:$0xf] }
  0x88   : > { %1348 = vmatmul.bf16.gmra.mxu2 %v1220_v6  ;;  %v1136_v18 = vsel %vm6097_vm10, %v1131_v8, %v1135_v46  ;;  %v385_v20 = vrot.slane %v383_v57, 7  ;;  %v386_v35 = vshll.u32 %v250_v47, 16  ;;  %v443_v38 = vshrl.u32 %v257_v55, 16 }
  0x89   : > { %v1207_v61 = vunpack.c.l.b16 %v1136_v18  ;;  %v6458_v21 = vld [vmem:[#allocation2 + $0x1c] sm:$0xf]  ;;  %v832_v22 = vor.u32 %v831_v16, %v828_v13  ;;  %v641_v4 = vsel %vm6052_vm6, %v380_v17, %v640_v12  ;;  %v446_v24 = vshll.u32 %v257_v55, 16 }
  0x8a   : > { %v835_v1 = vshll.u32 %v6458_v21, 16  ;;  %v839_v26 = vshrl.u32 %v6458_v21, 16  ;;  %v388_v5 = vor.u32 %v386_v35, %v385_v20  ;;  %v390_v27 = vrot.slane %v385_v20, 4  ;;  %642 = vst [vmem:[#allocation2 + $0x54] sm:$0xf] %v641_v4 }
  0x8b   : > { %v1224_v28 = vpack.c.b16 %v1207_v61, %v1206_v60  ;;  %v833_v29 = vrot.slane %v832_v22, 4  ;;  %v445_v30 = vrot.slane %v443_v38, 7  ;;  %v451_v31 = vshrl.u32 %v258_v50, 16  ;;  %v696_v20 = vld [vmem:[#allocation2 + $0xb4] sm:$0xf] }
  0x8c   : > { %v6465_v11 = vld [vmem:[#allocation2 + $0x20] sm:$0x1]  ;;  %v837_v53 = vrot.slane %v835_v1, 5  ;;  %v841_v62 = vrot.slane %v839_v26, 4  ;;  %v389_v32 = vsel %vm6042_vm5, %v381_v2, %v388_v5  ;;  %v645_v33 = vsel %vm6059_vm7, %v390_v27, %v644_v23 }
  0x8d   : > { %1368 = vmatmul.bf16.gmra.mxu3 %v1224_v28  ;;  %v845_v63 = vshll.u32 %v6465_v11, 16  ;;  %643 = vst [vmem:[#allocation2 + $0x58] sm:$0xf] %v389_v32  ;;  %v448_v39 = vor.u32 %v446_v24, %v445_v30  ;;  %v449_v40 = vrot.slane %v445_v30, 4  ;;  %v453_v58 = vrot.slane %v451_v31, 7 }
  0x8e   : > { %v838_v43 = vsel %vm6097_vm10, %v833_v29, %v837_v53  ;;  %v842_v44 = vor.u32 %v841_v62, %v837_v53  ;;  %646 = vst [vmem:[#allocation2 + $0x5c] sm:$0x1] %v645_v33  ;;  %v454_v45 = vshll.u32 %v258_v50, 16  ;;  %v511_v46 = vshrl.u32 %v265_v25, 16  ;;  %v700_v29 = vld [vmem:[#allocation2 + $0xbc] sm:$0x1] }
  0x8f   : > { %v847_v47 = vrot.slane %v845_v63, 5  ;;  %v1182_v49 = vunpack.c.l.b16 %v838_v43  ;;  %v458_v51 = vrot.slane %v453_v58, 4  ;;  %v669_v37 = vsel %vm6052_vm6, %v448_v39, %v668_v9  ;;  %v242_v30 = vld [vmem:[%s6033_s23 + $0x14] sm:$0xf]  ;;  %v612_v39 = vld [vmem:[#allocation2 + $0x24] sm:$0xf] }
  0x90   : > { %v843_v19 = vrot.slane %v842_v44, 4  ;;  %v456_v52 = vor.u32 %v454_v45, %v453_v58  ;;  %670 = vst [vmem:[#allocation2 + $0x84] sm:$0xf] %v669_v37  ;;  %v513_v55 = vrot.slane %v511_v46, 7  ;;  %v514_v56 = vshll.u32 %v265_v25, 16  ;;  %v5824_v45 = vld [vmem:[%s7415_s1 + $0xc8] sm:$0xff] }
  0x91   : > { %v724_v59 = vld [vmem:[#allocation2 + $0x54] sm:$0xf]  ;;  %v673_v0 = vsel %vm6059_vm7, %v458_v51, %v672_v34  ;;  %v519_v2 = vshrl.u32 %v266_v36, 16  ;;  %v522_v6 = vshll.u32 %v266_v36, 16  ;;  %v307_v7 = vshrl.u32 %v241_v48, 16  ;;  %2224 = vmatpush.bf16.msrb.mxu3 %v5824_v45 }
  0x92   : > { %v848_v8 = vsel %vm6097_vm10, %v843_v19, %v847_v47  ;;  %v946_v57 = vshrl.u32 %v724_v59, 16  ;;  %v949_v12 = vshll.u32 %v724_v59, 16  ;;  %v457_v60 = vsel %vm6042_vm5, %v449_v40, %v456_v52  ;;  %674 = vst [vmem:[#allocation2 + $0x8c] sm:$0x1] %v673_v0  ;;  %v5833_v46 = vld [vmem:[%s7415_s1 + $0x110] sm:$0xff]  ;;  %v5784_v19 = vld [vmem:[%s7415_s1 + $0x8] sm:$0xff] }
  0x93   : > { %v1183_v13 = vunpack.c.l.b16 %v848_v8  ;;  %671 = vst [vmem:[#allocation2 + $0x88] sm:$0xf] %v457_v60  ;;  %v516_v16 = vor.u32 %v514_v56, %v513_v55  ;;  %v517_v17 = vrot.slane %v513_v55, 4  ;;  %v521_v18 = vrot.slane %v519_v2, 7  ;;  %2905 = vmatpush.bf16.msrb.mxu0 %v5833_v46  ;;  %v5799_v59 = vld [vmem:[%s7415_s1 + $0x80] sm:$0xff]  ;;  %1529 = vmatpush.bf16.msrb.mxu1 %v5784_v19 }
  0x94   : > { %v6487_v35 = vld [vmem:[#allocation2 + $0x58] sm:$0xf]  ;;  %v948_v50 = vrot.slane %v946_v57, 4  ;;  %v951_v38 = vrot.slane %v949_v12, 5  ;;  %v6489_v61 = vrot.slane %v307_v7, 7  ;;  %v310_v22 = vshll.u32 %v241_v48, 16  ;;  %1911 = vmatpush.bf16.msrb.mxu2 %v5799_v59 }
  0x95   : > { %v1212_v4 = vpack.c.b16 %v1183_v13, %v1182_v49  ;;  %v6491_v23 = vld [vmem:[#allocation2 + $0x5c] sm:$0x1]  ;;  %v955_v24 = vshll.u32 %v6487_v35, 16  ;;  %v959_v25 = vshrl.u32 %v6487_v35, 16  ;;  %v524_v1 = vor.u32 %v522_v6, %v521_v18  ;;  %v5823_v8 = vld [vmem:[%s7415_s1 + $0xc0] sm:$0xff]  ;;  %v5832_v57 = vld [vmem:[%s7415_s1 + $0x108] sm:$0xff] }
  0x96   : > { %v952_v26 = vor.u32 %v951_v38, %v948_v50  ;;  %v965_v5 = vshll.u32 %v6491_v23, 16  ;;  %v526_v27 = vrot.slane %v521_v18, 4  ;;  %v697_v28 = vsel %vm6052_vm6, %v516_v16, %v696_v20  ;;  %v5783_v12 = vld [vmem:[%s7415_s1] sm:$0xff]  ;;  %v616_v18 = vld [vmem:[#allocation2 + $0x2c] sm:$0x1]  ;;  %2225 = vmatpush.bf16.msrb.mxu3 %v5823_v8  ;;  %v5878_v8 = vld [vmem:[%s7415_s1 + $0x1f8] sm:$0xff] }
  0x97   : > { %1308 = vmatmul.bf16.gmra.mxu0 %v1212_v4  ;;  %v957_v31 = vrot.slane %v955_v24, 5  ;;  %v961_v9 = vrot.slane %v959_v25, 4  ;;  %v732_v53 = vld [vmem:[#allocation2 + $0x84] sm:$0xf]  ;;  %v525_v62 = vsel %vm6042_vm5, %v517_v17, %v524_v1  ;;  %698 = vst [vmem:[#allocation2 + $0xb4] sm:$0xf] %v697_v28  ;;  %v312_v32 = vor.u32 %v310_v22, %v6489_v61  ;;  %1530 = vmatpush.bf16.msrb.mxu1 %v5783_v12 }
  0x98   : > { %v953_v33 = vrot.slane %v952_v26, 4  ;;  %v967_v34 = vrot.slane %v965_v5, 5  ;;  %v1042_v36 = vshrl.u32 %v732_v53, 16  ;;  %v1045_v63 = vshll.u32 %v732_v53, 16  ;;  %699 = vst [vmem:[#allocation2 + $0xb8] sm:$0xf] %v525_v62  ;;  %2906 = vmatpush.bf16.msrb.mxu0 %v5832_v57 }
  0x99   : > { %v962_v40 = vor.u32 %v961_v9, %v957_v31  ;;  %v769_v58 = vld [vmem:[#allocation2 + $0x8c] sm:$0x1]  ;;  %v701_v41 = vsel %vm6059_vm7, %v526_v27, %v700_v29  ;;  %v313_v43 = vrot.slane %v6489_v61, 4  ;;  %v315_v44 = vshrl.u32 %v242_v30, 16  ;;  %v5831_v5 = vld [vmem:[%s7415_s1 + $0x100] sm:$0xff]  ;;  %v5846_v57 = vld [vmem:[%s7415_s1 + $0x178] sm:$0xff] }
  0x9a   : > { %v958_v48 = vsel %vm6097_vm10, %v953_v33, %v957_v31  ;;  %v733_v47 = vld [vmem:[#allocation2 + $0x88] sm:$0xf]  ;;  %v1044_v49 = vrot.slane %v1042_v36, 4  ;;  %v1047_v51 = vrot.slane %v1045_v63, 5  ;;  %v1061_v37 = vshll.u32 %v769_v58, 16  ;;  %v5870_v31 = vld [vmem:[%s7415_s1 + $0x1b8] sm:$0xff]  ;;  %4323 = vmatpush.bf16.msra.mxu3 %v5878_v8 }
  0x9b   : > { %v963_v52 = vrot.slane %v962_v40, 4  ;;  %v1051_v55 = vshll.u32 %v733_v47, 16  ;;  %v1055_v56 = vshrl.u32 %v733_v47, 16  ;;  %702 = vst [vmem:[#allocation2 + $0xbc] sm:$0x1] %v701_v41  ;;  %v1192_v0 = vunpack.c.l.b16 %v958_v48  ;;  %3641 = vmatpush.bf16.msra.mxu2 %v5870_v31  ;;  %v5886_v12 = vld [vmem:[%s7415_s1 + $0x238] sm:$0xff]  ;;  %3326 = vmatpush.bf16.msra.mxu1 %v5846_v57 }
  0x9c   : > { %v1048_v2 = vor.u32 %v1047_v51, %v1044_v49  ;;  %v317_v6 = vrot.slane %v315_v44, 7  ;;  %v318_v7 = vshll.u32 %v242_v30, 16  ;;  %v613_v17 = vsel %vm6052_vm6, %v312_v32, %v612_v39  ;;  %2907 = vmatpush.bf16.msrb.mxu0 %v5831_v5  ;;  %v5921_v49 = vld [vmem:[#allocation2 + $0x4] sm:$0xf]  ;;  %v2339_v59 = vld [vmem:[#allocation2 + $0xc] sm:$0xf] }
  0x9d   : > { %v968_v60 = vsel %vm6097_vm10, %v963_v52, %v967_v34  ;;  %v1053_v13 = vrot.slane %v1051_v55, 5  ;;  %v1057_v16 = vrot.slane %v1055_v56, 4  ;;  %614 = vst [vmem:[#allocation2 + $0x24] sm:$0xf] %v613_v17  ;;  %v1063_v24 = vrot.slane %v1061_v37, 5 }
  0x9e   : > { %v1193_v20 = vunpack.c.l.b16 %v968_v60  ;;  %v1049_v50 = vrot.slane %v1048_v2, 4  ;;  %v740_v38 = vld [vmem:[#allocation2 + $0xb4] sm:$0xf]  ;;  %v320_v61 = vor.u32 %v318_v7, %v317_v6  ;;  %v322_v22 = vrot.slane %v317_v6, 4  ;;  %v1612_v55 = vld [vmem:[#allocation2] sm:$0xe] }
  0x9f   : > { %v1058_v4 = vor.u32 %v1057_v16, %v1053_v13  ;;  %v741_v25 = vld [vmem:[#allocation2 + $0xb8] sm:$0xf]  ;;  %v1138_v1 = vshrl.u32 %v740_v38, 16  ;;  %v1141_v26 = vshll.u32 %v740_v38, 16  ;;  %v1665_v51 = vrot.slane %v5921_v49, 5 }
  0xa0   : > { %v1217_v27 = vpack.c.b16 %v1193_v20, %v1192_v0  ;;  %v1054_v28 = vsel %vm6097_vm10, %v1049_v50, %v1053_v13  ;;  %v1147_v29 = vshll.u32 %v741_v25, 16  ;;  %v1151_v30 = vshrl.u32 %v741_v25, 16  ;;  %v5922_v17 = vld [vmem:[#allocation2 + $0x8] sm:$0x1]  ;;  %v2340_v20 = vld [vmem:[#allocation2 + $0x10] sm:$0xf]  ;;  %4749 = vmatpush.bf16.msra.mxu0 %v5886_v12 }
  0xa1   : > { %v1059_v9 = vrot.slane %v1058_v4, 4  ;;  %v1200_v53 = vunpack.c.l.b16 %v1054_v28  ;;  %v1140_v62 = vrot.slane %v1138_v1, 4  ;;  %v1143_v32 = vrot.slane %v1141_v26, 5  ;;  %v5807_v12 = vld [vmem:[#allocation2 + $0xc] sm:$0xff] }
  0xa2   : > { %1333 = vmatmul.bf16.gmra.mxu1 %v1217_v27  ;;  %v773_v33 = vld [vmem:[#allocation2 + $0xbc] sm:$0x1]  ;;  %v1149_v34 = vrot.slane %v1147_v29, 5  ;;  %v1153_v36 = vrot.slane %v1151_v30, 4  ;;  %v321_v63 = vsel %vm6042_vm5, %v313_v43, %v320_v61  ;;  %v617_v39 = vsel %vm6059_vm7, %v322_v22, %v616_v18 }
  0xa3   : > { %v1064_v40 = vsel %vm6097_vm10, %v1059_v9, %v1063_v24  ;;  %v1144_v58 = vor.u32 %v1143_v32, %v1140_v62  ;;  %v1157_v41 = vshll.u32 %v773_v33, 16  ;;  %615 = vst [vmem:[#allocation2 + $0x28] sm:$0xf] %v321_v63  ;;  %v5251_v13 = vrot.slane %v1612_v55, 9  ;;  %v5767_v62 = vld [vmem:[#allocation2] sm:$0xff] }
  0xa4   : > { %v1201_v44 = vunpack.c.l.b16 %v1064_v40  ;;  %v1154_v45 = vor.u32 %v1153_v36, %v1149_v34  ;;  %618 = vst [vmem:[#allocation2 + $0x2c] sm:$0x1] %v617_v39  ;;  %v716_v47 = vld [vmem:[#allocation2 + $0x24] sm:$0xf]  ;;  %v1667_v16 = vrot.slane %v1665_v51, 4  ;;  %v1668_v18 = vrot.slane %v5922_v17, 5 }
  0xa5   : > { %v1145_v46 = vrot.slane %v1144_v58, 4  ;;  %v1159_v48 = vrot.slane %v1157_v41, 5  ;;  %v850_v19 = vshrl.u32 %v716_v47, 16  ;;  %v853_v52 = vshll.u32 %v716_v47, 16  ;;  %v2341_v58 = vld [vmem:[#allocation2 + $0x14] sm:$0x1] }
  0xa6   : > { %v1221_v43 = vpack.c.b16 %v1201_v44, %v1200_v53  ;;  %v1155_v37 = vrot.slane %v1154_v45, 4  ;;  %v2388_v22 = vshrl.u32 %v2339_v59, 16  ;;  %v2391_v26 = vshll.u32 %v2339_v59, 16  ;;  %v2343_v17 = vld [vmem:[#allocation2 + $0x1c] sm:$0xf] }
  0xa7   : > { %v1150_v56 = vsel %vm6097_vm10, %v1145_v46, %v1149_v34  ;;  %v852_v6 = vrot.slane %v850_v19, 4  ;;  %v855_v7 = vrot.slane %v853_v52, 5  ;;  %v2397_v28 = vshll.u32 %v2340_v20, 16  ;;  %v1613_v19 = vld [vmem:[#allocation2 + $0xc] sm:$0xe] }
  0xa8   : > { %1353 = vmatmul.bf16.gmra.mxu2 %v1221_v43  ;;  %v1160_v0 = vsel %vm6097_vm10, %v1155_v37, %v1159_v48  ;;  %v1208_v2 = vunpack.c.l.b16 %v1150_v56  ;;  %v2401_v29 = vshrl.u32 %v2340_v20, 16  ;;  %v1666_v9 = vsel %vm6563_vm13, %v5251_v13, %v1665_v51 }
  0xa9   : > { %v1209_v60 = vunpack.c.l.b16 %v1160_v0  ;;  %v856_v38 = vor.u32 %v855_v7, %v852_v6  ;;  %v1669_v53 = vsel %vm6563_vm13, %v1667_v16, %v1668_v18  ;;  %v2390_v32 = vrot.slane %v2388_v22, 4  ;;  %v2342_v0 = vld [vmem:[#allocation2 + $0x18] sm:$0xf] }
  0xaa   : > { %v6559_v50 = vld [vmem:[#allocation2 + $0x28] sm:$0xf]  ;;  %v2393_v63 = vrot.slane %v2391_v26, 5  ;;  %v1792_v39 = vunpack.c.l.b16 %v1666_v9  ;;  %v1793_v40 = vunpack.c.l.b16 %v1669_v53  ;;  %v2399_v41 = vrot.slane %v2397_v28, 5  ;;  %v1614_v7 = vld [vmem:[#allocation2 + $0x18] sm:$0xe] }
  0xab   : > { %v1225_v4 = vpack.c.b16 %v1209_v60, %v1208_v2  ;;  %v6567_v24 = vld [vmem:[#allocation2 + $0x2c] sm:$0x1]  ;;  %v859_v25 = vshll.u32 %v6559_v50, 16  ;;  %v863_v1 = vshrl.u32 %v6559_v50, 16  ;;  %v857_v5 = vrot.slane %v856_v38, 4 }
  0xac   : > { %v869_v27 = vshll.u32 %v6567_v24, 16  ;;  %v2403_v44 = vrot.slane %v2401_v29, 4  ;;  %v2394_v47 = vor.u32 %v2393_v63, %v2390_v32  ;;  %v2407_v49 = vshll.u32 %v2341_v58, 16  ;;  %v5768_v28 = vld [vmem:[#allocation2 + $0xc] sm:$0xff] }
  0xad   : > { %1373 = vmatmul.bf16.gmra.mxu3 %v1225_v4  ;;  %v861_v30 = vrot.slane %v859_v25, 5  ;;  %v865_v31 = vrot.slane %v863_v1, 4  ;;  %v1824_v43 = vpack.c.b16 %v1793_v40, %v1792_v39  ;;  %v1672_v52 = vrot.slane %v6354_v3, 5 }
  0xae   : > { %v871_v36 = vrot.slane %v869_v27, 5  ;;  %v2404_v37 = vor.u32 %v2403_v44, %v2399_v41  ;;  %v2395_v56 = vrot.slane %v2394_v47, 4  ;;  %v2409_v59 = vrot.slane %v2407_v49, 5  ;;  %v5869_v27 = vld [vmem:[%s7415_s1 + $0x1b0] sm:$0xff]  ;;  %v2345_v44 = vld [vmem:[#allocation2 + $0x24] sm:$0xf] }
  0xaf   : > { %v862_v33 = vsel %vm6097_vm10, %v857_v5, %v861_v30  ;;  %v866_v34 = vor.u32 %v865_v31, %v861_v30  ;;  %v5252_v6 = vrot.slane %v1613_v19, 9  ;;  %v1679_v8 = vrot.slane %v6458_v21, 5  ;;  %3642 = vmatpush.bf16.msra.mxu2 %v5869_v27  ;;  %v5885_v47 = vld [vmem:[%s7415_s1 + $0x230] sm:$0xff]  ;;  %v5808_v49 = vld [vmem:[#allocation2 + $0x18] sm:$0xff] }
  0xb0   : > { %v1184_v46 = vunpack.c.l.b16 %v862_v33  ;;  %v2405_v2 = vrot.slane %v2404_v37, 4  ;;  %v1682_v57 = vrot.slane %v6465_v11, 5  ;;  %v1674_v60 = vrot.slane %v1672_v52, 4  ;;  %4750 = vmatpush.bf16.msra.mxu0 %v5885_v47 }
  0xb1   : > { %v867_v45 = vrot.slane %v866_v34, 4  ;;  %v1675_v13 = vrot.slane %v6358_v54, 5  ;;  %v5253_v16 = vrot.slane %v1614_v7, 9  ;;  %v1681_v3 = vrot.slane %v1679_v8, 4 }
  0xb2   : > { %1531 = vmatmul.bf16.vlgmr.msrb.gmra.mxu1 %v5767_v62  ;;  %v2400_v18 = vsel %vm6097_vm10, %v2395_v56, %v2399_v41  ;;  %v2412_v20 = vshrl.u32 %v2342_v0, 16  ;;  %v2415_v38 = vshll.u32 %v2342_v0, 16  ;;  %v2410_v21 = vsel %vm6097_vm10, %v2405_v2, %v2409_v59  ;;  %v5769_v2 = vld [vmem:[#allocation2 + $0x18] sm:$0xff] }
  0xb3   : > { %v872_v48 = vsel %vm6097_vm10, %v867_v45, %v871_v36  ;;  %v1680_v22 = vsel %vm6563_vm13, %v5253_v16, %v1679_v8  ;;  %v1673_v11 = vsel %vm6563_vm13, %v5252_v6, %v1672_v52  ;;  %v1683_v54 = vsel %vm6563_vm13, %v1681_v3, %v1682_v57  ;;  %v2344_v36 = vld [vmem:[#allocation2 + $0x20] sm:$0x1]  ;;  %v2346_v45 = vld [vmem:[#allocation2 + $0x28] sm:$0xf] }
  0xb4   : > { %v1185_v51 = vunpack.c.l.b16 %v872_v48  ;;  %v1796_v4 = vunpack.c.l.b16 %v1680_v22  ;;  %v1676_v25 = vsel %vm6563_vm13, %v1674_v60, %v1675_v13  ;;  %v2421_v1 = vshll.u32 %v2343_v17, 16  ;;  %v5845_v48 = vld [vmem:[%s7415_s1 + $0x170] sm:$0xff]  ;;  %v2347_v13 = vld [vmem:[#allocation2 + $0x2c] sm:$0x1] }
  0xb5   : > { %v2425_v26 = vshrl.u32 %v2343_v17, 16  ;;  %v1797_v5 = vunpack.c.l.b16 %v1683_v54  ;;  %v2788_v30 = vunpack.c.l.b16 %v2400_v18  ;;  %v2789_v31 = vunpack.c.l.b16 %v2410_v21  ;;  %3327 = vmatpush.bf16.msra.mxu1 %v5845_v48 }
  0xb6   : > { %v1213_v55 = vpack.c.b16 %v1185_v51, %v1184_v46  ;;  %v1794_v9 = vunpack.c.l.b16 %v1673_v11  ;;  %v1795_v53 = vunpack.c.l.b16 %v1676_v25  ;;  %v2414_v62 = vrot.slane %v2412_v20, 4  ;;  %v5877_v46 = vld [vmem:[%s7415_s1 + $0x1f0] sm:$0xff] }
  0xb7   : > { %v1826_v29 = vpack.c.b16 %v1797_v5, %v1796_v4  ;;  %v2417_v32 = vrot.slane %v2415_v38, 5  ;;  %v2423_v33 = vrot.slane %v2421_v1, 5  ;;  %v2427_v34 = vrot.slane %v2425_v26, 4  ;;  %4324 = vmatpush.bf16.msra.mxu3 %v5877_v46  ;;  %v1615_v38 = vld [vmem:[#allocation2 + $0x24] sm:$0xe] }
  0xb8   : > { %1313 = vmatmul.bf16.gmra.mxu0 %v1213_v55  ;;  %1912 = vmatmul.bf16.vlgmr.msrb.gmra.mxu2 %v1824_v43  ;;  %v2820_v63 = vpack.c.b16 %v2789_v31, %v2788_v30  ;;  %v1825_v39 = vpack.c.b16 %v1795_v53, %v1794_v9  ;;  %v2431_v41 = vshll.u32 %v2344_v36, 16  ;;  %v2436_v19 = vshrl.u32 %v2345_v44, 16  ;;  %v2348_v1 = vld [vmem:[#allocation2 + $0x30] sm:$0xf]  ;;  %v5809_v26 = vld [vmem:[#allocation2 + $0x24] sm:$0xff] }
  0xb9   : > { %v2418_v40 = vor.u32 %v2417_v32, %v2414_v62  ;;  %v2428_v58 = vor.u32 %v2427_v34, %v2423_v33  ;;  %v2439_v52 = vshll.u32 %v2345_v44, 16  ;;  %v2445_v55 = vshll.u32 %v2346_v45, 16  ;;  %v2349_v5 = vld [vmem:[#allocation2 + $0x34] sm:$0xf]  ;;  %v5770_v62 = vld [vmem:[#allocation2 + $0x24] sm:$0xff] }
  0xba   : > { %v2433_v37 = vrot.slane %v2431_v41, 5  ;;  %v2449_v56 = vshrl.u32 %v2346_v45, 16  ;;  %v2438_v6 = vrot.slane %v2436_v19, 4  ;;  %v2455_v3 = vshll.u32 %v2347_v13, 16  ;;  %v2350_v41 = vld [vmem:[#allocation2 + $0x38] sm:$0x1]  ;;  %v6625_v45 = vpop.f32.mrf.mxu1 }
  0xbb   : > { %v2419_v51 = vrot.slane %v2418_v40, 4  ;;  %v2429_v43 = vrot.slane %v2428_v58, 4  ;;  %v2441_v7 = vrot.slane %v2439_v52, 5  ;;  %v2447_v8 = vrot.slane %v2445_v55, 5 }
  0xbc   : > { %v2451_v57 = vrot.slane %v2449_v56, 4  ;;  %v1686_v20 = vrot.slane %v6559_v50, 5  ;;  %v2457_v11 = vrot.slane %v2455_v3, 5  ;;  %v5254_v54 = vrot.slane %v1615_v38, 9  ;;  %v5876_v56 = vld [vmem:[%s7415_s1 + $0x1e8] sm:$0xff] }
  0xbd   : > { %2226 = vmatmul.bf16.vlgmr.msrb.gmra.mxu3 %v5807_v12  ;;  %v2424_v59 = vsel %vm6097_vm10, %v2419_v51, %v2423_v33  ;;  %v2434_v0 = vsel %vm6097_vm10, %v2429_v43, %v2433_v37  ;;  %v2442_v16 = vor.u32 %v2441_v7, %v2438_v6  ;;  %v1689_v25 = vrot.slane %v6567_v24, 5  ;;  %v5868_v24 = vld [vmem:[%s7415_s1 + $0x1a8] sm:$0xff]  ;;  %v5923_v51 = vld [vmem:[#allocation2 + $0x34] sm:$0xf]  ;;  %v1616_v37 = vld [vmem:[#allocation2 + $0x30] sm:$0xe] }
  0xbe   : > { %v2790_v12 = vunpack.c.l.b16 %v2424_v59  ;;  %v2791_v60 = vunpack.c.l.b16 %v2434_v0  ;;  %v2452_v17 = vor.u32 %v2451_v57, %v2447_v8  ;;  %v1688_v4 = vrot.slane %v1686_v20, 4  ;;  %3643 = vmatpush.bf16.msra.mxu2 %v5868_v24  ;;  %v5844_v59 = vld [vmem:[%s7415_s1 + $0x168] sm:$0xff]  ;;  %4325 = vmatpush.bf16.msra.mxu3 %v5876_v56 }
  0xbf   : > { %v2443_v22 = vrot.slane %v2442_v16, 4  ;;  %v2460_v50 = vshrl.u32 %v2348_v1, 16  ;;  %v2463_v30 = vshll.u32 %v2348_v1, 16  ;;  %v1687_v31 = vsel %vm6563_vm13, %v5254_v54, %v1686_v20  ;;  %v5884_v0 = vld [vmem:[%s7415_s1 + $0x228] sm:$0xff]  ;;  %3328 = vmatpush.bf16.msra.mxu1 %v5844_v59 }
  0xc0   : > { %v2821_v18 = vpack.c.b16 %v2791_v60, %v2790_v12  ;;  %v2453_v21 = vrot.slane %v2452_v17, 4  ;;  %v2469_v9 = vshll.u32 %v2349_v5, 16  ;;  %v2473_v53 = vshrl.u32 %v2349_v5, 16  ;;  %v2351_v12 = vld [vmem:[#allocation2 + $0x3c] sm:$0xf]  ;;  %4751 = vmatpush.bf16.msra.mxu0 %v5884_v0 }
  0xc1   : > { %v2448_v27 = vsel %vm6097_vm10, %v2443_v22, %v2447_v8  ;;  %v1798_v34 = vunpack.c.l.b16 %v1687_v31  ;;  %v1693_v43 = vrot.slane %v5923_v51, 5  ;;  %v5255_v6 = vrot.slane %v1616_v37, 9  ;;  %v5924_v8 = vld [vmem:[#allocation2 + $0x38] sm:$0x1]  ;;  %v2352_v60 = vld [vmem:[#allocation2 + $0x40] sm:$0xf] }
  0xc2   : > { %1536 = vmatmul.bf16.gmra.mxu1 %v5768_v28  ;;  %v2458_v28 = vsel %vm6097_vm10, %v2453_v21, %v2457_v11  ;;  %v2792_v32 = vunpack.c.l.b16 %v2448_v27  ;;  %v2471_v40 = vrot.slane %v2469_v9, 5  ;;  %v2475_v58 = vrot.slane %v2473_v53, 4  ;;  %v6644_v21 = vpop.f32.mrf.mxu1  ;;  %v5771_v11 = vld [vmem:[#allocation2 + $0x30] sm:$0xff]  ;;  %v5926_v51 = vld [vmem:[#allocation2 + $0x44] sm:$0x1] }
  0xc3   : > { %v2793_v33 = vunpack.c.l.b16 %v2458_v28  ;;  %v1695_v7 = vrot.slane %v1693_v43, 4  ;;  %v1696_v57 = vrot.slane %v5924_v8, 5  ;;  %v2484_v17 = vshrl.u32 %v2351_v12, 16  ;;  %v2353_v28 = vld [vmem:[#allocation2 + $0x44] sm:$0x1]  ;;  %v5772_v8 = vld [vmem:[#allocation2 + $0x3c] sm:$0xff] }
  0xc4   : > { %v2476_v47 = vor.u32 %v2475_v58, %v2471_v40  ;;  %v2487_v3 = vshll.u32 %v2351_v12, 16  ;;  %v2493_v38 = vshll.u32 %v2352_v60, 16  ;;  %v2497_v22 = vshrl.u32 %v2352_v60, 16  ;;  %v2355_v58 = vld [vmem:[#allocation2 + $0x4c] sm:$0xf] }
  0xc5   : > { %v2822_v44 = vpack.c.b16 %v2793_v33, %v2792_v32  ;;  %v1697_v20 = vsel %vm6563_vm13, %v1695_v7, %v1696_v57  ;;  %v2486_v5 = vrot.slane %v2484_v17, 4  ;;  %v2503_v53 = vshll.u32 %v2353_v28, 16  ;;  %v5925_v32 = vld [vmem:[#allocation2 + $0x40] sm:$0xf]  ;;  %v5927_v28 = vld [vmem:[#allocation2 + $0x4c] sm:$0xf] }
  0xc6   : > { %v2477_v52 = vrot.slane %v2476_v47, 4  ;;  %v2489_v27 = vrot.slane %v2487_v3, 5  ;;  %v1700_v33 = vrot.slane %v5925_v32, 5 }
  0xc8   : > { %2908 = vmatmul.bf16.vlgmr.msrb.gmra.mxu0 %v2820_v63  ;;  %1917 = vmatmul.bf16.gmra.mxu2 %v1825_v39  ;;  %v2462_v63 = vrot.slane %v2460_v50, 4  ;;  %v2465_v39 = vrot.slane %v2463_v30, 5  ;;  %v2495_v50 = vrot.slane %v2493_v38, 5  ;;  %v2499_v30 = vrot.slane %v2497_v22, 4 }
  0xc9   : > { %v2490_v9 = vor.u32 %v2489_v27, %v2486_v5  ;;  %v1618_v27 = vld [vmem:[#allocation2 + $0x48] sm:$0xe] }
  0xca   : > { %v2466_v48 = vor.u32 %v2465_v39, %v2462_v63  ;;  %v2505_v39 = vrot.slane %v2503_v53, 5  ;;  %v2357_v53 = vld [vmem:[#allocation2 + $0x54] sm:$0xf] }
  0xcb   : > { %v2491_v63 = vrot.slane %v2490_v9, 4  ;;  %v5257_v9 = vrot.slane %v1618_v27, 9  ;;  %v1619_v27 = vld [vmem:[#allocation2 + $0x54] sm:$0xe] }
  0xcc   : > { %v2467_v19 = vrot.slane %v2466_v48, 4 }
  0xcd   : > { %2231 = vmatmul.bf16.gmra.mxu3 %v5808_v49  ;;  %v2479_v49 = vshll.u32 %v2350_v41, 16  ;;  %v6652_v41 = vpop.f32.mrf.mxu0  ;;  %v2496_v56 = vsel %vm6097_vm10, %v2491_v63, %v2495_v50  ;;  %v5875_v63 = vld [vmem:[%s7415_s1 + $0x1e0] sm:$0xff] }
  0xce   : > { %v2472_v13 = vsel %vm6097_vm10, %v2467_v19, %v2471_v40  ;;  %v2354_v40 = vld [vmem:[#allocation2 + $0x48] sm:$0xf]  ;;  %4326 = vmatpush.bf16.msra.mxu3 %v5875_v63  ;;  %v2361_v63 = vld [vmem:[#allocation2 + $0x64] sm:$0xf] }
  0xcf   : > { %v2481_v55 = vrot.slane %v2479_v49, 5  ;;  %v2794_v54 = vunpack.c.l.b16 %v2472_v13  ;;  %v1702_v49 = vrot.slane %v1700_v33, 4  ;;  %v2508_v37 = vshrl.u32 %v2354_v40, 16 }
  0xd0   : > { %v2511_v19 = vshll.u32 %v2354_v40, 16  ;;  %v5883_v40 = vld [vmem:[%s7415_s1 + $0x220] sm:$0xff] }
  0xd1   : > { %v2482_v16 = vsel %vm6097_vm10, %v2477_v52, %v2481_v55  ;;  %v2517_v52 = vshll.u32 %v2355_v58, 16  ;;  %v2521_v55 = vshrl.u32 %v2355_v58, 16  ;;  %v2510_v57 = vrot.slane %v2508_v37, 4  ;;  %v5812_v58 = vld [vmem:[#allocation2 + $0x48] sm:$0xff]  ;;  %4752 = vmatpush.bf16.msra.mxu0 %v5883_v40 }
  0xd2   : > { %1541 = vmatmul.bf16.gmra.mxu1 %v5769_v2  ;;  %v5810_v2 = vld [vmem:[#allocation2 + $0x30] sm:$0xff]  ;;  %v2513_v12 = vrot.slane %v2511_v19, 5  ;;  %v2535_v19 = vshll.u32 %v2357_v53, 16 }
  0xd3   : > { %v2519_v60 = vrot.slane %v2517_v52, 5  ;;  %v2523_v13 = vrot.slane %v2521_v55, 4 }
  0xd5   : > { %v6671_v22 = vpop.f32.mrf.mxu0 }
  0xd8   : > { %2913 = vmatmul.bf16.gmra.mxu0 %v2821_v18  ;;  %1922 = vmatmul.bf16.gmra.mxu2 %v1826_v29  ;;  %v1690_v29 = vsel %vm6563_vm13, %v1688_v4, %v1689_v25  ;;  %v1694_v18 = vsel %vm6563_vm13, %v5255_v6, %v1693_v43  ;;  %v2795_v4 = vunpack.c.l.b16 %v2482_v16  ;;  %v1703_v43 = vrot.slane %v5926_v51, 5  ;;  %v5867_v6 = vld [vmem:[%s7415_s1 + $0x1a0] sm:$0xff] }
  0xd9   : > { %v1799_v36 = vunpack.c.l.b16 %v1690_v29  ;;  %v1800_v1 = vunpack.c.l.b16 %v1694_v18  ;;  %3644 = vmatpush.bf16.msra.mxu2 %v5867_v6  ;;  %v2796_v16 = vunpack.c.l.b16 %v2496_v56 }
  0xda   : > { %v2823_v31 = vpack.c.b16 %v2795_v4, %v2794_v54  ;;  %v2524_v54 = vor.u32 %v2523_v13, %v2519_v60 }
  0xdb   : > { %v1827_v46 = vpack.c.b16 %v1799_v36, %v1798_v34  ;;  %v1617_v34 = vld [vmem:[#allocation2 + $0x3c] sm:$0xe] }
  0xdc   : > { %v5256_v47 = vrot.slane %v1617_v34, 9 }
  0xdd   : > { %2236 = vmatmul.bf16.gmra.mxu3 %v5809_v26  ;;  %v1801_v26 = vunpack.c.l.b16 %v1697_v20  ;;  %v2356_v20 = vld [vmem:[#allocation2 + $0x50] sm:$0x1] }
  0xde   : > { %v6646_v25 = vpop.f32.mrf.mxu2  ;;  %v1701_v0 = vsel %vm6563_vm13, %v5256_v47, %v1700_v33  ;;  %v2527_v4 = vshll.u32 %v2356_v20, 16  ;;  %v5928_v33 = vld [vmem:[#allocation2 + $0x50] sm:$0x1] }
  0xdf   : > { %v1828_v29 = vpack.c.b16 %v1801_v26, %v1800_v1  ;;  %v1802_v3 = vunpack.c.l.b16 %v1701_v0  ;;  %v1710_v34 = vrot.slane %v5928_v33, 5  ;;  %v5773_v0 = vld [vmem:[#allocation2 + $0x48] sm:$0xff] }
  0xe1   : > { %v6648_v24 = vpop.f32.mrf.mxu3  ;;  %v6650_v36 = vpop.f32.mrf.mxu1 }
  0xe2   : > { %1546 = vmatmul.bf16.gmra.mxu1 %v5770_v62  ;;  %v2500_v62 = vor.u32 %v2499_v30, %v2495_v50  ;;  %v1707_v50 = vrot.slane %v5927_v28, 5 }
  0xe4   : > { %v1709_v32 = vrot.slane %v1707_v50, 4  ;;  %v1708_v51 = vsel %vm6563_vm13, %v5257_v9, %v1707_v50  ;;  %v2360_v9 = vld [vmem:[#allocation2 + $0x60] sm:$0xf] }
  0xe5   : > { %v2559_v40 = vshll.u32 %v2360_v9, 16 }
  0xe6   : > { %v6654_v48 = vpop.f32.mrf.mxu2  ;;  %v1711_v37 = vsel %vm6563_vm13, %v1709_v32, %v1710_v34  ;;  %v5258_v32 = vrot.slane %v1619_v27, 9  ;;  %v1717_v34 = vrot.slane %v6491_v23, 5 }
  0xe8   : > { %2918 = vmatmul.bf16.gmra.mxu0 %v2822_v44  ;;  %1927 = vmatmul.bf16.gmra.mxu2 %v1827_v46  ;;  %v5811_v44 = vld [vmem:[#allocation2 + $0x3c] sm:$0xff]  ;;  %v2501_v46 = vrot.slane %v2500_v62, 4 }
  0xe9   : > { %v6667_v7 = vpop.f32.mrf.mxu3  ;;  %v6669_v38 = vpop.f32.mrf.mxu1 }
  0xea   : > { %v2506_v59 = vsel %vm6097_vm10, %v2501_v46, %v2505_v39  ;;  %v5843_v39 = vld [vmem:[%s7415_s1 + $0x160] sm:$0xff] }
  0xeb   : > { %v2797_v17 = vunpack.c.l.b16 %v2506_v59  ;;  %3329 = vmatpush.bf16.msra.mxu1 %v5843_v39  ;;  %v2556_v39 = vshrl.u32 %v2360_v9, 16 }
  0xed   : > { %2241 = vmatmul.bf16.gmra.mxu3 %v5810_v2  ;;  %v1704_v2 = vsel %vm6563_vm13, %v1702_v49, %v1703_v43  ;;  %v2824_v26 = vpack.c.b16 %v2797_v17, %v2796_v16  ;;  %v2532_v43 = vshrl.u32 %v2357_v53, 16  ;;  %v2359_v17 = vld [vmem:[#allocation2 + $0x5c] sm:$0x1]  ;;  %v5813_v53 = vld [vmem:[#allocation2 + $0x54] sm:$0xff] }
  0xee   : > { %v1803_v18 = vunpack.c.l.b16 %v1704_v2  ;;  %v6673_v1 = vpop.f32.mrf.mxu2 }
  0xf0   : > { %v1829_v5 = vpack.c.b16 %v1803_v18, %v1802_v3  ;;  %v6696_v56 = vpop.f32.mrf.mxu0 }
  0xf1   : > { %v6675_v62 = vpop.f32.mrf.mxu3 }
  0xf2   : > { %1551 = vmatmul.bf16.gmra.mxu1 %v5771_v11  ;;  %v2514_v11 = vor.u32 %v2513_v12, %v2510_v57  ;;  %v1805_v57 = vunpack.c.l.b16 %v1711_v37  ;;  %v2534_v12 = vrot.slane %v2532_v43, 4  ;;  %v5774_v43 = vld [vmem:[#allocation2 + $0x54] sm:$0xff] }
  0xf4   : > { %v2515_v30 = vrot.slane %v2514_v11, 4 }
  0xf6   : > { %v2520_v46 = vsel %vm6097_vm10, %v2515_v30, %v2519_v60  ;;  %v6698_v59 = vpop.f32.mrf.mxu2  ;;  %v2537_v60 = vrot.slane %v2535_v19, 5 }
  0xf7   : > { %v2798_v2 = vunpack.c.l.b16 %v2520_v46  ;;  %v2565_v46 = vshll.u32 %v2361_v63, 16 }
  0xf8   : > { %2923 = vmatmul.bf16.gmra.mxu0 %v2823_v31  ;;  %1932 = vmatmul.bf16.gmra.mxu2 %v1828_v29  ;;  %v2525_v31 = vrot.slane %v2524_v54, 4  ;;  %v2529_v29 = vrot.slane %v2527_v4, 5  ;;  %v2538_v11 = vor.u32 %v2537_v60, %v2534_v12  ;;  %v2551_v4 = vshll.u32 %v2359_v17, 16  ;;  %v6705_v28 = vpop.f32.mrf.mxu0 }
  0xf9   : > { %v6700_v3 = vpop.f32.mrf.mxu3 }
  0xfa   : > { %v2530_v47 = vsel %vm6097_vm10, %v2525_v31, %v2529_v29  ;;  %v2539_v30 = vrot.slane %v2538_v11, 4  ;;  %v2553_v29 = vrot.slane %v2551_v4, 5 }
  0xfb   : > { %v2799_v6 = vunpack.c.l.b16 %v2530_v47  ;;  %v2569_v47 = vshrl.u32 %v2361_v63, 16  ;;  %v5814_v63 = vld [vmem:[#allocation2 + $0x60] sm:$0xff] }
  0xfd   : > { %2246 = vmatmul.bf16.gmra.mxu3 %v5811_v44  ;;  %v2358_v44 = vld [vmem:[#allocation2 + $0x58] sm:$0xf]  ;;  %v2825_v18 = vpack.c.b16 %v2799_v6, %v2798_v2 }
  0xfe   : > { %v6690_v49 = vpop.f32.mrf.mxu1  ;;  %v2541_v52 = vshll.u32 %v2358_v44, 16  ;;  %v2545_v55 = vshrl.u32 %v2358_v44, 16 }
 0x100   : > { %v2543_v13 = vrot.slane %v2541_v52, 5  ;;  %v2547_v16 = vrot.slane %v2545_v55, 4  ;;  %v2558_v55 = vrot.slane %v2556_v39, 4 }
 0x102   : > { %1556 = vmatmul.bf16.gmra.mxu1 %v5772_v8  ;;  %v1804_v8 = vunpack.c.l.b16 %v1708_v51  ;;  %v2548_v54 = vor.u32 %v2547_v16, %v2543_v13 }
 0x104   : > { %v1830_v20 = vpack.c.b16 %v1805_v57, %v1804_v8  ;;  %v2549_v31 = vrot.slane %v2548_v54, 4  ;;  %v2567_v8 = vrot.slane %v2565_v46, 5  ;;  %v2571_v57 = vrot.slane %v2569_v47, 4  ;;  %v5929_v54 = vld [vmem:[#allocation2 + $0x64] sm:$0xf] }
 0x105   : > { %v1721_v4 = vrot.slane %v5929_v54, 5  ;;  %v2364_v46 = vld [vmem:[#allocation2 + $0x70] sm:$0xf] }
 0x108   : > { %2928 = vmatmul.bf16.gmra.mxu0 %v2824_v26  ;;  %1937 = vmatmul.bf16.gmra.mxu2 %v1829_v5  ;;  %v6702_v26 = vpop.f32.mrf.mxu1  ;;  %v1714_v5 = vrot.slane %v6487_v35, 5  ;;  %v2544_v35 = vsel %vm6097_vm10, %v2539_v30, %v2543_v13  ;;  %v2362_v13 = vld [vmem:[#allocation2 + $0x68] sm:$0x1]  ;;  %v1620_v30 = vld [vmem:[#allocation2 + $0x60] sm:$0xe] }
 0x109   : > { %v2800_v37 = vunpack.c.l.b16 %v2544_v35  ;;  %v2575_v11 = vshll.u32 %v2362_v13, 16  ;;  %v5259_v39 = vrot.slane %v1620_v30, 9  ;;  %v5930_v35 = vld [vmem:[#allocation2 + $0x68] sm:$0x1]  ;;  %v5775_v13 = vld [vmem:[#allocation2 + $0x60] sm:$0xff] }
 0x10a   : > { %v1716_v33 = vrot.slane %v1714_v5, 4  ;;  %v1715_v51 = vsel %vm6563_vm13, %v5258_v32, %v1714_v5  ;;  %v5866_v5 = vld [vmem:[%s7415_s1 + $0x198] sm:$0xff]  ;;  %v2363_v32 = vld [vmem:[#allocation2 + $0x6c] sm:$0xf] }
 0x10b   : > { %v6707_v50 = vpop.f32.mrf.mxu2  ;;  %v1806_v2 = vunpack.c.l.b16 %v1715_v51  ;;  %3645 = vmatpush.bf16.msra.mxu2 %v5866_v5 }
 0x10c   : > { %v1718_v23 = vsel %vm6563_vm13, %v1716_v33, %v1717_v34  ;;  %v5874_v33 = vld [vmem:[%s7415_s1 + $0x1d8] sm:$0xff] }
 0x10d   : > { %2251 = vmatmul.bf16.gmra.mxu3 %v5812_v58  ;;  %v2554_v58 = vsel %vm6097_vm10, %v2549_v31, %v2553_v29  ;;  %v1807_v6 = vunpack.c.l.b16 %v1718_v23  ;;  %v5842_v34 = vld [vmem:[%s7415_s1 + $0x158] sm:$0xff]  ;;  %v2580_v23 = vshrl.u32 %v2363_v32, 16 }
 0x10e   : > { %v2801_v19 = vunpack.c.l.b16 %v2554_v58  ;;  %v1724_v58 = vrot.slane %v5930_v35, 5  ;;  %4327 = vmatpush.bf16.msra.mxu3 %v5874_v33  ;;  %3330 = vmatpush.bf16.msra.mxu1 %v5842_v34 }
 0x110   : > { %v6714_v44 = vpop.f32.mrf.mxu3  ;;  %v2826_v17 = vpack.c.b16 %v2801_v19, %v2800_v37 }
 0x112   : > { %1561 = vmatmul.bf16.gmra.mxu1 %v5773_v0  ;;  %v2561_v0 = vrot.slane %v2559_v40, 5  ;;  %v1723_v40 = vrot.slane %v1721_v4, 4 }
 0x113   : > { %v6724_v60 = vpop.f32.mrf.mxu2 }
 0x114   : > { %v6722_v12 = vpop.f32.mrf.mxu0  ;;  %v2562_v16 = vor.u32 %v2561_v0, %v2558_v55  ;;  %v2589_v55 = vshll.u32 %v2364_v46, 16  ;;  %v2593_v0 = vshrl.u32 %v2364_v46, 16 }
 0x116   : > { %v2563_v31 = vrot.slane %v2562_v16, 4  ;;  %v2591_v30 = vrot.slane %v2589_v55, 5  ;;  %v2366_v55 = vld [vmem:[#allocation2 + $0x78] sm:$0xf] }
 0x118   : > { %2933 = vmatmul.bf16.gmra.mxu0 %v2825_v18  ;;  %1942 = vmatmul.bf16.gmra.mxu2 %v1830_v20  ;;  %v1831_v18 = vpack.c.b16 %v1807_v6, %v1806_v2  ;;  %v2572_v20 = vor.u32 %v2571_v57, %v2567_v8  ;;  %v6729_v27 = vpop.f32.mrf.mxu3  ;;  %v2568_v37 = vsel %vm6097_vm10, %v2563_v31, %v2567_v8  ;;  %v5882_v57 = vld [vmem:[%s7415_s1 + $0x218] sm:$0xff]  ;;  %v2365_v31 = vld [vmem:[#allocation2 + $0x74] sm:$0x1] }
 0x119   : > { %v1722_v2 = vsel %vm6563_vm13, %v5259_v39, %v1721_v4  ;;  %v1725_v6 = vsel %vm6563_vm13, %v1723_v40, %v1724_v58  ;;  %v2802_v16 = vunpack.c.l.b16 %v2568_v37  ;;  %4753 = vmatpush.bf16.msra.mxu0 %v5882_v57  ;;  %v2595_v4 = vrot.slane %v2593_v0, 4  ;;  %v5931_v40 = vld [vmem:[#allocation2 + $0x70] sm:$0xf]  ;;  %v1621_v58 = vld [vmem:[#allocation2 + $0x6c] sm:$0xe] }
 0x11a   : > { %v2573_v9 = vrot.slane %v2572_v20, 4  ;;  %v1808_v54 = vunpack.c.l.b16 %v1722_v2  ;;  %v1809_v5 = vunpack.c.l.b16 %v1725_v6  ;;  %v1728_v35 = vrot.slane %v5931_v40, 5  ;;  %v5815_v0 = vld [vmem:[#allocation2 + $0x6c] sm:$0xff]  ;;  %v5932_v57 = vld [vmem:[#allocation2 + $0x74] sm:$0x1] }
 0x11b   : > { %v2596_v34 = vor.u32 %v2595_v4, %v2591_v30  ;;  %v5260_v2 = vrot.slane %v1621_v58, 9 }
 0x11c   : > { %v6739_v47 = vpop.f32.mrf.mxu0  ;;  %v1832_v33 = vpack.c.b16 %v1809_v5, %v1808_v54  ;;  %v1730_v6 = vrot.slane %v1728_v35, 4  ;;  %v2604_v54 = vshrl.u32 %v2366_v55, 16  ;;  %v2607_v5 = vshll.u32 %v2366_v55, 16 }
 0x11d   : > { %2256 = vmatmul.bf16.gmra.mxu3 %v5813_v53  ;;  %v2577_v53 = vrot.slane %v2575_v11, 5  ;;  %v2597_v37 = vrot.slane %v2596_v34, 4  ;;  %v1729_v34 = vsel %vm6563_vm13, %v5260_v2, %v1728_v35 }
 0x11e   : > { %v2606_v58 = vrot.slane %v2604_v54, 4  ;;  %v5933_v54 = vld [vmem:[#allocation2 + $0x7c] sm:$0xf] }
 0x11f   : > { %v6720_v52 = vpop.f32.mrf.mxu1  ;;  %v2578_v19 = vsel %vm6097_vm10, %v2573_v9, %v2577_v53 }
 0x122   : > { %1566 = vmatmul.bf16.gmra.mxu1 %v5774_v43  ;;  %v2583_v43 = vshll.u32 %v2363_v32, 16 }
 0x124   : > { %v2585_v20 = vrot.slane %v2583_v43, 5 }
 0x127   : > { %v6731_v29 = vpop.f32.mrf.mxu1 }
 0x128   : > { %2938 = vmatmul.bf16.gmra.mxu0 %v2826_v17  ;;  %1947 = vmatmul.bf16.gmra.mxu2 %v1831_v18  ;;  %v2803_v17 = vunpack.c.l.b16 %v2578_v19  ;;  %v2582_v18 = vrot.slane %v2580_v23, 4 }
 0x12a   : > { %v2586_v53 = vor.u32 %v2585_v20, %v2582_v18  ;;  %v2827_v32 = vpack.c.b16 %v2803_v17, %v2802_v16  ;;  %v2367_v16 = vld [vmem:[#allocation2 + $0x7c] sm:$0xf] }
 0x12b   : > { %v6741_v51 = vpop.f32.mrf.mxu2 }
 0x12c   : > { %v2587_v46 = vrot.slane %v2586_v53, 4  ;;  %v2613_v53 = vshll.u32 %v2367_v16, 16 }
 0x12d   : > { %2261 = vmatmul.bf16.gmra.mxu3 %v5814_v63  ;;  %v2599_v63 = vshll.u32 %v2365_v31, 16 }
 0x12e   : > { %v2592_v18 = vsel %vm6097_vm10, %v2587_v46, %v2591_v30  ;;  %v2609_v46 = vrot.slane %v2607_v5, 5  ;;  %v1735_v5 = vrot.slane %v5933_v54, 5 }
 0x12f   : > { %v1532_v8 = vpop.f32.mrf.mxu1  ;;  %v2601_v19 = vrot.slane %v2599_v63, 5  ;;  %v2804_v30 = vunpack.c.l.b16 %v2592_v18 }
 0x130   : > { %v6754_v11 = vpop.f32.mrf.mxu3  ;;  %v1533_v17 = vadd.f32 %v1532_v8, %v6652_v41  ;;  %v5776_v8 = vld [vmem:[#allocation2 + $0x6c] sm:$0xff] }
 0x131   : > { %7428 = vst [vmem:[#allocation3_spill] sm:$0xff] %v6754_v11  ;;  %v2602_v4 = vsel %vm6097_vm10, %v2597_v37, %v2601_v19  ;;  %v1810_v37 = vunpack.c.l.b16 %v1729_v34 }
 0x132   : > { %1571 = vmatmul.bf16.gmra.mxu1 %v5775_v13  ;;  %v1731_v13 = vrot.slane %v5932_v57, 5  ;;  %v2805_v63 = vunpack.c.l.b16 %v2602_v4  ;;  %v2615_v57 = vrot.slane %v2613_v53, 5  ;;  %v5865_v53 = vld [vmem:[%s7415_s1 + $0x190] sm:$0xff] }
 0x133   : > { %v6756_v9 = vpop.f32.mrf.mxu2  ;;  %3646 = vmatpush.bf16.msra.mxu2 %v5865_v53 }
 0x134   : > { %v1732_v41 = vsel %vm6563_vm13, %v1730_v6, %v1731_v13  ;;  %v2828_v35 = vpack.c.b16 %v2805_v63, %v2804_v30  ;;  %v2370_v63 = vld [vmem:[#allocation2 + $0x88] sm:$0xf] }
 0x135   : > { %v6758_v39 = vpop.f32.mrf.mxu0  ;;  %v1811_v19 = vunpack.c.l.b16 %v1732_v41 }
 0x137   : > { %v1534_v23 = vpop.f32.mrf.mxu1  ;;  %v1833_v13 = vpack.c.b16 %v1811_v19, %v1810_v37  ;;  %v1737_v37 = vrot.slane %v1735_v5, 4  ;;  %v5934_v19 = vld [vmem:[#allocation2 + $0x80] sm:$0x1] }
 0x138   : > { %2943 = vmatmul.bf16.gmra.mxu0 %v2827_v32  ;;  %v6760_v43 = vpop.f32.mrf.mxu3  ;;  %1952 = vmatmul.bf16.gmra.mxu2 %v1832_v33  ;;  %v2617_v32 = vshrl.u32 %v2367_v16, 16 }
 0x139   : > { %7429 = vst [vmem:[#allocation4_spill] sm:$0xff] %v6760_v43  ;;  %v2610_v43 = vor.u32 %v2609_v46, %v2606_v58  ;;  %v5873_v58 = vld [vmem:[%s7415_s1 + $0x1d0] sm:$0xff] }
 0x13a   : > { %v2619_v16 = vrot.slane %v2617_v32, 4  ;;  %v1622_v32 = vld [vmem:[#allocation2 + $0x78] sm:$0xe]  ;;  %v5841_v46 = vld [vmem:[%s7415_s1 + $0x150] sm:$0xff]  ;;  %4328 = vmatpush.bf16.msra.mxu3 %v5873_v58 }
 0x13b   : > { %v1913_v20 = vpop.f32.mrf.mxu2  ;;  %v2611_v34 = vrot.slane %v2610_v43, 4  ;;  %v5261_v43 = vrot.slane %v1622_v32, 9  ;;  %3331 = vmatpush.bf16.msra.mxu1 %v5841_v46  ;;  %v5777_v32 = vld [vmem:[#allocation2 + $0x78] sm:$0xff] }
 0x13c   : > { %v1993_v31 = vadd.f32 %v1913_v20, %v1533_v17  ;;  %v2368_v20 = vld [vmem:[#allocation2 + $0x80] sm:$0x1]  ;;  %v2620_v18 = vor.u32 %v2619_v16, %v2615_v57  ;;  %v1738_v16 = vrot.slane %v5934_v19, 5  ;;  %v2371_v19 = vld [vmem:[#allocation2 + $0x8c] sm:$0x1] }
 0x13d   : > { %v6767_v33 = vpop.f32.mrf.mxu0  ;;  %2266 = vmatmul.bf16.gmra.mxu3 %v5815_v0  ;;  %v1535_v0 = vadd.f32 %v1534_v23, %v6671_v22  ;;  %v2623_v4 = vshll.u32 %v2368_v20, 16  ;;  %v2369_v23 = vld [vmem:[#allocation2 + $0x84] sm:$0xf]  ;;  %v2616_v20 = vsel %vm6097_vm10, %v2611_v34, %v2615_v57  ;;  %v1736_v53 = vsel %vm6563_vm13, %v5261_v43, %v1735_v5 }
 0x13e   : > { %v2806_v57 = vunpack.c.l.b16 %v2616_v20  ;;  %v1812_v46 = vunpack.c.l.b16 %v1736_v53 }
 0x13f   : > { %v1537_v40 = vpop.f32.mrf.mxu1  ;;  %v2625_v30 = vrot.slane %v2623_v4, 5  ;;  %v2641_v4 = vshrl.u32 %v2370_v63, 16 }
 0x140   : > { %v2227_v55 = vpop.f32.mrf.mxu3 }
 0x141   : > { %v2307_v17 = vadd.f32 %v2227_v55, %v1993_v31  ;;  %v5816_v55 = vld [vmem:[#allocation2 + $0x78] sm:$0xff]  ;;  %v2643_v43 = vrot.slane %v2641_v4, 4 }
 0x142   : > { %1576 = vmatmul.bf16.gmra.mxu1 %v5776_v8  ;;  %v2621_v8 = vrot.slane %v2620_v18, 4 }
 0x143   : > { %v1915_v2 = vpop.f32.mrf.mxu2 }
 0x144   : > { %v1994_v6 = vadd.f32 %v1915_v2, %v1535_v0  ;;  %v2631_v2 = vshll.u32 %v2369_v23, 16  ;;  %v2626_v18 = vsel %vm6097_vm10, %v2621_v8, %v2625_v30 }
 0x145   : > { %v2909_v11 = vpop.f32.mrf.mxu0 }
 0x146   : > { %v6777_v31 = vadd.f32 %v2909_v11, %v2307_v17  ;;  %v1538_v17 = vadd.f32 %v1537_v40, %v6696_v56  ;;  %v1739_v56 = vsel %vm6563_vm13, %v1737_v37, %v1738_v16  ;;  %v5881_v40 = vld [vmem:[%s7415_s1 + $0x210] sm:$0xff]  ;;  %v2633_v30 = vrot.slane %v2631_v2, 5 }
 0x147   : > { %v1539_v22 = vpop.f32.mrf.mxu1  ;;  %4754 = vmatpush.bf16.msra.mxu0 %v5881_v40  ;;  %v2647_v2 = vshll.u32 %v2371_v19, 16 }
 0x148   : > { %2948 = vmatmul.bf16.gmra.mxu0 %v2828_v35  ;;  %v2229_v41 = vpop.f32.mrf.mxu3  ;;  %1957 = vmatmul.bf16.gmra.mxu2 %v1833_v13  ;;  %v2628_v35 = vshrl.u32 %v2369_v23, 16  ;;  %v2637_v13 = vshll.u32 %v2370_v63, 16  ;;  %v2807_v23 = vunpack.c.l.b16 %v2626_v18  ;;  %v1540_v16 = vadd.f32 %v1539_v22, %v6705_v28 }
 0x149   : > { %v2308_v11 = vadd.f32 %v2229_v41, %v1994_v6  ;;  %v2649_v22 = vrot.slane %v2647_v2, 5 }
 0x14a   : > { %v2630_v8 = vrot.slane %v2628_v35, 4  ;;  %v2639_v63 = vrot.slane %v2637_v13, 5 }
 0x14b   : > { %v1918_v0 = vpop.f32.mrf.mxu2 }
 0x14c   : > { %v1995_v6 = vadd.f32 %v1918_v0, %v1538_v17  ;;  %v2829_v17 = vpack.c.b16 %v2807_v23, %v2806_v57  ;;  %v2634_v20 = vor.u32 %v2633_v30, %v2630_v8  ;;  %v2644_v35 = vor.u32 %v2643_v43, %v2639_v63  ;;  %v2372_v57 = vld [vmem:[#allocation2 + $0x90] sm:$0xf] }
 0x14d   : > { %v2911_v54 = vpop.f32.mrf.mxu0  ;;  %2271 = vmatmul.bf16.gmra.mxu3 %v5816_v55  ;;  %v1813_v55 = vunpack.c.l.b16 %v1739_v56  ;;  %v2655_v19 = vshll.u32 %v2372_v57, 16 }
 0x14e   : > { %v6797_v34 = vadd.f32 %v2911_v54, %v2308_v11  ;;  %v5935_v54 = vld [vmem:[#allocation2 + $0x88] sm:$0xf]  ;;  %v2635_v53 = vrot.slane %v2634_v20, 4  ;;  %v2645_v28 = vrot.slane %v2644_v35, 4 }
 0x14f   : > { %v1542_v41 = vpop.f32.mrf.mxu1  ;;  %v1834_v18 = vpack.c.b16 %v1813_v55, %v1812_v46  ;;  %v1742_v40 = vrot.slane %v5935_v54, 5  ;;  %v5778_v35 = vld [vmem:[#allocation2 + $0x84] sm:$0xff] }
 0x150   : > { %7430 = vst [vmem:[#allocation5_spill] sm:$0xff] %v6797_v34  ;;  %v2232_v58 = vpop.f32.mrf.mxu3  ;;  %v1543_v5 = vadd.f32 %v1542_v41, %v6722_v12  ;;  %v1623_v34 = vld [vmem:[#allocation2 + $0x84] sm:$0xe]  ;;  %v2640_v55 = vsel %vm6097_vm10, %v2635_v53, %v2639_v63  ;;  %v2657_v53 = vrot.slane %v2655_v19, 5 }
 0x151   : > { %v2309_v37 = vadd.f32 %v2232_v58, %v1995_v6  ;;  %v5817_v41 = vld [vmem:[#allocation2 + $0x84] sm:$0xff]  ;;  %v5262_v8 = vrot.slane %v1623_v34, 9  ;;  %v1744_v30 = vrot.slane %v1742_v40, 4  ;;  %v5936_v58 = vld [vmem:[#allocation2 + $0x8c] sm:$0x1] }
 0x152   : > { %1581 = vmatmul.bf16.gmra.mxu1 %v5777_v32  ;;  %v2373_v32 = vld [vmem:[#allocation2 + $0x94] sm:$0xf]  ;;  %v1745_v46 = vrot.slane %v5936_v58, 5 }
 0x153   : > { %v1920_v11 = vpop.f32.mrf.mxu2  ;;  %v1743_v34 = vsel %vm6563_vm13, %v5262_v8, %v1742_v40  ;;  %v2374_v40 = vld [vmem:[#allocation2 + $0x98] sm:$0x1] }
 0x154   : > { %v1996_v0 = vadd.f32 %v1920_v11, %v1540_v16  ;;  %v2661_v16 = vshll.u32 %v2373_v32, 16 }
 0x155   : > { %v2914_v13 = vpop.f32.mrf.mxu0 }
 0x156   : > { %v6801_v12 = vadd.f32 %v2914_v13, %v2309_v37  ;;  %v2652_v37 = vshrl.u32 %v2372_v57, 16 }
 0x157   : > { %v1544_v4 = vpop.f32.mrf.mxu1 }
 0x158   : > { %2953 = vmatmul.bf16.gmra.mxu0 %v2829_v17  ;;  %v2234_v6 = vpop.f32.mrf.mxu3  ;;  %1962 = vmatmul.bf16.gmra.mxu2 %v1834_v18  ;;  %v1545_v56 = vadd.f32 %v1544_v4, %v6739_v47  ;;  %v2650_v17 = vsel %vm6097_vm10, %v2645_v28, %v2649_v22  ;;  %v2665_v47 = vshrl.u32 %v2373_v32, 16  ;;  %v2808_v18 = vunpack.c.l.b16 %v2640_v55 }
 0x159   : > { %v2310_v23 = vadd.f32 %v2234_v6, %v1996_v0  ;;  %v1746_v0 = vsel %vm6563_vm13, %v1744_v30, %v1745_v46  ;;  %v2809_v2 = vunpack.c.l.b16 %v2650_v17  ;;  %v2654_v54 = vrot.slane %v2652_v37, 4  ;;  %v5937_v37 = vld [vmem:[#allocation2 + $0x94] sm:$0xf] }
 0x15a   : > { %v2663_v4 = vrot.slane %v2661_v16, 5  ;;  %v1814_v28 = vunpack.c.l.b16 %v1743_v34  ;;  %v1815_v22 = vunpack.c.l.b16 %v1746_v0  ;;  %v2667_v57 = vrot.slane %v2665_v47, 4  ;;  %v1624_v16 = vld [vmem:[#allocation2 + $0x90] sm:$0xe] }
 0x15b   : > { %v1923_v43 = vpop.f32.mrf.mxu2  ;;  %v2658_v30 = vor.u32 %v2657_v53, %v2654_v54  ;;  %v2671_v55 = vshll.u32 %v2374_v40, 16  ;;  %v1749_v19 = vrot.slane %v5937_v37, 5  ;;  %v5818_v54 = vld [vmem:[#allocation2 + $0x90] sm:$0xff]  ;;  %v5263_v53 = vrot.slane %v1624_v16, 9 }
 0x15c   : > { %v1997_v11 = vadd.f32 %v1923_v43, %v1543_v5  ;;  %v2668_v46 = vor.u32 %v2667_v57, %v2663_v4  ;;  %v2376_v57 = vld [vmem:[#allocation2 + $0xa0] sm:$0xf]  ;;  %v5779_v37 = vld [vmem:[#allocation2 + $0x90] sm:$0xff] }
 0x15d   : > { %v2916_v20 = vpop.f32.mrf.mxu0  ;;  %2276 = vmatmul.bf16.gmra.mxu3 %v5817_v41  ;;  %v2830_v41 = vpack.c.b16 %v2809_v2, %v2808_v18  ;;  %v2673_v34 = vrot.slane %v2671_v55, 5  ;;  %v2375_v18 = vld [vmem:[#allocation2 + $0x9c] sm:$0xf]  ;;  %v5840_v2 = vld [vmem:[%s7415_s1 + $0x148] sm:$0xff]  ;;  %v1750_v55 = vsel %vm6563_vm13, %v5263_v53, %v1749_v19 }
 0x15e   : > { %v6812_v63 = vadd.f32 %v2916_v20, %v2310_v23  ;;  %v1835_v23 = vpack.c.b16 %v1815_v22, %v1814_v28  ;;  %v5938_v28 = vld [vmem:[#allocation2 + $0x98] sm:$0x1]  ;;  %3332 = vmatpush.bf16.msra.mxu1 %v5840_v2  ;;  %v2676_v40 = vshrl.u32 %v2375_v18, 16 }
 0x15f   : > { %v1547_v13 = vpop.f32.mrf.mxu1  ;;  %v1752_v22 = vrot.slane %v5938_v28, 5 }
 0x160   : > { %v2237_v6 = vpop.f32.mrf.mxu3  ;;  %v1548_v5 = vadd.f32 %v1547_v13, %v6758_v39  ;;  %v5864_v39 = vld [vmem:[%s7415_s1 + $0x188] sm:$0xff] }
 0x161   : > { %v2311_v32 = vadd.f32 %v2237_v6, %v1997_v11  ;;  %v2659_v11 = vrot.slane %v2658_v30, 4  ;;  %3647 = vmatpush.bf16.msra.mxu2 %v5864_v39  ;;  %v1751_v6 = vrot.slane %v1749_v19, 4 }
 0x162   : > { %1586 = vmatmul.bf16.gmra.mxu1 %v5778_v35  ;;  %v5872_v35 = vld [vmem:[%s7415_s1 + $0x1c8] sm:$0xff] }
 0x163   : > { %v1925_v8 = vpop.f32.mrf.mxu2  ;;  %4329 = vmatpush.bf16.msra.mxu3 %v5872_v35 }
 0x164   : > { %v1998_v58 = vadd.f32 %v1925_v8, %v1545_v56  ;;  %v2669_v56 = vrot.slane %v2668_v46, 4 }
 0x165   : > { %v2919_v43 = vpop.f32.mrf.mxu0 }
 0x166   : > { %v6818_v17 = vadd.f32 %v2919_v43, %v2311_v32  ;;  %v2674_v8 = vsel %vm6097_vm10, %v2669_v56, %v2673_v34  ;;  %v1753_v43 = vsel %vm6563_vm13, %v1751_v6, %v1752_v22  ;;  %v1816_v34 = vunpack.c.l.b16 %v1750_v55 }
 0x167   : > { %v1549_v47 = vpop.f32.mrf.mxu1  ;;  %4330 = vmatpush.bf16.msra.mxu3 %v5871_v14 }
 0x168   : > { %2958 = vmatmul.bf16.gmra.mxu0 %v2830_v41  ;;  %v2239_v20 = vpop.f32.mrf.mxu3  ;;  %1967 = vmatmul.bf16.gmra.mxu2 %v1835_v23  ;;  %v1550_v0 = vadd.f32 %v1549_v47, %v6767_v33  ;;  %v2664_v33 = vsel %vm6097_vm10, %v2659_v11, %v2663_v4  ;;  %v2679_v41 = vshll.u32 %v2375_v18, 16  ;;  %v2685_v23 = vshll.u32 %v2376_v57, 16  ;;  %v5880_v4 = vld [vmem:[%s7415_s1 + $0x208] sm:$0xff] }
 0x169   : > { %v2312_v13 = vadd.f32 %v2239_v20, %v1998_v58  ;;  %v2689_v58 = vshrl.u32 %v2376_v57, 16  ;;  %v2810_v16 = vunpack.c.l.b16 %v2664_v33  ;;  %v2811_v11 = vunpack.c.l.b16 %v2674_v8  ;;  %4755 = vmatpush.bf16.msra.mxu0 %v5880_v4  ;;  %v5939_v8 = vld [vmem:[#allocation2 + $0xa0] sm:$0xf] }
 0x16a   : > { %v2678_v47 = vrot.slane %v2676_v40, 4  ;;  %v2681_v20 = vrot.slane %v2679_v41, 5  ;;  %v1817_v18 = vunpack.c.l.b16 %v1753_v43  ;;  %v2687_v19 = vrot.slane %v2685_v23, 5  ;;  %v1625_v41 = vld [vmem:[#allocation2 + $0x9c] sm:$0xe] }
 0x16b   : > { %v1928_v32 = vpop.f32.mrf.mxu2  ;;  %v2691_v35 = vrot.slane %v2689_v58, 4  ;;  %v2831_v53 = vpack.c.b16 %v2811_v11, %v2810_v16  ;;  %v1756_v40 = vrot.slane %v5939_v8, 5  ;;  %v2378_v43 = vld [vmem:[#allocation2 + $0xa8] sm:$0xf]  ;;  %v5819_v16 = vld [vmem:[#allocation2 + $0x9c] sm:$0xff]  ;;  %v5264_v11 = vrot.slane %v1625_v41, 9 }
 0x16c   : > { %v1999_v30 = vadd.f32 %v1928_v32, %v1548_v5  ;;  %v2682_v28 = vor.u32 %v2681_v20, %v2678_v47  ;;  %v5940_v20 = vld [vmem:[#allocation2 + $0xa4] sm:$0x1] }
 0x16d   : > { %v2921_v46 = vpop.f32.mrf.mxu0  ;;  %2281 = vmatmul.bf16.gmra.mxu3 %v5818_v54  ;;  %v2377_v54 = vld [vmem:[#allocation2 + $0xa4] sm:$0x1]  ;;  %v2692_v57 = vor.u32 %v2691_v35, %v2687_v19  ;;  %v1758_v47 = vrot.slane %v1756_v40, 4  ;;  %v2703_v35 = vshll.u32 %v2378_v43, 16 }
 0x16e   : > { %v6838_v39 = vadd.f32 %v2921_v46, %v2312_v13  ;;  %v1836_v13 = vpack.c.b16 %v1817_v18, %v1816_v34  ;;  %v2695_v33 = vshll.u32 %v2377_v54, 16  ;;  %v2700_v18 = vshrl.u32 %v2378_v43, 16 }
 0x16f   : > { %v1552_v5 = vpop.f32.mrf.mxu1  ;;  %v2693_v58 = vrot.slane %v2692_v57, 4  ;;  %v2705_v41 = vrot.slane %v2703_v35, 5 }
 0x170   : > { %7431 = vst [vmem:[#allocation6_spill] sm:$0xff] %v6838_v39  ;;  %v2242_v56 = vpop.f32.mrf.mxu3  ;;  %v2697_v4 = vrot.slane %v2695_v33, 5  ;;  %v1553_v34 = vadd.f32 %v1552_v5, %v6625_v45  ;;  %v5780_v5 = vld [vmem:[#allocation2 + $0x9c] sm:$0xff]  ;;  %v2702_v8 = vrot.slane %v2700_v18, 4  ;;  %v1626_v39 = vld [vmem:[#allocation2 + $0xa8] sm:$0xe] }
 0x171   : > { %v2313_v2 = vadd.f32 %v2242_v56, %v1999_v30  ;;  %v2683_v30 = vrot.slane %v2682_v28, 4  ;;  %v1759_v56 = vrot.slane %v5940_v20, 5 }
 0x172   : > { %1591 = vmatmul.bf16.gmra.mxu1 %v5779_v37  ;;  %v2379_v37 = vld [vmem:[#allocation2 + $0xac] sm:$0xf] }
 0x173   : > { %v1930_v6 = vpop.f32.mrf.mxu2  ;;  %v2709_v54 = vshll.u32 %v2379_v37, 16  ;;  %v2688_v28 = vsel %vm6097_vm10, %v2683_v30, %v2687_v19  ;;  %v1760_v45 = vsel %vm6563_vm13, %v1758_v47, %v1759_v56  ;;  %v2706_v56 = vor.u32 %v2705_v41, %v2702_v8  ;;  %v707_v41 = vld [vmem:[#allocation2 + $0xc8] sm:$0x1] }
 0x174   : > { %v2000_v22 = vadd.f32 %v1930_v6, %v1550_v0  ;;  %v267_v6 = vld [vmem:[%s6033_s23 + $0x78] sm:$0xf]  ;;  %v2812_v19 = vunpack.c.l.b16 %v2688_v28 }
 0x175   : > { %v2924_v32 = vpop.f32.mrf.mxu0  ;;  %v528_v57 = vshrl.u32 %v267_v6, 16  ;;  %v6854_v30 = vrot.slane %v2709_v54, 5  ;;  %v2707_v8 = vrot.slane %v2706_v56, 4  ;;  %v5820_v56 = vld [vmem:[#allocation2 + $0xa8] sm:$0xff] }
 0x176   : > { %v6840_v46 = vadd.f32 %v2924_v32, %v2313_v2  ;;  %v1757_v32 = vsel %vm6563_vm13, %v5264_v11, %v1756_v40  ;;  %v2380_v40 = vld [vmem:[#allocation2 + $0xb0] sm:$0x1]  ;;  %v268_v11 = vld [vmem:[%s6033_s23 + $0x7c] sm:$0xf] }
 0x177   : > { %v1554_v55 = vpop.f32.mrf.mxu1  ;;  %v2719_v54 = vshll.u32 %v2380_v40, 16  ;;  %v2712_v10 = vsel %vm6097_vm10, %v2707_v8, %v6854_v30 }
 0x178   : > { %7432 = vst [vmem:[#allocation7_spill] sm:$0xff] %v6840_v46  ;;  %2963 = vmatmul.bf16.gmra.mxu0 %v2831_v53  ;;  %v2244_v23 = vpop.f32.mrf.mxu3  ;;  %1972 = vmatmul.bf16.gmra.mxu2 %v1836_v13  ;;  %v2713_v53 = vshrl.u32 %v2379_v37, 16  ;;  %v1555_v47 = vadd.f32 %v1554_v55, %v6644_v21  ;;  %v5863_v21 = vld [vmem:[%s7415_s1 + $0x180] sm:$0xff] }
 0x179   : > { %v2314_v0 = vadd.f32 %v2244_v23, %v2000_v22  ;;  %v2698_v22 = vsel %vm6097_vm10, %v2693_v58, %v2697_v4  ;;  %v1818_v4 = vunpack.c.l.b16 %v1757_v32  ;;  %v5941_v32 = vld [vmem:[#allocation2 + $0xac] sm:$0xf]  ;;  %3648 = vmatpush.bf16.msra.mxu2 %v5863_v21 }
 0x17a   : > { %v2715_v37 = vrot.slane %v2713_v53, 4  ;;  %v2813_v20 = vunpack.c.l.b16 %v2698_v22  ;;  %v536_v53 = vshrl.u32 %v268_v11, 16 }
 0x17b   : > { %v1933_v2 = vpop.f32.mrf.mxu2 }
 0x17c   : > { %v2001_v13 = vadd.f32 %v1933_v2, %v1553_v34  ;;  %v1819_v34 = vunpack.c.l.b16 %v1760_v45  ;;  %v531_v2 = vshll.u32 %v267_v6, 16  ;;  %v2716_v35 = vor.u32 %v2715_v37, %v6854_v30 }
 0x17d   : > { %v2926_v33 = vpop.f32.mrf.mxu0  ;;  %2286 = vmatmul.bf16.gmra.mxu3 %v5819_v16  ;;  %v530_v16 = vrot.slane %v528_v57, 7  ;;  %v2832_v57 = vpack.c.b16 %v2813_v20, %v2812_v19  ;;  %v1763_v45 = vrot.slane %v5941_v32, 5  ;;  %v538_v6 = vrot.slane %v536_v53, 7 }
 0x17e   : > { %v6852_v43 = vadd.f32 %v2926_v33, %v2314_v0  ;;  %v703_v0 = vld [vmem:[#allocation2 + $0xc0] sm:$0xf]  ;;  %v1837_v22 = vpack.c.b16 %v1819_v34, %v1818_v4  ;;  %v2717_v37 = vrot.slane %v2716_v35, 4  ;;  %v2721_v20 = vrot.slane %v2719_v54, 5  ;;  %v2381_v4 = vld [vmem:[#allocation2 + $0xb4] sm:$0xf] }
 0x17f   : > { %v1557_v23 = vpop.f32.mrf.mxu1  ;;  %v533_v28 = vor.u32 %v531_v2, %v530_v16  ;;  %v534_v55 = vrot.slane %v530_v16, 4  ;;  %v543_v40 = vrot.slane %v538_v6, 4  ;;  %v5265_v16 = vrot.slane %v1626_v39, 9 }
 0x180   : > { %7433 = vst [vmem:[#allocation8_spill] sm:$0xff] %v6852_v43  ;;  %v2247_v58 = vpop.f32.mrf.mxu3  ;;  %v1558_v54 = vadd.f32 %v1557_v23, %v6650_v36  ;;  %v2724_v53 = vshrl.u32 %v2381_v4, 16  ;;  %v2722_v15 = vsel %vm6097_vm10, %v2717_v37, %v2721_v20  ;;  %v2814_v37 = vunpack.c.l.b16 %v2712_v10 }
 0x181   : > { %v2315_v46 = vadd.f32 %v2247_v58, %v2001_v13  ;;  %v539_v13 = vshll.u32 %v268_v11, 16  ;;  %v1765_v11 = vrot.slane %v1763_v45, 4  ;;  %v708_v39 = vsel %vm6059_vm7, %v543_v40, %v707_v41 }
 0x182   : > { %1596 = vmatmul.bf16.gmra.mxu1 %v5780_v5  ;;  %v704_v5 = vsel %vm6052_vm6, %v533_v28, %v703_v0  ;;  %v5942_v0 = vld [vmem:[#allocation2 + $0xb0] sm:$0x1]  ;;  %709 = vst [vmem:[#allocation2 + $0xc8] sm:$0x1] %v708_v39  ;;  %v1764_v36 = vsel %vm6563_vm13, %v5265_v16, %v1763_v45  ;;  %v2726_v41 = vrot.slane %v2724_v53, 4  ;;  %v2815_v20 = vunpack.c.l.b16 %v2722_v15 }
 0x183   : > { %v1935_v18 = vpop.f32.mrf.mxu2  ;;  %705 = vst [vmem:[#allocation2 + $0xc0] sm:$0xf] %v704_v5  ;;  %v541_v34 = vor.u32 %v539_v13, %v538_v6  ;;  %v5781_v6 = vld [vmem:[#allocation2 + $0xa8] sm:$0xff]  ;;  %v1820_v45 = vunpack.c.l.b16 %v1764_v36  ;;  %v5943_v39 = vld [vmem:[#allocation2 + $0xb8] sm:$0xf] }
 0x184   : > { %v2002_v33 = vadd.f32 %v1935_v18, %v1555_v47  ;;  %v2382_v47 = vld [vmem:[#allocation2 + $0xb8] sm:$0xf]  ;;  %v1766_v18 = vrot.slane %v5942_v0, 5  ;;  %v5944_v15 = vld [vmem:[#allocation2 + $0xbc] sm:$0x1] }
 0x185   : > { %v2929_v43 = vpop.f32.mrf.mxu0  ;;  %v542_v35 = vsel %vm6042_vm5, %v534_v55, %v541_v34  ;;  %v2737_v32 = vshrl.u32 %v2382_v47, 16  ;;  %v5879_v55 = vld [vmem:[%s7415_s1 + $0x200] sm:$0xff]  ;;  %v1773_v36 = vrot.slane %v5944_v15, 5 }
 0x186   : > { %v6864_v19 = vadd.f32 %v2929_v43, %v2315_v46  ;;  %v5839_v46 = vld [vmem:[%s7415_s1 + $0x140] sm:$0xff]  ;;  %706 = vst [vmem:[#allocation2 + $0xc4] sm:$0xf] %v542_v35  ;;  %v1767_v23 = vsel %vm6563_vm13, %v1765_v11, %v1766_v18  ;;  %4756 = vmatpush.bf16.msra.mxu0 %v5879_v55  ;;  %v1627_v35 = vld [vmem:[#allocation2 + $0xb4] sm:$0xe] }
 0x187   : > { %v1559_v58 = vpop.f32.mrf.mxu1  ;;  %3333 = vmatpush.bf16.msra.mxu1 %v5839_v46  ;;  %v2739_v8 = vrot.slane %v2737_v32, 4  ;;  %v1821_v40 = vunpack.c.l.b16 %v1767_v23  ;;  %v5945_v23 = vld [vmem:[#allocation2 + $0x10] sm:$0xf] }
 0x188   : > { %2968 = vmatmul.bf16.gmra.mxu0 %v2832_v57  ;;  %v2249_v2 = vpop.f32.mrf.mxu3  ;;  %1977 = vmatmul.bf16.gmra.mxu2 %v1837_v22  ;;  %v2727_v57 = vshll.u32 %v2381_v4, 16  ;;  %v2733_v22 = vshll.u32 %v2382_v47, 16  ;;  %v1560_v11 = vadd.f32 %v1559_v58, %v6669_v38  ;;  %v3087_v55 = vrot.slane %v5945_v23, 5 }
 0x189   : > { %v2316_v43 = vadd.f32 %v2249_v2, %v2002_v33  ;;  %v2383_v2 = vld [vmem:[#allocation2 + $0xbc] sm:$0x1]  ;;  %v1838_v18 = vpack.c.b16 %v1821_v40, %v1820_v45 }
 0x18a   : > { %v2729_v4 = vrot.slane %v2727_v57, 5  ;;  %v2735_v30 = vrot.slane %v2733_v22, 5  ;;  %v2384_v38 = vld [vmem:[#allocation2 + $0xc0] sm:$0xf] }
 0x18b   : > { %v1938_v28 = vpop.f32.mrf.mxu2 }
 0x18c   : > { %v2003_v33 = vadd.f32 %v1938_v28, %v1558_v54  ;;  %v2730_v14 = vor.u32 %v2729_v4, %v2726_v41  ;;  %v2740_v46 = vor.u32 %v2739_v8, %v2735_v30  ;;  %v1770_v54 = vrot.slane %v5943_v39, 5  ;;  %v5821_v41 = vld [vmem:[#allocation2 + $0xb4] sm:$0xff]  ;;  %v3021_v39 = vld [vmem:[#allocation2 + $0xc] sm:$0xe] }
 0x18d   : > { %v2931_v21 = vpop.f32.mrf.mxu0  ;;  %2291 = vmatmul.bf16.gmra.mxu3 %v5820_v56  ;;  %v2833_v56 = vpack.c.b16 %v2815_v20, %v2814_v37  ;;  %v2385_v4 = vld [vmem:[#allocation2 + $0xc4] sm:$0xf]  ;;  %v2748_v37 = vshrl.u32 %v2384_v38, 16 }
 0x18e   : > { %v6889_v13 = vadd.f32 %v2931_v21, %v2316_v43  ;;  %v2743_v43 = vshll.u32 %v2383_v2, 16  ;;  %v2731_v57 = vrot.slane %v2730_v14, 4  ;;  %v2741_v22 = vrot.slane %v2740_v46, 4 }
 0x18f   : > { %v1562_v5 = vpop.f32.mrf.mxu1  ;;  %v5266_v21 = vrot.slane %v1627_v35, 9  ;;  %v1772_v10 = vrot.slane %v1770_v54, 4  ;;  %v2751_v2 = vshll.u32 %v2384_v38, 16  ;;  %v2761_v14 = vshrl.u32 %v2385_v4, 16  ;;  %v6905_v38 = vld [vmem:[#allocation2 + $0x1c] sm:$0xf] }
 0x190   : > { %v2252_v34 = vpop.f32.mrf.mxu3  ;;  %v2745_v32 = vrot.slane %v2743_v43, 5  ;;  %v1563_v8 = vadd.f32 %v1562_v5, %v6690_v49  ;;  %v2736_v20 = vsel %vm6097_vm10, %v2731_v57, %v2735_v30  ;;  %v3089_v46 = vrot.slane %v3087_v55, 4  ;;  %v5946_v49 = vld [vmem:[#allocation2 + $0x14] sm:$0x1]  ;;  %v3762_v30 = vld [vmem:[#allocation2 + $0x18] sm:$0xf] }
 0x191   : > { %v2317_v16 = vadd.f32 %v2252_v34, %v2003_v33  ;;  %v1771_v40 = vsel %vm6563_vm13, %v5266_v21, %v1770_v54  ;;  %v3090_v5 = vrot.slane %v5946_v49, 5  ;;  %v2750_v35 = vrot.slane %v2748_v37, 4  ;;  %v2386_v37 = vld [vmem:[#allocation2 + $0xc8] sm:$0x1] }
 0x192   : > { %1601 = vmatmul.bf16.gmra.mxu1 %v5781_v6  ;;  %v2746_v34 = vsel %vm6097_vm10, %v2741_v22, %v2745_v32  ;;  %v1822_v57 = vunpack.c.l.b16 %v1771_v40  ;;  %v2753_v32 = vrot.slane %v2751_v2, 5  ;;  %v5475_v21 = vrot.slane %v3021_v39, 9 }
 0x193   : > { %v1940_v47 = vpop.f32.mrf.mxu2  ;;  %v3811_v23 = vshrl.u32 %v3762_v30, 16  ;;  %v3824_v40 = vshrl.u32 %v6905_v38, 16  ;;  %v2767_v49 = vshll.u32 %v2386_v37, 16 }
 0x194   : > { %v2004_v0 = vadd.f32 %v1940_v47, %v1560_v11  ;;  %v1774_v11 = vsel %vm6563_vm13, %v1772_v10, %v1773_v36  ;;  %v2757_v47 = vshll.u32 %v2385_v4, 16  ;;  %v2763_v36 = vrot.slane %v2761_v14, 4 }
 0x195   : > { %v2934_v28 = vpop.f32.mrf.mxu0  ;;  %v1823_v22 = vunpack.c.l.b16 %v1774_v11  ;;  %v3088_v4 = vsel %vm6563_vm13, %v5475_v21, %v3087_v55  ;;  %v6916_v21 = vld [vmem:[#allocation2 + $0x20] sm:$0x1] }
 0x196   : > { %v6892_v53 = vadd.f32 %v2934_v28, %v2317_v16  ;;  %v2759_v15 = vrot.slane %v2757_v47, 5 }
 0x197   : > { %v1564_v33 = vpop.f32.mrf.mxu1  ;;  %v1839_v11 = vpack.c.b16 %v1823_v22, %v1822_v57  ;;  %v5822_v57 = vld [vmem:[#allocation2 + $0xc0] sm:$0xff]  ;;  %v2769_v22 = vrot.slane %v2767_v49, 5 }
 0x198   : > { %2973 = vmatmul.bf16.gmra.mxu0 %v2833_v56  ;;  %v2254_v58 = vpop.f32.mrf.mxu3  ;;  %1982 = vmatmul.bf16.gmra.mxu2 %v1838_v18  ;;  %v2816_v56 = vunpack.c.l.b16 %v2736_v20  ;;  %v5782_v18 = vld [vmem:[#allocation2 + $0xb4] sm:$0xff]  ;;  %v1565_v10 = vadd.f32 %v1564_v33, %v6702_v26  ;;  %v3214_v20 = vunpack.c.l.b16 %v3088_v4  ;;  %v2764_v55 = vor.u32 %v2763_v36, %v2759_v15 }
 0x199   : > { %v2318_v6 = vadd.f32 %v2254_v58, %v2004_v0  ;;  %v2817_v0 = vunpack.c.l.b16 %v2746_v34 }
 0x19b   : > { %v1943_v45 = vpop.f32.mrf.mxu2  ;;  %v2834_v26 = vpack.c.b16 %v2817_v0, %v2816_v56 }
 0x19c   : > { %v2005_v16 = vadd.f32 %v1943_v45, %v1563_v8  ;;  %v3814_v8 = vshll.u32 %v3762_v30, 16  ;;  %v3820_v45 = vshll.u32 %v6905_v38, 16  ;;  %v3826_v30 = vrot.slane %v3824_v40, 4  ;;  %v3765_v40 = vld [vmem:[#allocation2 + $0x24] sm:$0xf] }
 0x19d   : > { %v2936_v43 = vpop.f32.mrf.mxu0  ;;  %2296 = vmatmul.bf16.gmra.mxu3 %v5821_v41 }
 0x19e   : > { %v6903_v28 = vadd.f32 %v2936_v43, %v2318_v6  ;;  %v3091_v6 = vsel %vm6563_vm13, %v3089_v46, %v3090_v5  ;;  %v3813_v43 = vrot.slane %v3811_v23, 4  ;;  %v3816_v46 = vrot.slane %v3814_v8, 5 }
 0x19f   : > { %v1567_v54 = vpop.f32.mrf.mxu1  ;;  %v3215_v34 = vunpack.c.l.b16 %v3091_v6  ;;  %v3822_v5 = vrot.slane %v3820_v45, 5  ;;  %v3830_v23 = vshll.u32 %v6916_v21, 16 }
 0x1a0   : > { %v2257_v58 = vpop.f32.mrf.mxu3 }
 0x1a1   : > { %v2319_v41 = vadd.f32 %v2257_v58, %v2005_v16  ;;  %v2754_v16 = vor.u32 %v2753_v32, %v2750_v35  ;;  %v3246_v47 = vpack.c.b16 %v3215_v34, %v3214_v20  ;;  %v2765_v35 = vrot.slane %v2764_v55, 4  ;;  %v3022_v55 = vld [vmem:[#allocation2 + $0x18] sm:$0xe] }
 0x1a2   : > { %1606 = vmatmul.bf16.gmra.mxu1 %v5782_v18  ;;  %v3817_v32 = vor.u32 %v3816_v46, %v3813_v43  ;;  %v3827_v36 = vor.u32 %v3826_v30, %v3822_v5  ;;  %v3832_v45 = vrot.slane %v3830_v23, 5  ;;  %v3835_v43 = vshrl.u32 %v3765_v40, 16 }
 0x1a3   : > { %v1945_v33 = vpop.f32.mrf.mxu2  ;;  %v2755_v56 = vrot.slane %v2754_v16, 4  ;;  %v2770_v37 = vsel %vm6097_vm10, %v2765_v35, %v2769_v22  ;;  %v3838_v46 = vshll.u32 %v3765_v40, 16  ;;  %v5476_v35 = vrot.slane %v3022_v55, 9 }
 0x1a4   : > { %v2006_v2 = vadd.f32 %v1945_v33, %v1565_v10  ;;  %v1568_v10 = vadd.f32 %v1567_v54, %v6720_v52  ;;  %v3818_v20 = vrot.slane %v3817_v32, 4  ;;  %v3828_v34 = vrot.slane %v3827_v36, 4  ;;  %v5947_v54 = vld [vmem:[#allocation2 + $0x1c] sm:$0xf]  ;;  %v5948_v32 = vld [vmem:[#allocation2 + $0x20] sm:$0x1] }
 0x1a5   : > { %v2939_v14 = vpop.f32.mrf.mxu0  ;;  %v2760_v8 = vsel %vm6097_vm10, %v2755_v56, %v2759_v15  ;;  %v3094_v33 = vrot.slane %v5947_v54, 5  ;;  %v2819_v16 = vunpack.c.l.b16 %v2770_v37  ;;  %v6936_v37 = vld [vmem:[#allocation2 + $0x2c] sm:$0x1]  ;;  %v4513_v55 = vrot.slane %v6916_v21, 5 }
 0x1a6   : > { %v6914_v18 = vadd.f32 %v2939_v14, %v2319_v41  ;;  %v3823_v15 = vsel %vm6097_vm10, %v3818_v20, %v3822_v5  ;;  %v5847_v5 = vld [vmem:[#allocation2 + $0x18] sm:$0xff] }
 0x1a7   : > { %v1569_v39 = vpop.f32.mrf.mxu1  ;;  %v3096_v22 = vrot.slane %v3094_v33, 4  ;;  %v3095_v54 = vsel %vm6563_vm13, %v5476_v35, %v3094_v33 }
 0x1a8   : > { %2978 = vmatmul.bf16.gmra.mxu0 %v2834_v26  ;;  %v2259_v58 = vpop.f32.mrf.mxu3  ;;  %1987 = vmatmul.bf16.gmra.mxu2 %v1839_v11  ;;  %v2818_v11 = vunpack.c.l.b16 %v2760_v8  ;;  %v1570_v30 = vadd.f32 %v1569_v39, %v6731_v29  ;;  %v4211_v29 = vunpack.c.l.b16 %v3823_v15  ;;  %v4444_v39 = vld [vmem:[#allocation2 + $0x18] sm:$0xe]  ;;  %v3840_v8 = vrot.slane %v3838_v46, 5 }
 0x1a9   : > { %v2320_v0 = vadd.f32 %v2259_v58, %v2006_v2  ;;  %v6926_v2 = vld [vmem:[#allocation2 + $0x28] sm:$0xf]  ;;  %v3833_v58 = vsel %vm6097_vm10, %v3828_v34, %v3832_v45 }
 0x1aa   : > { %v3844_v56 = vshll.u32 %v6926_v2, 16  ;;  %v2835_v36 = vpack.c.b16 %v2819_v16, %v2818_v11  ;;  %v5699_v16 = vrot.slane %v4444_v39, 9 }
 0x1ab   : > { %v1948_v4 = vpop.f32.mrf.mxu2 }
 0x1ac   : > { %v2007_v41 = vadd.f32 %v1948_v4, %v1568_v10  ;;  %v3097_v10 = vrot.slane %v5948_v32, 5  ;;  %v4510_v4 = vrot.slane %v6905_v38, 5  ;;  %v3846_v20 = vrot.slane %v3844_v56, 5 }
 0x1ad   : > { %v2941_v6 = vpop.f32.mrf.mxu0  ;;  %2301 = vmatmul.bf16.gmra.mxu3 %v5822_v57 }
 0x1ae   : > { %v6924_v26 = vadd.f32 %v2941_v6, %v2320_v0  ;;  %v3848_v0 = vshrl.u32 %v6926_v2, 16  ;;  %v3837_v6 = vrot.slane %v3835_v43, 4  ;;  %v3098_v11 = vsel %vm6563_vm13, %v3096_v22, %v3097_v10 }
 0x1af   : > { %v1572_v52 = vpop.f32.mrf.mxu1  ;;  %v3217_v56 = vunpack.c.l.b16 %v3098_v11  ;;  %v4511_v22 = vsel %vm6563_vm13, %v5699_v16, %v4510_v4 }
 0x1b0   : > { %v2262_v14 = vpop.f32.mrf.mxu3  ;;  %v3850_v34 = vrot.slane %v3848_v0, 4  ;;  %v3841_v46 = vor.u32 %v3840_v8, %v3837_v6  ;;  %v4637_v39 = vunpack.c.l.b16 %v4511_v22 }
 0x1b1   : > { %v2321_v49 = vadd.f32 %v2262_v14, %v2007_v41  ;;  %v4512_v14 = vrot.slane %v4510_v4, 4 }
 0x1b2   : > { %3334 = vmatmul.bf16.vlgmr.msra.gmra.mxu1 %v3246_v47  ;;  %v4212_v47 = vunpack.c.l.b16 %v3833_v58  ;;  %v3216_v58 = vunpack.c.l.b16 %v3095_v54  ;;  %v3851_v33 = vor.u32 %v3850_v34, %v3846_v20  ;;  %v3842_v32 = vrot.slane %v3841_v46, 4  ;;  %v3023_v34 = vld [vmem:[#allocation2 + $0x24] sm:$0xe] }
 0x1b3   : > { %v1950_v57 = vpop.f32.mrf.mxu2  ;;  %v4514_v21 = vsel %vm6563_vm13, %v4512_v14, %v4513_v55  ;;  %v5477_v46 = vrot.slane %v3023_v34, 9  ;;  %v4520_v34 = vrot.slane %v6936_v37, 5 }
 0x1b4   : > { %v2008_v23 = vadd.f32 %v1950_v57, %v1570_v30  ;;  %v4243_v43 = vpack.c.b16 %v4212_v47, %v4211_v29  ;;  %v1573_v30 = vadd.f32 %v1572_v52, %v6646_v25  ;;  %v3247_v10 = vpack.c.b16 %v3217_v56, %v3216_v58  ;;  %v5949_v52 = vld [vmem:[#allocation2 + $0x28] sm:$0xf]  ;;  %v6953_v47 = vld [vmem:[#allocation2 + $0x34] sm:$0xf] }
 0x1b5   : > { %v2944_v41 = vpop.f32.mrf.mxu0  ;;  %v3101_v29 = vrot.slane %v5949_v52, 5  ;;  %v4638_v6 = vunpack.c.l.b16 %v4514_v21  ;;  %v3847_v54 = vsel %vm6097_vm10, %v3842_v32, %v3846_v20  ;;  %v3868_v55 = vshll.u32 %v6953_v47, 16  ;;  %v5848_v20 = vld [vmem:[#allocation2 + $0x24] sm:$0xff]  ;;  %v6963_v32 = vld [vmem:[#allocation2 + $0x38] sm:$0x1] }
 0x1b6   : > { %v6938_v45 = vadd.f32 %v2944_v41, %v2321_v49  ;;  %v3854_v49 = vshll.u32 %v6936_v37, 16 }
 0x1b7   : > { %v1574_v40 = vpop.f32.mrf.mxu1  ;;  %v4669_v56 = vpack.c.b16 %v4638_v6, %v4637_v39  ;;  %v3102_v52 = vsel %vm6563_vm13, %v5477_v46, %v3101_v29 }
 0x1b8   : > { %2983 = vmatmul.bf16.gmra.mxu0 %v2835_v36  ;;  %v2264_v38 = vpop.f32.mrf.mxu3  ;;  %3649 = vmatmul.bf16.vlgmr.msra.gmra.mxu2 %v5847_v5  ;;  %v3852_v36 = vrot.slane %v3851_v33, 4  ;;  %v3768_v5 = vld [vmem:[#allocation2 + $0x30] sm:$0xf]  ;;  %v1575_v16 = vadd.f32 %v1574_v40, %v6654_v48  ;;  %v4213_v48 = vunpack.c.l.b16 %v3847_v54 }
 0x1b9   : > { %v2322_v15 = vadd.f32 %v2264_v38, %v2008_v23  ;;  %v3856_v23 = vrot.slane %v3854_v49, 5  ;;  %v3859_v11 = vshrl.u32 %v3768_v5, 16  ;;  %v3862_v38 = vshll.u32 %v3768_v5, 16 }
 0x1ba   : > { %v3103_v49 = vrot.slane %v3101_v29, 4 }
 0x1bb   : > { %v1953_v0 = vpop.f32.mrf.mxu2  ;;  %v3857_v14 = vsel %vm6097_vm10, %v3852_v36, %v3856_v23  ;;  %v3861_v22 = vrot.slane %v3859_v11, 4  ;;  %v3864_v21 = vrot.slane %v3862_v38, 5 }
 0x1bc   : > { %v2009_v57 = vadd.f32 %v1953_v0, %v1573_v30  ;;  %v5950_v30 = vld [vmem:[#allocation2 + $0x2c] sm:$0x1]  ;;  %v4517_v0 = vrot.slane %v6926_v2, 5  ;;  %v4214_v40 = vunpack.c.l.b16 %v3857_v14  ;;  %v3218_v14 = vunpack.c.l.b16 %v3102_v52 }
 0x1bd   : > { %v2946_v35 = vpop.f32.mrf.mxu0  ;;  %4331 = vmatmul.bf16.vlgmr.msra.gmra.mxu3 %v4243_v43  ;;  %v3104_v58 = vrot.slane %v5950_v30, 5  ;;  %v3865_v38 = vor.u32 %v3864_v21, %v3861_v22 }
 0x1be   : > { %v6951_v41 = vadd.f32 %v2946_v35, %v2322_v15  ;;  %v3872_v15 = vshrl.u32 %v6953_v47, 16  ;;  %v4445_v35 = vld [vmem:[#allocation2 + $0x24] sm:$0xe]  ;;  %v4244_v11 = vpack.c.b16 %v4214_v40, %v4213_v48  ;;  %v6980_v40 = vld [vmem:[#allocation2 + $0x40] sm:$0xf] }
 0x1bf   : > { %v1577_v25 = vpop.f32.mrf.mxu1  ;;  %v3105_v39 = vsel %vm6563_vm13, %v3103_v49, %v3104_v58  ;;  %v5700_v6 = vrot.slane %v4445_v35, 9  ;;  %v3866_v30 = vrot.slane %v3865_v38, 4 }
 0x1c0   : > { %v2267_v8 = vpop.f32.mrf.mxu3  ;;  %v3874_v36 = vrot.slane %v3872_v15, 4 }
 0x1c1   : > { %v2323_v4 = vadd.f32 %v2267_v8, %v2009_v57  ;;  %v4519_v8 = vrot.slane %v4517_v0, 4  ;;  %v4518_v49 = vsel %vm6563_vm13, %v5700_v6, %v4517_v0 }
 0x1c2   : > { %3339 = vmatmul.bf16.gmra.mxu1 %v3247_v10  ;;  %v3870_v10 = vrot.slane %v3868_v55, 5  ;;  %v3219_v55 = vunpack.c.l.b16 %v3105_v39  ;;  %v4639_v35 = vunpack.c.l.b16 %v4518_v49 }
 0x1c3   : > { %v1955_v43 = vpop.f32.mrf.mxu2  ;;  %v4521_v37 = vsel %vm6563_vm13, %v4519_v8, %v4520_v34  ;;  %v3892_v34 = vshll.u32 %v6980_v40, 16 }
 0x1c4   : > { %v2010_v33 = vadd.f32 %v1955_v43, %v1575_v16  ;;  %v1578_v16 = vadd.f32 %v1577_v25, %v6673_v1  ;;  %v3875_v29 = vor.u32 %v3874_v36, %v3870_v10  ;;  %v3248_v58 = vpack.c.b16 %v3219_v55, %v3218_v14  ;;  %v5951_v25 = vld [vmem:[#allocation2 + $0x34] sm:$0xf]  ;;  %v3024_v36 = vld [vmem:[#allocation2 + $0x30] sm:$0xe] }
 0x1c5   : > { %v2949_v57 = vpop.f32.mrf.mxu0  ;;  %v3108_v48 = vrot.slane %v5951_v25, 5  ;;  %v4640_v22 = vunpack.c.l.b16 %v4521_v37  ;;  %v3871_v52 = vsel %vm6097_vm10, %v3866_v30, %v3870_v10  ;;  %v5478_v38 = vrot.slane %v3024_v36, 9  ;;  %v5849_v10 = vld [vmem:[#allocation2 + $0x30] sm:$0xff]  ;;  %v6990_v30 = vld [vmem:[#allocation2 + $0x44] sm:$0x1] }
 0x1c6   : > { %v6965_v23 = vadd.f32 %v2949_v57, %v2323_v4  ;;  %v3878_v4 = vshll.u32 %v6963_v32, 16  ;;  %v4527_v36 = vrot.slane %v6963_v32, 5 }
 0x1c7   : > { %v1579_v5 = vpop.f32.mrf.mxu1  ;;  %v4670_v55 = vpack.c.b16 %v4640_v22, %v4639_v35  ;;  %v3109_v25 = vsel %vm6563_vm13, %v5478_v38, %v3108_v48 }
 0x1c8   : > { %4757 = vmatmul.bf16.vlgmr.msra.gmra.mxu0 %v4669_v56  ;;  %v2269_v2 = vpop.f32.mrf.mxu3  ;;  %3654 = vmatmul.bf16.gmra.mxu2 %v5848_v20  ;;  %v3876_v56 = vrot.slane %v3875_v29, 4  ;;  %v3771_v20 = vld [vmem:[#allocation2 + $0x3c] sm:$0xf]  ;;  %v1580_v6 = vadd.f32 %v1579_v5, %v6698_v59  ;;  %v4215_v59 = vunpack.c.l.b16 %v3871_v52 }
 0x1c9   : > { %v2324_v54 = vadd.f32 %v2269_v2, %v2010_v33  ;;  %v3880_v33 = vrot.slane %v3878_v4, 5  ;;  %v3883_v39 = vshrl.u32 %v3771_v20, 16  ;;  %v3886_v2 = vshll.u32 %v3771_v20, 16 }
 0x1ca   : > { %v3110_v4 = vrot.slane %v3108_v48, 4 }
 0x1cb   : > { %v1958_v15 = vpop.f32.mrf.mxu2  ;;  %v3881_v8 = vsel %vm6097_vm10, %v3876_v56, %v3880_v33  ;;  %v3885_v49 = vrot.slane %v3883_v39, 4  ;;  %v3888_v37 = vrot.slane %v3886_v2, 5 }
 0x1cc   : > { %v2011_v43 = vadd.f32 %v1958_v15, %v1578_v16  ;;  %v5952_v16 = vld [vmem:[#allocation2 + $0x38] sm:$0x1]  ;;  %v4524_v15 = vrot.slane %v6953_v47, 5  ;;  %v4216_v5 = vunpack.c.l.b16 %v3881_v8  ;;  %v3220_v8 = vunpack.c.l.b16 %v3109_v25 }
 0x1cd   : > { %v2951_v46 = vpop.f32.mrf.mxu0  ;;  %4336 = vmatmul.bf16.gmra.mxu3 %v4244_v11  ;;  %v3111_v14 = vrot.slane %v5952_v16, 5  ;;  %v3889_v2 = vor.u32 %v3888_v37, %v3885_v49 }
 0x1ce   : > { %v6978_v57 = vadd.f32 %v2951_v46, %v2324_v54  ;;  %v3896_v54 = vshrl.u32 %v6980_v40, 16  ;;  %v4446_v46 = vld [vmem:[#allocation2 + $0x30] sm:$0xe]  ;;  %v4245_v39 = vpack.c.b16 %v4216_v5, %v4215_v59  ;;  %v7007_v5 = vld [vmem:[#allocation2 + $0x4c] sm:$0xf] }
 0x1cf   : > { %v1582_v1 = vpop.f32.mrf.mxu1  ;;  %v3112_v35 = vsel %vm6563_vm13, %v3110_v4, %v3111_v14  ;;  %v5701_v22 = vrot.slane %v4446_v46, 9  ;;  %v3890_v16 = vrot.slane %v3889_v2, 4 }
 0x1d0   : > { %v2272_v21 = vpop.f32.mrf.mxu3  ;;  %v3898_v56 = vrot.slane %v3896_v54, 4 }
 0x1d1   : > { %v2325_v0 = vadd.f32 %v2272_v21, %v2011_v43  ;;  %v4526_v21 = vrot.slane %v4524_v15, 4  ;;  %v4525_v4 = vsel %vm6563_vm13, %v5701_v22, %v4524_v15 }
 0x1d2   : > { %3344 = vmatmul.bf16.gmra.mxu1 %v3248_v58  ;;  %v3894_v58 = vrot.slane %v3892_v34, 5  ;;  %v3221_v34 = vunpack.c.l.b16 %v3112_v35  ;;  %v4641_v46 = vunpack.c.l.b16 %v4525_v4 }
 0x1d3   : > { %v1960_v11 = vpop.f32.mrf.mxu2  ;;  %v4528_v32 = vsel %vm6563_vm13, %v4526_v21, %v4527_v36  ;;  %v3916_v36 = vshll.u32 %v7007_v5, 16 }
 0x1d4   : > { %v2012_v29 = vadd.f32 %v1960_v11, %v1580_v6  ;;  %v1583_v6 = vadd.f32 %v1582_v1, %v6707_v50  ;;  %v3899_v48 = vor.u32 %v3898_v56, %v3894_v58  ;;  %v3249_v14 = vpack.c.b16 %v3221_v34, %v3220_v8  ;;  %v5953_v1 = vld [vmem:[#allocation2 + $0x40] sm:$0xf]  ;;  %v3025_v56 = vld [vmem:[#allocation2 + $0x3c] sm:$0xe] }
 0x1d5   : > { %v2954_v43 = vpop.f32.mrf.mxu0  ;;  %v3115_v59 = vrot.slane %v5953_v1, 5  ;;  %v4642_v49 = vunpack.c.l.b16 %v4528_v32  ;;  %v3895_v25 = vsel %vm6097_vm10, %v3890_v16, %v3894_v58  ;;  %v5479_v2 = vrot.slane %v3025_v56, 9  ;;  %v5850_v58 = vld [vmem:[#allocation2 + $0x3c] sm:$0xff]  ;;  %v7017_v16 = vld [vmem:[#allocation2 + $0x50] sm:$0x1] }
 0x1d6   : > { %v6992_v33 = vadd.f32 %v2954_v43, %v2325_v0  ;;  %v3902_v0 = vshll.u32 %v6990_v30, 16  ;;  %v4534_v56 = vrot.slane %v6990_v30, 5 }
 0x1d7   : > { %v1584_v20 = vpop.f32.mrf.mxu1  ;;  %v4671_v34 = vpack.c.b16 %v4642_v49, %v4641_v46  ;;  %v3116_v1 = vsel %vm6563_vm13, %v5479_v2, %v3115_v59 }
 0x1d8   : > { %4762 = vmatmul.bf16.gmra.mxu0 %v4670_v55  ;;  %v2274_v47 = vpop.f32.mrf.mxu3  ;;  %3659 = vmatmul.bf16.gmra.mxu2 %v5849_v10  ;;  %v3900_v55 = vrot.slane %v3899_v48, 4  ;;  %v3774_v10 = vld [vmem:[#allocation2 + $0x48] sm:$0xf]  ;;  %v1585_v22 = vadd.f32 %v1584_v20, %v6724_v60  ;;  %v4217_v60 = vunpack.c.l.b16 %v3895_v25 }
 0x1d9   : > { %v2326_v52 = vadd.f32 %v2274_v47, %v2012_v29  ;;  %v3904_v29 = vrot.slane %v3902_v0, 5  ;;  %v3907_v35 = vshrl.u32 %v3774_v10, 16  ;;  %v3910_v47 = vshll.u32 %v3774_v10, 16 }
 0x1da   : > { %v3117_v0 = vrot.slane %v3115_v59, 4 }
 0x1db   : > { %v1963_v54 = vpop.f32.mrf.mxu2  ;;  %v3905_v21 = vsel %vm6097_vm10, %v3900_v55, %v3904_v29  ;;  %v3909_v4 = vrot.slane %v3907_v35, 4  ;;  %v3912_v32 = vrot.slane %v3910_v47, 5 }
 0x1dc   : > { %v2013_v11 = vadd.f32 %v1963_v54, %v1583_v6  ;;  %v5954_v6 = vld [vmem:[#allocation2 + $0x44] sm:$0x1]  ;;  %v4531_v54 = vrot.slane %v6980_v40, 5  ;;  %v4218_v20 = vunpack.c.l.b16 %v3905_v21  ;;  %v3222_v21 = vunpack.c.l.b16 %v3116_v1 }
 0x1dd   : > { %v2956_v38 = vpop.f32.mrf.mxu0  ;;  %4341 = vmatmul.bf16.gmra.mxu3 %v4245_v39  ;;  %v3118_v8 = vrot.slane %v5954_v6, 5  ;;  %v3913_v47 = vor.u32 %v3912_v32, %v3909_v4 }
 0x1de   : > { %v7005_v43 = vadd.f32 %v2956_v38, %v2326_v52  ;;  %v3920_v52 = vshrl.u32 %v7007_v5, 16  ;;  %v4447_v38 = vld [vmem:[#allocation2 + $0x3c] sm:$0xe]  ;;  %v4246_v35 = vpack.c.b16 %v4218_v20, %v4217_v60  ;;  %v7034_v20 = vld [vmem:[#allocation2 + $0x58] sm:$0xf] }
 0x1df   : > { %v1587_v50 = vpop.f32.mrf.mxu1  ;;  %v3119_v46 = vsel %vm6563_vm13, %v3117_v0, %v3118_v8  ;;  %v5702_v49 = vrot.slane %v4447_v38, 9  ;;  %v3914_v6 = vrot.slane %v3913_v47, 4 }
 0x1e0   : > { %v2277_v37 = vpop.f32.mrf.mxu3  ;;  %v3922_v55 = vrot.slane %v3920_v52, 4 }
 0x1e1   : > { %v2327_v15 = vadd.f32 %v2277_v37, %v2013_v11  ;;  %v4533_v37 = vrot.slane %v4531_v54, 4  ;;  %v4532_v0 = vsel %vm6563_vm13, %v5702_v49, %v4531_v54 }
 0x1e2   : > { %3349 = vmatmul.bf16.gmra.mxu1 %v3249_v14  ;;  %v3918_v14 = vrot.slane %v3916_v36, 5  ;;  %v3223_v36 = vunpack.c.l.b16 %v3119_v46  ;;  %v4643_v38 = vunpack.c.l.b16 %v4532_v0 }
 0x1e3   : > { %v1965_v39 = vpop.f32.mrf.mxu2  ;;  %v4535_v30 = vsel %vm6563_vm13, %v4533_v37, %v4534_v56  ;;  %v3940_v56 = vshll.u32 %v7034_v20, 16 }
 0x1e4   : > { %v2014_v48 = vadd.f32 %v1965_v39, %v1585_v22  ;;  %v1588_v22 = vadd.f32 %v1587_v50, %v6741_v51  ;;  %v3923_v59 = vor.u32 %v3922_v55, %v3918_v14  ;;  %v3250_v8 = vpack.c.b16 %v3223_v36, %v3222_v21  ;;  %v5955_v50 = vld [vmem:[#allocation2 + $0x4c] sm:$0xf]  ;;  %v3026_v55 = vld [vmem:[#allocation2 + $0x48] sm:$0xe] }
 0x1e5   : > { %v2959_v11 = vpop.f32.mrf.mxu0  ;;  %v3122_v60 = vrot.slane %v5955_v50, 5  ;;  %v4644_v4 = vunpack.c.l.b16 %v4535_v30  ;;  %v3919_v1 = vsel %vm6097_vm10, %v3914_v6, %v3918_v14  ;;  %v5480_v47 = vrot.slane %v3026_v55, 9  ;;  %v5851_v14 = vld [vmem:[#allocation2 + $0x48] sm:$0xff]  ;;  %v7044_v6 = vld [vmem:[#allocation2 + $0x5c] sm:$0x1] }
 0x1e6   : > { %v7019_v29 = vadd.f32 %v2959_v11, %v2327_v15  ;;  %v3926_v15 = vshll.u32 %v7017_v16, 16  ;;  %v4541_v55 = vrot.slane %v7017_v16, 5 }
 0x1e7   : > { %v1589_v10 = vpop.f32.mrf.mxu1  ;;  %v4672_v36 = vpack.c.b16 %v4644_v4, %v4643_v38  ;;  %v3123_v50 = vsel %vm6563_vm13, %v5480_v47, %v3122_v60 }
 0x1e8   : > { %4767 = vmatmul.bf16.gmra.mxu0 %v4671_v34  ;;  %v2279_v40 = vpop.f32.mrf.mxu3  ;;  %3664 = vmatmul.bf16.gmra.mxu2 %v5850_v58  ;;  %v3924_v34 = vrot.slane %v3923_v59, 4  ;;  %v3777_v58 = vld [vmem:[#allocation2 + $0x54] sm:$0xf]  ;;  %v1590_v49 = vadd.f32 %v1589_v10, %v6756_v9  ;;  %v4219_v9 = vunpack.c.l.b16 %v3919_v1 }
 0x1e9   : > { %v2328_v25 = vadd.f32 %v2279_v40, %v2014_v48  ;;  %v3928_v48 = vrot.slane %v3926_v15, 5  ;;  %v3931_v46 = vshrl.u32 %v3777_v58, 16  ;;  %v3934_v40 = vshll.u32 %v3777_v58, 16 }
 0x1ea   : > { %v3124_v15 = vrot.slane %v3122_v60, 4 }
 0x1eb   : > { %v1968_v52 = vpop.f32.mrf.mxu2  ;;  %v3929_v37 = vsel %vm6097_vm10, %v3924_v34, %v3928_v48  ;;  %v3933_v0 = vrot.slane %v3931_v46, 4  ;;  %v3936_v30 = vrot.slane %v3934_v40, 5 }
 0x1ec   : > { %v2015_v39 = vadd.f32 %v1968_v52, %v1588_v22  ;;  %v5956_v22 = vld [vmem:[#allocation2 + $0x50] sm:$0x1]  ;;  %v4538_v52 = vrot.slane %v7007_v5, 5  ;;  %v4220_v10 = vunpack.c.l.b16 %v3929_v37  ;;  %v3224_v37 = vunpack.c.l.b16 %v3123_v50 }
 0x1ed   : > { %v2961_v2 = vpop.f32.mrf.mxu0  ;;  %4346 = vmatmul.bf16.gmra.mxu3 %v4246_v35  ;;  %v3125_v21 = vrot.slane %v5956_v22, 5  ;;  %v3937_v40 = vor.u32 %v3936_v30, %v3933_v0  ;;  %v3027_v30 = vld [vmem:[#allocation2 + $0x54] sm:$0xe] }
 0x1ee   : > { %v7032_v11 = vadd.f32 %v2961_v2, %v2328_v25  ;;  %v3944_v25 = vshrl.u32 %v7034_v20, 16  ;;  %v4448_v2 = vld [vmem:[#allocation2 + $0x48] sm:$0xe]  ;;  %v4247_v46 = vpack.c.b16 %v4220_v10, %v4219_v9 }
 0x1ef   : > { %v1592_v51 = vpop.f32.mrf.mxu1  ;;  %v3126_v38 = vsel %vm6563_vm13, %v3124_v15, %v3125_v21  ;;  %v5703_v4 = vrot.slane %v4448_v2, 9  ;;  %v3938_v16 = vrot.slane %v3937_v40, 4  ;;  %v3780_v21 = vld [vmem:[#allocation2 + $0x60] sm:$0xf]  ;;  %v5957_v2 = vld [vmem:[#allocation2 + $0x58] sm:$0xf] }
 0x1f0   : > { %v2282_v32 = vpop.f32.mrf.mxu3  ;;  %v3946_v34 = vrot.slane %v3944_v25, 4  ;;  %v3958_v50 = vshll.u32 %v3780_v21, 16 }
 0x1f1   : > { %v2329_v54 = vadd.f32 %v2282_v32, %v2015_v39  ;;  %v4540_v32 = vrot.slane %v4538_v52, 4 }
 0x1f2   : > { %3354 = vmatmul.bf16.gmra.mxu1 %v3250_v8  ;;  %v3942_v8 = vrot.slane %v3940_v56, 5  ;;  %v3225_v56 = vunpack.c.l.b16 %v3126_v38 }
 0x1f3   : > { %v1970_v35 = vpop.f32.mrf.mxu2  ;;  %v4542_v47 = vsel %vm6563_vm13, %v4540_v32, %v4541_v55 }
 0x1f4   : > { %v2016_v59 = vadd.f32 %v1970_v35, %v1590_v49  ;;  %v1593_v49 = vadd.f32 %v1592_v51, %v6648_v24  ;;  %v3947_v60 = vor.u32 %v3946_v34, %v3942_v8  ;;  %v4539_v35 = vsel %vm6563_vm13, %v5703_v4, %v4538_v52 }
 0x1f5   : > { %v2964_v39 = vpop.f32.mrf.mxu0  ;;  %v4645_v51 = vunpack.c.l.b16 %v4539_v35  ;;  %v4646_v9 = vunpack.c.l.b16 %v4542_v47  ;;  %v3129_v52 = vrot.slane %v5957_v2, 5  ;;  %v3955_v34 = vshrl.u32 %v3780_v21, 16  ;;  %v4449_v21 = vld [vmem:[#allocation2 + $0x54] sm:$0xe] }
 0x1f6   : > { %v7046_v48 = vadd.f32 %v2964_v39, %v2329_v54  ;;  %v3950_v54 = vshll.u32 %v7044_v6, 16  ;;  %v7059_v39 = vld [vmem:[#allocation2 + $0x64] sm:$0xf]  ;;  %v3943_v55 = vsel %vm6097_vm10, %v3938_v16, %v3942_v8  ;;  %v4545_v35 = vrot.slane %v7034_v20, 5 }
 0x1f7   : > { %v1594_v58 = vpop.f32.mrf.mxu1  ;;  %v3968_v4 = vshrl.u32 %v7059_v39, 16  ;;  %v3957_v47 = vrot.slane %v3955_v34, 4  ;;  %v5704_v2 = vrot.slane %v4449_v21, 9 }
 0x1f8   : > { %4772 = vmatmul.bf16.gmra.mxu0 %v4672_v36  ;;  %v2284_v5 = vpop.f32.mrf.mxu3  ;;  %3669 = vmatmul.bf16.gmra.mxu2 %v5851_v14  ;;  %v3251_v36 = vpack.c.b16 %v3225_v56, %v3224_v37  ;;  %v3952_v14 = vrot.slane %v3950_v54, 5  ;;  %v1595_v32 = vadd.f32 %v1594_v58, %v6667_v7  ;;  %v5481_v54 = vrot.slane %v3027_v30, 9  ;;  %v5958_v37 = vld [vmem:[#allocation2 + $0x5c] sm:$0x1] }
 0x1f9   : > { %v2330_v1 = vadd.f32 %v2284_v5, %v2016_v59  ;;  %v3948_v59 = vrot.slane %v3947_v60, 4  ;;  %v3964_v5 = vshll.u32 %v7059_v39, 16  ;;  %v3132_v56 = vrot.slane %v5958_v37, 5 }
 0x1fa   : > { %v4221_v58 = vunpack.c.l.b16 %v3943_v55  ;;  %v3970_v16 = vrot.slane %v3968_v4, 4  ;;  %v4548_v30 = vrot.slane %v7044_v6, 5 }
 0x1fb   : > { %v1973_v25 = vpop.f32.mrf.mxu2  ;;  %v3966_v8 = vrot.slane %v3964_v5, 5 }
 0x1fc   : > { %v2017_v15 = vadd.f32 %v1973_v25, %v1593_v49  ;;  %v3131_v49 = vrot.slane %v3129_v52, 4  ;;  %v5852_v25 = vld [vmem:[#allocation2 + $0x54] sm:$0xff] }
 0x1fd   : > { %v2966_v22 = vpop.f32.mrf.mxu0  ;;  %4351 = vmatmul.bf16.gmra.mxu3 %v4247_v46  ;;  %v4673_v46 = vpack.c.b16 %v4646_v9, %v4645_v51  ;;  %v3130_v51 = vsel %vm6563_vm13, %v5481_v54, %v3129_v52  ;;  %v3971_v4 = vor.u32 %v3970_v16, %v3966_v8  ;;  %v4552_v16 = vrot.slane %v7059_v39, 5  ;;  %v5960_v39 = vld [vmem:[#allocation2 + $0x68] sm:$0x1] }
 0x1fe   : > { %v7061_v24 = vadd.f32 %v2966_v22, %v2330_v1  ;;  %v3953_v1 = vsel %vm6097_vm10, %v3948_v59, %v3952_v14  ;;  %v3133_v9 = vsel %vm6563_vm13, %v3131_v49, %v3132_v56  ;;  %v3226_v55 = vunpack.c.l.b16 %v3130_v51  ;;  %v3028_v51 = vld [vmem:[#allocation2 + $0x60] sm:$0xe] }
 0x1ff   : > { %v1597_v10 = vpop.f32.mrf.mxu1  ;;  %v4222_v22 = vunpack.c.l.b16 %v3953_v1  ;;  %v3227_v52 = vunpack.c.l.b16 %v3133_v9  ;;  %v3972_v37 = vrot.slane %v3971_v4, 4 }
 0x200   : > { %v2287_v0 = vpop.f32.mrf.mxu3 }
 0x201   : > { %v2331_v38 = vadd.f32 %v2287_v0, %v2017_v15  ;;  %v3960_v15 = vrot.slane %v3958_v50, 5  ;;  %v4547_v0 = vrot.slane %v4545_v35, 4  ;;  %v4248_v5 = vpack.c.b16 %v4222_v22, %v4221_v58  ;;  %v7088_v22 = vld [vmem:[#allocation2 + $0x70] sm:$0xf] }
 0x202   : > { %3359 = vmatmul.bf16.gmra.mxu1 %v3251_v36  ;;  %v7071_v36 = vld [vmem:[#allocation2 + $0x68] sm:$0x1] }
 0x203   : > { %v1975_v40 = vpop.f32.mrf.mxu2  ;;  %v3961_v34 = vor.u32 %v3960_v15, %v3957_v47 }
 0x204   : > { %v2018_v60 = vadd.f32 %v1975_v40, %v1595_v32  ;;  %v1598_v32 = vadd.f32 %v1597_v10, %v6675_v62  ;;  %v4549_v40 = vsel %vm6563_vm13, %v4547_v0, %v4548_v30 }
 0x205   : > { %v2969_v7 = vpop.f32.mrf.mxu0  ;;  %v3962_v49 = vrot.slane %v3961_v34, 4  ;;  %v4648_v10 = vunpack.c.l.b16 %v4549_v40 }
 0x206   : > { %v7073_v59 = vadd.f32 %v2969_v7, %v2331_v38  ;;  %v3974_v38 = vshll.u32 %v7071_v36, 16  ;;  %v5959_v7 = vld [vmem:[#allocation2 + $0x64] sm:$0xf] }
 0x207   : > { %v1599_v14 = vpop.f32.mrf.mxu1  ;;  %v3136_v58 = vrot.slane %v5959_v7, 5  ;;  %v3967_v21 = vsel %vm6097_vm10, %v3962_v49, %v3966_v8  ;;  %v5482_v8 = vrot.slane %v3028_v51, 9 }
 0x208   : > { %4777 = vmatmul.bf16.gmra.mxu0 %v4673_v46  ;;  %v2289_v20 = vpop.f32.mrf.mxu3  ;;  %3674 = vmatmul.bf16.gmra.mxu2 %v5852_v25  ;;  %v4546_v46 = vsel %vm6563_vm13, %v5704_v2, %v4545_v35  ;;  %v3976_v56 = vrot.slane %v3974_v38, 5  ;;  %v3783_v25 = vld [vmem:[#allocation2 + $0x6c] sm:$0xf]  ;;  %v4450_v2 = vld [vmem:[#allocation2 + $0x60] sm:$0xe]  ;;  %v1600_v34 = vadd.f32 %v1599_v14, %v6700_v3  ;;  %v4555_v3 = vrot.slane %v7071_v36, 5 }
 0x209   : > { %v2332_v50 = vadd.f32 %v2289_v20, %v2018_v60  ;;  %v3252_v60 = vpack.c.b16 %v3227_v52, %v3226_v55  ;;  %v4647_v62 = vunpack.c.l.b16 %v4546_v46  ;;  %v3979_v0 = vshrl.u32 %v3783_v25, 16 }
 0x20a   : > { %v3977_v20 = vsel %vm6097_vm10, %v3972_v37, %v3976_v56  ;;  %v3982_v30 = vshll.u32 %v3783_v25, 16  ;;  %v3139_v55 = vrot.slane %v5960_v39, 5  ;;  %v4223_v46 = vunpack.c.l.b16 %v3967_v21  ;;  %v7099_v56 = vld [vmem:[#allocation2 + $0x74] sm:$0x1] }
 0x20b   : > { %v1978_v1 = vpop.f32.mrf.mxu2  ;;  %v4674_v4 = vpack.c.b16 %v4648_v10, %v4647_v62  ;;  %v4224_v40 = vunpack.c.l.b16 %v3977_v20  ;;  %v3981_v14 = vrot.slane %v3979_v0, 4  ;;  %v3137_v7 = vsel %vm6563_vm13, %v5482_v8, %v3136_v58 }
 0x20c   : > { %v2019_v54 = vadd.f32 %v1978_v1, %v1598_v32  ;;  %v3138_v32 = vrot.slane %v3136_v58, 4  ;;  %v5853_v1 = vld [vmem:[#allocation2 + $0x60] sm:$0xff]  ;;  %v3984_v37 = vrot.slane %v3982_v30, 5  ;;  %v3998_v0 = vshll.u32 %v7099_v56, 16 }
 0x20d   : > { %v2971_v6 = vpop.f32.mrf.mxu0  ;;  %4356 = vmatmul.bf16.gmra.mxu3 %v4248_v5  ;;  %v3992_v5 = vshrl.u32 %v7088_v22, 16  ;;  %v4249_v51 = vpack.c.b16 %v4224_v40, %v4223_v46  ;;  %v3228_v58 = vunpack.c.l.b16 %v3137_v7 }
 0x20e   : > { %v7086_v47 = vadd.f32 %v2971_v6, %v2332_v50  ;;  %v3988_v50 = vshll.u32 %v7088_v22, 16  ;;  %v4554_v6 = vrot.slane %v4552_v16, 4  ;;  %v4000_v46 = vrot.slane %v3998_v0, 5 }
 0x20f   : > { %v1602_v15 = vpop.f32.mrf.mxu1  ;;  %v3994_v25 = vrot.slane %v3992_v5, 4 }
 0x210   : > { %v2292_v35 = vpop.f32.mrf.mxu3  ;;  %v1603_v30 = vadd.f32 %v1602_v15, %v6714_v44  ;;  %v5961_v44 = vld [vmem:[#allocation2 + $0x70] sm:$0xf] }
 0x211   : > { %v2333_v9 = vadd.f32 %v2292_v35, %v2019_v54  ;;  %v5705_v54 = vrot.slane %v4450_v2, 9  ;;  %v3140_v35 = vsel %vm6563_vm13, %v3138_v32, %v3139_v55  ;;  %v4556_v2 = vsel %vm6563_vm13, %v4554_v6, %v4555_v3  ;;  %v7113_v55 = vld [vmem:[#allocation2 + $0x7c] sm:$0xf]  ;;  %v3029_v3 = vld [vmem:[#allocation2 + $0x6c] sm:$0xe] }
 0x212   : > { %3364 = vmatmul.bf16.gmra.mxu1 %v3252_v60  ;;  %v3990_v60 = vrot.slane %v3988_v50, 5  ;;  %v4650_v39 = vunpack.c.l.b16 %v4556_v2  ;;  %v3143_v15 = vrot.slane %v5961_v44, 5  ;;  %v5483_v0 = vrot.slane %v3029_v3, 9 }
 0x213   : > { %v1980_v38 = vpop.f32.mrf.mxu2  ;;  %v4553_v36 = vsel %vm6563_vm13, %v5705_v54, %v4552_v16 }
 0x214   : > { %v2020_v52 = vadd.f32 %v1980_v38, %v1600_v34  ;;  %v3229_v34 = vunpack.c.l.b16 %v3140_v35  ;;  %v3995_v50 = vor.u32 %v3994_v25, %v3990_v60  ;;  %v3786_v38 = vld [vmem:[#allocation2 + $0x78] sm:$0xf]  ;;  %v4649_v32 = vunpack.c.l.b16 %v4553_v36 }
 0x215   : > { %v2974_v49 = vpop.f32.mrf.mxu0  ;;  %v4016_v25 = vshrl.u32 %v7113_v55, 16  ;;  %v3144_v44 = vsel %vm6563_vm13, %v5483_v0, %v3143_v15 }
 0x216   : > { %v7101_v62 = vadd.f32 %v2974_v49, %v2333_v9  ;;  %v3985_v9 = vor.u32 %v3984_v37, %v3981_v14  ;;  %v4003_v49 = vshrl.u32 %v3786_v38, 16  ;;  %v4006_v14 = vshll.u32 %v3786_v38, 16 }
 0x217   : > { %v1604_v10 = vpop.f32.mrf.mxu1  ;;  %v4012_v37 = vshll.u32 %v7113_v55, 16  ;;  %v4675_v7 = vpack.c.b16 %v4650_v39, %v4649_v32  ;;  %v7127_v39 = vld [vmem:[#allocation2 + $0x80] sm:$0x1] }
 0x218   : > { %4782 = vmatmul.bf16.gmra.mxu0 %v4674_v4  ;;  %v2294_v21 = vpop.f32.mrf.mxu3  ;;  %3679 = vmatmul.bf16.gmra.mxu2 %v5853_v1  ;;  %v3986_v16 = vrot.slane %v3985_v9, 4  ;;  %v3996_v1 = vrot.slane %v3995_v50, 4  ;;  %v4451_v9 = vld [vmem:[#allocation2 + $0x6c] sm:$0xe]  ;;  %v4005_v50 = vrot.slane %v4003_v49, 4  ;;  %v4008_v38 = vrot.slane %v4006_v14, 5 }
 0x219   : > { %v2334_v20 = vadd.f32 %v2294_v21, %v2020_v52  ;;  %v3253_v52 = vpack.c.b16 %v3229_v34, %v3228_v58  ;;  %v1605_v21 = vadd.f32 %v1604_v10, %v6729_v27  ;;  %v5962_v58 = vld [vmem:[#allocation2 + $0x74] sm:$0x1]  ;;  %v7125_v27 = vrot.slane %v4012_v37, 5 }
 0x21a   : > { %v4001_v36 = vsel %vm6097_vm10, %v3996_v1, %v4000_v46  ;;  %v3146_v34 = vrot.slane %v5962_v58, 5  ;;  %v4018_v10 = vrot.slane %v4016_v25, 4  ;;  %v4562_v1 = vrot.slane %v7099_v56, 5 }
 0x21b   : > { %v1983_v5 = vpop.f32.mrf.mxu2  ;;  %v4226_v32 = vunpack.c.l.b16 %v4001_v36  ;;  %v4009_v3 = vor.u32 %v4008_v38, %v4005_v50  ;;  %v4022_v37 = vshll.u32 %v7127_v39, 16  ;;  %v3230_v56 = vunpack.c.l.b16 %v3144_v44  ;;  %v3789_v50 = vld [vmem:[#allocation2 + $0x84] sm:$0xf] }
 0x21c   : > { %v2021_v4 = vadd.f32 %v1983_v5, %v1603_v30  ;;  %v3145_v30 = vrot.slane %v3143_v15, 4  ;;  %v4019_v14 = vor.u32 %v4018_v10, %v7125_v27  ;;  %v4027_v44 = vshrl.u32 %v3789_v50, 16 }
 0x21d   : > { %v2976_v8 = vpop.f32.mrf.mxu0  ;;  %4361 = vmatmul.bf16.gmra.mxu3 %v4249_v51  ;;  %v3991_v51 = vsel %vm6097_vm10, %v3986_v16, %v3990_v60  ;;  %v5706_v16 = vrot.slane %v4451_v9, 9  ;;  %v4010_v0 = vrot.slane %v4009_v3, 4  ;;  %v4024_v58 = vrot.slane %v4022_v37, 5 }
 0x21e   : > { %v7115_v40 = vadd.f32 %v2976_v8, %v2334_v20  ;;  %v4559_v20 = vrot.slane %v7088_v22, 5  ;;  %v4225_v60 = vunpack.c.l.b16 %v3991_v51  ;;  %v3147_v49 = vsel %vm6563_vm13, %v3145_v30, %v3146_v34 }
 0x21f   : > { %v1607_v54 = vpop.f32.mrf.mxu1  ;;  %v3231_v36 = vunpack.c.l.b16 %v3147_v49  ;;  %v4020_v30 = vrot.slane %v4019_v14, 4  ;;  %v4030_v3 = vshll.u32 %v3789_v50, 16  ;;  %v4029_v50 = vrot.slane %v4027_v44, 4 }
 0x220   : > { %v2297_v6 = vpop.f32.mrf.mxu3  ;;  %v4560_v15 = vsel %vm6563_vm13, %v5706_v16, %v4559_v20  ;;  %v4015_v16 = vsel %vm6097_vm10, %v4010_v0, %v7125_v27  ;;  %v5855_v0 = vld [vmem:[#allocation2 + $0x78] sm:$0xff] }
 0x221   : > { %v2335_v35 = vadd.f32 %v2297_v6, %v2021_v4  ;;  %v5854_v4 = vld [vmem:[#allocation2 + $0x6c] sm:$0xff]  ;;  %v4651_v38 = vunpack.c.l.b16 %v4560_v15  ;;  %v5964_v15 = vld [vmem:[#allocation2 + $0x80] sm:$0x1] }
 0x222   : > { %3369 = vmatmul.bf16.gmra.mxu1 %v3253_v52  ;;  %v4561_v52 = vrot.slane %v4559_v20, 4  ;;  %v5963_v20 = vld [vmem:[#allocation2 + $0x7c] sm:$0xf] }
 0x223   : > { %v1985_v2 = vpop.f32.mrf.mxu2 }
 0x224   : > { %v2022_v5 = vadd.f32 %v1985_v2, %v1605_v21  ;;  %v7434_v21 = vld [vmem:[#allocation3_spill] sm:$0xff]  ;;  %v4563_v2 = vsel %vm6563_vm13, %v4561_v52, %v4562_v1  ;;  %v4025_v52 = vsel %vm6097_vm10, %v4020_v30, %v4024_v58 }
 0x225   : > { %v2979_v8 = vpop.f32.mrf.mxu0  ;;  %v1608_v51 = vadd.f32 %v1607_v54, %v7434_v21  ;;  %v4652_v10 = vunpack.c.l.b16 %v4563_v2  ;;  %v3030_v1 = vld [vmem:[#allocation2 + $0x78] sm:$0xe]  ;;  %v4566_v21 = vrot.slane %v7113_v55, 5  ;;  %v3153_v2 = vrot.slane %v5964_v15, 5 }
 0x226   : > { %v7129_v22 = vadd.f32 %v2979_v8, %v2335_v35  ;;  %v4250_v35 = vpack.c.b16 %v4226_v32, %v4225_v60  ;;  %v3150_v60 = vrot.slane %v5963_v20, 5  ;;  %v5484_v27 = vrot.slane %v3030_v1, 9 }
 0x227   : > { %v1609_v46 = vpop.f32.mrf.mxu1  ;;  %v4228_v30 = vunpack.c.l.b16 %v4025_v52  ;;  %v4032_v20 = vrot.slane %v4030_v3, 5  ;;  %v4569_v55 = vrot.slane %v7127_v39, 5 }
 0x228   : > { %4787 = vmatmul.bf16.gmra.mxu0 %v4675_v7  ;;  %v2299_v6 = vpop.f32.mrf.mxu3  ;;  %3684 = vmatmul.bf16.gmra.mxu2 %v5854_v4  ;;  %v7143_v4 = vld [vmem:[#allocation2 + $0x88] sm:$0xf] }
 0x229   : > { %v2336_v25 = vadd.f32 %v2299_v6, %v2022_v5  ;;  %v3254_v5 = vpack.c.b16 %v3231_v36, %v3230_v56  ;;  %v4452_v6 = vld [vmem:[#allocation2 + $0x78] sm:$0xe]  ;;  %v4036_v14 = vshll.u32 %v7143_v4, 16  ;;  %v4040_v37 = vshrl.u32 %v7143_v4, 16 }
 0x22a   : > { %v3152_v36 = vrot.slane %v3150_v60, 4  ;;  %v5707_v58 = vrot.slane %v4452_v6, 9  ;;  %v4033_v39 = vor.u32 %v4032_v20, %v4029_v50 }
 0x22b   : > { %v1988_v7 = vpop.f32.mrf.mxu2 }
 0x22c   : > { %v2023_v9 = vadd.f32 %v1988_v7, %v1608_v51  ;;  %v4676_v51 = vpack.c.b16 %v4652_v10, %v4651_v38  ;;  %v7159_v38 = vld [vmem:[#allocation2 + $0x8c] sm:$0x1]  ;;  %v4567_v6 = vsel %vm6563_vm13, %v5707_v58, %v4566_v21 }
 0x22d   : > { %v2981_v34 = vpop.f32.mrf.mxu0  ;;  %4366 = vmatmul.bf16.gmra.mxu3 %v4250_v35 }
 0x22e   : > { %v7145_v54 = vadd.f32 %v2981_v34, %v2336_v25  ;;  %v7435_v25 = vld [vmem:[#allocation4_spill] sm:$0xff] }
 0x22f   : > { %v3335_v8 = vpop.f32.mrf.mxu1  ;;  %v1610_v35 = vadd.f32 %v1609_v46, %v7435_v25  ;;  %v4042_v46 = vrot.slane %v4040_v37, 4  ;;  %v3151_v25 = vsel %vm6563_vm13, %v5484_v27, %v3150_v60  ;;  %v3792_v27 = vld [vmem:[#allocation2 + $0x90] sm:$0xf] }
 0x230   : > { %v2302_v32 = vpop.f32.mrf.mxu3  ;;  %v3232_v60 = vunpack.c.l.b16 %v3151_v25 }
 0x231   : > { %v2337_v49 = vadd.f32 %v2302_v32, %v2023_v9  ;;  %v4227_v9 = vunpack.c.l.b16 %v4015_v16  ;;  %v7156_v32 = vrot.slane %v4036_v14, 5  ;;  %v3154_v16 = vsel %vm6563_vm13, %v3152_v36, %v3153_v2 }
 0x232   : > { %3374 = vmatmul.bf16.gmra.mxu1 %v3254_v5  ;;  %v4568_v5 = vrot.slane %v4566_v21, 4  ;;  %v4653_v36 = vunpack.c.l.b16 %v4567_v6  ;;  %v4034_v21 = vrot.slane %v4033_v39, 4 }
 0x233   : > { %v1990_v56 = vpop.f32.mrf.mxu2  ;;  %v4251_v44 = vpack.c.b16 %v4228_v30, %v4227_v9  ;;  %v4043_v14 = vor.u32 %v4042_v46, %v7156_v32  ;;  %v7174_v9 = vld [vmem:[#allocation2 + $0x94] sm:$0xf]  ;;  %v5965_v46 = vld [vmem:[#allocation2 + $0x88] sm:$0xf] }
 0x234   : > { %v2024_v7 = vadd.f32 %v1990_v56, %v1610_v35  ;;  %v4570_v37 = vsel %vm6563_vm13, %v4568_v5, %v4569_v55  ;;  %v3233_v35 = vunpack.c.l.b16 %v3154_v16  ;;  %v3157_v5 = vrot.slane %v5965_v46, 5 }
 0x235   : > { %v2984_v34 = vpop.f32.mrf.mxu0  ;;  %v4654_v2 = vunpack.c.l.b16 %v4570_v37  ;;  %v4054_v55 = vshll.u32 %v3792_v27, 16  ;;  %v4060_v25 = vshll.u32 %v7174_v9, 16  ;;  %v4064_v16 = vshrl.u32 %v7174_v9, 16 }
 0x236   : > { %v7161_v10 = vadd.f32 %v2984_v34, %v2337_v49  ;;  %v4046_v49 = vshll.u32 %v7159_v38, 16  ;;  %v3255_v58 = vpack.c.b16 %v3233_v35, %v3232_v60  ;;  %v4051_v34 = vshrl.u32 %v3792_v27, 16  ;;  %v5966_v60 = vld [vmem:[#allocation2 + $0x8c] sm:$0x1] }
 0x237   : > { %v3337_v1 = vpop.f32.mrf.mxu1  ;;  %v4039_v6 = vsel %vm6097_vm10, %v4034_v21, %v7156_v32  ;;  %v3159_v37 = vrot.slane %v3157_v5, 4  ;;  %v3160_v35 = vrot.slane %v5966_v60, 5  ;;  %v7437_v27 = vld [vmem:[#allocation5_spill] sm:$0xff] }
 0x238   : > { %4792 = vmatmul.bf16.gmra.mxu0 %v4676_v51  ;;  %v2304_v52 = vpop.f32.mrf.mxu3  ;;  %3689 = vmatmul.bf16.gmra.mxu2 %v5855_v0  ;;  %v3415_v51 = vadd.f32 %v3335_v8, %v6777_v31  ;;  %v4048_v0 = vrot.slane %v4046_v49, 5  ;;  %v3031_v8 = vld [vmem:[#allocation2 + $0x84] sm:$0xe]  ;;  %v4053_v39 = vrot.slane %v4051_v34, 4  ;;  %v4229_v21 = vunpack.c.l.b16 %v4039_v6 }
 0x239   : > { %v2338_v3 = vadd.f32 %v2304_v52, %v2024_v7  ;;  %v4044_v7 = vrot.slane %v4043_v14, 4  ;;  %v4677_v52 = vpack.c.b16 %v4654_v2, %v4653_v36  ;;  %v5485_v49 = vrot.slane %v3031_v8, 9  ;;  %v5856_v36 = vld [vmem:[#allocation2 + $0x84] sm:$0xff] }
 0x23a   : > { %v4573_v2 = vrot.slane %v7143_v4, 5  ;;  %v4576_v6 = vrot.slane %v7159_v38, 5 }
 0x23b   : > { %v3650_v56 = vpop.f32.mrf.mxu2  ;;  %v3158_v4 = vsel %vm6563_vm13, %v5485_v49, %v3157_v5 }
 0x23c   : > { %v3730_v30 = vadd.f32 %v3650_v56, %v3415_v51  ;;  %v4056_v56 = vrot.slane %v4054_v55, 5  ;;  %v3416_v51 = vadd.f32 %v3337_v1, %v7437_v27  ;;  %v3234_v27 = vunpack.c.l.b16 %v3158_v4 }
 0x23d   : > { %v2986_v15 = vpop.f32.mrf.mxu0  ;;  %4371 = vmatmul.bf16.gmra.mxu3 %v4251_v44 }
 0x23e   : > { %v7176_v50 = vadd.f32 %v2986_v15, %v2338_v3  ;;  %v4049_v3 = vsel %vm6097_vm10, %v4044_v7, %v4048_v0  ;;  %v4453_v15 = vld [vmem:[#allocation2 + $0x84] sm:$0xe]  ;;  %v7195_v0 = vld [vmem:[#allocation2 + $0x98] sm:$0x1]  ;;  %v4057_v8 = vor.u32 %v4056_v56, %v4053_v39 }
 0x23f   : > { %v3340_v20 = vpop.f32.mrf.mxu1  ;;  %v4230_v7 = vunpack.c.l.b16 %v4049_v3  ;;  %v5708_v46 = vrot.slane %v4453_v15, 9 }
 0x240   : > { %7436 = vst [vmem:[#allocation3_spill] sm:$0xff] %v7176_v50  ;;  %v4332_v31 = vpop.f32.mrf.mxu3  ;;  %v4058_v39 = vrot.slane %v4057_v8, 4 }
 0x241   : > { %v4412_v44 = vadd.f32 %v4332_v31, %v3730_v30  ;;  %v7188_v30 = vrot.slane %v4060_v25, 5  ;;  %v3161_v31 = vsel %vm6563_vm13, %v3159_v37, %v3160_v35  ;;  %v4574_v5 = vsel %vm6563_vm13, %v5708_v46, %v4573_v2 }
 0x242   : > { %3379 = vmatmul.bf16.gmra.mxu1 %v3255_v58  ;;  %v4066_v58 = vrot.slane %v4064_v16, 4  ;;  %v4575_v16 = vrot.slane %v4573_v2, 4 }
 0x243   : > { %v3652_v14 = vpop.f32.mrf.mxu2 }
 0x244   : > { %v3731_v1 = vadd.f32 %v3652_v14, %v3416_v51  ;;  %v4067_v3 = vor.u32 %v4066_v58, %v7188_v30  ;;  %v4252_v14 = vpack.c.b16 %v4230_v7, %v4229_v21  ;;  %v3235_v51 = vunpack.c.l.b16 %v3161_v31  ;;  %v7210_v21 = vld [vmem:[#allocation2 + $0xa0] sm:$0xf] }
 0x245   : > { %v4758_v32 = vpop.f32.mrf.mxu0  ;;  %v4577_v37 = vsel %vm6563_vm13, %v4575_v16, %v4576_v6  ;;  %v4655_v7 = vunpack.c.l.b16 %v4574_v5  ;;  %v3032_v6 = vld [vmem:[#allocation2 + $0x90] sm:$0xe] }
 0x246   : > { %v4838_v34 = vadd.f32 %v4758_v32, %v4412_v44  ;;  %v4070_v44 = vshll.u32 %v7195_v0, 16  ;;  %v4068_v35 = vrot.slane %v4067_v3, 4  ;;  %v3256_v58 = vpack.c.b16 %v3235_v51, %v3234_v27  ;;  %v3795_v32 = vld [vmem:[#allocation2 + $0x9c] sm:$0xf] }
 0x247   : > { %v3342_v55 = vpop.f32.mrf.mxu1  ;;  %v4656_v2 = vunpack.c.l.b16 %v4577_v37  ;;  %v4075_v3 = vshrl.u32 %v3795_v32, 16 }
 0x248   : > { %4797 = vmatmul.bf16.gmra.mxu0 %v4677_v52  ;;  %4870 = vst [vmem:[%s7193_s19] sm:$0xff] %v4838_v34  ;;  %v4334_v25 = vpop.f32.mrf.mxu3  ;;  %3694 = vmatmul.bf16.gmra.mxu2 %v5856_v36  ;;  %v3417_v52 = vadd.f32 %v3340_v20, %v6801_v12  ;;  %v4072_v38 = vrot.slane %v4070_v44, 5  ;;  %v4063_v12 = vsel %vm6097_vm10, %v4058_v39, %v7188_v30  ;;  %v5967_v20 = vld [vmem:[#allocation2 + $0x94] sm:$0xf]  ;;  %v4078_v44 = vshll.u32 %v3795_v32, 16 }
 0x249   : > { %v4413_v60 = vadd.f32 %v4334_v25, %v3731_v1  ;;  %v3164_v46 = vrot.slane %v5967_v20, 5  ;;  %v4940_v4 = vmul.f32 %v4838_v34, %v4838_v34  ;;  %v4678_v30 = vpack.c.b16 %v4656_v2, %v4655_v7 }
 0x24a   : > { %v4073_v16 = vsel %vm6097_vm10, %v4068_v35, %v4072_v38  ;;  %v3418_v37 = vadd.f32 %v3342_v55, %v6812_v63  ;;  %v4231_v35 = vunpack.c.l.b16 %v4063_v12  ;;  %v4580_v32 = vrot.slane %v7174_v9, 5 }
 0x24b   : > { %v3655_v49 = vpop.f32.mrf.mxu2  ;;  %v3166_v39 = vrot.slane %v3164_v46, 4  ;;  %v4232_v38 = vunpack.c.l.b16 %v4073_v16  ;;  %v4077_v50 = vrot.slane %v4075_v3, 4 }
 0x24c   : > { %v3732_v15 = vadd.f32 %v3655_v49, %v3417_v52  ;;  %v5486_v49 = vrot.slane %v3032_v6, 9  ;;  %v4582_v3 = vrot.slane %v4580_v32, 4 }
 0x24d   : > { %v4760_v56 = vpop.f32.mrf.mxu0  ;;  %4376 = vmatmul.bf16.gmra.mxu3 %v4252_v14  ;;  %v4084_v14 = vshll.u32 %v7210_v21, 16 }
 0x24e   : > { %v4839_v36 = vadd.f32 %v4760_v56, %v4413_v60  ;;  %v4088_v60 = vshrl.u32 %v7210_v21, 16  ;;  %v5857_v56 = vld [vmem:[#allocation2 + $0x90] sm:$0xff]  ;;  %v3165_v63 = vsel %vm6563_vm13, %v5486_v49, %v3164_v46 }
 0x24f   : > { %v3345_v1 = vpop.f32.mrf.mxu1  ;;  %v3236_v49 = vunpack.c.l.b16 %v3165_v63 }
 0x250   : > { %4871 = vst [vmem:[%s7193_s19 + $0x8] sm:$0xff] %v4839_v36  ;;  %v4902_v31 = vadd.f32 %v4839_v36, %v4838_v34  ;;  %v4941_v8 = vmul.f32 %v4839_v36, %v4839_v36  ;;  %v4337_v25 = vpop.f32.mrf.mxu3  ;;  %v5968_v34 = vld [vmem:[#allocation2 + $0x98] sm:$0x1]  ;;  %v4454_v36 = vld [vmem:[#allocation2 + $0x90] sm:$0xe] }
 0x251   : > { %v4414_v51 = vadd.f32 %v4337_v25, %v3732_v15  ;;  %v3167_v52 = vrot.slane %v5968_v34, 5  ;;  %v7222_v15 = vrot.slane %v4084_v14, 5  ;;  %v5709_v25 = vrot.slane %v4454_v36, 9 }
 0x252   : > { %v4972_v27 = vadd.f32 %v4941_v8, %v4940_v4  ;;  %3384 = vmatmul.bf16.gmra.mxu1 %v3256_v58  ;;  %v4080_v4 = vrot.slane %v4078_v44, 5  ;;  %v4090_v58 = vrot.slane %v4088_v60, 4  ;;  %v7224_v8 = vld [vmem:[#allocation2 + $0xa4] sm:$0x1]  ;;  %v4583_v44 = vrot.slane %v7195_v0, 5 }
 0x253   : > { %v3657_v5 = vpop.f32.mrf.mxu2  ;;  %v3168_v55 = vsel %vm6563_vm13, %v3166_v39, %v3167_v52  ;;  %v4253_v14 = vpack.c.b16 %v4232_v38, %v4231_v35  ;;  %v4581_v52 = vsel %vm6563_vm13, %v5709_v25, %v4580_v32 }
 0x254   : > { %v3733_v2 = vadd.f32 %v3657_v5, %v3418_v37  ;;  %v4081_v60 = vor.u32 %v4080_v4, %v4077_v50  ;;  %v4094_v5 = vshll.u32 %v7224_v8, 16  ;;  %v3237_v37 = vunpack.c.l.b16 %v3168_v55 }
 0x255   : > { %v4763_v20 = vpop.f32.mrf.mxu0  ;;  %v4584_v0 = vsel %vm6563_vm13, %v4582_v3, %v4583_v44 }
 0x256   : > { %v4840_v7 = vadd.f32 %v4763_v20, %v4414_v51  ;;  %v4091_v51 = vor.u32 %v4090_v58, %v7222_v15  ;;  %v4082_v50 = vrot.slane %v4081_v60, 4  ;;  %v4096_v38 = vrot.slane %v4094_v5, 5 }
 0x257   : > { %v3347_v6 = vpop.f32.mrf.mxu1  ;;  %v3257_v4 = vpack.c.b16 %v3237_v37, %v3236_v49  ;;  %v4587_v60 = vrot.slane %v7210_v21, 5 }
 0x258   : > { %4802 = vmatmul.bf16.gmra.mxu0 %v4678_v30  ;;  %4872 = vst [vmem:[%s7193_s19 + $0x10] sm:$0xff] %v4840_v7  ;;  %v4903_v9 = vadd.f32 %v4902_v31, %v4840_v7  ;;  %v4942_v12 = vmul.f32 %v4840_v7, %v4840_v7  ;;  %v4339_v16 = vpop.f32.mrf.mxu3  ;;  %3699 = vmatmul.bf16.gmra.mxu2 %v5857_v56  ;;  %v3798_v30 = vld [vmem:[#allocation2 + $0xa8] sm:$0xf]  ;;  %v4092_v35 = vrot.slane %v4091_v51, 4  ;;  %v4657_v7 = vunpack.c.l.b16 %v4581_v52 }
 0x259   : > { %v4415_v46 = vadd.f32 %v4339_v16, %v3733_v2  ;;  %v3419_v31 = vadd.f32 %v3345_v1, %v6818_v17  ;;  %v4099_v58 = vshrl.u32 %v3798_v30, 16  ;;  %v4658_v17 = vunpack.c.l.b16 %v4584_v0  ;;  %v5969_v2 = vld [vmem:[#allocation2 + $0xa0] sm:$0xf]  ;;  %v3033_v16 = vld [vmem:[#allocation2 + $0x9c] sm:$0xe] }
 0x25a   : > { %v4973_v34 = vadd.f32 %v4972_v27, %v4942_v12  ;;  %v7239_v27 = vld [vmem:[#allocation2 + $0xac] sm:$0xf]  ;;  %v3171_v32 = vrot.slane %v5969_v2, 5  ;;  %v4102_v25 = vshll.u32 %v3798_v30, 16 }
 0x25b   : > { %v3660_v39 = vpop.f32.mrf.mxu2  ;;  %v4108_v3 = vshll.u32 %v7239_v27, 16  ;;  %v4112_v44 = vshrl.u32 %v7239_v27, 16  ;;  %v4101_v49 = vrot.slane %v4099_v58, 4 }
 0x25c   : > { %v3734_v20 = vadd.f32 %v3660_v39, %v3419_v31  ;;  %v5487_v39 = vrot.slane %v3033_v16, 9  ;;  %v3173_v30 = vrot.slane %v3171_v32, 4  ;;  %v5970_v31 = vld [vmem:[#allocation2 + $0xa4] sm:$0x1]  ;;  %v4104_v0 = vrot.slane %v4102_v25, 5 }
 0x25d   : > { %v4765_v56 = vpop.f32.mrf.mxu0  ;;  %4381 = vmatmul.bf16.gmra.mxu3 %v4253_v14  ;;  %v4087_v14 = vsel %vm6097_vm10, %v4082_v50, %v7222_v15  ;;  %v3174_v52 = vrot.slane %v5970_v31, 5  ;;  %v5858_v15 = vld [vmem:[#allocation2 + $0x9c] sm:$0xff]  ;;  %v7251_v50 = vld [vmem:[#allocation2 + $0xb0] sm:$0x1]  ;;  %v7253_v21 = vrot.slane %v4108_v3, 5  ;;  %v4590_v16 = vrot.slane %v7224_v8, 5 }
 0x25e   : > { %v4841_v36 = vadd.f32 %v4765_v56, %v4415_v46  ;;  %v4097_v46 = vsel %vm6097_vm10, %v4092_v35, %v4096_v38  ;;  %v4679_v56 = vpack.c.b16 %v4658_v17, %v4657_v7  ;;  %v4233_v35 = vunpack.c.l.b16 %v4087_v14 }
 0x25f   : > { %v3350_v1 = vpop.f32.mrf.mxu1  ;;  %v4234_v38 = vunpack.c.l.b16 %v4097_v46  ;;  %v3175_v7 = vsel %vm6563_vm13, %v3173_v30, %v3174_v52  ;;  %v4105_v17 = vor.u32 %v4104_v0, %v4101_v49  ;;  %v4118_v3 = vshll.u32 %v7251_v50, 16  ;;  %v7439_v30 = vld [vmem:[#allocation7_spill] sm:$0xff] }
 0x260   : > { %4873 = vst [vmem:[%s7193_s19 + $0x18] sm:$0xff] %v4841_v36  ;;  %v4904_v63 = vadd.f32 %v4903_v9, %v4841_v36  ;;  %v4943_v55 = vmul.f32 %v4841_v36, %v4841_v36  ;;  %v4342_v12 = vpop.f32.mrf.mxu3  ;;  %v4455_v9 = vld [vmem:[#allocation2 + $0x9c] sm:$0xe]  ;;  %v7438_v36 = vld [vmem:[#allocation6_spill] sm:$0xff]  ;;  %v3421_v52 = vadd.f32 %v3350_v1, %v7439_v30 }
 0x261   : > { %v4416_v5 = vadd.f32 %v4342_v12, %v3734_v20  ;;  %v3420_v2 = vadd.f32 %v3347_v6, %v7438_v36  ;;  %v4589_v12 = vrot.slane %v4587_v60, 4  ;;  %v3172_v6 = vsel %vm6563_vm13, %v5487_v39, %v3171_v32 }
 0x262   : > { %v4974_v51 = vadd.f32 %v4973_v34, %v4943_v55  ;;  %3389 = vmatmul.bf16.gmra.mxu1 %v3257_v4  ;;  %v4114_v34 = vrot.slane %v4112_v44, 4  ;;  %v5710_v4 = vrot.slane %v4455_v9, 9  ;;  %v4254_v9 = vpack.c.b16 %v4234_v38, %v4233_v35  ;;  %v7268_v35 = vld [vmem:[#allocation2 + $0xb8] sm:$0xf] }
 0x263   : > { %v3662_v37 = vpop.f32.mrf.mxu2  ;;  %v3238_v31 = vunpack.c.l.b16 %v3172_v6  ;;  %v3239_v36 = vunpack.c.l.b16 %v3175_v7  ;;  %v4591_v49 = vsel %vm6563_vm13, %v4589_v12, %v4590_v16 }
 0x264   : > { %v3735_v55 = vadd.f32 %v3662_v37, %v3420_v2  ;;  %v4588_v32 = vsel %vm6563_vm13, %v5710_v4, %v4587_v60  ;;  %v4660_v60 = vunpack.c.l.b16 %v4591_v49  ;;  %v5972_v49 = vld [vmem:[#allocation2 + $0xb0] sm:$0x1] }
 0x265   : > { %v4768_v20 = vpop.f32.mrf.mxu0  ;;  %v4659_v38 = vunpack.c.l.b16 %v4588_v32 }
 0x266   : > { %v4842_v58 = vadd.f32 %v4768_v20, %v4416_v5  ;;  %v4115_v5 = vor.u32 %v4114_v34, %v7253_v21  ;;  %v3258_v34 = vpack.c.b16 %v3239_v36, %v3238_v31  ;;  %v3801_v20 = vld [vmem:[#allocation2 + $0xb4] sm:$0xf] }
 0x267   : > { %v3352_v25 = vpop.f32.mrf.mxu1 }
 0x268   : > { %4807 = vmatmul.bf16.gmra.mxu0 %v4679_v56  ;;  %4874 = vst [vmem:[%s7193_s19 + $0x20] sm:$0xff] %v4842_v58  ;;  %v4905_v44 = vadd.f32 %v4904_v63, %v4842_v58  ;;  %v4944_v14 = vmul.f32 %v4842_v58, %v4842_v58  ;;  %v4344_v46 = vpop.f32.mrf.mxu3  ;;  %3704 = vmatmul.bf16.gmra.mxu2 %v5858_v15  ;;  %v4106_v63 = vrot.slane %v4105_v17, 4  ;;  %v4116_v0 = vrot.slane %v4115_v5, 4  ;;  %v5971_v58 = vld [vmem:[#allocation2 + $0xac] sm:$0xf] }
 0x269   : > { %v4417_v37 = vadd.f32 %v4344_v46, %v3735_v55  ;;  %v4120_v56 = vrot.slane %v4118_v3, 5  ;;  %v3178_v55 = vrot.slane %v5971_v58, 5  ;;  %v3034_v17 = vld [vmem:[#allocation2 + $0xa8] sm:$0xe]  ;;  %v4123_v3 = vshrl.u32 %v3801_v20, 16 }
 0x26a   : > { %v4975_v8 = vadd.f32 %v4974_v51, %v4944_v14  ;;  %v4111_v6 = vsel %vm6097_vm10, %v4106_v63, %v7253_v21  ;;  %v4126_v14 = vshll.u32 %v3801_v20, 16  ;;  %v4132_v46 = vshll.u32 %v7268_v35, 16  ;;  %v7440_v21 = vld [vmem:[#allocation8_spill] sm:$0xff]  ;;  %v7282_v58 = vld [vmem:[#allocation2 + $0xbc] sm:$0x1] }
 0x26b   : > { %v3665_v39 = vpop.f32.mrf.mxu2  ;;  %v4121_v7 = vsel %vm6097_vm10, %v4116_v0, %v4120_v56  ;;  %v4136_v5 = vshrl.u32 %v7268_v35, 16  ;;  %v5488_v36 = vrot.slane %v3034_v17, 9  ;;  %v3180_v32 = vrot.slane %v3178_v55, 4  ;;  %v4456_v56 = vld [vmem:[#allocation2 + $0xa8] sm:$0xe] }
 0x26c   : > { %v3736_v51 = vadd.f32 %v3665_v39, %v3421_v52  ;;  %v3181_v39 = vrot.slane %v5972_v49, 5  ;;  %v3422_v30 = vadd.f32 %v3352_v25, %v7440_v21  ;;  %v5859_v52 = vld [vmem:[#allocation2 + $0xa8] sm:$0xff]  ;;  %v4235_v63 = vunpack.c.l.b16 %v4111_v6 }
 0x26d   : > { %v4770_v2 = vpop.f32.mrf.mxu0  ;;  %4386 = vmatmul.bf16.gmra.mxu3 %v4254_v9  ;;  %v4236_v0 = vunpack.c.l.b16 %v4121_v7  ;;  %v4125_v20 = vrot.slane %v4123_v3, 4  ;;  %v3179_v25 = vsel %vm6563_vm13, %v5488_v36, %v3178_v55 }
 0x26e   : > { %v4843_v15 = vadd.f32 %v4770_v2, %v4417_v37  ;;  %v4594_v2 = vrot.slane %v7239_v27, 5  ;;  %v3182_v6 = vsel %vm6563_vm13, %v3180_v32, %v3181_v39  ;;  %v3240_v36 = vunpack.c.l.b16 %v3179_v25 }
 0x26f   : > { %v3355_v4 = vpop.f32.mrf.mxu1  ;;  %v3241_v21 = vunpack.c.l.b16 %v3182_v6 }
 0x270   : > { %4875 = vst [vmem:[%s7193_s19 + $0x28] sm:$0xff] %v4843_v15  ;;  %v4906_v12 = vadd.f32 %v4905_v44, %v4843_v15  ;;  %v4945_v1 = vmul.f32 %v4843_v15, %v4843_v15  ;;  %v4347_v16 = vpop.f32.mrf.mxu3  ;;  %v4680_v44 = vpack.c.b16 %v4660_v60, %v4659_v38  ;;  %v4596_v3 = vrot.slane %v4594_v2, 4 }
 0x271   : > { %v4418_v37 = vadd.f32 %v4347_v16, %v3736_v51  ;;  %v7280_v51 = vrot.slane %v4132_v46, 5  ;;  %v4255_v46 = vpack.c.b16 %v4236_v0, %v4235_v63 }
 0x272   : > { %v4976_v9 = vadd.f32 %v4975_v8, %v4945_v1  ;;  %3394 = vmatmul.bf16.gmra.mxu1 %v3258_v34  ;;  %v4128_v8 = vrot.slane %v4126_v14, 5  ;;  %v4138_v34 = vrot.slane %v4136_v5, 4  ;;  %v5711_v1 = vrot.slane %v4456_v56, 9 }
 0x273   : > { %v3667_v31 = vpop.f32.mrf.mxu2  ;;  %v4597_v14 = vrot.slane %v7251_v50, 5 }
 0x274   : > { %v3737_v60 = vadd.f32 %v3667_v31, %v3422_v30  ;;  %v4129_v5 = vor.u32 %v4128_v8, %v4125_v20  ;;  %v4142_v31 = vshll.u32 %v7282_v58, 16  ;;  %v4595_v39 = vsel %vm6563_vm13, %v5711_v1, %v4594_v2 }
 0x275   : > { %v4773_v15 = vpop.f32.mrf.mxu0  ;;  %v4598_v50 = vsel %vm6563_vm13, %v4596_v3, %v4597_v14  ;;  %v3259_v20 = vpack.c.b16 %v3241_v21, %v3240_v36 }
 0x276   : > { %v4844_v38 = vadd.f32 %v4773_v15, %v4418_v37  ;;  %v4139_v37 = vor.u32 %v4138_v34, %v7280_v51  ;;  %v4144_v0 = vrot.slane %v4142_v31, 5  ;;  %v4661_v34 = vunpack.c.l.b16 %v4595_v39 }
 0x277   : > { %v3357_v16 = vpop.f32.mrf.mxu1 }
 0x278   : > { %4812 = vmatmul.bf16.gmra.mxu0 %v4680_v44  ;;  %4876 = vst [vmem:[%s7193_s19 + $0x30] sm:$0xff] %v4844_v38  ;;  %v4907_v27 = vadd.f32 %v4906_v12, %v4844_v38  ;;  %v4946_v7 = vmul.f32 %v4844_v38, %v4844_v38  ;;  %v4349_v17 = vpop.f32.mrf.mxu3  ;;  %3709 = vmatmul.bf16.gmra.mxu2 %v5859_v52  ;;  %v3804_v44 = vld [vmem:[#allocation2 + $0xc0] sm:$0xf]  ;;  %v4130_v52 = vrot.slane %v4129_v5, 4  ;;  %v4140_v63 = vrot.slane %v4139_v37, 4 }
 0x279   : > { %v4419_v55 = vadd.f32 %v4349_v17, %v3737_v60  ;;  %v3423_v12 = vadd.f32 %v3355_v4, %v6864_v19  ;;  %v4147_v8 = vshrl.u32 %v3804_v44, 16  ;;  %v4662_v19 = vunpack.c.l.b16 %v4598_v50  ;;  %v5973_v38 = vld [vmem:[#allocation2 + $0xb8] sm:$0xf] }
 0x27a   : > { %v4977_v49 = vadd.f32 %v4976_v9, %v4946_v7  ;;  %v7297_v9 = vld [vmem:[#allocation2 + $0xc4] sm:$0xf]  ;;  %v3185_v2 = vrot.slane %v5973_v38, 5  ;;  %v4150_v60 = vshll.u32 %v3804_v44, 16  ;;  %v3035_v7 = vld [vmem:[#allocation2 + $0xb4] sm:$0xe]  ;;  %v4135_v14 = vsel %vm6097_vm10, %v4130_v52, %v7280_v51 }
 0x27b   : > { %v3670_v32 = vpop.f32.mrf.mxu2  ;;  %v4156_v17 = vshll.u32 %v7297_v9, 16  ;;  %v4160_v3 = vshrl.u32 %v7297_v9, 16  ;;  %v4145_v31 = vsel %vm6097_vm10, %v4140_v63, %v4144_v0  ;;  %v5489_v21 = vrot.slane %v3035_v7, 9  ;;  %v5974_v44 = vld [vmem:[#allocation2 + $0xbc] sm:$0x1]  ;;  %v5860_v51 = vld [vmem:[#allocation2 + $0xb4] sm:$0xff] }
 0x27c   : > { %v3738_v15 = vadd.f32 %v3670_v32, %v3423_v12  ;;  %v3187_v32 = vrot.slane %v3185_v2, 4  ;;  %v3188_v12 = vrot.slane %v5974_v44, 5  ;;  %v4152_v39 = vrot.slane %v4150_v60, 5  ;;  %v7309_v52 = vld [vmem:[#allocation2 + $0xc8] sm:$0x1] }
 0x27d   : > { %v4775_v30 = vpop.f32.mrf.mxu0  ;;  %4391 = vmatmul.bf16.gmra.mxu3 %v4255_v46  ;;  %v4601_v46 = vrot.slane %v7268_v35, 5  ;;  %v4681_v50 = vpack.c.b16 %v4662_v19, %v4661_v34  ;;  %v7311_v35 = vrot.slane %v4156_v17, 5  ;;  %v4237_v63 = vunpack.c.l.b16 %v4135_v14 }
 0x27e   : > { %v4845_v56 = vadd.f32 %v4775_v30, %v4419_v55  ;;  %v4149_v55 = vrot.slane %v4147_v8, 4  ;;  %v3424_v30 = vadd.f32 %v3357_v16, %v6889_v13  ;;  %v4238_v0 = vunpack.c.l.b16 %v4145_v31 }
 0x27f   : > { %v3360_v4 = vpop.f32.mrf.mxu1  ;;  %v4603_v38 = vrot.slane %v4601_v46, 4  ;;  %v3186_v13 = vsel %vm6563_vm13, %v5489_v21, %v3185_v2  ;;  %v3189_v16 = vsel %vm6563_vm13, %v3187_v32, %v3188_v12  ;;  %v4166_v19 = vshll.u32 %v7309_v52, 16 }
 0x280   : > { %4877 = vst [vmem:[%s7193_s19 + $0x38] sm:$0xff] %v4845_v56  ;;  %v4908_v1 = vadd.f32 %v4907_v27, %v4845_v56  ;;  %v4947_v25 = vmul.f32 %v4845_v56, %v4845_v56  ;;  %v4352_v6 = vpop.f32.mrf.mxu3  ;;  %v4457_v27 = vld [vmem:[#allocation2 + $0xb4] sm:$0xe]  ;;  %v4153_v34 = vor.u32 %v4152_v39, %v4149_v55  ;;  %v4256_v14 = vpack.c.b16 %v4238_v0, %v4237_v63  ;;  %v5975_v63 = vld [vmem:[#allocation2 + $0xc4] sm:$0xf] }
 0x281   : > { %v4420_v37 = vadd.f32 %v4352_v6, %v3738_v15  ;;  %v5712_v15 = vrot.slane %v4457_v27, 9  ;;  %v3242_v31 = vunpack.c.l.b16 %v3186_v13  ;;  %v3243_v27 = vunpack.c.l.b16 %v3189_v16 }
 0x282   : > { %v4978_v5 = vadd.f32 %v4977_v49, %v4947_v25  ;;  %3399 = vmatmul.bf16.gmra.mxu1 %v3259_v20  ;;  %v4162_v49 = vrot.slane %v4160_v3, 4  ;;  %v4604_v25 = vrot.slane %v7282_v58, 5  ;;  %v3425_v21 = vadd.f32 %v3360_v4, %v6892_v53 }
 0x283   : > { %v3672_v36 = vpop.f32.mrf.mxu2  ;;  %v4602_v2 = vsel %vm6563_vm13, %v5712_v15, %v4601_v46  ;;  %v4168_v44 = vrot.slane %v4166_v19, 5  ;;  %v3192_v0 = vrot.slane %v5975_v63, 5 }
 0x284   : > { %v3739_v8 = vadd.f32 %v3672_v36, %v3424_v30  ;;  %v4163_v3 = vor.u32 %v4162_v49, %v7311_v35  ;;  %v4605_v55 = vsel %vm6563_vm13, %v4603_v38, %v4604_v25  ;;  %v3807_v30 = vld [vmem:[#allocation2 + $0xcc] sm:$0xf]  ;;  %v4663_v49 = vunpack.c.l.b16 %v4602_v2  ;;  %v3036_v38 = vld [vmem:[#allocation2 + $0xc0] sm:$0xe] }
 0x285   : > { %v4778_v56 = vpop.f32.mrf.mxu0  ;;  %v4664_v46 = vunpack.c.l.b16 %v4605_v55  ;;  %v4171_v25 = vshrl.u32 %v3807_v30, 16  ;;  %v4174_v13 = vshll.u32 %v3807_v30, 16 }
 0x286   : > { %v4846_v20 = vadd.f32 %v4778_v56, %v4420_v37  ;;  %v4164_v32 = vrot.slane %v4163_v3, 4  ;;  %v5490_v3 = vrot.slane %v3036_v38, 9 }
 0x287   : > { %v3362_v60 = vpop.f32.mrf.mxu1 }
 0x288   : > { %4817 = vmatmul.bf16.gmra.mxu0 %v4681_v50  ;;  %4878 = vst [vmem:[%s7193_s19 + $0x40] sm:$0xff] %v4846_v20  ;;  %v4909_v6 = vadd.f32 %v4908_v1, %v4846_v20  ;;  %v4948_v7 = vmul.f32 %v4846_v20, %v4846_v20  ;;  %v4354_v17 = vpop.f32.mrf.mxu3  ;;  %3714 = vmatmul.bf16.gmra.mxu2 %v5860_v51  ;;  %v4154_v1 = vrot.slane %v4153_v34, 4  ;;  %v7326_v51 = vld [vmem:[#allocation2 + $0xd0] sm:$0xf] }
 0x289   : > { %v4421_v37 = vadd.f32 %v4354_v17, %v3739_v8  ;;  %v3260_v50 = vpack.c.b16 %v3243_v27, %v3242_v31  ;;  %v4169_v8 = vsel %vm6097_vm10, %v4164_v32, %v4168_v44  ;;  %v4180_v16 = vshll.u32 %v7326_v51, 16  ;;  %v5861_v27 = vld [vmem:[#allocation2 + $0xc0] sm:$0xff] }
 0x28a   : > { %v4979_v58 = vadd.f32 %v4978_v5, %v4948_v7  ;;  %v4159_v20 = vsel %vm6097_vm10, %v4154_v1, %v7311_v35  ;;  %v4184_v34 = vshrl.u32 %v7326_v51, 16  ;;  %v3426_v35 = vadd.f32 %v3362_v60, %v6903_v28 }
 0x28b   : > { %v3675_v36 = vpop.f32.mrf.mxu2  ;;  %v4239_v2 = vunpack.c.l.b16 %v4159_v20  ;;  %v4240_v55 = vunpack.c.l.b16 %v4169_v8  ;;  %v4173_v32 = vrot.slane %v4171_v25, 4  ;;  %v4182_v44 = vrot.slane %v4180_v16, 5 }
 0x28c   : > { %v3740_v5 = vadd.f32 %v3675_v36, %v3425_v21  ;;  %v4458_v36 = vld [vmem:[#allocation2 + $0xc0] sm:$0xe]  ;;  %v4608_v21 = vrot.slane %v7297_v9, 5  ;;  %v3193_v28 = vsel %vm6563_vm13, %v5490_v3, %v3192_v0 }
 0x28d   : > { %v4780_v12 = vpop.f32.mrf.mxu0  ;;  %4396 = vmatmul.bf16.gmra.mxu3 %v4256_v14  ;;  %v3194_v14 = vrot.slane %v3192_v0, 4  ;;  %v5713_v30 = vrot.slane %v4458_v36, 9  ;;  %v4257_v20 = vpack.c.b16 %v4240_v55, %v4239_v2  ;;  %v3244_v0 = vunpack.c.l.b16 %v3193_v28 }
 0x28e   : > { %v4847_v39 = vadd.f32 %v4780_v12, %v4421_v37  ;;  %v5976_v37 = vld [vmem:[#allocation2 + $0xc8] sm:$0x1]  ;;  %v4186_v12 = vrot.slane %v4184_v34, 4 }
 0x28f   : > { %v3365_v56 = vpop.f32.mrf.mxu1  ;;  %v3195_v31 = vrot.slane %v5976_v37, 5 }
 0x290   : > { %4879 = vst [vmem:[%s7193_s19 + $0x48] sm:$0xff] %v4847_v39  ;;  %v4910_v15 = vadd.f32 %v4909_v6, %v4847_v39  ;;  %v4949_v53 = vmul.f32 %v4847_v39, %v4847_v39  ;;  %v4357_v4 = vpop.f32.mrf.mxu3  ;;  %v4682_v6 = vpack.c.b16 %v4664_v46, %v4663_v49  ;;  %v4187_v38 = vor.u32 %v4186_v12, %v4182_v44 }
 0x291   : > { %v4422_v7 = vadd.f32 %v4357_v4, %v3740_v5  ;;  %v3196_v60 = vsel %vm6563_vm13, %v3194_v14, %v3195_v31  ;;  %v4611_v4 = vrot.slane %v7309_v52, 5 }
 0x292   : > { %v4980_v19 = vadd.f32 %v4979_v58, %v4949_v53  ;;  %3404 = vmatmul.bf16.gmra.mxu1 %v3260_v50  ;;  %v4176_v58 = vrot.slane %v4174_v13, 5  ;;  %v7338_v50 = vld [vmem:[#allocation2 + $0xd4] sm:$0x1]  ;;  %v4610_v53 = vrot.slane %v4608_v21, 4  ;;  %v3245_v34 = vunpack.c.l.b16 %v3196_v60 }
 0x293   : > { %v3677_v17 = vpop.f32.mrf.mxu2  ;;  %v4190_v25 = vshll.u32 %v7338_v50, 16  ;;  %v4188_v14 = vrot.slane %v4187_v38, 4 }
 0x294   : > { %v3741_v5 = vadd.f32 %v3677_v17, %v3426_v35  ;;  %v4177_v8 = vor.u32 %v4176_v58, %v4173_v32  ;;  %v4609_v17 = vsel %vm6563_vm13, %v5713_v30, %v4608_v21  ;;  %v4612_v52 = vsel %vm6563_vm13, %v4610_v53, %v4611_v4  ;;  %v5862_v30 = vld [vmem:[#allocation2 + $0xcc] sm:$0xff] }
 0x295   : > { %v4783_v1 = vpop.f32.mrf.mxu0  ;;  %v4192_v35 = vrot.slane %v4190_v25, 5  ;;  %v4665_v36 = vunpack.c.l.b16 %v4609_v17  ;;  %v4459_v4 = vld [vmem:[#allocation2 + $0xcc] sm:$0xe] }
 0x296   : > { %v4848_v39 = vadd.f32 %v4783_v1, %v4422_v7  ;;  %v4178_v3 = vrot.slane %v4177_v8, 4  ;;  %v5714_v25 = vrot.slane %v4459_v4, 9 }
 0x297   : > { %v3367_v49 = vpop.f32.mrf.mxu1  ;;  %v4193_v58 = vsel %vm6097_vm10, %v4188_v14, %v4192_v35 }
 0x298   : > { %4822 = vmatmul.bf16.gmra.mxu0 %v4682_v6  ;;  %4880 = vst [vmem:[%s7193_s19 + $0x50] sm:$0xff] %v4848_v39  ;;  %v4911_v9 = vadd.f32 %v4910_v15, %v4848_v39  ;;  %v4950_v46 = vmul.f32 %v4848_v39, %v4848_v39  ;;  %v4359_v63 = vpop.f32.mrf.mxu3  ;;  %3719 = vmatmul.bf16.gmra.mxu2 %v5861_v27 }
 0x299   : > { %v4423_v16 = vadd.f32 %v4359_v63, %v3741_v5  ;;  %v3427_v6 = vadd.f32 %v3365_v56, %v6914_v18  ;;  %v4666_v18 = vunpack.c.l.b16 %v4612_v52  ;;  %v4183_v21 = vsel %vm6097_vm10, %v4178_v3, %v4182_v44 }
 0x29a   : > { %v4981_v13 = vadd.f32 %v4980_v19, %v4950_v46  ;;  %v3261_v19 = vpack.c.b16 %v3245_v34, %v3244_v0  ;;  %v3428_v5 = vadd.f32 %v3367_v49, %v6924_v26  ;;  %v4241_v60 = vunpack.c.l.b16 %v4183_v21 }
 0x29b   : > { %v3680_v7 = vpop.f32.mrf.mxu2  ;;  %v4683_v39 = vpack.c.b16 %v4666_v18, %v4665_v36  ;;  %v4615_v46 = vrot.slane %v7326_v51, 5  ;;  %v4618_v49 = vrot.slane %v7338_v50, 5 }
 0x29c   : > { %v3742_v31 = vadd.f32 %v3680_v7, %v3427_v6 }
 0x29d   : > { %v4785_v15 = vpop.f32.mrf.mxu0  ;;  %4401 = vmatmul.bf16.gmra.mxu3 %v4257_v20  ;;  %v4617_v26 = vrot.slane %v4615_v46, 4  ;;  %v4616_v7 = vsel %vm6563_vm13, %v5714_v25, %v4615_v46 }
 0x29e   : > { %v4849_v37 = vadd.f32 %v4785_v15, %v4423_v16  ;;  %v4667_v14 = vunpack.c.l.b16 %v4616_v7 }
 0x29f   : > { %v3370_v27 = vpop.f32.mrf.mxu1  ;;  %v4619_v6 = vsel %vm6563_vm13, %v4617_v26, %v4618_v49 }
 0x2a0   : > { %4881 = vst [vmem:[%s7193_s19 + $0x58] sm:$0xff] %v4849_v37  ;;  %v4912_v2 = vadd.f32 %v4911_v9, %v4849_v37  ;;  %v4951_v55 = vmul.f32 %v4849_v37, %v4849_v37  ;;  %v4362_v56 = vpop.f32.mrf.mxu3  ;;  %v4242_v9 = vunpack.c.l.b16 %v4193_v58  ;;  %v3429_v51 = vadd.f32 %v3370_v27, %v6938_v45 }
 0x2a1   : > { %v4424_v32 = vadd.f32 %v4362_v56, %v3742_v31  ;;  %v4668_v37 = vunpack.c.l.b16 %v4619_v6 }
 0x2a2   : > { %v4982_v1 = vadd.f32 %v4981_v13, %v4951_v55  ;;  %3409 = vmatmul.bf16.gmra.mxu1 %v3261_v19  ;;  %v4258_v38 = vpack.c.b16 %v4242_v9, %v4241_v60 }
 0x2a3   : > { %v3682_v12 = vpop.f32.mrf.mxu2  ;;  %v4684_v27 = vpack.c.b16 %v4668_v37, %v4667_v14 }
 0x2a4   : > { %v3743_v53 = vadd.f32 %v3682_v12, %v3428_v5 }
 0x2a5   : > { %v4788_v28 = vpop.f32.mrf.mxu0 }
 0x2a6   : > { %v4850_v63 = vadd.f32 %v4788_v28, %v4424_v32 }
 0x2a7   : > { %v3372_v20 = vpop.f32.mrf.mxu1 }
 0x2a8   : > { %4827 = vmatmul.bf16.gmra.mxu0 %v4683_v39  ;;  %4882 = vst [vmem:[%s7193_s19 + $0x60] sm:$0xff] %v4850_v63  ;;  %v4913_v44 = vadd.f32 %v4912_v2, %v4850_v63  ;;  %v4952_v8 = vmul.f32 %v4850_v63, %v4850_v63  ;;  %v4364_v42 = vpop.f32.mrf.mxu3  ;;  %3724 = vmatmul.bf16.gmra.mxu2 %v5862_v30 }
 0x2a9   : > { %v4425_v16 = vadd.f32 %v4364_v42, %v3743_v53  ;;  %v3430_v2 = vadd.f32 %v3372_v20, %v6951_v41 }
 0x2aa   : > { %v4983_v13 = vadd.f32 %v4982_v1, %v4952_v8 }
 0x2ab   : > { %v3685_v0 = vpop.f32.mrf.mxu2 }
 0x2ac   : > { %v3744_v17 = vadd.f32 %v3685_v0, %v3429_v51 }
 0x2ad   : > { %v4790_v34 = vpop.f32.mrf.mxu0  ;;  %4406 = vmatmul.bf16.gmra.mxu3 %v4258_v38 }
 0x2ae   : > { %v4851_v15 = vadd.f32 %v4790_v34, %v4425_v16 }
 0x2af   : > { %v3375_v52 = vpop.f32.mrf.mxu1 }
 0x2b0   : > { %4883 = vst [vmem:[%s7193_s19 + $0x68] sm:$0xff] %v4851_v15  ;;  %v4914_v3 = vadd.f32 %v4913_v44, %v4851_v15  ;;  %v4953_v50 = vmul.f32 %v4851_v15, %v4851_v15  ;;  %v4367_v31 = vpop.f32.mrf.mxu3  ;;  %v3431_v39 = vadd.f32 %v3375_v52, %v6965_v23 }
 0x2b1   : > { %v4426_v45 = vadd.f32 %v4367_v31, %v3744_v17 }
 0x2b2   : > { %v4984_v19 = vadd.f32 %v4983_v13, %v4953_v50 }
 0x2b3   : > { %v3687_v35 = vpop.f32.mrf.mxu2 }
 0x2b4   : > { %v3745_v61 = vadd.f32 %v3687_v35, %v3430_v2 }
 0x2b5   : > { %v4793_v55 = vpop.f32.mrf.mxu0 }
 0x2b6   : > { %v4852_v36 = vadd.f32 %v4793_v55, %v4426_v45 }
 0x2b7   : > { %v3377_v18 = vpop.f32.mrf.mxu1 }
 0x2b8   : > { %4832 = vmatmul.bf16.gmra.mxu0 %v4684_v27  ;;  %4884 = vst [vmem:[%s7193_s19 + $0x70] sm:$0xff] %v4852_v36  ;;  %v4915_v56 = vadd.f32 %v4914_v3, %v4852_v36  ;;  %v4954_v1 = vmul.f32 %v4852_v36, %v4852_v36  ;;  %v4369_v32 = vpop.f32.mrf.mxu3  ;;  %v3432_v20 = vadd.f32 %v3377_v18, %v6978_v57 }
 0x2b9   : > { %v4427_v58 = vadd.f32 %v4369_v32, %v3745_v61 }
 0x2ba   : > { %v4985_v21 = vadd.f32 %v4984_v19, %v4954_v1 }
 0x2bb   : > { %v3690_v12 = vpop.f32.mrf.mxu2 }
 0x2bc   : > { %v3746_v28 = vadd.f32 %v3690_v12, %v3431_v39 }
 0x2bd   : > { %v4795_v5 = vpop.f32.mrf.mxu0 }
 0x2be   : > { %v4853_v30 = vadd.f32 %v4795_v5, %v4427_v58 }
 0x2bf   : > { %v3380_v41 = vpop.f32.mrf.mxu1 }
 0x2c0   : > { %4885 = vst [vmem:[%s7193_s19 + $0x78] sm:$0xff] %v4853_v30  ;;  %v4916_v60 = vadd.f32 %v4915_v56, %v4853_v30  ;;  %v4955_v9 = vmul.f32 %v4853_v30, %v4853_v30  ;;  %v4372_v46 = vpop.f32.mrf.mxu3  ;;  %v3433_v0 = vadd.f32 %v3380_v41, %v6992_v33 }
 0x2c1   : > { %v4428_v53 = vadd.f32 %v4372_v46, %v3746_v28 }
 0x2c2   : > { %v4986_v63 = vadd.f32 %v4985_v21, %v4955_v9 }
 0x2c3   : > { %v3692_v4 = vpop.f32.mrf.mxu2 }
 0x2c4   : > { %v3747_v42 = vadd.f32 %v3692_v4, %v3432_v20 }
 0x2c5   : > { %v4798_v44 = vpop.f32.mrf.mxu0 }
 0x2c6   : > { %v4854_v8 = vadd.f32 %v4798_v44, %v4428_v53 }
 0x2c7   : > { %v3382_v38 = vpop.f32.mrf.mxu1 }
 0x2c8   : > { %4886 = vst [vmem:[%s7193_s19 + $0x80] sm:$0xff] %v4854_v8  ;;  %v4917_v23 = vadd.f32 %v4916_v60, %v4854_v8  ;;  %v4956_v25 = vmul.f32 %v4854_v8, %v4854_v8  ;;  %v4374_v26 = vpop.f32.mrf.mxu3  ;;  %v3434_v14 = vadd.f32 %v3382_v38, %v7005_v43 }
 0x2c9   : > { %v4429_v13 = vadd.f32 %v4374_v26, %v3747_v42 }
 0x2ca   : > { %v4987_v49 = vadd.f32 %v4986_v63, %v4956_v25 }
 0x2cb   : > { %v3695_v16 = vpop.f32.mrf.mxu2 }
 0x2cc   : > { %v3748_v7 = vadd.f32 %v3695_v16, %v3433_v0 }
 0x2cd   : > { %v4800_v51 = vpop.f32.mrf.mxu0 }
 0x2ce   : > { %v4855_v34 = vadd.f32 %v4800_v51, %v4429_v13 }
 0x2cf   : > { %v3385_v6 = vpop.f32.mrf.mxu1 }
 0x2d0   : > { %4887 = vst [vmem:[%s7193_s19 + $0x88] sm:$0xff] %v4855_v34  ;;  %v4918_v57 = vadd.f32 %v4917_v23, %v4855_v34  ;;  %v4957_v15 = vmul.f32 %v4855_v34, %v4855_v34  ;;  %v4377_v17 = vpop.f32.mrf.mxu3  ;;  %v3435_v61 = vadd.f32 %v3385_v6, %v7019_v29 }
 0x2d1   : > { %v4430_v3 = vadd.f32 %v4377_v17, %v3748_v7 }
 0x2d2   : > { %v4988_v52 = vadd.f32 %v4987_v49, %v4957_v15 }
 0x2d3   : > { %v3697_v50 = vpop.f32.mrf.mxu2 }
 0x2d4   : > { %v3749_v19 = vadd.f32 %v3697_v50, %v3434_v14 }
 0x2d5   : > { %v4803_v37 = vpop.f32.mrf.mxu0 }
 0x2d6   : > { %v4856_v31 = vadd.f32 %v4803_v37, %v4430_v3 }
 0x2d7   : > { %v3387_v45 = vpop.f32.mrf.mxu1 }
 0x2d8   : > { %4888 = vst [vmem:[%s7193_s19 + $0x90] sm:$0xff] %v4856_v31  ;;  %v4919_v33 = vadd.f32 %v4918_v57, %v4856_v31  ;;  %v4958_v35 = vmul.f32 %v4856_v31, %v4856_v31  ;;  %v4379_v27 = vpop.f32.mrf.mxu3  ;;  %v3436_v30 = vadd.f32 %v3387_v45, %v7032_v11 }
 0x2d9   : > { %v4431_v55 = vadd.f32 %v4379_v27, %v3749_v19 }
 0x2da   : > { %v4989_v2 = vadd.f32 %v4988_v52, %v4958_v35 }
 0x2db   : > { %v3700_v36 = vpop.f32.mrf.mxu2 }
 0x2dc   : > { %v3750_v1 = vadd.f32 %v3700_v36, %v3435_v61 }
 0x2dd   : > { %v4805_v18 = vpop.f32.mrf.mxu0 }
 0x2de   : > { %v4857_v56 = vadd.f32 %v4805_v18, %v4431_v55 }
 0x2df   : > { %v3390_v32 = vpop.f32.mrf.mxu1 }
 0x2e0   : > { %4889 = vst [vmem:[%s7193_s19 + $0x98] sm:$0xff] %v4857_v56  ;;  %v4920_v43 = vadd.f32 %v4919_v33, %v4857_v56  ;;  %v4959_v21 = vmul.f32 %v4857_v56, %v4857_v56  ;;  %v4382_v58 = vpop.f32.mrf.mxu3  ;;  %v3437_v44 = vadd.f32 %v3390_v32, %v7046_v48 }
 0x2e1   : > { %v4432_v39 = vadd.f32 %v4382_v58, %v3750_v1 }
 0x2e2   : > { %v4990_v12 = vadd.f32 %v4989_v2, %v4959_v21 }
 0x2e3   : > { %v3702_v5 = vpop.f32.mrf.mxu2 }
 0x2e4   : > { %v3751_v60 = vadd.f32 %v3702_v5, %v3436_v30 }
 0x2e5   : > { %v4808_v28 = vpop.f32.mrf.mxu0 }
 0x2e6   : > { %v4858_v41 = vadd.f32 %v4808_v28, %v4432_v39 }
 0x2e7   : > { %v3392_v9 = vpop.f32.mrf.mxu1 }
 0x2e8   : > { %4890 = vst [vmem:[%s7193_s19 + $0xa0] sm:$0xff] %v4858_v41  ;;  %v4921_v29 = vadd.f32 %v4920_v43, %v4858_v41  ;;  %v4960_v46 = vmul.f32 %v4858_v41, %v4858_v41  ;;  %v4384_v63 = vpop.f32.mrf.mxu3  ;;  %v3438_v0 = vadd.f32 %v3392_v9, %v7061_v24 }
 0x2e9   : > { %v4433_v4 = vadd.f32 %v4384_v63, %v3751_v60 }
 0x2ea   : > { %v4991_v53 = vadd.f32 %v4990_v12, %v4960_v46 }
 0x2eb   : > { %v3705_v20 = vpop.f32.mrf.mxu2 }
 0x2ec   : > { %v3752_v38 = vadd.f32 %v3705_v20, %v3437_v44 }
 0x2ed   : > { %v4810_v8 = vpop.f32.mrf.mxu0 }
 0x2ee   : > { %v4859_v42 = vadd.f32 %v4810_v8, %v4433_v4 }
 0x2ef   : > { %v3395_v23 = vpop.f32.mrf.mxu1 }
 0x2f0   : > { %4891 = vst [vmem:[%s7193_s19 + $0xa8] sm:$0xff] %v4859_v42  ;;  %v4922_v11 = vadd.f32 %v4921_v29, %v4859_v42  ;;  %v4961_v25 = vmul.f32 %v4859_v42, %v4859_v42  ;;  %v4387_v26 = vpop.f32.mrf.mxu3  ;;  %v3439_v50 = vadd.f32 %v3395_v23, %v7073_v59 }
 0x2f1   : > { %v4434_v13 = vadd.f32 %v4387_v26, %v3752_v38 }
 0x2f2   : > { %v4992_v49 = vadd.f32 %v4991_v53, %v4961_v25 }
 0x2f3   : > { %v3707_v16 = vpop.f32.mrf.mxu2 }
 0x2f4   : > { %v3753_v7 = vadd.f32 %v3707_v16, %v3438_v0 }
 0x2f5   : > { %v4813_v51 = vpop.f32.mrf.mxu0 }
 0x2f6   : > { %v4860_v34 = vadd.f32 %v4813_v51, %v4434_v13 }
 0x2f7   : > { %v3397_v6 = vpop.f32.mrf.mxu1 }
 0x2f8   : > { %4892 = vst [vmem:[%s7193_s19 + $0xb0] sm:$0xff] %v4860_v34  ;;  %v4923_v48 = vadd.f32 %v4922_v11, %v4860_v34  ;;  %v4962_v57 = vmul.f32 %v4860_v34, %v4860_v34  ;;  %v4389_v15 = vpop.f32.mrf.mxu3  ;;  %v3440_v55 = vadd.f32 %v3397_v6, %v7086_v47 }
 0x2f9   : > { %v4435_v52 = vadd.f32 %v4389_v15, %v3753_v7 }
 0x2fa   : > { %v4993_v17 = vadd.f32 %v4992_v49, %v4962_v57 }
 0x2fb   : > { %v3710_v3 = vpop.f32.mrf.mxu2 }
 0x2fc   : > { %v3754_v31 = vadd.f32 %v3710_v3, %v3439_v50 }
 0x2fd   : > { %v4815_v14 = vpop.f32.mrf.mxu0 }
 0x2fe   : > { %v4861_v37 = vadd.f32 %v4815_v14, %v4435_v52 }
 0x2ff   : > { %v3400_v19 = vpop.f32.mrf.mxu1 }
 0x300   : > { %4893 = vst [vmem:[%s7193_s19 + $0xb8] sm:$0xff] %v4861_v37  ;;  %v4924_v24 = vadd.f32 %v4923_v48, %v4861_v37  ;;  %v4963_v45 = vmul.f32 %v4861_v37, %v4861_v37  ;;  %v4392_v33 = vpop.f32.mrf.mxu3  ;;  %v3441_v12 = vadd.f32 %v3400_v19, %v7101_v62 }
 0x301   : > { %v4436_v27 = vadd.f32 %v4392_v33, %v3754_v31 }
 0x302   : > { %v4994_v35 = vadd.f32 %v4993_v17, %v4963_v45 }
 0x303   : > { %v3712_v2 = vpop.f32.mrf.mxu2 }
 0x304   : > { %v3755_v18 = vadd.f32 %v3712_v2, %v3440_v55  ;;  %v5986_v2 = vmov 0.0  }
 0x305   : > { %v4818_v36 = vpop.f32.mrf.mxu0  ;;  %5010 = vst [vmem:[%s7403_s24 + $0x2] sm:$0x3f] %v5986_v2 }
 0x306   : > { %v4862_v61 = vadd.f32 %v4818_v36, %v4436_v27 }
 0x307   : > { %v3402_v32 = vpop.f32.mrf.mxu1 }
 0x308   : > { %4894 = vst [vmem:[%s7193_s19 + $0xc0] sm:$0xff] %v4862_v61  ;;  %v4925_v59 = vadd.f32 %v4924_v24, %v4862_v61  ;;  %v4964_v56 = vmul.f32 %v4862_v61, %v4862_v61  ;;  %v4394_v1 = vpop.f32.mrf.mxu3  ;;  %v3442_v63 = vadd.f32 %v3402_v32, %v7115_v40  ;;  %v7441_v61 = vld [vmem:[#allocation3_spill] sm:$0xff] }
 0x309   : > { %v4437_v21 = vadd.f32 %v4394_v1, %v3755_v18 }
 0x30a   : > { %v4995_v43 = vadd.f32 %v4994_v35, %v4964_v56 }
 0x30b   : > { %v3715_v58 = vpop.f32.mrf.mxu2 }
 0x30c   : > { %v3756_v30 = vadd.f32 %v3715_v58, %v3441_v12 }
 0x30d   : > { %v4820_v39 = vpop.f32.mrf.mxu0 }
 0x30e   : > { %v4863_v5 = vadd.f32 %v4820_v39, %v4437_v21 }
 0x30f   : > { %v3405_v46 = vpop.f32.mrf.mxu1 }
 0x310   : > { %4895 = vst [vmem:[%s7193_s19 + $0xc8] sm:$0xff] %v4863_v5  ;;  %v4926_v47 = vadd.f32 %v4925_v59, %v4863_v5  ;;  %v4965_v28 = vmul.f32 %v4863_v5, %v4863_v5  ;;  %v4397_v41 = vpop.f32.mrf.mxu3  ;;  %v3443_v11 = vadd.f32 %v3405_v46, %v7129_v22 }
 0x311   : > { %v4438_v9 = vadd.f32 %v4397_v41, %v3756_v30 }
 0x312   : > { %v4996_v60 = vadd.f32 %v4995_v43, %v4965_v28 }
 0x313   : > { %v3717_v29 = vpop.f32.mrf.mxu2 }
 0x314   : > { %v3757_v20 = vadd.f32 %v3717_v29, %v3442_v63 }
 0x315   : > { %v4823_v53 = vpop.f32.mrf.mxu0 }
 0x316   : > { %v4864_v4 = vadd.f32 %v4823_v53, %v4438_v9 }
 0x317   : > { %v3407_v26 = vpop.f32.mrf.mxu1 }
 0x318   : > { %4896 = vst [vmem:[%s7193_s19 + $0xd0] sm:$0xff] %v4864_v4  ;;  %v4927_v62 = vadd.f32 %v4926_v47, %v4864_v4  ;;  %v4966_v44 = vmul.f32 %v4864_v4, %v4864_v4  ;;  %v4399_v8 = vpop.f32.mrf.mxu3  ;;  %v3444_v6 = vadd.f32 %v3407_v26, %v7145_v54 }
 0x319   : > { %v4439_v38 = vadd.f32 %v4399_v8, %v3757_v20 }
 0x31a   : > { %v4997_v42 = vadd.f32 %v4996_v60, %v4966_v44 }
 0x31b   : > { %v3720_v23 = vpop.f32.mrf.mxu2 }
 0x31c   : > { %v3758_v13 = vadd.f32 %v3720_v23, %v3443_v11 }
 0x31d   : > { %v4825_v25 = vpop.f32.mrf.mxu0 }
 0x31e   : > { %v4865_v49 = vadd.f32 %v4825_v25, %v4439_v38 }
 0x31f   : > { %v3410_v22 = vpop.f32.mrf.mxu1 }
 0x320   : > { %4897 = vst [vmem:[%s7193_s19 + $0xd8] sm:$0xff] %v4865_v49  ;;  %v4928_v40 = vadd.f32 %v4927_v62, %v4865_v49  ;;  %v4967_v16 = vmul.f32 %v4865_v49, %v4865_v49  ;;  %v4402_v0 = vpop.f32.mrf.mxu3  ;;  %v3445_v31 = vadd.f32 %v3410_v22, %v7161_v10 }
 0x321   : > { %v4440_v34 = vadd.f32 %v4402_v0, %v3758_v13 }
 0x322   : > { %v4998_v51 = vadd.f32 %v4997_v42, %v4967_v16 }
 0x323   : > { %v3722_v7 = vpop.f32.mrf.mxu2 }
 0x324   : > { %v3759_v15 = vadd.f32 %v3722_v7, %v3444_v6 }
 0x325   : > { %v4828_v48 = vpop.f32.mrf.mxu0 }
 0x326   : > { %v4866_v57 = vadd.f32 %v4828_v48, %v4440_v34 }
 0x327   : > { %v3412_v27 = vpop.f32.mrf.mxu1 }
 0x328   : > { %4898 = vst [vmem:[%s7193_s19 + $0xe0] sm:$0xff] %v4866_v57  ;;  %v4929_v17 = vadd.f32 %v4928_v40, %v4866_v57  ;;  %v4968_v52 = vmul.f32 %v4866_v57, %v4866_v57  ;;  %v4404_v3 = vpop.f32.mrf.mxu3  ;;  %v3446_v18 = vadd.f32 %v3412_v27, %v7441_v61 }
 0x329   : > { %v4441_v14 = vadd.f32 %v4404_v3, %v3759_v15 }
 0x32a   : > { %v4999_v50 = vadd.f32 %v4998_v51, %v4968_v52 }
 0x32b   : > { %v3725_v37 = vpop.f32.mrf.mxu2 }
 0x32c   : > { %v3760_v45 = vadd.f32 %v3725_v37, %v3445_v31 }
 0x32d   : > { %v4830_v19 = vpop.f32.mrf.mxu0 }
 0x32e   : > { %v4867_v24 = vadd.f32 %v4830_v19, %v4441_v14 }
 0x330   : > { %4899 = vst [vmem:[%s7193_s19 + $0xe8] sm:$0xff] %v4867_v24  ;;  %v4930_v54 = vadd.f32 %v4929_v17, %v4867_v24  ;;  %v4969_v33 = vmul.f32 %v4867_v24, %v4867_v24  ;;  %v4407_v35 = vpop.f32.mrf.mxu3 }
 0x331   : > { %v4442_v55 = vadd.f32 %v4407_v35, %v3760_v45 }
 0x332   : > { %v5000_v10 = vadd.f32 %v4999_v50, %v4969_v33 }
 0x333   : > { %v3727_v36 = vpop.f32.mrf.mxu2 }
 0x334   : > { %v3761_v1 = vadd.f32 %v3727_v36, %v3446_v18 }
 0x335   : > { %v4833_v59 = vpop.f32.mrf.mxu0 }
 0x336   : > { %v4868_v56 = vadd.f32 %v4833_v59, %v4442_v55 }
 0x338   : > { %4900 = vst [vmem:[%s7193_s19 + $0xf0] sm:$0xff] %v4868_v56  ;;  %v4931_v32 = vadd.f32 %v4930_v54, %v4868_v56  ;;  %v4970_v43 = vmul.f32 %v4868_v56, %v4868_v56  ;;  %v4409_v21 = vpop.f32.mrf.mxu3 }
 0x339   : > { %v4443_v12 = vadd.f32 %v4409_v21, %v3761_v1 }
 0x33a   : > { %v5001_v58 = vadd.f32 %v5000_v10, %v4970_v43 }
 0x33d   : > { %v4835_v39 = vpop.f32.mrf.mxu0 }
 0x33e   : > { %v4869_v5 = vadd.f32 %v4835_v39, %v4443_v12 }
 0x340   : > { %4901 = vst [vmem:[%s7193_s19 + $0xf8] sm:$0xff] %v4869_v5  ;;  %v4932_v30 = vadd.f32 %v4931_v32, %v4869_v5  ;;  %v4971_v47 = vmul.f32 %v4869_v5, %v4869_v5 }
 0x342   : > { %v4933_v28 = vrot.slane %v4932_v30, 4  ;;  %v5002_v41 = vadd.f32 %v5001_v58, %v4971_v47 }
 0x344   : > { %v4934_v60 = vadd.f32 %v4933_v28, %v4932_v30  ;;  %v5003_v9 = vrot.slane %v5002_v41, 4 }
 0x346   : > { %v4935_v29 = vrot.slane %v4934_v60, 2  ;;  %v5004_v46 = vadd.f32 %v5003_v9, %v5002_v41 }
 0x348   : > { %v4936_v63 = vadd.f32 %v4935_v29, %v4934_v60  ;;  %v5005_v53 = vrot.slane %v5004_v46, 2 }
 0x34a   : > { %v4937_v4 = vrot.slane %v4936_v63, 1  ;;  %v5006_v20 = vadd.f32 %v5005_v53, %v5004_v46 }
 0x34c   : > { %v4938_v62 = vadd.f32 %v4937_v4, %v4936_v63  ;;  %v5007_v44 = vrot.slane %v5006_v20, 1 }
 0x34e   : > { %4939 = vst [vmem:[%s7403_s24] sm:$0x1] %v4938_v62  ;;  %v5008_v8 = vadd.f32 %v5007_v44, %v5006_v20 }
 0x350   : > { %5009 = vst [vmem:[%s7403_s24 + $0x1] sm:$0x1] %v5008_v8 }
 0x351 PF: > { %s14_s12 = sadd.s32 1, %s5983_s12  }
 0x352   : > { %p11_p4 = scmp.ge.s32.totalorder %s14_s12, 4  }
 0x354   :  { %13 = sbr.rel (!%p11_p4) target bundleno = 1 (0x1), region = 80 }

// kernel: residual_block_forward.4
= control target key start
LH: loop header
LB: loop body
LE: loop exit
PB: predicated region body
PF: predicated region fallthrough
CT: control target
= control target key end

     0   :  { %s6213_s18 = smov 0   ;;  %s7821_s0 = inlined_call_operand.vmem [shape: f32[2,16,16,128], index: 0, kind: input, shape index: {}]   ;;  %s7822_s1 = inlined_call_operand.vmem [shape: f32[1,128], index: 1, kind: input, shape index: {}]   ;;  %s7823_s2 = inlined_call_operand.vmem [shape: f32[1,128], index: 2, kind: input, shape index: {}]   ;;  %s7824_s3 = inlined_call_operand.vmem [shape: bf16[9,128,128], index: 3, kind: input, shape index: {}]   ;;  %s7825_s4 = inlined_call_operand.vmem [shape: f32[2,16,16,128], index: 4, kind: output, shape index: {0}]   ;;  %s7826_s5 = inlined_call_operand.vmem [shape: f32[2,8,128], index: 5, kind: output, shape index: {1}]  }
   0x1 LB: > { %s5287_s19 = sadd.s32 4294967295, %s6179_s18   ;;  %p5291_p0 = scmp.ge.s32.totalorder %s6179_s18, 1  ;;  %s6179_s18 = sphi %s6213_s18, %s16_s18  }
   0x2   : > { %p190_p1 = scmp.lt.s32.totalorder %s6179_s18, 3 }
   0x4   : > { %p191_p2 = pnand %p5291_p0, %p190_p1 }
   0x6   : > { %194 = sbr.rel (%p191_p2) target bundleno = 862 (0x35e), region = 36 }
   0xb   : > { %v5988_v0 = vld [vmem:[%s7824_s3 + $0x78] sm:$0xff]  ;;  %p222_p3 = scmp.lt.s32.totalorder %s5287_s19, 1  ;;  %v6181_v1 = vmov 0   ;;  %v5987_v2 = vld [vmem:[%s7824_s3 + $0x70] sm:$0xff]  ;;  %v6233_v3 = vld [vmem:[%s7822_s1] ss:$0 sm:$0xff] }
   0xc   : > { %417 = vst [vmem:[#allocation2 + $0x30] sm:$0xf] %v6181_v1  ;;  %6077 = vmatpush.bf16.msra.mxu1 %v5988_v0  ;;  %6078 = vmatpush.bf16.msra.mxu2 %v5988_v0  ;;  %v6247_v4 = vld [vmem:[%s7823_s2] ss:$0 sm:$0xff]  ;;  %v5986_v5 = vld [vmem:[%s7824_s3 + $0x68] sm:$0xff]  ;;  %v5984_v20 = vld [vmem:[%s7824_s3 + $0x58] sm:$0xff] }
   0xd   : > { %s7854_s19 = smov (!%p222_p3, %s5287_s19), 1  ;;  %6079 = vmatpush.bf16.msra.mxu3 %v5988_v0  ;;  %1480 = vmatpush.bf16.msra.mxu0 %v5988_v0  ;;  %418 = vst [vmem:[#allocation2 + $0x34] sm:$0xf] %v6181_v1  ;;  %v5985_v16 = vld [vmem:[%s7824_s3 + $0x60] sm:$0xff]  ;;  %vm783_vm0 = vcmask 1043456   ;;  %vm790_vm1 = vcmask 1040384  }
   0xe   : > { %s5955_s26 = sshll.u32 %s7854_s19, 8  ;;  %419 = vst [vmem:[#allocation2 + $0x38] sm:$0x1] %v6181_v1  ;;  %vm459_vm2 = vsmask.f32 256  ;;  %v5983_v34 = vld [vmem:[%s7824_s3 + $0x50] sm:$0xff] }
   0xf   : > { %s6242_s29 = scalar_lea.vmem %s7821_s0, %s5955_s26  ;;  %405 = vst [vmem:[#allocation2] sm:$0xf] %v6181_v1  ;;  %vm460_vm3 = vsmask.f32 4368  ;;  %vm784_vm4 = vsmask.f32 7938  ;;  %vm6284_vm5 = vmand %vm790_vm1, %vm459_vm2  ;;  %s7570_s9 = scalar_lea.vmem %s7825_s4, %s5955_s26 }
  0x10   : > { %6080 = vmatpush.bf16.msra.mxu1 %v5987_v2  ;;  %6081 = vmatpush.bf16.msra.mxu2 %v5987_v2  ;;  %v243_v6 = vld [vmem:[%s6242_s29 + $0x30] sm:$0xff]  ;;  %v244_v7 = vld [vmem:[%s6242_s29 + $0x38] sm:$0xff]  ;;  %406 = vst [vmem:[#allocation2 + $0x4] sm:$0xf] %v6181_v1  ;;  %vm6296_vm6 = vmor %vm459_vm2, %vm460_vm3  ;;  %vm964_vm8 = vsmask.f32 3328 }
  0x11   : > { %6082 = vmatpush.bf16.msra.mxu3 %v5987_v2  ;;  %1481 = vmatpush.bf16.msra.mxu0 %v5987_v2  ;;  %v279_v8 = vmul.f32 %v6233_v3, %v243_v6  ;;  %v280_v9 = vmul.f32 %v6233_v3, %v244_v7  ;;  %v251_v10 = vld [vmem:[%s6242_s29 + $0x70] sm:$0xff]  ;;  %v252_v11 = vld [vmem:[%s6242_s29 + $0x78] sm:$0xff]  ;;  %407 = vst [vmem:[#allocation2 + $0x8] sm:$0x1] %v6181_v1  ;;  %vm6304_vm7 = vmand %vm783_vm0, %vm784_vm4  ;;  %vm965_vm9 = vsmask.f32 7440 }
  0x12   : > { %v287_v12 = vmul.f32 %v6233_v3, %v251_v10  ;;  %v288_v13 = vmul.f32 %v6233_v3, %v252_v11  ;;  %408 = vst [vmem:[#allocation2 + $0xc] sm:$0xf] %v6181_v1  ;;  %v259_v25 = vld [vmem:[%s6242_s29 + $0xb0] sm:$0xff]  ;;  %v260_v26 = vld [vmem:[%s6242_s29 + $0xb8] sm:$0xff]  ;;  %v5982_v53 = vld [vmem:[%s7824_s3 + $0x48] sm:$0xff]  ;;  %vm1850_vm11 = vcmask 1042432  }
  0x13   : > { %v315_v14 = vadd.f32 %v6247_v4, %v279_v8  ;;  %v316_v15 = vadd.f32 %v6247_v4, %v280_v9  ;;  %409 = vst [vmem:[#allocation2 + $0x10] sm:$0xf] %v6181_v1  ;;  %v295_v38 = vmul.f32 %v6233_v3, %v259_v25  ;;  %v809_v40 = vld [vmem:[#allocation2 + $0x30] sm:$0xf]  ;;  %v296_v42 = vmul.f32 %v6233_v3, %v260_v26  ;;  %v5981_v60 = vld [vmem:[%s7824_s3 + $0x40] sm:$0xff]  ;;  %vm6367_vm10 = vmor %vm964_vm8, %vm965_vm9  ;;  %s5296_s26 = sshll.u32 %s7854_s19, 3 }
  0x14   : > { %6083 = vmatpush.bf16.msra.mxu1 %v5986_v5  ;;  %6084 = vmatpush.bf16.msra.mxu2 %v5986_v5  ;;  %v323_v17 = vadd.f32 %v6247_v4, %v287_v12  ;;  %410 = vst [vmem:[#allocation2 + $0x14] sm:$0x1] %v6181_v1  ;;  %v324_v21 = vadd.f32 %v6247_v4, %v288_v13  ;;  %vm1851_vm12 = vcmask 1046532   ;;  %s7810_s12 = scalar_lea.vmem %s7826_s5, %s5296_s26 }
  0x15   : > { %6085 = vmatpush.bf16.msra.mxu3 %v5986_v5  ;;  %1482 = vmatpush.bf16.msra.mxu0 %v5986_v5  ;;  %v347_v18 = vmax.f32 %v315_v14, 0.0  ;;  %v348_v19 = vmax.f32 %v316_v15, 0.0  ;;  %411 = vst [vmem:[#allocation2 + $0x18] sm:$0xf] %v6181_v1  ;;  %v813_v41 = vld [vmem:[#allocation2 + $0x38] sm:$0x1]  ;;  %v331_v49 = vadd.f32 %v6247_v4, %v295_v38  ;;  %v332_v54 = vadd.f32 %v6247_v4, %v296_v42  ;;  %vm6906_vm13 = vmor %vm1850_vm11, %vm1851_vm12 }
  0x16   : > { %v355_v22 = vmax.f32 %v323_v17, 0.0  ;;  %412 = vst [vmem:[#allocation2 + $0x1c] sm:$0xf] %v6181_v1  ;;  %v356_v32 = vmax.f32 %v324_v21, 0.0 }
  0x17   : > { %v379_v23 = vpack.c.bf16 %v347_v18, %v347_v18  ;;  %v380_v24 = vpack.c.bf16 %v348_v19, %v348_v19  ;;  %413 = vst [vmem:[#allocation2 + $0x20] sm:$0x1] %v6181_v1  ;;  %v363_v55 = vmax.f32 %v331_v49, 0.0  ;;  %v364_v58 = vmax.f32 %v332_v54, 0.0 }
  0x18   : > { %6086 = vmatpush.bf16.msra.mxu1 %v5985_v16  ;;  %6087 = vmatpush.bf16.msra.mxu2 %v5985_v16  ;;  %414 = vst [vmem:[#allocation2 + $0x24] sm:$0xf] %v6181_v1  ;;  %v6289_v33 = vpack.c.bf16 %v355_v22, %v355_v22  ;;  %v6312_v47 = vpack.c.bf16 %v356_v32, %v356_v32 }
  0x19   : > { %6088 = vmatpush.bf16.msra.mxu3 %v5985_v16  ;;  %1483 = vmatpush.bf16.msra.mxu0 %v5985_v16  ;;  %v514_v27 = vshrl.u32 %v379_v23, 16  ;;  %v517_v28 = vshll.u32 %v379_v23, 16  ;;  %v522_v29 = vshrl.u32 %v380_v24, 16  ;;  %v525_v30 = vshll.u32 %v380_v24, 16  ;;  %415 = vst [vmem:[#allocation2 + $0x28] sm:$0xf] %v6181_v1 }
  0x1a   : > { %416 = vst [vmem:[#allocation2 + $0x2c] sm:$0x1] %v6181_v1  ;;  %v582_v48 = vshrl.u32 %v6289_v33, 16  ;;  %v590_v57 = vshrl.u32 %v6312_v47, 16  ;;  %v6330_v59 = vpack.c.bf16 %v363_v55, %v363_v55  ;;  %v396_v61 = vpack.c.bf16 %v364_v58, %v364_v58  ;;  %v245_v23 = vld [vmem:[%s6242_s29 + $0x40] sm:$0xff] }
  0x1b   : > { %v516_v36 = vrot.slane %v514_v27, 7  ;;  %v524_v37 = vrot.slane %v522_v29, 7  ;;  %420 = vst [vmem:[#allocation2 + $0x3c] sm:$0xf] %v6181_v1  ;;  %v585_v63 = vshll.u32 %v6289_v33, 16  ;;  %v593_v5 = vshll.u32 %v6312_v47, 16 }
  0x1c   : > { %6089 = vmatpush.bf16.msra.mxu1 %v5984_v20  ;;  %6090 = vmatpush.bf16.msra.mxu2 %v5984_v20  ;;  %421 = vst [vmem:[#allocation2 + $0x40] sm:$0xf] %v6181_v1  ;;  %v6327_v56 = vrot.slane %v582_v48, 7  ;;  %v650_v62 = vshrl.u32 %v6330_v59, 16  ;;  %v6342_v2 = vrot.slane %v590_v57, 7  ;;  %v658_v8 = vshrl.u32 %v396_v61, 16 }
  0x1d   : > { %6091 = vmatpush.bf16.msra.mxu3 %v5984_v20  ;;  %1484 = vmatpush.bf16.msra.mxu0 %v5984_v20  ;;  %v519_v43 = vor.u32 %v517_v28, %v516_v36  ;;  %v520_v44 = vrot.slane %v516_v36, 4  ;;  %v527_v45 = vor.u32 %v525_v30, %v524_v37  ;;  %v529_v46 = vrot.slane %v524_v37, 4  ;;  %422 = vst [vmem:[#allocation2 + $0x44] sm:$0x1] %v6181_v1  ;;  %v246_v27 = vld [vmem:[%s6242_s29 + $0x48] sm:$0xff]  ;;  %v253_v29 = vld [vmem:[%s6242_s29 + $0x80] sm:$0xff] }
  0x1e   : > { %423 = vst [vmem:[#allocation2 + $0x48] sm:$0xf] %v6181_v1  ;;  %v588_v0 = vrot.slane %v6327_v56, 4  ;;  %v6346_v7 = vrot.slane %v650_v62, 7  ;;  %v661_v18 = vshll.u32 %v396_v61, 16  ;;  %v6353_v21 = vor.u32 %v585_v63, %v6327_v56  ;;  %v254_v30 = vld [vmem:[%s6242_s29 + $0x88] sm:$0xff] }
  0x1f   : > { %v528_v50 = vsel %vm6296_vm6, %v520_v44, %v527_v45  ;;  %v810_v51 = vsel %vm6304_vm7, %v519_v43, %v809_v40  ;;  %v814_v52 = vsel %vm6284_vm5, %v529_v46, %v813_v41  ;;  %424 = vst [vmem:[#allocation2 + $0x4c] sm:$0xf] %v6181_v1  ;;  %v6355_v22 = vrot.slane %v658_v8, 7  ;;  %v261_v57 = vld [vmem:[%s6242_s29 + $0xc0] sm:$0xff] }
  0x20   : > { %6092 = vmatpush.bf16.msra.mxu1 %v5983_v34  ;;  %6093 = vmatpush.bf16.msra.mxu2 %v5983_v34  ;;  %811 = vst [vmem:[#allocation2 + $0x30] sm:$0xf] %v810_v51  ;;  %v595_v25 = vor.u32 %v593_v5, %v6342_v2  ;;  %v597_v26 = vrot.slane %v6342_v2, 4  ;;  %v281_v28 = vmul.f32 %v6233_v3, %v245_v23  ;;  %v653_v36 = vshll.u32 %v6330_v59, 16  ;;  %v262_v5 = vld [vmem:[%s6242_s29 + $0xc8] sm:$0xff] }
  0x21   : > { %6094 = vmatpush.bf16.msra.mxu3 %v5983_v34  ;;  %1485 = vmatpush.bf16.msra.mxu0 %v5983_v34  ;;  %812 = vst [vmem:[#allocation2 + $0x34] sm:$0xf] %v528_v50  ;;  %v282_v37 = vmul.f32 %v6233_v3, %v246_v27  ;;  %v289_v41 = vmul.f32 %v6233_v3, %v253_v29  ;;  %v656_v44 = vrot.slane %v6346_v7, 4  ;;  %v665_v62 = vrot.slane %v6355_v22, 4  ;;  %v900_v8 = vld [vmem:[#allocation2] sm:$0xf] }
  0x22   : > { %815 = vst [vmem:[#allocation2 + $0x38] sm:$0x1] %v814_v52  ;;  %v317_v40 = vadd.f32 %v6247_v4, %v281_v28  ;;  %v290_v42 = vmul.f32 %v6233_v3, %v254_v30  ;;  %v663_v45 = vor.u32 %v661_v18, %v6355_v22  ;;  %v6401_v59 = vor.u32 %v653_v36, %v6346_v7  ;;  %v948_v27 = vld [vmem:[#allocation2 + $0x8] sm:$0x1] }
  0x23   : > { %425 = vst [vmem:[#allocation2 + $0x50] sm:$0x1] %v6181_v1  ;;  %v318_v46 = vadd.f32 %v6247_v4, %v282_v37  ;;  %v325_v49 = vadd.f32 %v6247_v4, %v289_v41  ;;  %v987_v37 = vshll.u32 %v948_v27, 16  ;;  %v238_v41 = vld [vmem:[%s6242_s29 + $0x8] sm:$0xff] }
  0x24   : > { %6095 = vmatpush.bf16.msra.mxu1 %v5982_v53  ;;  %6096 = vmatpush.bf16.msra.mxu2 %v5982_v53  ;;  %426 = vst [vmem:[#allocation2 + $0x54] sm:$0xf] %v6181_v1  ;;  %v349_v48 = vmax.f32 %v317_v40, 0.0  ;;  %v326_v50 = vadd.f32 %v6247_v4, %v290_v42  ;;  %v6406_v56 = vsel %vm6296_vm6, %v656_v44, %v663_v45  ;;  %v237_v40 = vld [vmem:[%s6242_s29] sm:$0xff] }
  0x25   : > { %6097 = vmatpush.bf16.msra.mxu3 %v5982_v53  ;;  %1486 = vmatpush.bf16.msra.mxu0 %v5982_v53  ;;  %427 = vst [vmem:[#allocation2 + $0x58] sm:$0xf] %v6181_v1  ;;  %v6394_v53 = vsel %vm6296_vm6, %v588_v0, %v595_v25  ;;  %v350_v55 = vmax.f32 %v318_v46, 0.0  ;;  %v357_v61 = vmax.f32 %v325_v49, 0.0  ;;  %v989_v49 = vrot.slane %v987_v37, 5 }
  0x26   : > { %428 = vst [vmem:[#allocation2 + $0x5c] sm:$0x1] %v6181_v1  ;;  %v358_v0 = vmax.f32 %v326_v50, 0.0 }
  0x27   : > { %v908_v6 = vld [vmem:[#allocation2 + $0x30] sm:$0xf]  ;;  %429 = vst [vmem:[#allocation2 + $0x60] sm:$0xf] %v6181_v1  ;;  %v382_v63 = vpack.c.bf16 %v350_v55, %v350_v55 }
  0x28   : > { %6098 = vmatpush.bf16.msra.mxu1 %v5981_v60  ;;  %6099 = vmatpush.bf16.msra.mxu2 %v5981_v60  ;;  %v909_v9 = vld [vmem:[#allocation2 + $0x34] sm:$0xf]  ;;  %v1064_v10 = vshrl.u32 %v908_v6, 16  ;;  %v1067_v11 = vshll.u32 %v908_v6, 16  ;;  %430 = vst [vmem:[#allocation2 + $0x64] sm:$0xf] %v6181_v1  ;;  %v390_v30 = vpack.c.bf16 %v358_v0, %v358_v0 }
  0x29   : > { %6100 = vmatpush.bf16.msra.mxu3 %v5981_v60  ;;  %1487 = vmatpush.bf16.msra.mxu0 %v5981_v60  ;;  %v952_v12 = vld [vmem:[#allocation2 + $0x38] sm:$0x1]  ;;  %v1073_v13 = vshll.u32 %v909_v9, 16  ;;  %v1077_v14 = vshrl.u32 %v909_v9, 16  ;;  %431 = vst [vmem:[#allocation2 + $0x68] sm:$0x1] %v6181_v1  ;;  %v381_v60 = vpack.c.bf16 %v349_v48, %v349_v48 }
  0x2a   : > { %v1066_v15 = vrot.slane %v1064_v10, 4  ;;  %v1069_v16 = vrot.slane %v1067_v11, 5  ;;  %v1083_v17 = vshll.u32 %v952_v12, 16  ;;  %432 = vst [vmem:[#allocation2 + $0x6c] sm:$0xf] %v6181_v1  ;;  %v6415_v10 = vpack.c.bf16 %v357_v61, %v357_v61 }
  0x2b   : > { %v1075_v19 = vrot.slane %v1073_v13, 5  ;;  %v1079_v20 = vrot.slane %v1077_v14, 4  ;;  %433 = vst [vmem:[#allocation2 + $0x70] sm:$0xf] %v6181_v1  ;;  %v901_v9 = vld [vmem:[#allocation2 + $0x4] sm:$0xf]  ;;  %v297_v11 = vmul.f32 %v6233_v3, %v261_v57  ;;  %v273_v57 = vmul.f32 %v6233_v3, %v237_v40 }
  0x2c   : > { %v1070_v24 = vor.u32 %v1069_v16, %v1066_v15  ;;  %v1085_v34 = vrot.slane %v1083_v17, 5  ;;  %434 = vst [vmem:[#allocation2 + $0x74] sm:$0x1] %v6181_v1  ;;  %v968_v12 = vshrl.u32 %v900_v8, 16  ;;  %v971_v13 = vshll.u32 %v900_v8, 16  ;;  %v6019_v40 = vld [vmem:[%s7824_s3 + $0xf0] sm:$0xff] }
  0x2d   : > { %v1080_v33 = vor.u32 %v1079_v20, %v1075_v19  ;;  %435 = vst [vmem:[#allocation2 + $0x78] sm:$0xf] %v6181_v1  ;;  %v977_v14 = vshll.u32 %v901_v9, 16  ;;  %v981_v15 = vshrl.u32 %v901_v9, 16  ;;  %v531_v16 = vshrl.u32 %v381_v60, 16 }
  0x2e   : > { %v1071_v38 = vrot.slane %v1070_v24, 4  ;;  %436 = vst [vmem:[#allocation2 + $0x7c] sm:$0xf] %v6181_v1  ;;  %v6396_v54 = vld [vmem:[#allocation2 + $0x60] sm:$0xf]  ;;  %v534_v17 = vshll.u32 %v381_v60, 16  ;;  %v333_v55 = vadd.f32 %v6247_v4, %v297_v11 }
  0x2f   : > { %v1081_v43 = vrot.slane %v1080_v33, 4  ;;  %437 = vst [vmem:[#allocation2 + $0x80] sm:$0x1] %v6181_v1  ;;  %v838_v7 = vsel %vm6304_vm7, %v6353_v21, %v6396_v54  ;;  %v539_v18 = vshrl.u32 %v382_v63, 16  ;;  %v970_v20 = vrot.slane %v968_v12, 4  ;;  %v247_v11 = vld [vmem:[%s6242_s29 + $0x50] sm:$0xff] }
  0x30   : > { %v1076_v47 = vsel %vm6367_vm10, %v1071_v38, %v1075_v19  ;;  %438 = vst [vmem:[#allocation2 + $0x84] sm:$0xf] %v6181_v1  ;;  %v542_v19 = vshll.u32 %v382_v63, 16  ;;  %v973_v23 = vrot.slane %v971_v13, 5  ;;  %v979_v24 = vrot.slane %v977_v14, 5 }
  0x31   : > { %v1086_v51 = vsel %vm6367_vm10, %v1081_v43, %v1085_v34  ;;  %v1376_v52 = vunpack.c.l.b16 %v1076_v47  ;;  %439 = vst [vmem:[#allocation2 + $0x88] sm:$0xf] %v6181_v1  ;;  %v983_v25 = vrot.slane %v981_v15, 4  ;;  %v533_v28 = vrot.slane %v531_v16, 7  ;;  %v841_v42 = vld [vmem:[#allocation2 + $0x68] sm:$0x1] }
  0x32   : > { %v1377_v58 = vunpack.c.l.b16 %v1086_v51  ;;  %440 = vst [vmem:[#allocation2 + $0x8c] sm:$0x1] %v6181_v1  ;;  %v6422_v29 = vrot.slane %v539_v18, 7  ;;  %v298_v33 = vmul.f32 %v6233_v3, %v262_v5  ;;  %v974_v34 = vor.u32 %v973_v23, %v970_v20  ;;  %v6438_v51 = vld [vmem:[#allocation2 + $0x3c] sm:$0xf] }
  0x33   : > { %441 = vst [vmem:[#allocation2 + $0x90] sm:$0xf] %v6181_v1  ;;  %v984_v36 = vor.u32 %v983_v25, %v979_v24  ;;  %v599_v38 = vshrl.u32 %v6415_v10, 16  ;;  %v6430_v43 = vor.u32 %v534_v17, %v533_v28  ;;  %v537_v44 = vrot.slane %v533_v28, 4  ;;  %v820_v9 = vld [vmem:[#allocation2 + $0x44] sm:$0x1] }
  0x34   : > { %v1404_v6 = vpack.c.b16 %v1377_v58, %v1376_v52  ;;  %442 = vst [vmem:[#allocation2 + $0x94] sm:$0xf] %v6181_v1  ;;  %v544_v45 = vor.u32 %v542_v19, %v6422_v29  ;;  %v602_v46 = vshll.u32 %v6415_v10, 16  ;;  %v975_v47 = vrot.slane %v974_v34, 4  ;;  %v6463_v10 = vld [vmem:[#allocation2 + $0x6c] sm:$0xf] }
  0x35   : > { %443 = vst [vmem:[#allocation2 + $0x98] sm:$0x1] %v6181_v1  ;;  %v985_v48 = vrot.slane %v984_v36, 4  ;;  %v6435_v50 = vrot.slane %v599_v38, 7  ;;  %v607_v52 = vshrl.u32 %v390_v30, 16  ;;  %v274_v58 = vmul.f32 %v6233_v3, %v238_v41  ;;  %v5996_v17 = vld [vmem:[%s7824_s3 + $0xb8] sm:$0xff] }
  0x36   : > { %1508 = vmatmul.bf16.vlgmr.msra.gmra.mxu1 %v1404_v6  ;;  %444 = vst [vmem:[#allocation2 + $0x9c] sm:$0xf] %v6181_v1  ;;  %v6448_v60 = vsel %vm6284_vm5, %v597_v26, %v841_v42  ;;  %v980_v63 = vsel %vm6367_vm10, %v975_v47, %v979_v24  ;;  %v334_v5 = vadd.f32 %v6247_v4, %v298_v33  ;;  %v546_v26 = vrot.slane %v6422_v29, 4  ;;  %v6020_v19 = vld [vmem:[%s7824_s3 + $0xf8] sm:$0xff]  ;;  %v5995_v34 = vld [vmem:[%s7824_s3 + $0xb0] sm:$0xff] }
  0x37   : > { %445 = vst [vmem:[#allocation2 + $0xa0] sm:$0xf] %v6181_v1  ;;  %v990_v0 = vsel %vm6367_vm10, %v985_v48, %v989_v49  ;;  %v1368_v6 = vunpack.c.l.b16 %v980_v63  ;;  %v6460_v2 = vsel %vm6296_vm6, %v537_v44, %v544_v45  ;;  %v817_v13 = vsel %vm6304_vm7, %v6430_v43, %v6438_v51  ;;  %v5980_v20 = vld [vmem:[%s7824_s3 + $0x38] sm:$0xff]  ;;  %2094 = vmatpush.bf16.msrb.mxu2 %v5996_v17  ;;  %v5979_v41 = vld [vmem:[%s7824_s3 + $0x30] sm:$0xff]  ;;  %v6544_v17 = vld [vmem:[#allocation2 + $0xc] sm:$0xf] }
  0x38   : > { %446 = vst [vmem:[#allocation2 + $0xa4] sm:$0x1] %v6181_v1  ;;  %v1369_v8 = vunpack.c.l.b16 %v990_v0  ;;  %v6472_v14 = vor.u32 %v602_v46, %v6435_v50  ;;  %v6474_v15 = vrot.slane %v607_v52, 7  ;;  %v610_v16 = vshll.u32 %v390_v30, 16  ;;  %v6028_v28 = vld [vmem:[%s7824_s3 + $0x138] sm:$0xff]  ;;  %2408 = vmatpush.bf16.msrb.mxu3 %v6020_v19  ;;  %1713 = vmatpush.bf16.msrb.mxu1 %v5980_v20 }
  0x39   : > { %447 = vst [vmem:[#allocation2 + $0xa8] sm:$0xf] %v6181_v1  ;;  %v365_v23 = vmax.f32 %v333_v55, 0.0  ;;  %v309_v24 = vadd.f32 %v6247_v4, %v273_v57  ;;  %v310_v25 = vadd.f32 %v6247_v4, %v274_v58  ;;  %v605_v29 = vrot.slane %v6435_v50, 4  ;;  %3090 = vmatpush.bf16.msrb.mxu0 %v6028_v28  ;;  %v848_v49 = vld [vmem:[#allocation2 + $0x74] sm:$0x1] }
  0x3a   : > { %448 = vst [vmem:[#allocation2 + $0xac] sm:$0xf] %v6181_v1  ;;  %v6450_v61 = vld [vmem:[#allocation2 + $0x90] sm:$0xf]  ;;  %v1400_v18 = vpack.c.b16 %v1369_v8, %v1368_v6  ;;  %v612_v30 = vor.u32 %v610_v16, %v6474_v15  ;;  %v283_v33 = vmul.f32 %v6233_v3, %v247_v11  ;;  %v366_v36 = vmax.f32 %v334_v5, 0.0  ;;  %v248_v55 = vld [vmem:[%s6242_s29 + $0x58] sm:$0xff] }
  0x3b   : > { %449 = vst [vmem:[#allocation2 + $0xb0] sm:$0x1] %v6181_v1  ;;  %v866_v27 = vsel %vm6304_vm7, %v6401_v59, %v6450_v61  ;;  %v6505_v59 = vsel %vm6284_vm5, %v546_v26, %v820_v9  ;;  %v397_v37 = vpack.c.bf16 %v365_v23, %v365_v23  ;;  %v845_v42 = vsel %vm6304_vm7, %v6472_v14, %v6463_v10  ;;  %v255_v5 = vld [vmem:[%s6242_s29 + $0x90] sm:$0xff] }
  0x3c   : > { %450 = vst [vmem:[#allocation2 + $0xb4] sm:$0xf] %v6181_v1  ;;  %v869_v12 = vld [vmem:[#allocation2 + $0x98] sm:$0x1]  ;;  %1488 = vmatmul.bf16.vlgmr.msra.gmra.mxu0 %v1400_v18  ;;  %v341_v22 = vmax.f32 %v309_v24, 0.0  ;;  %v342_v44 = vmax.f32 %v310_v25, 0.0  ;;  %v398_v45 = vpack.c.bf16 %v366_v36, %v366_v36  ;;  %v6527_v48 = vsel %vm6296_vm6, %v605_v29, %v612_v30  ;;  %2095 = vmatpush.bf16.msrb.mxu2 %v5995_v34 }
  0x3d   : > { %451 = vst [vmem:[#allocation2 + $0xb8] sm:$0xf] %v6181_v1  ;;  %v870_v38 = vsel %vm6284_vm5, %v665_v62, %v869_v12  ;;  %v614_v62 = vrot.slane %v6474_v15, 4  ;;  %v667_v46 = vshrl.u32 %v397_v37, 16  ;;  %v670_v47 = vshll.u32 %v397_v37, 16  ;;  %2409 = vmatpush.bf16.msrb.mxu3 %v6019_v40  ;;  %1714 = vmatpush.bf16.msrb.mxu1 %v5979_v41  ;;  %v256_v25 = vld [vmem:[%s6242_s29 + $0x98] sm:$0xff] }
  0x3e   : > { %452 = vst [vmem:[#allocation2 + $0xbc] sm:$0x1] %v6181_v1  ;;  %v373_v50 = vpack.c.bf16 %v341_v22, %v341_v22  ;;  %v374_v52 = vpack.c.bf16 %v342_v44, %v342_v44  ;;  %v319_v57 = vadd.f32 %v6247_v4, %v283_v33  ;;  %v675_v61 = vshrl.u32 %v398_v45, 16  ;;  %v6539_v6 = vld [vmem:[#allocation2 + $0x9c] sm:$0xf]  ;;  %v263_v34 = vld [vmem:[%s6242_s29 + $0xd0] sm:$0xff] }
  0x3f   : > { %453 = vst [vmem:[#allocation2 + $0xc0] sm:$0xf] %v6181_v1  ;;  %v669_v58 = vrot.slane %v667_v46, 7  ;;  %v678_v63 = vshll.u32 %v398_v45, 16  ;;  %v284_v0 = vmul.f32 %v6233_v3, %v248_v55  ;;  %v876_v8 = vld [vmem:[#allocation2 + $0xa4] sm:$0x1]  ;;  %v6550_v54 = vsel %vm6284_vm5, %v614_v62, %v848_v49 }
  0x40   : > { %454 = vst [vmem:[#allocation2 + $0xc4] sm:$0xf] %v6181_v1  ;;  %v463_v26 = vshrl.u32 %v373_v50, 16  ;;  %v471_v9 = vshrl.u32 %v374_v52, 16  ;;  %v474_v11 = vshll.u32 %v374_v52, 16  ;;  %v677_v16 = vrot.slane %v675_v61, 7 }
  0x41   : > { %455 = vst [vmem:[#allocation2 + $0xc8] sm:$0x1] %v6181_v1  ;;  %v6542_v12 = vor.u32 %v670_v47, %v669_v58  ;;  %v673_v15 = vrot.slane %v669_v58, 4  ;;  %v320_v21 = vadd.f32 %v6247_v4, %v284_v0  ;;  %v792_v19 = vld [vmem:[#allocation2 + $0x14] sm:$0x1]  ;;  %v291_v28 = vmul.f32 %v6233_v3, %v255_v5  ;;  %v264_v40 = vld [vmem:[%s6242_s29 + $0xd8] sm:$0xff] }
  0x42   : > { %456 = vst [vmem:[#allocation2 + $0xcc] sm:$0xf] %v6181_v1  ;;  %v473_v18 = vrot.slane %v471_v9, 7  ;;  %v680_v20 = vor.u32 %v678_v63, %v677_v16  ;;  %v682_v23 = vrot.slane %v677_v16, 4  ;;  %v292_v44 = vmul.f32 %v6233_v3, %v256_v25 }
  0x43   : > { %457 = vst [vmem:[#allocation2 + $0xd0] sm:$0xf] %v6181_v1  ;;  %v352_v24 = vmax.f32 %v320_v21, 0.0  ;;  %v299_v45 = vmul.f32 %v6233_v3, %v263_v34 }
  0x44   : > { %458 = vst [vmem:[#allocation2 + $0xd4] sm:$0x1] %v6181_v1  ;;  %v466_v1 = vshll.u32 %v373_v50, 16  ;;  %v476_v30 = vor.u32 %v474_v11, %v473_v18  ;;  %v478_v33 = vrot.slane %v473_v18, 4  ;;  %v6560_v36 = vsel %vm6296_vm6, %v673_v15, %v680_v20 }
  0x45   : > { %839 = vst [vmem:[#allocation2 + $0x60] sm:$0xf] %v838_v7  ;;  %v465_v7 = vrot.slane %v463_v26, 7  ;;  %v6568_v37 = vsel %vm6284_vm5, %v682_v23, %v876_v8  ;;  %v6586_v22 = vpack.c.bf16 %v352_v24, %v352_v24  ;;  %v6599_v50 = vadd.f32 %v6247_v4, %v291_v28 }
  0x46   : > { %840 = vst [vmem:[#allocation2 + $0x64] sm:$0xf] %v6394_v53  ;;  %v351_v53 = vmax.f32 %v319_v57, 0.0  ;;  %v6592_v43 = vsel %vm6284_vm5, %v478_v33, %v792_v19  ;;  %v6608_v58 = vadd.f32 %v6247_v4, %v292_v44  ;;  %v6611_v61 = vadd.f32 %v6247_v4, %v299_v45  ;;  %v6018_v44 = vld [vmem:[%s7824_s3 + $0xe8] sm:$0xff] }
  0x47   : > { %843 = vst [vmem:[#allocation2 + $0x68] sm:$0x1] %v6448_v60  ;;  %v6555_v60 = vor.u32 %v466_v1, %v465_v7  ;;  %v469_v29 = vrot.slane %v465_v7, 4  ;;  %2410 = vmatpush.bf16.msrb.mxu3 %v6018_v44 }
  0x48   : > { %867 = vst [vmem:[#allocation2 + $0x90] sm:$0xf] %v866_v27  ;;  %v873_v27 = vsel %vm6304_vm7, %v6542_v12, %v6539_v6  ;;  %v6026_v6 = vld [vmem:[%s7824_s3 + $0x128] sm:$0xff] }
  0x49   : > { %868 = vst [vmem:[#allocation2 + $0x94] sm:$0xf] %v6406_v56  ;;  %v6570_v56 = vpack.c.bf16 %v351_v53, %v351_v53  ;;  %v787_v41 = vsel %vm6304_vm7, %v6555_v60, %v6544_v17  ;;  %v559_v17 = vshll.u32 %v6586_v22, 16  ;;  %v359_v60 = vmax.f32 %v6599_v50, 0.0 }
  0x4a   : > { %871 = vst [vmem:[#allocation2 + $0x98] sm:$0x1] %v870_v38  ;;  %v6580_v38 = vsel %vm6296_vm6, %v469_v29, %v476_v30 }
  0x4b   : > { %818 = vst [vmem:[#allocation2 + $0x3c] sm:$0xf] %v817_v13  ;;  %v548_v51 = vshrl.u32 %v6570_v56, 16  ;;  %v551_v13 = vshll.u32 %v6570_v56, 16 }
  0x4c   : > { %v916_v62 = vld [vmem:[#allocation2 + $0x60] sm:$0xf]  ;;  %819 = vst [vmem:[#allocation2 + $0x40] sm:$0xf] %v6460_v2  ;;  %v300_v2 = vmul.f32 %v6233_v3, %v264_v40  ;;  %v5994_v3 = vld [vmem:[%s7824_s3 + $0xa8] sm:$0xff] }
  0x4d   : > { %v917_v46 = vld [vmem:[#allocation2 + $0x64] sm:$0xf]  ;;  %v1160_v47 = vshrl.u32 %v916_v62, 16  ;;  %v1163_v49 = vshll.u32 %v916_v62, 16  ;;  %822 = vst [vmem:[#allocation2 + $0x44] sm:$0x1] %v6505_v59  ;;  %2096 = vmatpush.bf16.msrb.mxu2 %v5994_v3 }
  0x4e   : > { %v956_v52 = vld [vmem:[#allocation2 + $0x68] sm:$0x1]  ;;  %v1169_v55 = vshll.u32 %v917_v46, 16  ;;  %v1173_v57 = vshrl.u32 %v917_v46, 16  ;;  %846 = vst [vmem:[#allocation2 + $0x6c] sm:$0xf] %v845_v42  ;;  %v6617_v8 = vadd.f32 %v6247_v4, %v300_v2 }
  0x4f   : > { %v1162_v59 = vrot.slane %v1160_v47, 4  ;;  %v1165_v63 = vrot.slane %v1163_v49, 5  ;;  %v1179_v0 = vshll.u32 %v956_v52, 16  ;;  %v924_v5 = vld [vmem:[#allocation2 + $0x90] sm:$0xf] }
  0x50   : > { %v1171_v26 = vrot.slane %v1169_v55, 5  ;;  %v1175_v10 = vrot.slane %v1173_v57, 4  ;;  %v925_v14 = vld [vmem:[#allocation2 + $0x94] sm:$0xf]  ;;  %v1256_v42 = vshrl.u32 %v924_v5, 16  ;;  %v1259_v1 = vshll.u32 %v924_v5, 16 }
  0x51   : > { %v1166_v9 = vor.u32 %v1165_v63, %v1162_v59  ;;  %v1181_v11 = vrot.slane %v1179_v0, 5  ;;  %v960_v15 = vld [vmem:[#allocation2 + $0x98] sm:$0x1]  ;;  %v1265_v16 = vshll.u32 %v925_v14, 16  ;;  %v1269_v21 = vshrl.u32 %v925_v14, 16  ;;  %v6027_v59 = vld [vmem:[%s7824_s3 + $0x130] sm:$0xff] }
  0x52   : > { %v1176_v7 = vor.u32 %v1175_v10, %v1171_v26  ;;  %v1258_v18 = vrot.slane %v1256_v42, 4  ;;  %v1261_v19 = vrot.slane %v1259_v1, 5  ;;  %v1275_v53 = vshll.u32 %v960_v15, 16  ;;  %v910_v20 = vld [vmem:[#allocation2 + $0x3c] sm:$0xf]  ;;  %v5978_v63 = vld [vmem:[%s7824_s3 + $0x28] sm:$0xff]  ;;  %3091 = vmatpush.bf16.msrb.mxu0 %v6027_v59 }
  0x53   : > { %v1167_v23 = vrot.slane %v1166_v9, 4  ;;  %v1267_v24 = vrot.slane %v1265_v16, 5  ;;  %v1271_v4 = vrot.slane %v1269_v21, 4  ;;  %v911_v25 = vld [vmem:[#allocation2 + $0x40] sm:$0xf]  ;;  %v1088_v28 = vshrl.u32 %v910_v20, 16  ;;  %1715 = vmatpush.bf16.msrb.mxu1 %v5978_v63 }
  0x54   : > { %v1177_v29 = vrot.slane %v1176_v7, 4  ;;  %v1262_v30 = vor.u32 %v1261_v19, %v1258_v18  ;;  %v1277_v33 = vrot.slane %v1275_v53, 5  ;;  %v953_v34 = vld [vmem:[#allocation2 + $0x44] sm:$0x1]  ;;  %v1091_v40 = vshll.u32 %v910_v20, 16 }
  0x55   : > { %v1172_v62 = vsel %vm6367_vm10, %v1167_v23, %v1171_v26  ;;  %v1272_v45 = vor.u32 %v1271_v4, %v1267_v24  ;;  %v1090_v46 = vrot.slane %v1088_v28, 4  ;;  %v1097_v47 = vshll.u32 %v911_v25, 16  ;;  %847 = vst [vmem:[#allocation2 + $0x70] sm:$0xf] %v6527_v48  ;;  %v918_v49 = vld [vmem:[#allocation2 + $0x6c] sm:$0xf] }
  0x56   : > { %v1182_v2 = vsel %vm6367_vm10, %v1177_v29, %v1181_v11  ;;  %v1384_v52 = vunpack.c.l.b16 %v1172_v62  ;;  %v1263_v55 = vrot.slane %v1262_v30, 4  ;;  %v1093_v57 = vrot.slane %v1091_v40, 5  ;;  %850 = vst [vmem:[#allocation2 + $0x74] sm:$0x1] %v6550_v54  ;;  %v5993_v54 = vld [vmem:[%s7824_s3 + $0xa0] sm:$0xff]  ;;  %3092 = vmatpush.bf16.msrb.mxu0 %v6026_v6 }
  0x57   : > { %v1385_v0 = vunpack.c.l.b16 %v1182_v2  ;;  %v1273_v48 = vrot.slane %v1272_v45, 4  ;;  %v1099_v5 = vrot.slane %v1097_v47, 5  ;;  %v1101_v3 = vshrl.u32 %v911_v25, 16  ;;  %874 = vst [vmem:[#allocation2 + $0x9c] sm:$0xf] %v873_v27  ;;  %v6017_v1 = vld [vmem:[%s7824_s3 + $0xe0] sm:$0xff]  ;;  %2097 = vmatpush.bf16.msrb.mxu2 %v5993_v54 }
  0x58   : > { %v1268_v26 = vsel %vm6367_vm10, %v1263_v55, %v1267_v24  ;;  %v1094_v10 = vor.u32 %v1093_v57, %v1090_v46  ;;  %v1107_v14 = vshll.u32 %v953_v34, 16  ;;  %v1184_v42 = vshrl.u32 %v918_v49, 16  ;;  %875 = vst [vmem:[#allocation2 + $0xa0] sm:$0xf] %v6560_v36  ;;  %v5977_v36 = vld [vmem:[%s7824_s3 + $0x20] sm:$0xff]  ;;  %2411 = vmatpush.bf16.msrb.mxu3 %v6017_v1 }
  0x59   : > { %v1408_v12 = vpack.c.b16 %v1385_v0, %v1384_v52  ;;  %v1278_v27 = vsel %vm6367_vm10, %v1273_v48, %v1277_v33  ;;  %v1392_v9 = vunpack.c.l.b16 %v1268_v26  ;;  %v1103_v11 = vrot.slane %v1101_v3, 4  ;;  %878 = vst [vmem:[#allocation2 + $0xa4] sm:$0x1] %v6568_v37  ;;  %1716 = vmatpush.bf16.msrb.mxu1 %v5977_v36 }
  0x5a   : > { %v1393_v15 = vunpack.c.l.b16 %v1278_v27  ;;  %v1095_v16 = vrot.slane %v1094_v10, 4  ;;  %v1109_v21 = vrot.slane %v1107_v14, 5  ;;  %v1186_v7 = vrot.slane %v1184_v42, 4  ;;  %788 = vst [vmem:[#allocation2 + $0xc] sm:$0xf] %v787_v41 }
  0x5b   : > { %1528 = vmatmul.bf16.vlgmr.msra.gmra.mxu2 %v1408_v12  ;;  %v1104_v18 = vor.u32 %v1103_v11, %v1099_v5  ;;  %v1187_v19 = vshll.u32 %v918_v49, 16  ;;  %789 = vst [vmem:[#allocation2 + $0x10] sm:$0xf] %v6580_v38  ;;  %v6665_v37 = vrot.slane %v548_v51, 7  ;;  %v556_v53 = vshrl.u32 %v6586_v22, 16 }
  0x5c   : > { %v1412_v20 = vpack.c.b16 %v1393_v15, %v1392_v9  ;;  %v1100_v23 = vsel %vm6367_vm10, %v1095_v16, %v1099_v5  ;;  %v919_v24 = vld [vmem:[#allocation2 + $0x70] sm:$0xf]  ;;  %794 = vst [vmem:[#allocation2 + $0x14] sm:$0x1] %v6592_v43 }
  0x5d   : > { %v1105_v38 = vrot.slane %v1104_v18, 4  ;;  %v1378_v41 = vunpack.c.l.b16 %v1100_v23  ;;  %v957_v4 = vld [vmem:[#allocation2 + $0x74] sm:$0x1]  ;;  %v1189_v51 = vrot.slane %v1187_v19, 5  ;;  %v1193_v25 = vshll.u32 %v919_v24, 16 }
  0x5e   : > { %1548 = vmatmul.bf16.vlgmr.msra.gmra.mxu3 %v1412_v20  ;;  %v1197_v28 = vshrl.u32 %v919_v24, 16  ;;  %v1203_v29 = vshll.u32 %v957_v4, 16  ;;  %v926_v30 = vld [vmem:[#allocation2 + $0x9c] sm:$0xf]  ;;  %v6676_v33 = vor.u32 %v551_v13, %v6665_v37  ;;  %v554_v43 = vrot.slane %v6665_v37, 4 }
  0x5f   : > { %v1110_v34 = vsel %vm6367_vm10, %v1105_v38, %v1109_v21  ;;  %v1190_v40 = vor.u32 %v1189_v51, %v1186_v7  ;;  %v1195_v44 = vrot.slane %v1193_v25, 5  ;;  %v927_v62 = vld [vmem:[#allocation2 + $0xa0] sm:$0xf]  ;;  %v1280_v45 = vshrl.u32 %v926_v30, 16  ;;  %v823_v25 = vld [vmem:[#allocation2 + $0x48] sm:$0xf] }
  0x60   : > { %v1379_v46 = vunpack.c.l.b16 %v1110_v34  ;;  %v1199_v47 = vrot.slane %v1197_v28, 4  ;;  %v1205_v49 = vrot.slane %v1203_v29, 5  ;;  %v961_v2 = vld [vmem:[#allocation2 + $0xa4] sm:$0x1]  ;;  %v1283_v52 = vshll.u32 %v926_v30, 16 }
  0x61   : > { %v1191_v55 = vrot.slane %v1190_v40, 4  ;;  %v1282_v57 = vrot.slane %v1280_v45, 4  ;;  %v1289_v59 = vshll.u32 %v927_v62, 16  ;;  %v1293_v56 = vshrl.u32 %v927_v62, 16  ;;  %v902_v13 = vld [vmem:[#allocation2 + $0xc] sm:$0xf] }
  0x62   : > { %v1405_v63 = vpack.c.b16 %v1379_v46, %v1378_v41  ;;  %v1200_v0 = vor.u32 %v1199_v47, %v1195_v44  ;;  %v1285_v48 = vrot.slane %v1283_v52, 5  ;;  %v1299_v5 = vshll.u32 %v961_v2, 16  ;;  %v6681_v3 = vld [vmem:[#allocation2 + $0x10] sm:$0xf] }
  0x63   : > { %v1196_v54 = vsel %vm6367_vm10, %v1191_v55, %v1195_v44  ;;  %v1291_v26 = vrot.slane %v1289_v59, 5  ;;  %v1295_v10 = vrot.slane %v1293_v56, 4  ;;  %v6685_v14 = vld [vmem:[#allocation2 + $0x14] sm:$0x1]  ;;  %v992_v42 = vshrl.u32 %v902_v13, 16 }
  0x64   : > { %1513 = vmatmul.bf16.gmra.mxu1 %v1405_v63  ;;  %v1201_v1 = vrot.slane %v1200_v0, 4  ;;  %v1386_v6 = vunpack.c.l.b16 %v1196_v54  ;;  %v1286_v12 = vor.u32 %v1285_v48, %v1282_v57  ;;  %v1301_v27 = vrot.slane %v1299_v5, 5  ;;  %v827_v40 = vld [vmem:[#allocation2 + $0x50] sm:$0x1]  ;;  %v851_v54 = vld [vmem:[#allocation2 + $0x78] sm:$0xf] }
  0x65   : > { %v1296_v9 = vor.u32 %v1295_v10, %v1291_v26  ;;  %v994_v11 = vrot.slane %v992_v42, 4  ;;  %v995_v36 = vshll.u32 %v902_v13, 16  ;;  %v1001_v15 = vshll.u32 %v6681_v3, 16  ;;  %v239_v59 = vld [vmem:[%s6242_s29 + $0x10] sm:$0xff]  ;;  %v6724_v42 = vld [vmem:[%s7822_s1] ss:$0 sm:$0xff] }
  0x66   : > { %v1206_v16 = vsel %vm6367_vm10, %v1201_v1, %v1205_v49  ;;  %v1287_v21 = vrot.slane %v1286_v12, 4  ;;  %v1005_v7 = vshrl.u32 %v6681_v3, 16  ;;  %v1011_v18 = vshll.u32 %v6685_v14, 16 }
  0x67   : > { %v1387_v19 = vunpack.c.l.b16 %v1206_v16  ;;  %v1297_v20 = vrot.slane %v1296_v9, 4  ;;  %v997_v23 = vrot.slane %v995_v36, 5  ;;  %v1003_v24 = vrot.slane %v1001_v15, 5  ;;  %v5992_v9 = vld [vmem:[%s7824_s3 + $0x98] sm:$0xff]  ;;  %v855_v36 = vld [vmem:[#allocation2 + $0x80] sm:$0x1] }
  0x68   : > { %v1292_v38 = vsel %vm6367_vm10, %v1287_v21, %v1291_v26  ;;  %v1007_v41 = vrot.slane %v1005_v7, 4  ;;  %v1013_v4 = vrot.slane %v1011_v18, 5  ;;  %v558_v51 = vrot.slane %v556_v53, 7  ;;  %2098 = vmatpush.bf16.msrb.mxu2 %v5992_v9 }
  0x69   : > { %v1409_v28 = vpack.c.b16 %v1387_v19, %v1386_v6  ;;  %v1302_v29 = vsel %vm6367_vm10, %v1297_v20, %v1301_v27  ;;  %v1394_v30 = vunpack.c.l.b16 %v1292_v38  ;;  %v998_v34 = vor.u32 %v997_v23, %v994_v11  ;;  %v249_v11 = vld [vmem:[%s6242_s29 + $0x60] sm:$0xff] }
  0x6a   : > { %v1395_v44 = vunpack.c.l.b16 %v1302_v29  ;;  %v1008_v62 = vor.u32 %v1007_v41, %v1003_v24  ;;  %v561_v45 = vor.u32 %v559_v17, %v558_v51  ;;  %v563_v46 = vrot.slane %v558_v51, 4 }
  0x6b   : > { %1533 = vmatmul.bf16.gmra.mxu2 %v1409_v28  ;;  %v999_v47 = vrot.slane %v998_v34, 4  ;;  %v824_v53 = vsel %vm6304_vm7, %v6676_v33, %v823_v25  ;;  %v360_v49 = vmax.f32 %v6608_v58, 0.0  ;;  %v391_v2 = vpack.c.bf16 %v359_v60, %v359_v60  ;;  %v240_v60 = vld [vmem:[%s6242_s29 + $0x18] sm:$0xff] }
  0x6c   : > { %v1413_v52 = vpack.c.b16 %v1395_v44, %v1394_v30  ;;  %v1009_v55 = vrot.slane %v1008_v62, 4  ;;  %v562_v22 = vsel %vm6296_vm6, %v554_v43, %v561_v45  ;;  %825 = vst [vmem:[#allocation2 + $0x48] sm:$0xf] %v824_v53  ;;  %v828_v17 = vsel %vm6284_vm5, %v563_v46, %v827_v40  ;;  %v879_v62 = vld [vmem:[#allocation2 + $0xa8] sm:$0xf] }
  0x6d   : > { %v1004_v33 = vsel %vm6367_vm10, %v999_v47, %v1003_v24  ;;  %826 = vst [vmem:[#allocation2 + $0x4c] sm:$0xf] %v562_v22  ;;  %v392_v58 = vpack.c.bf16 %v360_v49, %v360_v49  ;;  %v616_v57 = vshrl.u32 %v391_v2, 16  ;;  %v619_v50 = vshll.u32 %v391_v2, 16  ;;  %v6737_v24 = vld [vmem:[%s7823_s2] ss:$0 sm:$0xff] }
  0x6e   : > { %1553 = vmatmul.bf16.gmra.mxu3 %v1413_v52  ;;  %v1014_v37 = vsel %vm6367_vm10, %v1009_v55, %v1013_v4  ;;  %v1370_v56 = vunpack.c.l.b16 %v1004_v33  ;;  %829 = vst [vmem:[#allocation2 + $0x50] sm:$0x1] %v828_v17  ;;  %v367_v43 = vmax.f32 %v6611_v61, 0.0  ;;  %v368_v13 = vmax.f32 %v6617_v8, 0.0  ;;  %v250_v45 = vld [vmem:[%s6242_s29 + $0x68] sm:$0xff] }
  0x6f   : > { %v1371_v63 = vunpack.c.l.b16 %v1014_v37  ;;  %v618_v0 = vrot.slane %v616_v57, 7  ;;  %v624_v48 = vshrl.u32 %v392_v58, 16  ;;  %v627_v5 = vshll.u32 %v392_v58, 16 }
  0x70   : > { %v399_v26 = vpack.c.bf16 %v367_v43, %v367_v43  ;;  %v400_v10 = vpack.c.bf16 %v368_v13, %v368_v13  ;;  %v275_v1 = vmul.f32 %v6724_v42, %v239_v59  ;;  %v276_v6 = vmul.f32 %v6724_v42, %v240_v60 }
  0x71   : > { %v1401_v61 = vpack.c.b16 %v1371_v63, %v1370_v56  ;;  %v621_v12 = vor.u32 %v619_v50, %v618_v0  ;;  %v622_v8 = vrot.slane %v618_v0, 4  ;;  %v626_v27 = vrot.slane %v624_v48, 7  ;;  %v883_v50 = vld [vmem:[#allocation2 + $0xb0] sm:$0x1]  ;;  %v6016_v0 = vld [vmem:[%s7824_s3 + $0xd8] sm:$0xff]  ;;  %v6025_v48 = vld [vmem:[%s7824_s3 + $0x120] sm:$0xff] }
  0x72   : > { %v684_v15 = vshrl.u32 %v399_v26, 16  ;;  %v687_v16 = vshll.u32 %v399_v26, 16  ;;  %v692_v21 = vshrl.u32 %v400_v10, 16  ;;  %v695_v7 = vshll.u32 %v400_v10, 16  ;;  %2412 = vmatpush.bf16.msrb.mxu3 %v6016_v0  ;;  %3093 = vmatpush.bf16.msrb.mxu0 %v6025_v48 }
  0x73   : > { %1493 = vmatmul.bf16.gmra.mxu0 %v1401_v61  ;;  %v912_v18 = vld [vmem:[#allocation2 + $0x48] sm:$0xf]  ;;  %v629_v19 = vor.u32 %v627_v5, %v626_v27  ;;  %v631_v20 = vrot.slane %v626_v27, 4  ;;  %v852_v23 = vsel %vm6304_vm7, %v621_v12, %v851_v54  ;;  %v311_v38 = vadd.f32 %v6737_v24, %v275_v1  ;;  %v5976_v5 = vld [vmem:[%s7824_s3 + $0x18] sm:$0xff]  ;;  %v5991_v12 = vld [vmem:[%s7824_s3 + $0x90] sm:$0xff] }
  0x74   : > { %v913_v41 = vld [vmem:[#allocation2 + $0x4c] sm:$0xf]  ;;  %v1112_v4 = vshrl.u32 %v912_v18, 16  ;;  %v1115_v51 = vshll.u32 %v912_v18, 16  ;;  %853 = vst [vmem:[#allocation2 + $0x78] sm:$0xf] %v852_v23  ;;  %v312_v25 = vadd.f32 %v6737_v24, %v276_v6  ;;  %v6742_v28 = vmul.f32 %v6724_v42, %v249_v11  ;;  %1717 = vmatpush.bf16.msrb.mxu1 %v5976_v5  ;;  %2099 = vmatpush.bf16.msrb.mxu2 %v5991_v12 }
  0x75   : > { %v954_v29 = vld [vmem:[#allocation2 + $0x50] sm:$0x1]  ;;  %v1121_v30 = vshll.u32 %v913_v41, 16  ;;  %v1125_v34 = vshrl.u32 %v913_v41, 16  ;;  %v630_v40 = vsel %vm6296_vm6, %v622_v8, %v629_v19  ;;  %v856_v44 = vsel %vm6284_vm5, %v631_v20, %v855_v36 }
  0x76   : > { %v1114_v46 = vrot.slane %v1112_v4, 4  ;;  %v1117_v47 = vrot.slane %v1115_v51, 5  ;;  %v1131_v53 = vshll.u32 %v954_v29, 16  ;;  %854 = vst [vmem:[#allocation2 + $0x7c] sm:$0xf] %v630_v40  ;;  %v686_v49 = vrot.slane %v684_v15, 7 }
  0x77   : > { %v1123_v2 = vrot.slane %v1121_v30, 5  ;;  %v1127_v52 = vrot.slane %v1125_v34, 4  ;;  %857 = vst [vmem:[#allocation2 + $0x80] sm:$0x1] %v856_v44  ;;  %v694_v55 = vrot.slane %v692_v21, 7  ;;  %v343_v22 = vmax.f32 %v311_v38, 0.0 }
  0x78   : > { %v1118_v17 = vor.u32 %v1117_v47, %v1114_v46  ;;  %v1133_v33 = vrot.slane %v1131_v53, 5  ;;  %v689_v58 = vor.u32 %v687_v16, %v686_v49  ;;  %v690_v57 = vrot.slane %v686_v49, 4  ;;  %v6015_v36 = vld [vmem:[%s7824_s3 + $0xd0] sm:$0xff]  ;;  %v6024_v4 = vld [vmem:[%s7824_s3 + $0x118] sm:$0xff] }
  0x79   : > { %v1128_v59 = vor.u32 %v1127_v52, %v1123_v2  ;;  %v697_v60 = vor.u32 %v695_v7, %v694_v55  ;;  %v699_v37 = vrot.slane %v694_v55, 4  ;;  %v344_v56 = vmax.f32 %v312_v25, 0.0  ;;  %v5975_v34 = vld [vmem:[%s7824_s3 + $0x10] sm:$0xff]  ;;  %v795_v46 = vld [vmem:[#allocation2 + $0x18] sm:$0xf]  ;;  %2413 = vmatpush.bf16.msrb.mxu3 %v6015_v36  ;;  %3094 = vmatpush.bf16.msrb.mxu0 %v6024_v4 }
  0x7a   : > { %v1119_v43 = vrot.slane %v1118_v17, 4  ;;  %v880_v13 = vsel %vm6304_vm7, %v689_v58, %v879_v62  ;;  %v375_v63 = vpack.c.bf16 %v343_v22, %v343_v22  ;;  %v6761_v54 = vmul.f32 %v6724_v42, %v250_v45  ;;  %1718 = vmatpush.bf16.msrb.mxu1 %v5975_v34 }
  0x7b   : > { %v1129_v26 = vrot.slane %v1128_v59, 4  ;;  %v920_v10 = vld [vmem:[#allocation2 + $0x78] sm:$0xf]  ;;  %v698_v1 = vsel %vm6296_vm6, %v690_v57, %v697_v60  ;;  %881 = vst [vmem:[#allocation2 + $0xa8] sm:$0xf] %v880_v13  ;;  %v884_v6 = vsel %vm6284_vm5, %v699_v37, %v883_v50  ;;  %v376_v61 = vpack.c.bf16 %v344_v56, %v344_v56 }
  0x7c   : > { %v1124_v8 = vsel %vm6367_vm10, %v1119_v43, %v1123_v2  ;;  %v1208_v27 = vshrl.u32 %v920_v10, 16  ;;  %v1211_v9 = vshll.u32 %v920_v10, 16  ;;  %882 = vst [vmem:[#allocation2 + $0xac] sm:$0xf] %v698_v1  ;;  %v480_v11 = vshrl.u32 %v375_v63, 16  ;;  %v257_v10 = vld [vmem:[%s6242_s29 + $0xa0] sm:$0xff] }
  0x7d   : > { %v1134_v15 = vsel %vm6367_vm10, %v1129_v26, %v1133_v33  ;;  %v1380_v16 = vunpack.c.l.b16 %v1124_v8  ;;  %v921_v21 = vld [vmem:[#allocation2 + $0x7c] sm:$0xf]  ;;  %885 = vst [vmem:[#allocation2 + $0xb0] sm:$0x1] %v884_v6  ;;  %v483_v7 = vshll.u32 %v375_v63, 16  ;;  %v488_v18 = vshrl.u32 %v376_v61, 16 }
  0x7e   : > { %v1381_v19 = vunpack.c.l.b16 %v1134_v15  ;;  %v958_v20 = vld [vmem:[#allocation2 + $0x80] sm:$0x1]  ;;  %v1210_v23 = vrot.slane %v1208_v27, 4  ;;  %v1213_v38 = vrot.slane %v1211_v9, 5  ;;  %v1217_v41 = vshll.u32 %v921_v21, 16  ;;  %v258_v8 = vld [vmem:[%s6242_s29 + $0xa8] sm:$0xff] }
  0x7f   : > { %v1221_v51 = vshrl.u32 %v921_v21, 16  ;;  %v1227_v25 = vshll.u32 %v958_v20, 16  ;;  %v482_v29 = vrot.slane %v480_v11, 7  ;;  %v490_v30 = vrot.slane %v488_v18, 7  ;;  %v799_v37 = vld [vmem:[#allocation2 + $0x20] sm:$0x1] }
  0x80   : > { %v1406_v40 = vpack.c.b16 %v1381_v19, %v1380_v16  ;;  %v1214_v44 = vor.u32 %v1213_v38, %v1210_v23  ;;  %v1219_v62 = vrot.slane %v1217_v41, 5  ;;  %v491_v45 = vshll.u32 %v376_v61, 16  ;;  %v265_v15 = vld [vmem:[%s6242_s29 + $0xe0] sm:$0xff] }
  0x81   : > { %v1223_v47 = vrot.slane %v1221_v51, 4  ;;  %v1229_v53 = vrot.slane %v1227_v25, 5  ;;  %v485_v49 = vor.u32 %v483_v7, %v482_v29  ;;  %v486_v2 = vrot.slane %v482_v29, 4 }
  0x82   : > { %1518 = vmatmul.bf16.gmra.mxu1 %v1406_v40  ;;  %v1215_v52 = vrot.slane %v1214_v44, 4  ;;  %v928_v55 = vld [vmem:[#allocation2 + $0xa8] sm:$0xf]  ;;  %v493_v22 = vor.u32 %v491_v45, %v490_v30  ;;  %v495_v17 = vrot.slane %v490_v30, 4  ;;  %v321_v33 = vadd.f32 %v6737_v24, %v6742_v28 }
  0x83   : > { %v1224_v58 = vor.u32 %v1223_v47, %v1219_v62  ;;  %v929_v57 = vld [vmem:[#allocation2 + $0xac] sm:$0xf]  ;;  %v1304_v50 = vshrl.u32 %v928_v55, 16  ;;  %v1307_v59 = vshll.u32 %v928_v55, 16  ;;  %v796_v60 = vsel %vm6304_vm7, %v485_v49, %v795_v46 }
  0x84   : > { %v1220_v56 = vsel %vm6367_vm10, %v1215_v52, %v1219_v62  ;;  %v962_v43 = vld [vmem:[#allocation2 + $0xb0] sm:$0x1]  ;;  %v1313_v13 = vshll.u32 %v929_v57, 16  ;;  %v1317_v63 = vshrl.u32 %v929_v57, 16  ;;  %v494_v0 = vsel %vm6296_vm6, %v486_v2, %v493_v22  ;;  %797 = vst [vmem:[#allocation2 + $0x18] sm:$0xf] %v796_v60 }
  0x85   : > { %v1225_v28 = vrot.slane %v1224_v58, 4  ;;  %v1388_v48 = vunpack.c.l.b16 %v1220_v56  ;;  %v1306_v5 = vrot.slane %v1304_v50, 4  ;;  %v1309_v26 = vrot.slane %v1307_v59, 5  ;;  %798 = vst [vmem:[#allocation2 + $0x1c] sm:$0xf] %v494_v0  ;;  %v266_v0 = vld [vmem:[%s6242_s29 + $0xe8] sm:$0xff] }
  0x86   : > { %v1315_v1 = vrot.slane %v1313_v13, 5  ;;  %v1319_v6 = vrot.slane %v1317_v63, 4  ;;  %v1323_v61 = vshll.u32 %v962_v43, 16  ;;  %v800_v12 = vsel %vm6284_vm5, %v495_v17, %v799_v37  ;;  %v830_v37 = vld [vmem:[#allocation2 + $0x54] sm:$0xf] }
  0x87   : > { %v1230_v27 = vsel %vm6367_vm10, %v1225_v28, %v1229_v53  ;;  %v1310_v9 = vor.u32 %v1309_v26, %v1306_v5  ;;  %801 = vst [vmem:[#allocation2 + $0x20] sm:$0x1] %v800_v12  ;;  %v322_v11 = vadd.f32 %v6737_v24, %v6761_v54  ;;  %v353_v36 = vmax.f32 %v321_v33, 0.0  ;;  %v834_v5 = vld [vmem:[#allocation2 + $0x5c] sm:$0x1] }
  0x88   : > { %v1389_v16 = vunpack.c.l.b16 %v1230_v27  ;;  %v1320_v21 = vor.u32 %v1319_v6, %v1315_v1  ;;  %v1325_v7 = vrot.slane %v1323_v61, 5  ;;  %v293_v18 = vmul.f32 %v6724_v42, %v257_v10 }
  0x89   : > { %v1311_v19 = vrot.slane %v1310_v9, 4  ;;  %v354_v20 = vmax.f32 %v322_v11, 0.0  ;;  %v385_v23 = vpack.c.bf16 %v353_v36, %v353_v36  ;;  %v294_v38 = vmul.f32 %v6724_v42, %v258_v8 }
  0x8a   : > { %v1410_v41 = vpack.c.b16 %v1389_v16, %v1388_v48  ;;  %v1321_v4 = vrot.slane %v1320_v21, 4  ;;  %v329_v51 = vadd.f32 %v6737_v24, %v293_v18  ;;  %v301_v25 = vmul.f32 %v6724_v42, %v265_v15 }
  0x8b   : > { %v1316_v54 = vsel %vm6367_vm10, %v1311_v19, %v1315_v1  ;;  %v904_v29 = vld [vmem:[#allocation2 + $0x18] sm:$0xf]  ;;  %v386_v30 = vpack.c.bf16 %v354_v20, %v354_v20  ;;  %v565_v34 = vshrl.u32 %v385_v23, 16  ;;  %v568_v40 = vshll.u32 %v385_v23, 16 }
  0x8c   : > { %1538 = vmatmul.bf16.gmra.mxu2 %v1410_v41  ;;  %v1326_v44 = vsel %vm6367_vm10, %v1321_v4, %v1325_v7  ;;  %v1396_v62 = vunpack.c.l.b16 %v1316_v54  ;;  %v6808_v45 = vld [vmem:[#allocation2 + $0x1c] sm:$0xf]  ;;  %v1016_v46 = vshrl.u32 %v904_v29, 16  ;;  %v1019_v47 = vshll.u32 %v904_v29, 16  ;;  %v241_v7 = vld [vmem:[%s6242_s29 + $0x20] sm:$0xff] }
  0x8d   : > { %v1397_v53 = vunpack.c.l.b16 %v1326_v44  ;;  %v1025_v49 = vshll.u32 %v6808_v45, 16  ;;  %v1029_v2 = vshrl.u32 %v6808_v45, 16  ;;  %v567_v52 = vrot.slane %v565_v34, 7 }
  0x8e   : > { %v6812_v55 = vld [vmem:[#allocation2 + $0x20] sm:$0x1]  ;;  %v1018_v22 = vrot.slane %v1016_v46, 4  ;;  %v1021_v17 = vrot.slane %v1019_v47, 5  ;;  %v573_v33 = vshrl.u32 %v386_v30, 16  ;;  %v576_v58 = vshll.u32 %v386_v30, 16 }
  0x8f   : > { %v1414_v57 = vpack.c.b16 %v1397_v53, %v1396_v62  ;;  %v1027_v50 = vrot.slane %v1025_v49, 5  ;;  %v1031_v59 = vrot.slane %v1029_v2, 4  ;;  %v1035_v60 = vshll.u32 %v6812_v55, 16  ;;  %v858_v2 = vld [vmem:[#allocation2 + $0x84] sm:$0xf] }
  0x90   : > { %v1022_v56 = vor.u32 %v1021_v17, %v1018_v22  ;;  %v570_v43 = vor.u32 %v568_v40, %v567_v52  ;;  %v571_v13 = vrot.slane %v567_v52, 4  ;;  %v575_v63 = vrot.slane %v573_v33, 7  ;;  %v862_v17 = vld [vmem:[#allocation2 + $0x8c] sm:$0x1] }
  0x91   : > { %1558 = vmatmul.bf16.gmra.mxu3 %v1414_v57  ;;  %v1032_v28 = vor.u32 %v1031_v59, %v1027_v50  ;;  %v1037_v48 = vrot.slane %v1035_v60, 5  ;;  %v330_v26 = vadd.f32 %v6737_v24, %v294_v38  ;;  %v361_v10 = vmax.f32 %v329_v51, 0.0  ;;  %v242_v38 = vld [vmem:[%s6242_s29 + $0x28] sm:$0xff] }
  0x92   : > { %v1023_v1 = vrot.slane %v1022_v56, 4  ;;  %v578_v6 = vor.u32 %v576_v58, %v575_v63  ;;  %v580_v61 = vrot.slane %v575_v63, 4  ;;  %v831_v12 = vsel %vm6304_vm7, %v570_v43, %v830_v37  ;;  %v886_v43 = vld [vmem:[#allocation2 + $0xb4] sm:$0xf] }
  0x93   : > { %v1033_v8 = vrot.slane %v1032_v28, 4  ;;  %832 = vst [vmem:[#allocation2 + $0x54] sm:$0xf] %v831_v12  ;;  %v362_v27 = vmax.f32 %v330_v26, 0.0  ;;  %v393_v9 = vpack.c.bf16 %v361_v10, %v361_v10  ;;  %v302_v11 = vmul.f32 %v6724_v42, %v266_v0 }
  0x94   : > { %v1028_v36 = vsel %vm6367_vm10, %v1023_v1, %v1027_v50  ;;  %v579_v15 = vsel %vm6296_vm6, %v571_v13, %v578_v6  ;;  %v835_v16 = vsel %vm6284_vm5, %v580_v61, %v834_v5  ;;  %v337_v21 = vadd.f32 %v6737_v24, %v301_v25 }
  0x95   : > { %v1038_v18 = vsel %vm6367_vm10, %v1033_v8, %v1037_v48  ;;  %v1372_v19 = vunpack.c.l.b16 %v1028_v36  ;;  %833 = vst [vmem:[#allocation2 + $0x58] sm:$0xf] %v579_v15  ;;  %v394_v20 = vpack.c.bf16 %v362_v27, %v362_v27  ;;  %v633_v23 = vshrl.u32 %v393_v9, 16  ;;  %v890_v36 = vld [vmem:[#allocation2 + $0xbc] sm:$0x1] }
  0x96   : > { %v1373_v41 = vunpack.c.l.b16 %v1038_v18  ;;  %836 = vst [vmem:[#allocation2 + $0x5c] sm:$0x1] %v835_v16  ;;  %v636_v4 = vshll.u32 %v393_v9, 16  ;;  %v338_v51 = vadd.f32 %v6737_v24, %v302_v11  ;;  %v369_v54 = vmax.f32 %v337_v21, 0.0 }
  0x97   : > { %v635_v29 = vrot.slane %v633_v23, 7  ;;  %v641_v30 = vshrl.u32 %v394_v20, 16  ;;  %v644_v34 = vshll.u32 %v394_v20, 16  ;;  %v277_v25 = vmul.f32 %v6724_v42, %v241_v7 }
  0x98   : > { %v1402_v40 = vpack.c.b16 %v1373_v41, %v1372_v19  ;;  %v370_v44 = vmax.f32 %v338_v51, 0.0  ;;  %v401_v62 = vpack.c.bf16 %v369_v54, %v369_v54  ;;  %v278_v46 = vmul.f32 %v6724_v42, %v242_v38  ;;  %v5990_v42 = vld [vmem:[%s7824_s3 + $0x88] sm:$0xff] }
  0x99   : > { %v638_v47 = vor.u32 %v636_v4, %v635_v29  ;;  %v639_v53 = vrot.slane %v635_v29, 4  ;;  %v643_v49 = vrot.slane %v641_v30, 7  ;;  %v313_v52 = vadd.f32 %v6737_v24, %v277_v25  ;;  %2100 = vmatpush.bf16.msrb.mxu2 %v5990_v42 }
  0x9a   : > { %1498 = vmatmul.bf16.gmra.mxu0 %v1402_v40  ;;  %v914_v22 = vld [vmem:[#allocation2 + $0x54] sm:$0xf]  ;;  %v402_v33 = vpack.c.bf16 %v370_v44, %v370_v44  ;;  %v701_v58 = vshrl.u32 %v401_v62, 16  ;;  %v704_v57 = vshll.u32 %v401_v62, 16  ;;  %v314_v50 = vadd.f32 %v6737_v24, %v278_v46 }
  0x9b   : > { %v1136_v59 = vshrl.u32 %v914_v22, 16  ;;  %v1139_v60 = vshll.u32 %v914_v22, 16  ;;  %v646_v37 = vor.u32 %v644_v34, %v643_v49  ;;  %v648_v56 = vrot.slane %v643_v49, 4 }
  0x9c   : > { %v6839_v13 = vld [vmem:[#allocation2 + $0x58] sm:$0xf]  ;;  %v859_v63 = vsel %vm6304_vm7, %v638_v47, %v858_v2  ;;  %v703_v0 = vrot.slane %v701_v58, 7  ;;  %v709_v28 = vshrl.u32 %v402_v33, 16  ;;  %v712_v48 = vshll.u32 %v402_v33, 16 }
  0x9d   : > { %v6843_v5 = vld [vmem:[#allocation2 + $0x5c] sm:$0x1]  ;;  %v1138_v24 = vrot.slane %v1136_v59, 4  ;;  %v1141_v26 = vrot.slane %v1139_v60, 5  ;;  %v1145_v10 = vshll.u32 %v6839_v13, 16  ;;  %v1149_v1 = vshrl.u32 %v6839_v13, 16 }
  0x9e   : > { %v1155_v6 = vshll.u32 %v6843_v5, 16  ;;  %v647_v61 = vsel %vm6296_vm6, %v639_v53, %v646_v37  ;;  %860 = vst [vmem:[#allocation2 + $0x84] sm:$0xf] %v859_v63  ;;  %v863_v12 = vsel %vm6284_vm5, %v648_v56, %v862_v17  ;;  %v706_v8 = vor.u32 %v704_v57, %v703_v0  ;;  %v802_v57 = vld [vmem:[#allocation2 + $0x24] sm:$0xf] }
  0x9f   : > { %v1142_v27 = vor.u32 %v1141_v26, %v1138_v24  ;;  %v1147_v9 = vrot.slane %v1145_v10, 5  ;;  %v1151_v11 = vrot.slane %v1149_v1, 4  ;;  %861 = vst [vmem:[#allocation2 + $0x88] sm:$0xf] %v647_v61  ;;  %v707_v15 = vrot.slane %v703_v0, 4  ;;  %v5974_v24 = vld [vmem:[%s7824_s3 + $0x8] sm:$0xff] }
  0xa0   : > { %864 = vst [vmem:[#allocation2 + $0x8c] sm:$0x1] %v863_v12  ;;  %v711_v16 = vrot.slane %v709_v28, 7  ;;  %v887_v21 = vsel %vm6304_vm7, %v706_v8, %v886_v43  ;;  %v345_v7 = vmax.f32 %v313_v52, 0.0  ;;  %v1157_v20 = vrot.slane %v1155_v6, 5  ;;  %v6014_v43 = vld [vmem:[%s7824_s3 + $0xc8] sm:$0xff]  ;;  %1719 = vmatpush.bf16.msrb.mxu1 %v5974_v24 }
  0xa1   : > { %v1143_v18 = vrot.slane %v1142_v27, 4  ;;  %v1152_v19 = vor.u32 %v1151_v11, %v1147_v9  ;;  %888 = vst [vmem:[#allocation2 + $0xb4] sm:$0xf] %v887_v21  ;;  %v346_v23 = vmax.f32 %v314_v50, 0.0  ;;  %v806_v61 = vld [vmem:[#allocation2 + $0x2c] sm:$0x1]  ;;  %2414 = vmatpush.bf16.msrb.mxu3 %v6014_v43 }
  0xa2   : > { %v714_v38 = vor.u32 %v712_v48, %v711_v16  ;;  %v716_v41 = vrot.slane %v711_v16, 4  ;;  %v377_v4 = vpack.c.bf16 %v345_v7, %v345_v7  ;;  %v6023_v48 = vld [vmem:[%s7824_s3 + $0x110] sm:$0xff]  ;;  %v5989_v12 = vld [vmem:[%s7824_s3 + $0x80] sm:$0xff] }
  0xa3   : > { %v1148_v51 = vsel %vm6367_vm10, %v1143_v18, %v1147_v9  ;;  %v1153_v54 = vrot.slane %v1152_v19, 4  ;;  %v6856_v29 = vpack.c.bf16 %v346_v23, %v346_v23  ;;  %v6013_v8 = vld [vmem:[%s7824_s3 + $0xc0] sm:$0xff]  ;;  %3095 = vmatpush.bf16.msrb.mxu0 %v6023_v48  ;;  %2101 = vmatpush.bf16.msrb.mxu2 %v5989_v12 }
  0xa4   : > { %v1382_v30 = vunpack.c.l.b16 %v1148_v51  ;;  %v715_v34 = vsel %vm6296_vm6, %v707_v15, %v714_v38  ;;  %v891_v25 = vsel %vm6284_vm5, %v716_v41, %v890_v36  ;;  %v497_v40 = vshrl.u32 %v377_v4, 16  ;;  %v6022_v15 = vld [vmem:[%s7824_s3 + $0x108] sm:$0xff]  ;;  %v5973_v16 = vld [vmem:[%s7824_s3] sm:$0xff] }
  0xa5   : > { %v1158_v44 = vsel %vm6367_vm10, %v1153_v54, %v1157_v20  ;;  %v922_v62 = vld [vmem:[#allocation2 + $0x84] sm:$0xf]  ;;  %889 = vst [vmem:[#allocation2 + $0xb8] sm:$0xf] %v715_v34  ;;  %v500_v46 = vshll.u32 %v377_v4, 16  ;;  %v505_v47 = vshrl.u32 %v6856_v29, 16  ;;  %2415 = vmatpush.bf16.msrb.mxu3 %v6013_v8  ;;  %1720 = vmatpush.bf16.msrb.mxu1 %v5973_v16 }
  0xa6   : > { %v1383_v53 = vunpack.c.l.b16 %v1158_v44  ;;  %v923_v49 = vld [vmem:[#allocation2 + $0x88] sm:$0xf]  ;;  %v1232_v2 = vshrl.u32 %v922_v62, 16  ;;  %v1235_v52 = vshll.u32 %v922_v62, 16  ;;  %892 = vst [vmem:[#allocation2 + $0xbc] sm:$0x1] %v891_v25 }
  0xa7   : > { %v959_v22 = vld [vmem:[#allocation2 + $0x8c] sm:$0x1]  ;;  %v1241_v17 = vshll.u32 %v923_v49, 16  ;;  %v1245_v33 = vshrl.u32 %v923_v49, 16  ;;  %v499_v58 = vrot.slane %v497_v40, 7  ;;  %v507_v6 = vrot.slane %v505_v47, 7  ;;  %3096 = vmatpush.bf16.msrb.mxu0 %v6022_v15 }
  0xa8   : > { %v1407_v50 = vpack.c.b16 %v1383_v53, %v1382_v30  ;;  %v1234_v59 = vrot.slane %v1232_v2, 4  ;;  %v1237_v60 = vrot.slane %v1235_v52, 5  ;;  %v1251_v37 = vshll.u32 %v959_v22, 16  ;;  %v930_v56 = vld [vmem:[#allocation2 + $0xb4] sm:$0xf]  ;;  %v6060_v25 = vld [vmem:[%s7824_s3 + $0x1b8] sm:$0xff] }
  0xa9   : > { %v1243_v42 = vrot.slane %v1241_v17, 5  ;;  %v1247_v63 = vrot.slane %v1245_v33, 4  ;;  %v1328_v0 = vshrl.u32 %v930_v56, 16  ;;  %v1331_v28 = vshll.u32 %v930_v56, 16  ;;  %v6021_v47 = vld [vmem:[%s7824_s3 + $0x100] sm:$0xff]  ;;  %3831 = vmatpush.bf16.msra.mxu2 %v6060_v25 }
  0xaa   : > { %1523 = vmatmul.bf16.gmra.mxu1 %v1407_v50  ;;  %v1238_v26 = vor.u32 %v1237_v60, %v1234_v59  ;;  %v1253_v10 = vrot.slane %v1251_v37, 5  ;;  %v502_v1 = vor.u32 %v500_v46, %v499_v58  ;;  %v508_v36 = vshll.u32 %v6856_v29, 16  ;;  %v1802_v17 = vld [vmem:[#allocation2] sm:$0xe]  ;;  %v6116_v56 = vld [vmem:[#allocation2 + $0x8] sm:$0x1] }
  0xab   : > { %v1248_v27 = vor.u32 %v1247_v63, %v1243_v42  ;;  %v1330_v9 = vrot.slane %v1328_v0, 4  ;;  %v1333_v11 = vrot.slane %v1331_v28, 5  ;;  %v503_v18 = vrot.slane %v499_v58, 4  ;;  %3097 = vmatpush.bf16.msrb.mxu0 %v6021_v47  ;;  %v5957_v28 = vld [vmem:[#allocation2] sm:$0xff]  ;;  %v2530_v8 = vld [vmem:[#allocation2 + $0x10] sm:$0xf] }
  0xac   : > { %v1239_v21 = vrot.slane %v1238_v26, 4  ;;  %v931_v7 = vld [vmem:[#allocation2 + $0xb8] sm:$0xf]  ;;  %v512_v19 = vrot.slane %v507_v6, 4  ;;  %v803_v20 = vsel %vm6304_vm7, %v502_v1, %v802_v57  ;;  %v510_v30 = vor.u32 %v508_v36, %v507_v6  ;;  %v6115_v57 = vld [vmem:[#allocation2 + $0x4] sm:$0xf] }
  0xad   : > { %v1249_v23 = vrot.slane %v1248_v27, 4  ;;  %v963_v38 = vld [vmem:[#allocation2 + $0xbc] sm:$0x1]  ;;  %v1334_v41 = vor.u32 %v1333_v11, %v1330_v9  ;;  %v1337_v4 = vshll.u32 %v931_v7, 16  ;;  %v1341_v51 = vshrl.u32 %v931_v7, 16 }
  0xae   : > { %v1244_v54 = vsel %vm6367_vm10, %v1239_v21, %v1243_v42  ;;  %v1347_v29 = vshll.u32 %v963_v38, 16  ;;  %804 = vst [vmem:[#allocation2 + $0x24] sm:$0xf] %v803_v20  ;;  %v807_v34 = vsel %vm6284_vm5, %v512_v19, %v806_v61  ;;  %v511_v2 = vsel %vm6296_vm6, %v503_v18, %v510_v30  ;;  %v2529_v42 = vld [vmem:[#allocation2 + $0xc] sm:$0xf]  ;;  %v6068_v6 = vld [vmem:[%s7824_s3 + $0x1f8] sm:$0xff] }
  0xaf   : > { %v1254_v40 = vsel %vm6367_vm10, %v1249_v23, %v1253_v10  ;;  %v1390_v44 = vunpack.c.l.b16 %v1244_v54  ;;  %v1335_v62 = vrot.slane %v1334_v41, 4  ;;  %v1339_v46 = vrot.slane %v1337_v4, 5  ;;  %808 = vst [vmem:[#allocation2 + $0x2c] sm:$0x1] %v807_v34  ;;  %v6036_v61 = vld [vmem:[%s7824_s3 + $0x178] sm:$0xff]  ;;  %4513 = vmatpush.bf16.msra.mxu3 %v6068_v6  ;;  %v5997_v6 = vld [vmem:[#allocation2 + $0xc] sm:$0xff] }
  0xb0   : > { %v1391_v53 = vunpack.c.l.b16 %v1254_v40  ;;  %v1343_v49 = vrot.slane %v1341_v51, 4  ;;  %v1349_v22 = vrot.slane %v1347_v29, 5  ;;  %805 = vst [vmem:[#allocation2 + $0x28] sm:$0xf] %v511_v2  ;;  %v1855_v50 = vrot.slane %v6115_v57, 5  ;;  %v6076_v11 = vld [vmem:[%s7824_s3 + $0x238] sm:$0xff]  ;;  %3516 = vmatpush.bf16.msra.mxu1 %v6036_v61 }
  0xb1   : > { %v1340_v52 = vsel %vm6367_vm10, %v1335_v62, %v1339_v46  ;;  %v5441_v60 = vrot.slane %v1802_v17, 9  ;;  %v1858_v43 = vrot.slane %v6116_v56, 5  ;;  %v2578_v27 = vshrl.u32 %v2529_v42, 16  ;;  %4939 = vmatpush.bf16.msra.mxu0 %v6076_v11  ;;  %v2531_v2 = vld [vmem:[#allocation2 + $0x14] sm:$0x1] }
  0xb2   : > { %v1411_v33 = vpack.c.b16 %v1391_v53, %v1390_v44  ;;  %v1344_v58 = vor.u32 %v1343_v49, %v1339_v46  ;;  %v1857_v37 = vrot.slane %v1855_v50, 4  ;;  %v1398_v63 = vunpack.c.l.b16 %v1340_v52  ;;  %v2532_v61 = vld [vmem:[#allocation2 + $0x18] sm:$0xf] }
  0xb3   : > { %v2581_v9 = vshll.u32 %v2529_v42, 16  ;;  %v1856_v21 = vsel %vm6906_vm13, %v5441_v60, %v1855_v50  ;;  %v2587_v41 = vshll.u32 %v2530_v8, 16  ;;  %v2591_v4 = vshrl.u32 %v2530_v8, 16  ;;  %v1803_v60 = vld [vmem:[#allocation2 + $0xc] sm:$0xe] }
  0xb4   : > { %1543 = vmatmul.bf16.gmra.mxu2 %v1411_v33  ;;  %v1345_v59 = vrot.slane %v1344_v58, 4  ;;  %v1859_v7 = vsel %vm6906_vm13, %v1857_v37, %v1858_v43  ;;  %v1982_v30 = vunpack.c.l.b16 %v1856_v21  ;;  %v2580_v44 = vrot.slane %v2578_v27, 4  ;;  %v5958_v43 = vld [vmem:[#allocation2 + $0xc] sm:$0xff]  ;;  %v2533_v8 = vld [vmem:[#allocation2 + $0x1c] sm:$0xf] }
  0xb5   : > { %v906_v0 = vld [vmem:[#allocation2 + $0x24] sm:$0xf]  ;;  %v1983_v34 = vunpack.c.l.b16 %v1859_v7  ;;  %v2583_v62 = vrot.slane %v2581_v9, 5  ;;  %v2589_v47 = vrot.slane %v2587_v41, 5  ;;  %v2593_v53 = vrot.slane %v2591_v4, 4 }
  0xb6   : > { %v1350_v24 = vsel %vm6367_vm10, %v1345_v59, %v1349_v22  ;;  %v6912_v26 = vld [vmem:[#allocation2 + $0x2c] sm:$0x1]  ;;  %v1040_v10 = vshrl.u32 %v906_v0, 16  ;;  %v1043_v1 = vshll.u32 %v906_v0, 16  ;;  %v1862_v58 = vrot.slane %v6681_v3, 5 }
  0xb7   : > { %v1399_v12 = vunpack.c.l.b16 %v1350_v24  ;;  %v6923_v36 = vld [vmem:[#allocation2 + $0x28] sm:$0xf]  ;;  %v1059_v23 = vshll.u32 %v6912_v26, 16  ;;  %v2014_v22 = vpack.c.b16 %v1983_v34, %v1982_v30  ;;  %v2584_v33 = vor.u32 %v2583_v62, %v2580_v44  ;;  %v2534_v44 = vld [vmem:[#allocation2 + $0x20] sm:$0x1] }
  0xb8   : > { %v1042_v15 = vrot.slane %v1040_v10, 4  ;;  %v1045_v16 = vrot.slane %v1043_v1, 5  ;;  %v1049_v19 = vshll.u32 %v6923_v36, 16  ;;  %v1053_v20 = vshrl.u32 %v6923_v36, 16  ;;  %v1804_v10 = vld [vmem:[#allocation2 + $0x18] sm:$0xe] }
  0xb9   : > { %v1415_v18 = vpack.c.b16 %v1399_v12, %v1398_v63  ;;  %v1061_v40 = vrot.slane %v1059_v23, 5  ;;  %v2594_v50 = vor.u32 %v2593_v53, %v2589_v47  ;;  %v2597_v59 = vshll.u32 %v2531_v2, 16  ;;  %v6059_v23 = vld [vmem:[%s7824_s3 + $0x1b0] sm:$0xff]  ;;  %v2535_v2 = vld [vmem:[#allocation2 + $0x24] sm:$0xf] }
  0xba   : > { %v1046_v38 = vor.u32 %v1045_v16, %v1042_v15  ;;  %1721 = vmatmul.bf16.vlgmr.msrb.gmra.mxu1 %v5957_v28  ;;  %v1051_v51 = vrot.slane %v1049_v19, 5  ;;  %v1055_v54 = vrot.slane %v1053_v20, 4  ;;  %v2585_v56 = vrot.slane %v2584_v33, 4  ;;  %3832 = vmatpush.bf16.msra.mxu2 %v6059_v23  ;;  %v6075_v33 = vld [vmem:[%s7824_s3 + $0x230] sm:$0xff] }
  0xbb   : > { %1563 = vmatmul.bf16.gmra.mxu3 %v1415_v18  ;;  %v5442_v42 = vrot.slane %v1803_v60, 9  ;;  %v1864_v63 = vrot.slane %v1862_v58, 4  ;;  %v1865_v0 = vrot.slane %v6685_v14, 5  ;;  %v2595_v28 = vrot.slane %v2594_v50, 4  ;;  %4940 = vmatpush.bf16.msra.mxu0 %v6075_v33 }
  0xbc   : > { %v1047_v29 = vrot.slane %v1046_v38, 4  ;;  %v1056_v25 = vor.u32 %v1055_v54, %v1051_v51  ;;  %v2599_v24 = vrot.slane %v2597_v59, 5  ;;  %v1869_v1 = vrot.slane %v6808_v45, 5 }
  0xbd   : > { %v1872_v3 = vrot.slane %v6812_v55, 5  ;;  %v5443_v12 = vrot.slane %v1804_v10, 9  ;;  %v2590_v9 = vsel %vm6367_vm10, %v2585_v56, %v2589_v47  ;;  %v1863_v11 = vsel %vm6906_vm13, %v5442_v42, %v1862_v58  ;;  %v5998_v58 = vld [vmem:[#allocation2 + $0x18] sm:$0xff] }
  0xbe   : > { %v1052_v46 = vsel %vm6367_vm10, %v1047_v29, %v1051_v51  ;;  %v1057_v49 = vrot.slane %v1056_v25, 4  ;;  %v1871_v27 = vrot.slane %v1869_v1, 4  ;;  %v1866_v14 = vsel %vm6906_vm13, %v1864_v63, %v1865_v0 }
  0xbf   : > { %v1374_v52 = vunpack.c.l.b16 %v1052_v46  ;;  %v1870_v15 = vsel %vm6906_vm13, %v5443_v12, %v1869_v1  ;;  %v2600_v45 = vsel %vm6367_vm10, %v2595_v28, %v2599_v24  ;;  %v2602_v55 = vshrl.u32 %v2532_v61, 16  ;;  %v2537_v24 = vld [vmem:[#allocation2 + $0x2c] sm:$0x1] }
  0xc0   : > { %v1062_v17 = vsel %vm6367_vm10, %v1057_v49, %v1061_v40  ;;  %v1873_v16 = vsel %vm6906_vm13, %v1871_v27, %v1872_v3  ;;  %v1986_v21 = vunpack.c.l.b16 %v1870_v15  ;;  %v2605_v7 = vshll.u32 %v2532_v61, 16  ;;  %v5959_v49 = vld [vmem:[#allocation2 + $0x18] sm:$0xff] }
  0xc1   : > { %v1375_v57 = vunpack.c.l.b16 %v1062_v17  ;;  %v2611_v18 = vshll.u32 %v2533_v8, 16  ;;  %v2615_v19 = vshrl.u32 %v2533_v8, 16  ;;  %v1987_v20 = vunpack.c.l.b16 %v1873_v16  ;;  %v6035_v17 = vld [vmem:[%s7824_s3 + $0x170] sm:$0xff] }
  0xc2   : > { %v1984_v38 = vunpack.c.l.b16 %v1863_v11  ;;  %v1985_v41 = vunpack.c.l.b16 %v1866_v14  ;;  %v2978_v51 = vunpack.c.l.b16 %v2590_v9  ;;  %v2979_v54 = vunpack.c.l.b16 %v2600_v45  ;;  %3517 = vmatpush.bf16.msra.mxu1 %v6035_v17  ;;  %v1805_v11 = vld [vmem:[#allocation2 + $0x24] sm:$0xe] }
  0xc3   : > { %v1403_v37 = vpack.c.b16 %v1375_v57, %v1374_v52  ;;  %v2016_v4 = vpack.c.b16 %v1987_v20, %v1986_v21  ;;  %v2604_v29 = vrot.slane %v2602_v55, 4  ;;  %v2607_v30 = vrot.slane %v2605_v7, 5  ;;  %v2536_v52 = vld [vmem:[#allocation2 + $0x28] sm:$0xf]  ;;  %v2539_v20 = vld [vmem:[#allocation2 + $0x34] sm:$0xf] }
  0xc4   : > { %2102 = vmatmul.bf16.vlgmr.msrb.gmra.mxu2 %v2014_v22  ;;  %v2613_v34 = vrot.slane %v2611_v18, 5  ;;  %v2617_v25 = vrot.slane %v2615_v19, 4  ;;  %v2015_v40 = vpack.c.b16 %v1985_v41, %v1984_v38  ;;  %v3010_v62 = vpack.c.b16 %v2979_v54, %v2978_v51  ;;  %v6067_v22 = vld [vmem:[%s7824_s3 + $0x1f0] sm:$0xff]  ;;  %v5960_v7 = vld [vmem:[#allocation2 + $0x24] sm:$0xff] }
  0xc5   : > { %1503 = vmatmul.bf16.gmra.mxu0 %v1403_v37  ;;  %v2608_v46 = vor.u32 %v2607_v30, %v2604_v29  ;;  %v2621_v53 = vshll.u32 %v2534_v44, 16  ;;  %v2626_v60 = vshrl.u32 %v2535_v2, 16  ;;  %v2629_v37 = vshll.u32 %v2535_v2, 16  ;;  %4514 = vmatpush.bf16.msra.mxu3 %v6067_v22  ;;  %v5999_v18 = vld [vmem:[#allocation2 + $0x24] sm:$0xff]  ;;  %v2538_v19 = vld [vmem:[#allocation2 + $0x30] sm:$0xf]  ;;  %v6981_v44 = vpop.f32.mrf.mxu1 }
  0xc6   : > { %v2618_v47 = vor.u32 %v2617_v25, %v2613_v34  ;;  %v2635_v56 = vshll.u32 %v2536_v52, 16  ;;  %v2645_v12 = vshll.u32 %v2537_v24, 16  ;;  %v1876_v27 = vrot.slane %v6923_v36, 5  ;;  %v6058_v29 = vld [vmem:[%s7824_s3 + $0x1a8] sm:$0xff] }
  0xc7   : > { %v2609_v57 = vrot.slane %v2608_v46, 4  ;;  %v2623_v59 = vrot.slane %v2621_v53, 5  ;;  %v2628_v0 = vrot.slane %v2626_v60, 4  ;;  %v2631_v28 = vrot.slane %v2629_v37, 5  ;;  %3833 = vmatpush.bf16.msra.mxu2 %v6058_v29  ;;  %v6034_v24 = vld [vmem:[%s7824_s3 + $0x168] sm:$0xff] }
  0xc8   : > { %v2619_v50 = vrot.slane %v2618_v47, 4  ;;  %v2637_v10 = vrot.slane %v2635_v56, 5  ;;  %v2647_v15 = vrot.slane %v2645_v12, 5  ;;  %v5444_v55 = vrot.slane %v1805_v11, 9  ;;  %v6118_v56 = vld [vmem:[#allocation2 + $0x38] sm:$0x1]  ;;  %3518 = vmatpush.bf16.msra.mxu1 %v6034_v24 }
  0xc9   : > { %v2614_v42 = vsel %vm6367_vm10, %v2609_v57, %v2613_v34  ;;  %v2632_v61 = vor.u32 %v2631_v28, %v2628_v0  ;;  %v1878_v16 = vrot.slane %v1876_v27, 4  ;;  %v1879_v21 = vrot.slane %v6912_v26, 5  ;;  %v6066_v28 = vld [vmem:[%s7824_s3 + $0x1e8] sm:$0xff]  ;;  %v6057_v24 = vld [vmem:[%s7824_s3 + $0x1a0] sm:$0xff] }
  0xca   : > { %1726 = vmatmul.bf16.gmra.mxu1 %v5958_v43  ;;  %v2639_v43 = vshrl.u32 %v2536_v52, 16  ;;  %v2624_v63 = vsel %vm6367_vm10, %v2619_v50, %v2623_v59  ;;  %v2980_v3 = vunpack.c.l.b16 %v2614_v42  ;;  %v1877_v38 = vsel %vm6906_vm13, %v5444_v55, %v1876_v27  ;;  %v6117_v52 = vld [vmem:[#allocation2 + $0x34] sm:$0xf]  ;;  %v1806_v50 = vld [vmem:[#allocation2 + $0x30] sm:$0xe]  ;;  %4515 = vmatpush.bf16.msra.mxu3 %v6066_v28 }
  0xcb   : > { %2416 = vmatmul.bf16.vlgmr.msrb.gmra.mxu3 %v5997_v6  ;;  %v2981_v6 = vunpack.c.l.b16 %v2624_v63  ;;  %v2633_v14 = vrot.slane %v2632_v61, 4  ;;  %v1880_v41 = vsel %vm6906_vm13, %v1878_v16, %v1879_v21  ;;  %v2653_v26 = vshll.u32 %v2538_v19, 16  ;;  %v5961_v59 = vld [vmem:[#allocation2 + $0x30] sm:$0xff]  ;;  %v2542_v61 = vld [vmem:[#allocation2 + $0x40] sm:$0xf]  ;;  %3834 = vmatpush.bf16.msra.mxu2 %v6057_v24 }
  0xcc   : > { %v2641_v1 = vrot.slane %v2639_v43, 4  ;;  %v2659_v51 = vshll.u32 %v2539_v20, 16  ;;  %v2663_v54 = vshrl.u32 %v2539_v20, 16  ;;  %v1988_v30 = vunpack.c.l.b16 %v1877_v38 }
  0xcd   : > { %v3011_v9 = vpack.c.b16 %v2981_v6, %v2980_v3  ;;  %v2638_v23 = vsel %vm6367_vm10, %v2633_v14, %v2637_v10  ;;  %v1989_v34 = vunpack.c.l.b16 %v1880_v41  ;;  %v2655_v46 = vrot.slane %v2653_v26, 5  ;;  %v6992_v3 = vpop.f32.mrf.mxu1  ;;  %v2541_v6 = vld [vmem:[#allocation2 + $0x3c] sm:$0xf]  ;;  %v6119_v26 = vld [vmem:[#allocation2 + $0x40] sm:$0xf] }
  0xce   : > { %v2642_v8 = vor.u32 %v2641_v1, %v2637_v10  ;;  %v2982_v25 = vunpack.c.l.b16 %v2638_v23  ;;  %v2661_v47 = vrot.slane %v2659_v51, 5  ;;  %v2665_v53 = vrot.slane %v2663_v54, 4  ;;  %v6074_v10 = vld [vmem:[%s7824_s3 + $0x228] sm:$0xff]  ;;  %v6000_v1 = vld [vmem:[#allocation2 + $0x30] sm:$0xff] }
  0xcf   : > { %v2017_v2 = vpack.c.b16 %v1989_v34, %v1988_v30  ;;  %v1883_v22 = vrot.slane %v6117_v52, 5  ;;  %v5445_v60 = vrot.slane %v1806_v50, 9  ;;  %v1886_v43 = vrot.slane %v6118_v56, 5  ;;  %4941 = vmatpush.bf16.msra.mxu0 %v6074_v10  ;;  %v1807_v30 = vld [vmem:[#allocation2 + $0x3c] sm:$0xe] }
  0xd0   : > { %v2643_v45 = vrot.slane %v2642_v8, 4  ;;  %v2674_v11 = vshrl.u32 %v2541_v6, 16  ;;  %v2677_v14 = vshll.u32 %v2541_v6, 16  ;;  %v1890_v51 = vrot.slane %v6119_v26, 5  ;;  %v5962_v52 = vld [vmem:[#allocation2 + $0x3c] sm:$0xff] }
  0xd1   : > { %v1885_v37 = vrot.slane %v1883_v22, 4  ;;  %v1884_v12 = vsel %vm6906_vm13, %v5445_v60, %v1883_v22  ;;  %v2545_v22 = vld [vmem:[#allocation2 + $0x4c] sm:$0xf] }
  0xd2   : > { %v2648_v36 = vsel %vm6367_vm10, %v2643_v45, %v2647_v15  ;;  %v2683_v15 = vshll.u32 %v2542_v61, 16  ;;  %v2687_v45 = vshrl.u32 %v2542_v61, 16  ;;  %v1990_v16 = vunpack.c.l.b16 %v1884_v12 }
  0xd3   : > { %v1887_v8 = vsel %vm6906_vm13, %v1885_v37, %v1886_v43  ;;  %v2679_v20 = vrot.slane %v2677_v14, 5  ;;  %v2707_v43 = vshll.u32 %v2545_v22, 16 }
  0xd4   : > { %2107 = vmatmul.bf16.gmra.mxu2 %v2015_v40  ;;  %v2983_v40 = vunpack.c.l.b16 %v2648_v36  ;;  %v1991_v21 = vunpack.c.l.b16 %v1887_v8  ;;  %v2685_v23 = vrot.slane %v2683_v15, 5  ;;  %v2689_v36 = vrot.slane %v2687_v45, 4  ;;  %v2546_v8 = vld [vmem:[#allocation2 + $0x50] sm:$0x1] }
  0xd5   : > { %3098 = vmatmul.bf16.vlgmr.msrb.gmra.mxu0 %v3010_v62 }
  0xd6   : > { %v3012_v17 = vpack.c.b16 %v2983_v40, %v2982_v25  ;;  %v2018_v41 = vpack.c.b16 %v1991_v21, %v1990_v16  ;;  %v2690_v25 = vor.u32 %v2689_v36, %v2685_v23  ;;  %v2717_v21 = vshll.u32 %v2546_v8, 16  ;;  %v1808_v36 = vld [vmem:[#allocation2 + $0x48] sm:$0xe] }
  0xd8   : > { %v2719_v26 = vrot.slane %v2717_v21, 5 }
  0xda   : > { %1731 = vmatmul.bf16.gmra.mxu1 %v5959_v49  ;;  %v2540_v49 = vld [vmem:[#allocation2 + $0x38] sm:$0x1] }
  0xdb   : > { %2421 = vmatmul.bf16.gmra.mxu3 %v5998_v58  ;;  %v2666_v58 = vor.u32 %v2665_v53, %v2661_v47  ;;  %v2669_v57 = vshll.u32 %v2540_v49, 16  ;;  %v6120_v53 = vld [vmem:[#allocation2 + $0x44] sm:$0x1] }
  0xdc   : > { %v1893_v49 = vrot.slane %v6120_v53, 5  ;;  %v6033_v53 = vld [vmem:[%s7824_s3 + $0x160] sm:$0xff] }
  0xdd   : > { %v2667_v63 = vrot.slane %v2666_v58, 4  ;;  %v2671_v0 = vrot.slane %v2669_v57, 5  ;;  %v2691_v57 = vrot.slane %v2690_v25, 4  ;;  %v6122_v25 = vld [vmem:[#allocation2 + $0x50] sm:$0x1]  ;;  %3519 = vmatpush.bf16.msra.mxu1 %v6033_v53 }
  0xde   : > { %v7002_v55 = vpop.f32.mrf.mxu2  ;;  %v2551_v53 = vld [vmem:[#allocation2 + $0x64] sm:$0xf] }
  0xe1   : > { %v7004_v38 = vpop.f32.mrf.mxu1  ;;  %v7006_v29 = vpop.f32.mrf.mxu3 }
  0xe4   : > { %2112 = vmatmul.bf16.gmra.mxu2 %v2016_v4  ;;  %v2650_v4 = vshrl.u32 %v2538_v19, 16  ;;  %v2676_v19 = vrot.slane %v2674_v11, 4 }
  0xe5   : > { %3103 = vmatmul.bf16.gmra.mxu0 %v3011_v9  ;;  %v2672_v9 = vsel %vm6367_vm10, %v2667_v63, %v2671_v0 }
  0xe6   : > { %v2652_v62 = vrot.slane %v2650_v4, 4  ;;  %v2543_v4 = vld [vmem:[#allocation2 + $0x44] sm:$0x1]  ;;  %v2680_v34 = vor.u32 %v2679_v20, %v2676_v19  ;;  %v6121_v19 = vld [vmem:[#allocation2 + $0x4c] sm:$0xf] }
  0xe7   : > { %v2693_v40 = vshll.u32 %v2543_v4, 16  ;;  %v1897_v20 = vrot.slane %v6121_v19, 5 }
  0xe8   : > { %v2656_v33 = vor.u32 %v2655_v46, %v2652_v62  ;;  %v7008_v62 = vpop.f32.mrf.mxu2  ;;  %v5446_v46 = vrot.slane %v1807_v30, 9  ;;  %v2681_v58 = vrot.slane %v2680_v34, 4  ;;  %v5447_v30 = vrot.slane %v1808_v36, 9 }
  0xe9   : > { %v2695_v50 = vrot.slane %v2693_v40, 5  ;;  %v7016_v63 = vpop.f32.mrf.mxu1  ;;  %v7025_v10 = vpop.f32.mrf.mxu3  ;;  %v1899_v34 = vrot.slane %v1897_v20, 4  ;;  %v1900_v40 = vrot.slane %v6122_v25, 5  ;;  %v5964_v25 = vld [vmem:[#allocation2 + $0x54] sm:$0xff] }
  0xea   : > { %1736 = vmatmul.bf16.gmra.mxu1 %v5960_v7  ;;  %v2657_v42 = vrot.slane %v2656_v33, 4  ;;  %v6001_v33 = vld [vmem:[#allocation2 + $0x3c] sm:$0xff]  ;;  %v1891_v37 = vsel %vm6906_vm13, %v5446_v46, %v1890_v51  ;;  %v2686_v0 = vsel %vm6367_vm10, %v2681_v58, %v2685_v23 }
  0xeb   : > { %2426 = vmatmul.bf16.gmra.mxu3 %v5999_v18  ;;  %v2985_v18 = vunpack.c.l.b16 %v2672_v9  ;;  %v2696_v28 = vsel %vm6367_vm10, %v2691_v57, %v2695_v50  ;;  %v2986_v11 = vunpack.c.l.b16 %v2686_v0  ;;  %v1898_v50 = vsel %vm6906_vm13, %v5447_v30, %v1897_v20  ;;  %v1809_v20 = vld [vmem:[#allocation2 + $0x54] sm:$0xe] }
  0xec   : > { %v2662_v27 = vsel %vm6367_vm10, %v2657_v42, %v2661_v47  ;;  %v1892_v47 = vrot.slane %v1890_v51, 4  ;;  %v2711_v42 = vshrl.u32 %v2545_v22, 16  ;;  %v2987_v14 = vunpack.c.l.b16 %v2696_v28  ;;  %v2548_v22 = vld [vmem:[#allocation2 + $0x58] sm:$0xf] }
  0xed   : > { %v2984_v7 = vunpack.c.l.b16 %v2662_v27  ;;  %v2709_v27 = vrot.slane %v2707_v43, 5  ;;  %v2735_v43 = vshrl.u32 %v2548_v22, 16  ;;  %v1994_v0 = vunpack.c.l.b16 %v1898_v50 }
  0xee   : > { %v1894_v56 = vsel %vm6906_vm13, %v1892_v47, %v1893_v49  ;;  %v2713_v9 = vrot.slane %v2711_v42, 4  ;;  %v3014_v23 = vpack.c.b16 %v2987_v14, %v2986_v11  ;;  %v6065_v47 = vld [vmem:[%s7824_s3 + $0x1e0] sm:$0xff]  ;;  %v2755_v50 = vshll.u32 %v2551_v53, 16 }
  0xef   : > { %v3013_v54 = vpack.c.b16 %v2985_v18, %v2984_v7  ;;  %v1993_v6 = vunpack.c.l.b16 %v1894_v56  ;;  %v6073_v49 = vld [vmem:[%s7824_s3 + $0x220] sm:$0xff]  ;;  %4516 = vmatpush.bf16.msra.mxu3 %v6065_v47  ;;  %v2731_v56 = vshll.u32 %v2548_v22, 16 }
  0xf0   : > { %v7027_v15 = vpop.f32.mrf.mxu2  ;;  %v2714_v18 = vor.u32 %v2713_v9, %v2709_v27  ;;  %4942 = vmatpush.bf16.msra.mxu0 %v6073_v49  ;;  %v2549_v9 = vld [vmem:[#allocation2 + $0x5c] sm:$0x1]  ;;  %v2550_v47 = vld [vmem:[#allocation2 + $0x60] sm:$0xf] }
  0xf1   : > { %v7033_v46 = vpop.f32.mrf.mxu3  ;;  %v2733_v8 = vrot.slane %v2731_v56, 5  ;;  %v2741_v19 = vshll.u32 %v2549_v9, 16  ;;  %v2552_v9 = vld [vmem:[#allocation2 + $0x68] sm:$0x1] }
  0xf2   : > { %v2715_v51 = vrot.slane %v2714_v18, 4 }
  0xf4   : > { %2117 = vmatmul.bf16.gmra.mxu2 %v2017_v2  ;;  %v2544_v2 = vld [vmem:[#allocation2 + $0x48] sm:$0xf]  ;;  %v2720_v58 = vsel %vm6367_vm10, %v2715_v51, %v2719_v26  ;;  %v1907_v51 = vrot.slane %v6843_v5, 5 }
  0xf5   : > { %3108 = vmatmul.bf16.gmra.mxu0 %v3012_v17  ;;  %v7010_v17 = vpop.f32.mrf.mxu0  ;;  %v2701_v60 = vshll.u32 %v2544_v2, 16 }
  0xf7   : > { %v2703_v12 = vrot.slane %v2701_v60, 5 }
  0xf8   : > { %v7048_v57 = vpop.f32.mrf.mxu2 }
  0xf9   : > { %v7058_v11 = vpop.f32.mrf.mxu3 }
  0xfa   : > { %1741 = vmatmul.bf16.gmra.mxu1 %v5961_v59  ;;  %v2698_v59 = vshrl.u32 %v2544_v2, 16  ;;  %v6002_v2 = vld [vmem:[#allocation2 + $0x48] sm:$0xff] }
  0xfb   : > { %2431 = vmatmul.bf16.gmra.mxu3 %v6000_v1  ;;  %v1992_v1 = vunpack.c.l.b16 %v1891_v37 }
  0xfc   : > { %v2700_v61 = vrot.slane %v2698_v59, 4  ;;  %v1901_v59 = vsel %vm6906_vm13, %v1899_v34, %v1900_v40  ;;  %v2743_v34 = vrot.slane %v2741_v19, 5 }
  0xfd   : > { %v2019_v45 = vpack.c.b16 %v1993_v6, %v1992_v1  ;;  %v7029_v7 = vpop.f32.mrf.mxu0  ;;  %v1995_v28 = vunpack.c.l.b16 %v1901_v59  ;;  %v2989_v1 = vunpack.c.l.b16 %v2720_v58  ;;  %v2749_v58 = vshll.u32 %v2550_v47, 16 }
  0xfe   : > { %v2704_v16 = vor.u32 %v2703_v12, %v2700_v61  ;;  %v2759_v59 = vshrl.u32 %v2551_v53, 16  ;;  %v6004_v53 = vld [vmem:[#allocation2 + $0x60] sm:$0xff] }
  0xff   : > { %v2020_v14 = vpack.c.b16 %v1995_v28, %v1994_v0 }
 0x100   : > { %v2705_v4 = vrot.slane %v2704_v16, 4 }
 0x104   : > { %2122 = vmatmul.bf16.gmra.mxu2 %v2018_v41  ;;  %v7031_v41 = vpop.f32.mrf.mxu1 }
 0x105   : > { %3113 = vmatmul.bf16.gmra.mxu0 %v3013_v54  ;;  %v5963_v54 = vld [vmem:[#allocation2 + $0x48] sm:$0xff]  ;;  %v7054_v42 = vpop.f32.mrf.mxu0 }
 0x10a   : > { %1746 = vmatmul.bf16.gmra.mxu1 %v5962_v52  ;;  %v2547_v52 = vld [vmem:[#allocation2 + $0x54] sm:$0xf] }
 0x10b   : > { %2436 = vmatmul.bf16.gmra.mxu3 %v6001_v33  ;;  %v2710_v33 = vsel %vm6367_vm10, %v2705_v4, %v2709_v27  ;;  %v2722_v60 = vshrl.u32 %v2547_v52, 16  ;;  %v2725_v37 = vshll.u32 %v2547_v52, 16  ;;  %v2737_v27 = vrot.slane %v2735_v43, 4 }
 0x10c   : > { %v2988_v24 = vunpack.c.l.b16 %v2710_v33  ;;  %v7056_v6 = vpop.f32.mrf.mxu1  ;;  %v5448_v4 = vrot.slane %v1809_v20, 9  ;;  %v2746_v33 = vshrl.u32 %v2550_v47, 16  ;;  %v2765_v20 = vshll.u32 %v2552_v9, 16  ;;  %v6032_v47 = vld [vmem:[%s7824_s3 + $0x158] sm:$0xff] }
 0x10d   : > { %v2724_v61 = vrot.slane %v2722_v60, 4  ;;  %v2727_v12 = vrot.slane %v2725_v37, 5  ;;  %v2738_v18 = vor.u32 %v2737_v27, %v2733_v8  ;;  %v7063_v36 = vpop.f32.mrf.mxu0  ;;  %3520 = vmatpush.bf16.msra.mxu1 %v6032_v47  ;;  %v6072_v9 = vld [vmem:[%s7824_s3 + $0x218] sm:$0xff] }
 0x10e   : > { %v3015_v16 = vpack.c.b16 %v2989_v1, %v2988_v24  ;;  %v2748_v24 = vrot.slane %v2746_v33, 4  ;;  %v2751_v1 = vrot.slane %v2749_v58, 5  ;;  %v2553_v58 = vld [vmem:[#allocation2 + $0x6c] sm:$0xf]  ;;  %4943 = vmatpush.bf16.msra.mxu0 %v6072_v9 }
 0x10f   : > { %v2728_v21 = vor.u32 %v2727_v12, %v2724_v61  ;;  %v2739_v30 = vrot.slane %v2738_v18, 4  ;;  %v2757_v61 = vrot.slane %v2755_v50, 5  ;;  %v2761_v12 = vrot.slane %v2759_v59, 4  ;;  %v2554_v50 = vld [vmem:[#allocation2 + $0x70] sm:$0xf] }
 0x110   : > { %v2752_v18 = vor.u32 %v2751_v1, %v2748_v24 }
 0x111   : > { %v2744_v5 = vsel %vm6367_vm10, %v2739_v30, %v2743_v34  ;;  %v2762_v19 = vor.u32 %v2761_v12, %v2757_v61  ;;  %v6124_v30 = vld [vmem:[#allocation2 + $0x68] sm:$0x1]  ;;  %v2779_v12 = vshll.u32 %v2554_v50, 16 }
 0x112   : > { %v2991_v0 = vunpack.c.l.b16 %v2744_v5  ;;  %v1914_v34 = vrot.slane %v6124_v30, 5 }
 0x114   : > { %2127 = vmatmul.bf16.gmra.mxu2 %v2019_v45  ;;  %v1904_v45 = vrot.slane %v6839_v13, 5  ;;  %v6003_v13 = vld [vmem:[#allocation2 + $0x54] sm:$0xff]  ;;  %v7076_v22 = vpop.f32.mrf.mxu3 }
 0x115   : > { %3118 = vmatmul.bf16.gmra.mxu0 %v3014_v23  ;;  %v7061_v23 = vpop.f32.mrf.mxu2 }
 0x116   : > { %v1906_v26 = vrot.slane %v1904_v45, 4  ;;  %v1905_v49 = vsel %vm6906_vm13, %v5448_v4, %v1904_v45  ;;  %v6056_v4 = vld [vmem:[%s7824_s3 + $0x198] sm:$0xff] }
 0x117   : > { %v1996_v60 = vunpack.c.l.b16 %v1905_v49  ;;  %v7080_v28 = vpop.f32.mrf.mxu0  ;;  %3835 = vmatpush.bf16.msra.mxu2 %v6056_v4  ;;  %v2753_v49 = vrot.slane %v2752_v18, 4 }
 0x119   : > { %v2758_v24 = vsel %vm6367_vm10, %v2753_v49, %v2757_v61  ;;  %v2781_v61 = vrot.slane %v2779_v12, 5  ;;  %v1811_v49 = vld [vmem:[#allocation2 + $0x6c] sm:$0xe] }
 0x11a   : > { %1751 = vmatmul.bf16.gmra.mxu1 %v5963_v54  ;;  %v2729_v54 = vrot.slane %v2728_v21, 4  ;;  %v1810_v21 = vld [vmem:[#allocation2 + $0x60] sm:$0xe]  ;;  %v5966_v12 = vld [vmem:[#allocation2 + $0x6c] sm:$0xff] }
 0x11b   : > { %2441 = vmatmul.bf16.gmra.mxu3 %v6002_v2  ;;  %v1908_v2 = vsel %vm6906_vm13, %v1906_v26, %v1907_v51  ;;  %v5449_v51 = vrot.slane %v1810_v21, 9 }
 0x11c   : > { %v2734_v52 = vsel %vm6367_vm10, %v2729_v54, %v2733_v8  ;;  %v1997_v37 = vunpack.c.l.b16 %v1908_v2  ;;  %v7087_v26 = vpop.f32.mrf.mxu3  ;;  %v2763_v2 = vrot.slane %v2762_v19, 4 }
 0x11d   : > { %v7078_v56 = vpop.f32.mrf.mxu2  ;;  %v2990_v43 = vunpack.c.l.b16 %v2734_v52  ;;  %7837 = vst [vmem:[#allocation3_spill] sm:$0xff] %v7087_v26  ;;  %v2767_v52 = vrot.slane %v2765_v20, 5 }
 0x11e   : > { %v2021_v27 = vpack.c.b16 %v1997_v37, %v1996_v60 }
 0x11f   : > { %v7097_v59 = vpop.f32.mrf.mxu0  ;;  %v2768_v1 = vsel %vm6367_vm10, %v2763_v2, %v2767_v52 }
 0x120   : > { %v2993_v21 = vunpack.c.l.b16 %v2768_v1 }
 0x124   : > { %2132 = vmatmul.bf16.gmra.mxu2 %v2020_v14  ;;  %v6123_v14 = vld [vmem:[#allocation2 + $0x64] sm:$0xf] }
 0x125   : > { %3123 = vmatmul.bf16.gmra.mxu0 %v3015_v16  ;;  %v1911_v45 = vrot.slane %v6123_v14, 5  ;;  %v3016_v16 = vpack.c.b16 %v2991_v0, %v2990_v43  ;;  %v2770_v43 = vshrl.u32 %v2553_v58, 16  ;;  %v2773_v0 = vshll.u32 %v2553_v58, 16 }
 0x127   : > { %v7066_v40 = vpop.f32.mrf.mxu1  ;;  %v1913_v54 = vrot.slane %v1911_v45, 4  ;;  %v1912_v60 = vsel %vm6906_vm13, %v5449_v51, %v1911_v45  ;;  %v2772_v19 = vrot.slane %v2770_v43, 4  ;;  %v2775_v20 = vrot.slane %v2773_v0, 5 }
 0x128   : > { %v1998_v14 = vunpack.c.l.b16 %v1912_v60 }
 0x129   : > { %v1915_v37 = vsel %vm6906_vm13, %v1913_v54, %v1914_v34  ;;  %v2555_v34 = vld [vmem:[#allocation2 + $0x74] sm:$0x1] }
 0x12a   : > { %1756 = vmatmul.bf16.gmra.mxu1 %v5964_v25  ;;  %v5965_v25 = vld [vmem:[#allocation2 + $0x60] sm:$0xff]  ;;  %v1999_v45 = vunpack.c.l.b16 %v1915_v37  ;;  %v2789_v58 = vshll.u32 %v2555_v34, 16  ;;  %v6126_v37 = vld [vmem:[#allocation2 + $0x74] sm:$0x1] }
 0x12b   : > { %2446 = vmatmul.bf16.gmra.mxu3 %v6003_v13  ;;  %v6064_v13 = vld [vmem:[%s7824_s3 + $0x1d8] sm:$0xff]  ;;  %v1921_v43 = vrot.slane %v6126_v37, 5 }
 0x12c   : > { %4517 = vmatpush.bf16.msra.mxu3 %v6064_v13  ;;  %v2022_v30 = vpack.c.b16 %v1999_v45, %v1998_v14  ;;  %v2791_v14 = vrot.slane %v2789_v58, 5 }
 0x12f   : > { %v7082_v8 = vpop.f32.mrf.mxu1 }
 0x134   : > { %2137 = vmatmul.bf16.gmra.mxu2 %v2021_v27  ;;  %v2783_v27 = vshrl.u32 %v2554_v50, 16  ;;  %v5450_v50 = vrot.slane %v1811_v49, 9 }
 0x135   : > { %3128 = vmatmul.bf16.gmra.mxu0 %v3016_v16  ;;  %v2992_v16 = vunpack.c.l.b16 %v2758_v24 }
 0x136   : > { %v2785_v51 = vrot.slane %v2783_v27, 4  ;;  %v6005_v27 = vld [vmem:[#allocation2 + $0x6c] sm:$0xff] }
 0x137   : > { %v7095_v5 = vpop.f32.mrf.mxu2  ;;  %v1722_v33 = vpop.f32.mrf.mxu1  ;;  %v3017_v47 = vpack.c.b16 %v2993_v21, %v2992_v16  ;;  %v2556_v21 = vld [vmem:[#allocation2 + $0x78] sm:$0xf] }
 0x138   : > { %v2786_v52 = vor.u32 %v2785_v51, %v2781_v61  ;;  %v1723_v24 = vadd.f32 %v1722_v33, %v7010_v17  ;;  %v2794_v17 = vshrl.u32 %v2556_v21, 16  ;;  %v2797_v33 = vshll.u32 %v2556_v21, 16 }
 0x13a   : > { %1761 = vmatmul.bf16.gmra.mxu1 %v5965_v25  ;;  %v6125_v25 = vld [vmem:[#allocation2 + $0x70] sm:$0xf]  ;;  %v2787_v9 = vrot.slane %v2786_v52, 4 }
 0x13b   : > { %2451 = vmatmul.bf16.gmra.mxu3 %v6004_v53  ;;  %v1918_v13 = vrot.slane %v6125_v25, 5  ;;  %v2776_v53 = vor.u32 %v2775_v20, %v2772_v19  ;;  %v2557_v20 = vld [vmem:[#allocation2 + $0x7c] sm:$0xf] }
 0x13c   : > { %v2807_v49 = vshrl.u32 %v2557_v20, 16 }
 0x13d   : > { %v1920_v60 = vrot.slane %v1918_v13, 4  ;;  %v2777_v1 = vrot.slane %v2776_v53, 4  ;;  %v1919_v51 = vsel %vm6906_vm13, %v5450_v50, %v1918_v13  ;;  %v2803_v53 = vshll.u32 %v2557_v20, 16 }
 0x13e   : > { %v7110_v18 = vpop.f32.mrf.mxu3  ;;  %v2000_v52 = vunpack.c.l.b16 %v1919_v51 }
 0x13f   : > { %7838 = vst [vmem:[#allocation4_spill] sm:$0xff] %v7110_v18  ;;  %v7112_v4 = vpop.f32.mrf.mxu2  ;;  %v1724_v54 = vpop.f32.mrf.mxu1  ;;  %v2782_v34 = vsel %vm6367_vm10, %v2777_v1, %v2781_v61  ;;  %v2799_v61 = vrot.slane %v2797_v33, 5  ;;  %v2558_v18 = vld [vmem:[#allocation2 + $0x80] sm:$0x1] }
 0x140   : > { %v2994_v13 = vunpack.c.l.b16 %v2782_v34  ;;  %v2813_v26 = vshll.u32 %v2558_v18, 16  ;;  %v6128_v33 = vld [vmem:[#allocation2 + $0x80] sm:$0x1]  ;;  %v6063_v18 = vld [vmem:[%s7824_s3 + $0x1d0] sm:$0xff] }
 0x141   : > { %4518 = vmatpush.bf16.msra.mxu3 %v6063_v18 }
 0x142   : > { %v7114_v2 = vpop.f32.mrf.mxu0 }
 0x144   : > { %2142 = vmatmul.bf16.gmra.mxu2 %v2022_v30  ;;  %v1922_v30 = vsel %vm6906_vm13, %v1920_v60, %v1921_v43  ;;  %v1725_v60 = vadd.f32 %v1724_v54, %v7029_v7  ;;  %v2796_v43 = vrot.slane %v2794_v17, 4  ;;  %v6055_v7 = vld [vmem:[%s7824_s3 + $0x190] sm:$0xff] }
 0x145   : > { %3133 = vmatmul.bf16.gmra.mxu0 %v3017_v47  ;;  %v2792_v47 = vsel %vm6367_vm10, %v2787_v9, %v2791_v14  ;;  %v2001_v58 = vunpack.c.l.b16 %v1922_v30  ;;  %v6127_v9 = vld [vmem:[#allocation2 + $0x7c] sm:$0xf]  ;;  %v1812_v30 = vld [vmem:[#allocation2 + $0x78] sm:$0xe]  ;;  %3836 = vmatpush.bf16.msra.mxu2 %v6055_v7 }
 0x146   : > { %v7116_v0 = vpop.f32.mrf.mxu3  ;;  %v2995_v50 = vunpack.c.l.b16 %v2792_v47  ;;  %v1925_v14 = vrot.slane %v6127_v9, 5  ;;  %v2800_v51 = vor.u32 %v2799_v61, %v2796_v43  ;;  %v2815_v43 = vrot.slane %v2813_v26, 5 }
 0x147   : > { %7839 = vst [vmem:[#allocation5_spill] sm:$0xff] %v7116_v0  ;;  %v2103_v45 = vpop.f32.mrf.mxu2  ;;  %v1727_v16 = vpop.f32.mrf.mxu1  ;;  %v2023_v0 = vpack.c.b16 %v2001_v58, %v2000_v52 }
 0x148   : > { %v2183_v19 = vadd.f32 %v2103_v45, %v1723_v24  ;;  %v2809_v45 = vrot.slane %v2807_v49, 4  ;;  %v3018_v20 = vpack.c.b16 %v2995_v50, %v2994_v13  ;;  %v1927_v17 = vrot.slane %v1925_v14, 4  ;;  %v5967_v13 = vld [vmem:[#allocation2 + $0x78] sm:$0xff] }
 0x149   : > { %v1728_v52 = vadd.f32 %v1727_v16, %v7054_v42  ;;  %v2801_v58 = vrot.slane %v2800_v51, 4  ;;  %v2560_v16 = vld [vmem:[#allocation2 + $0x88] sm:$0xf] }
 0x14a   : > { %1766 = vmatmul.bf16.gmra.mxu1 %v5966_v12  ;;  %v7125_v25 = vpop.f32.mrf.mxu0  ;;  %v2805_v12 = vrot.slane %v2803_v53, 5  ;;  %v1928_v53 = vrot.slane %v6128_v33, 5 }
 0x14b   : > { %2456 = vmatmul.bf16.gmra.mxu3 %v6005_v27 }
 0x14c   : > { %v2810_v47 = vor.u32 %v2809_v45, %v2805_v12 }
 0x14e   : > { %v2417_v37 = vpop.f32.mrf.mxu3 }
 0x14f   : > { %v2497_v24 = vadd.f32 %v2417_v37, %v2183_v19  ;;  %v2105_v1 = vpop.f32.mrf.mxu2  ;;  %v1729_v21 = vpop.f32.mrf.mxu1  ;;  %v5451_v19 = vrot.slane %v1812_v30, 9  ;;  %v6006_v37 = vld [vmem:[#allocation2 + $0x78] sm:$0xff] }
 0x150   : > { %v2184_v27 = vadd.f32 %v2105_v1, %v1725_v60  ;;  %v2811_v60 = vrot.slane %v2810_v47, 4  ;;  %v2559_v1 = vld [vmem:[#allocation2 + $0x84] sm:$0xf]  ;;  %v2831_v47 = vshrl.u32 %v2560_v16, 16 }
 0x151   : > { %v1926_v9 = vsel %vm6906_vm13, %v5451_v19, %v1925_v14  ;;  %v2818_v26 = vshrl.u32 %v2559_v1, 16  ;;  %v6071_v14 = vld [vmem:[%s7824_s3 + $0x210] sm:$0xff] }
 0x152   : > { %v3099_v34 = vpop.f32.mrf.mxu0  ;;  %v2816_v30 = vsel %vm6367_vm10, %v2811_v60, %v2815_v43  ;;  %v2002_v7 = vunpack.c.l.b16 %v1926_v9  ;;  %4944 = vmatpush.bf16.msra.mxu0 %v6071_v14  ;;  %v5968_v14 = vld [vmem:[#allocation2 + $0x84] sm:$0xff] }
 0x153   : > { %v7133_v54 = vadd.f32 %v3099_v34, %v2497_v24  ;;  %v2827_v34 = vshll.u32 %v2560_v16, 16  ;;  %v2997_v33 = vunpack.c.l.b16 %v2816_v30 }
 0x154   : > { %2147 = vmatmul.bf16.gmra.mxu2 %v2023_v0  ;;  %v6031_v0 = vld [vmem:[%s7824_s3 + $0x150] sm:$0xff] }
 0x155   : > { %3138 = vmatmul.bf16.gmra.mxu0 %v3018_v20  ;;  %3521 = vmatpush.bf16.msra.mxu1 %v6031_v0  ;;  %v1929_v20 = vsel %vm6906_vm13, %v1927_v17, %v1928_v53  ;;  %v2829_v0 = vrot.slane %v2827_v34, 5 }
 0x156   : > { %v2419_v49 = vpop.f32.mrf.mxu3  ;;  %v2003_v19 = vunpack.c.l.b16 %v1929_v20  ;;  %v1813_v20 = vld [vmem:[#allocation2 + $0x84] sm:$0xe] }
 0x157   : > { %v2498_v50 = vadd.f32 %v2419_v49, %v2184_v27  ;;  %v2108_v61 = vpop.f32.mrf.mxu2  ;;  %v1732_v24 = vpop.f32.mrf.mxu1  ;;  %v2806_v27 = vsel %vm6367_vm10, %v2801_v58, %v2805_v12  ;;  %v1730_v49 = vadd.f32 %v1729_v21, %v7063_v36 }
 0x158   : > { %v2185_v45 = vadd.f32 %v2108_v61, %v1728_v52  ;;  %v1733_v42 = vadd.f32 %v1732_v24, %v7080_v28  ;;  %v2821_v28 = vshll.u32 %v2559_v1, 16  ;;  %v2996_v12 = vunpack.c.l.b16 %v2806_v27  ;;  %v2561_v24 = vld [vmem:[#allocation2 + $0x8c] sm:$0x1] }
 0x159   : > { %v2820_v52 = vrot.slane %v2818_v26, 4  ;;  %v2024_v61 = vpack.c.b16 %v2003_v19, %v2002_v7  ;;  %v2837_v36 = vshll.u32 %v2561_v24, 16 }
 0x15a   : > { %1771 = vmatmul.bf16.gmra.mxu1 %v5967_v13  ;;  %v3101_v51 = vpop.f32.mrf.mxu0  ;;  %v2823_v18 = vrot.slane %v2821_v28, 5  ;;  %v3019_v9 = vpack.c.b16 %v2997_v33, %v2996_v12  ;;  %v6130_v28 = vld [vmem:[#allocation2 + $0x8c] sm:$0x1] }
 0x15b   : > { %2461 = vmatmul.bf16.gmra.mxu3 %v6006_v37  ;;  %v7154_v17 = vadd.f32 %v3101_v51, %v2498_v50  ;;  %v2833_v37 = vrot.slane %v2831_v47, 4  ;;  %v6129_v50 = vld [vmem:[#allocation2 + $0x88] sm:$0xf]  ;;  %v1935_v34 = vrot.slane %v6130_v28, 5  ;;  %v2839_v12 = vrot.slane %v2837_v36, 5 }
 0x15c   : > { %v1932_v16 = vrot.slane %v6129_v50, 5  ;;  %v2824_v51 = vor.u32 %v2823_v18, %v2820_v52  ;;  %v2562_v52 = vld [vmem:[#allocation2 + $0x90] sm:$0xf] }
 0x15d   : > { %v2834_v30 = vor.u32 %v2833_v37, %v2829_v0 }
 0x15e   : > { %v2422_v53 = vpop.f32.mrf.mxu3  ;;  %v1934_v26 = vrot.slane %v1932_v16, 4  ;;  %v2825_v19 = vrot.slane %v2824_v51, 4 }
 0x15f   : > { %v2499_v58 = vadd.f32 %v2422_v53, %v2185_v45  ;;  %v2110_v13 = vpop.f32.mrf.mxu2  ;;  %v1734_v60 = vpop.f32.mrf.mxu1  ;;  %v5452_v45 = vrot.slane %v1813_v20, 9  ;;  %v2835_v53 = vrot.slane %v2834_v30, 4 }
 0x160   : > { %v2186_v43 = vadd.f32 %v2110_v13, %v1730_v49  ;;  %v1735_v1 = vadd.f32 %v1734_v60, %v7097_v59  ;;  %v6007_v59 = vld [vmem:[#allocation2 + $0x84] sm:$0xff]  ;;  %v1936_v60 = vsel %vm6906_vm13, %v1934_v26, %v1935_v34  ;;  %v2830_v50 = vsel %vm6367_vm10, %v2825_v19, %v2829_v0 }
 0x161   : > { %v1933_v37 = vsel %vm6906_vm13, %v5452_v45, %v1932_v16  ;;  %v2998_v16 = vunpack.c.l.b16 %v2830_v50 }
 0x162   : > { %v3104_v27 = vpop.f32.mrf.mxu0  ;;  %v2004_v20 = vunpack.c.l.b16 %v1933_v37 }
 0x163   : > { %v7158_v21 = vadd.f32 %v3104_v27, %v2499_v58  ;;  %v2563_v58 = vld [vmem:[#allocation2 + $0x94] sm:$0xf]  ;;  %v2005_v27 = vunpack.c.l.b16 %v1936_v60 }
 0x164   : > { %2152 = vmatmul.bf16.gmra.mxu2 %v2024_v61  ;;  %v2842_v61 = vshrl.u32 %v2562_v52, 16 }
 0x165   : > { %3143 = vmatmul.bf16.gmra.mxu0 %v3019_v9  ;;  %v2851_v9 = vshll.u32 %v2563_v58, 16  ;;  %v2025_v19 = vpack.c.b16 %v2005_v27, %v2004_v20  ;;  %v5969_v27 = vld [vmem:[#allocation2 + $0x90] sm:$0xff] }
 0x166   : > { %v2424_v47 = vpop.f32.mrf.mxu3  ;;  %v2844_v45 = vrot.slane %v2842_v61, 4  ;;  %v2565_v61 = vld [vmem:[#allocation2 + $0x9c] sm:$0xf] }
 0x167   : > { %v2500_v7 = vadd.f32 %v2424_v47, %v2186_v43  ;;  %v2113_v33 = vpop.f32.mrf.mxu2  ;;  %v1737_v49 = vpop.f32.mrf.mxu1  ;;  %v2845_v43 = vshll.u32 %v2562_v52, 16  ;;  %v2853_v47 = vrot.slane %v2851_v9, 5  ;;  %v2566_v9 = vld [vmem:[#allocation2 + $0xa0] sm:$0xf] }
 0x168   : > { %v2187_v13 = vadd.f32 %v2113_v33, %v1733_v42  ;;  %v1738_v18 = vadd.f32 %v1737_v49, %v7114_v2  ;;  %v2840_v42 = vsel %vm6367_vm10, %v2835_v53, %v2839_v12  ;;  %v2855_v2 = vshrl.u32 %v2563_v58, 16  ;;  %v2564_v33 = vld [vmem:[#allocation2 + $0x98] sm:$0x1]  ;;  %v6131_v12 = vld [vmem:[#allocation2 + $0x94] sm:$0xf] }
 0x169   : > { %v2999_v30 = vunpack.c.l.b16 %v2840_v42  ;;  %v2847_v26 = vrot.slane %v2845_v43, 5  ;;  %v1939_v49 = vrot.slane %v6131_v12, 5  ;;  %v1814_v58 = vld [vmem:[#allocation2 + $0x90] sm:$0xe]  ;;  %v6132_v42 = vld [vmem:[#allocation2 + $0x98] sm:$0x1] }
 0x16a   : > { %1776 = vmatmul.bf16.gmra.mxu1 %v5968_v14  ;;  %v3106_v24 = vpop.f32.mrf.mxu0  ;;  %v2857_v14 = vrot.slane %v2855_v2, 4 }
 0x16b   : > { %2466 = vmatmul.bf16.gmra.mxu3 %v6007_v59  ;;  %v7169_v51 = vadd.f32 %v3106_v24, %v2500_v7  ;;  %v3020_v52 = vpack.c.b16 %v2999_v30, %v2998_v16  ;;  %v2848_v7 = vor.u32 %v2847_v26, %v2844_v45  ;;  %v2861_v24 = vshll.u32 %v2564_v33, 16  ;;  %v6062_v16 = vld [vmem:[%s7824_s3 + $0x1c8] sm:$0xff]  ;;  %v6008_v45 = vld [vmem:[#allocation2 + $0x90] sm:$0xff] }
 0x16c   : > { %v2858_v60 = vor.u32 %v2857_v14, %v2853_v47  ;;  %v1941_v50 = vrot.slane %v1939_v49, 4  ;;  %v6030_v30 = vld [vmem:[%s7824_s3 + $0x148] sm:$0xff]  ;;  %v2869_v33 = vshll.u32 %v2565_v61, 16  ;;  %4519 = vmatpush.bf16.msra.mxu3 %v6062_v16 }
 0x16d   : > { %v2849_v20 = vrot.slane %v2848_v7, 4  ;;  %3522 = vmatpush.bf16.msra.mxu1 %v6030_v30  ;;  %v2875_v7 = vshll.u32 %v2566_v9, 16 }
 0x16e   : > { %v2427_v36 = vpop.f32.mrf.mxu3  ;;  %v2859_v26 = vrot.slane %v2858_v60, 4 }
 0x16f   : > { %v2501_v28 = vadd.f32 %v2427_v36, %v2187_v13  ;;  %v2115_v34 = vpop.f32.mrf.mxu2  ;;  %v1739_v59 = vpop.f32.mrf.mxu1  ;;  %v6054_v13 = vld [vmem:[%s7824_s3 + $0x188] sm:$0xff] }
 0x170   : > { %v2188_v0 = vadd.f32 %v2115_v34, %v1735_v1  ;;  %v1740_v53 = vadd.f32 %v1739_v59, %v7125_v25  ;;  %v5453_v1 = vrot.slane %v1814_v58, 9  ;;  %v1942_v25 = vrot.slane %v6132_v42, 5  ;;  %3837 = vmatpush.bf16.msra.mxu2 %v6054_v13 }
 0x171   : > { %v2866_v59 = vshrl.u32 %v2565_v61, 16  ;;  %v2879_v58 = vshrl.u32 %v2566_v9, 16  ;;  %v2871_v61 = vrot.slane %v2869_v33, 5  ;;  %v268_v33 = vld [vmem:[%s6242_s29 + $0xf8] sm:$0xff] }
 0x172   : > { %v3109_v37 = vpop.f32.mrf.mxu0  ;;  %v1940_v12 = vsel %vm6906_vm13, %v5453_v1, %v1939_v49 }
 0x173   : > { %v7175_v43 = vadd.f32 %v3109_v37, %v2501_v28  ;;  %v2863_v28 = vrot.slane %v2861_v24, 5  ;;  %v2854_v37 = vsel %vm6367_vm10, %v2849_v20, %v2853_v47  ;;  %v2868_v60 = vrot.slane %v2866_v59, 4  ;;  %v6070_v24 = vld [vmem:[%s7824_s3 + $0x208] sm:$0xff]  ;;  %v267_v59 = vld [vmem:[%s6242_s29 + $0xf0] sm:$0xff] }
 0x174   : > { %2157 = vmatmul.bf16.gmra.mxu2 %v2025_v19  ;;  %v2006_v49 = vunpack.c.l.b16 %v1940_v12  ;;  %v2881_v42 = vrot.slane %v2879_v58, 4  ;;  %4945 = vmatpush.bf16.msra.mxu0 %v6070_v24  ;;  %v3000_v47 = vunpack.c.l.b16 %v2854_v37  ;;  %v6134_v58 = vld [vmem:[%s7822_s1] ss:$0 sm:$0xff] }
 0x175   : > { %3148 = vmatmul.bf16.gmra.mxu0 %v3020_v52  ;;  %v1943_v52 = vsel %vm6906_vm13, %v1941_v50, %v1942_v25  ;;  %v7196_v50 = vrot.slane %v2875_v7, 5  ;;  %v1815_v7 = vld [vmem:[#allocation2 + $0x9c] sm:$0xe] }
 0x176   : > { %v2429_v2 = vpop.f32.mrf.mxu3  ;;  %v2007_v13 = vunpack.c.l.b16 %v1943_v52 }
 0x177   : > { %v2502_v36 = vadd.f32 %v2429_v2, %v2188_v0  ;;  %v2118_v34 = vpop.f32.mrf.mxu2  ;;  %v1742_v14 = vpop.f32.mrf.mxu1 }
 0x178   : > { %v2189_v19 = vadd.f32 %v2118_v34, %v1738_v18  ;;  %v2864_v18 = vsel %vm6367_vm10, %v2859_v26, %v2863_v28  ;;  %v2872_v26 = vor.u32 %v2871_v61, %v2868_v60  ;;  %v2882_v28 = vor.u32 %v2881_v42, %v7196_v50 }
 0x179   : > { %v3001_v25 = vunpack.c.l.b16 %v2864_v18  ;;  %v6135_v18 = vld [vmem:[%s7823_s2] ss:$0 sm:$0xff]  ;;  %v5454_v61 = vrot.slane %v1815_v7, 9 }
 0x17a   : > { %1781 = vmatmul.bf16.gmra.mxu1 %v5969_v27  ;;  %v3111_v0 = vpop.f32.mrf.mxu0  ;;  %v2567_v27 = vld [vmem:[#allocation2 + $0xa4] sm:$0x1] }
 0x17b   : > { %2471 = vmatmul.bf16.gmra.mxu3 %v6008_v45  ;;  %v7194_v1 = vadd.f32 %v3111_v0, %v2502_v36  ;;  %v2026_v45 = vpack.c.b16 %v2007_v13, %v2006_v49  ;;  %v6133_v36 = vld [vmem:[#allocation2 + $0xa0] sm:$0xf]  ;;  %v3021_v12 = vpack.c.b16 %v3001_v25, %v3000_v47  ;;  %v2885_v52 = vshll.u32 %v2567_v27, 16  ;;  %v6136_v47 = vld [vmem:[#allocation2 + $0xa4] sm:$0x1] }
 0x17c   : > { %v1946_v34 = vrot.slane %v6133_v36, 5  ;;  %v304_v0 = vmul.f32 %v6134_v58, %v268_v33  ;;  %v2883_v13 = vrot.slane %v2882_v28, 4  ;;  %v1949_v25 = vrot.slane %v6136_v47, 5  ;;  %v6009_v33 = vld [vmem:[#allocation2 + $0x9c] sm:$0xff]  ;;  %v2569_v28 = vld [vmem:[#allocation2 + $0xac] sm:$0xf] }
 0x17d   : > { %v2887_v27 = vrot.slane %v2885_v52, 5  ;;  %v2899_v47 = vshll.u32 %v2569_v28, 16 }
 0x17e   : > { %v2432_v9 = vpop.f32.mrf.mxu3  ;;  %v340_v24 = vadd.f32 %v6135_v18, %v304_v0  ;;  %v1948_v42 = vrot.slane %v1946_v34, 4 }
 0x17f   : > { %v2503_v2 = vadd.f32 %v2432_v9, %v2189_v19  ;;  %v2120_v20 = vpop.f32.mrf.mxu2  ;;  %v1744_v16 = vpop.f32.mrf.mxu1  ;;  %v303_v19 = vmul.f32 %v6134_v58, %v267_v59 }
 0x180   : > { %v2190_v30 = vadd.f32 %v2120_v20, %v1740_v53  ;;  %v2873_v53 = vrot.slane %v2872_v26, 4  ;;  %v1743_v20 = vadd.f32 %v1742_v14, %v6981_v44  ;;  %v372_v36 = vmax.f32 %v340_v24, 0.0 }
 0x181   : > { %v339_v60 = vadd.f32 %v6135_v18, %v303_v19  ;;  %v1947_v44 = vsel %vm6906_vm13, %v5454_v61, %v1946_v34  ;;  %v1950_v14 = vsel %vm6906_vm13, %v1948_v42, %v1949_v25  ;;  %v1745_v25 = vadd.f32 %v1744_v16, %v6992_v3  ;;  %v1816_v3 = vld [vmem:[#allocation2 + $0xa8] sm:$0xe] }
 0x182   : > { %v3114_v37 = vpop.f32.mrf.mxu0 }
 0x183   : > { %v7207_v49 = vadd.f32 %v3114_v37, %v2503_v2  ;;  %v371_v26 = vmax.f32 %v339_v60, 0.0  ;;  %v2568_v2 = vld [vmem:[#allocation2 + $0xa8] sm:$0xf]  ;;  %v404_v37 = vpack.c.bf16 %v372_v36, %v372_v36 }
 0x184   : > { %2162 = vmatmul.bf16.gmra.mxu2 %v2026_v45  ;;  %v5970_v45 = vld [vmem:[#allocation2 + $0x9c] sm:$0xff]  ;;  %v2890_v52 = vshrl.u32 %v2568_v2, 16  ;;  %v2893_v24 = vshll.u32 %v2568_v2, 16 }
 0x185   : > { %7840 = vst [vmem:[#allocation6_spill] sm:$0xff] %v7207_v49  ;;  %3153 = vmatmul.bf16.gmra.mxu0 %v3021_v12  ;;  %v403_v7 = vpack.c.bf16 %v371_v26, %v371_v26  ;;  %v2878_v12 = vsel %vm6367_vm10, %v2873_v53, %v7196_v50  ;;  %v2009_v50 = vunpack.c.l.b16 %v1950_v14  ;;  %v2570_v14 = vld [vmem:[#allocation2 + $0xb0] sm:$0x1] }
 0x186   : > { %v2434_v9 = vpop.f32.mrf.mxu3  ;;  %v3002_v34 = vunpack.c.l.b16 %v2878_v12  ;;  %v2895_v49 = vrot.slane %v2893_v24, 5  ;;  %v893_v12 = vld [vmem:[#allocation2 + $0xc0] sm:$0xf] }
 0x187   : > { %v2504_v59 = vadd.f32 %v2434_v9, %v2190_v30  ;;  %v2123_v58 = vpop.f32.mrf.mxu2  ;;  %v7210_v19 = vpop.f32.mrf.mxu1  ;;  %v2888_v30 = vsel %vm6367_vm10, %v2883_v13, %v2887_v27  ;;  %v718_v18 = vshrl.u32 %v403_v7, 16  ;;  %v2903_v9 = vshrl.u32 %v2569_v28, 16 }
 0x188   : > { %v2191_v0 = vadd.f32 %v2123_v58, %v1743_v20  ;;  %v2008_v20 = vunpack.c.l.b16 %v1947_v44  ;;  %v3003_v61 = vunpack.c.l.b16 %v2888_v30  ;;  %v2892_v13 = vrot.slane %v2890_v52, 4  ;;  %v6137_v30 = vld [vmem:[#allocation2 + $0xac] sm:$0xf] }
 0x189   : > { %v720_v26 = vrot.slane %v718_v18, 7  ;;  %v721_v27 = vshll.u32 %v403_v7, 16  ;;  %v2905_v2 = vrot.slane %v2903_v9, 4  ;;  %v1953_v18 = vrot.slane %v6137_v30, 5  ;;  %v6053_v9 = vld [vmem:[%s7824_s3 + $0x180] sm:$0xff]  ;;  %v6010_v30 = vld [vmem:[#allocation2 + $0xa8] sm:$0xff] }
 0x18a   : > { %1786 = vmatmul.bf16.gmra.mxu1 %v5970_v45  ;;  %v3116_v60 = vpop.f32.mrf.mxu0  ;;  %v726_v45 = vshrl.u32 %v404_v37, 16  ;;  %v729_v52 = vshll.u32 %v404_v37, 16  ;;  %v5455_v37 = vrot.slane %v1816_v3, 9  ;;  %3838 = vmatpush.bf16.msra.mxu2 %v6053_v9  ;;  %v1748_v39 = vadd.f32 %v7210_v19, %v7004_v38 }
 0x18b   : > { %2476 = vmatmul.bf16.gmra.mxu3 %v6009_v33  ;;  %v7221_v53 = vadd.f32 %v3116_v60, %v2504_v59  ;;  %v7224_v33 = vrot.slane %v2899_v47, 5  ;;  %v2027_v59 = vpack.c.b16 %v2009_v50, %v2008_v20  ;;  %v723_v60 = vor.u32 %v721_v27, %v720_v26  ;;  %v897_v50 = vld [vmem:[#allocation2 + $0xc8] sm:$0x1] }
 0x18c   : > { %v724_v16 = vrot.slane %v720_v26, 4  ;;  %v728_v7 = vrot.slane %v726_v45, 7  ;;  %v2909_v47 = vshll.u32 %v2570_v14, 16  ;;  %v2572_v45 = vld [vmem:[#allocation2 + $0xb8] sm:$0xf]  ;;  %v1954_v35 = vsel %vm6906_vm13, %v5455_v37, %v1953_v18 }
 0x18d   : > { %7841 = vst [vmem:[#allocation7_spill] sm:$0xff] %v7221_v53  ;;  %v3022_v53 = vpack.c.b16 %v3003_v61, %v3002_v34  ;;  %v2906_v24 = vor.u32 %v2905_v2, %v7224_v33  ;;  %v894_v20 = vsel %vm6304_vm7, %v723_v60, %v893_v12  ;;  %v5971_v2 = vld [vmem:[#allocation2 + $0xa8] sm:$0xff] }
 0x18e   : > { %v2437_v42 = vpop.f32.mrf.mxu3  ;;  %v731_v34 = vor.u32 %v729_v52, %v728_v7  ;;  %v733_v61 = vrot.slane %v728_v7, 4  ;;  %895 = vst [vmem:[#allocation2 + $0xc0] sm:$0xf] %v894_v20  ;;  %v2911_v38 = vrot.slane %v2909_v47, 5  ;;  %v6069_v20 = vld [vmem:[%s7824_s3 + $0x200] sm:$0xff] }
 0x18f   : > { %v2505_v36 = vadd.f32 %v2437_v42, %v2191_v0  ;;  %v2125_v58 = vpop.f32.mrf.mxu2  ;;  %v7226_v28 = vpop.f32.mrf.mxu1  ;;  %v2896_v42 = vor.u32 %v2895_v49, %v2892_v13  ;;  %v1955_v49 = vrot.slane %v1953_v18, 4  ;;  %v6138_v13 = vld [vmem:[#allocation2 + $0xb0] sm:$0x1]  ;;  %v2907_v3 = vrot.slane %v2906_v24, 4  ;;  %4946 = vmatpush.bf16.msra.mxu0 %v6069_v20  ;;  %v5972_v20 = vld [vmem:[#allocation2 + $0xb4] sm:$0xff] }
 0x190   : > { %v2192_v44 = vadd.f32 %v2125_v58, %v1745_v25  ;;  %v2571_v25 = vld [vmem:[#allocation2 + $0xb4] sm:$0xf]  ;;  %v1956_v27 = vrot.slane %v6138_v13, 5  ;;  %v732_v14 = vsel %vm6296_vm6, %v724_v16, %v731_v34  ;;  %v898_v12 = vsel %vm6284_vm5, %v733_v61, %v897_v50 }
 0x191   : > { %v2897_v60 = vrot.slane %v2896_v42, 4  ;;  %896 = vst [vmem:[#allocation2 + $0xc4] sm:$0xf] %v732_v14  ;;  %v2917_v9 = vshll.u32 %v2571_v25, 16  ;;  %v2927_v16 = vshrl.u32 %v2572_v45, 16  ;;  %v2912_v47 = vsel %vm6367_vm10, %v2907_v3, %v2911_v38 }
 0x192   : > { %v3119_v0 = vpop.f32.mrf.mxu0  ;;  %899 = vst [vmem:[#allocation2 + $0xc8] sm:$0x1] %v898_v12  ;;  %v1957_v31 = vsel %vm6906_vm13, %v1955_v49, %v1956_v27  ;;  %v2010_v18 = vunpack.c.l.b16 %v1954_v35  ;;  %v3005_v27 = vunpack.c.l.b16 %v2912_v47 }
 0x193   : > { %v7234_v26 = vadd.f32 %v3119_v0, %v2505_v36  ;;  %v6029_v36 = vld [vmem:[%s7824_s3 + $0x140] sm:$0xff]  ;;  %v2914_v0 = vshrl.u32 %v2571_v25, 16  ;;  %v2902_v24 = vsel %vm6367_vm10, %v2897_v60, %v7224_v33  ;;  %v2011_v50 = vunpack.c.l.b16 %v1957_v31  ;;  %v6140_v31 = vld [vmem:[#allocation2 + $0xbc] sm:$0x1] }
 0x194   : > { %2167 = vmatmul.bf16.gmra.mxu2 %v2027_v59  ;;  %v6061_v59 = vld [vmem:[%s7824_s3 + $0x1c0] sm:$0xff]  ;;  %3523 = vmatpush.bf16.msra.mxu1 %v6029_v36  ;;  %v2919_v61 = vrot.slane %v2917_v9, 5  ;;  %v2929_v49 = vrot.slane %v2927_v16, 4  ;;  %v3004_v13 = vunpack.c.l.b16 %v2902_v24  ;;  %v1750_v33 = vadd.f32 %v7226_v28, %v7016_v63  ;;  %v6139_v36 = vld [vmem:[#allocation2 + $0xb8] sm:$0xf] }
 0x195   : > { %3158 = vmatmul.bf16.gmra.mxu0 %v3022_v53  ;;  %4520 = vmatpush.bf16.msra.mxu3 %v6061_v59  ;;  %v2916_v34 = vrot.slane %v2914_v0, 4  ;;  %v1960_v14 = vrot.slane %v6139_v36, 5 }
 0x196   : > { %v2439_v58 = vpop.f32.mrf.mxu3 }
 0x197   : > { %v2506_v53 = vadd.f32 %v2439_v58, %v2192_v44  ;;  %v2128_v19 = vpop.f32.mrf.mxu2  ;;  %v1752_v7 = vpop.f32.mrf.mxu1  ;;  %v2923_v44 = vshll.u32 %v2572_v45, 16  ;;  %v2573_v58 = vld [vmem:[#allocation2 + $0xbc] sm:$0x1]  ;;  %v2920_v60 = vor.u32 %v2919_v61, %v2916_v34  ;;  %v1962_v35 = vrot.slane %v1960_v14, 4 }
 0x198   : > { %v2193_v52 = vadd.f32 %v2128_v19, %v1748_v39  ;;  %v2933_v38 = vshll.u32 %v2573_v58, 16  ;;  %v3023_v19 = vpack.c.b16 %v3005_v27, %v3004_v13  ;;  %v1753_v47 = vadd.f32 %v1752_v7, %v7031_v41 }
 0x199   : > { %v2925_v37 = vrot.slane %v2923_v44, 5  ;;  %v1963_v44 = vrot.slane %v6140_v31, 5  ;;  %v2921_v28 = vrot.slane %v2920_v60, 4  ;;  %v3211_v31 = vld [vmem:[#allocation2 + $0xc] sm:$0xe] }
 0x19a   : > { %1791 = vmatmul.bf16.gmra.mxu1 %v5971_v2  ;;  %v3121_v42 = vpop.f32.mrf.mxu0  ;;  %v2935_v16 = vrot.slane %v2933_v38, 5 }
 0x19b   : > { %2481 = vmatmul.bf16.gmra.mxu3 %v6010_v30  ;;  %v7260_v25 = vadd.f32 %v3121_v42, %v2506_v53  ;;  %v2028_v53 = vpack.c.b16 %v2011_v50, %v2010_v18  ;;  %v1817_v30 = vld [vmem:[#allocation2 + $0xb4] sm:$0xe]  ;;  %v2930_v3 = vor.u32 %v2929_v49, %v2925_v37  ;;  %v2574_v42 = vld [vmem:[#allocation2 + $0xc0] sm:$0xf]  ;;  %v2575_v18 = vld [vmem:[#allocation2 + $0xc4] sm:$0xf] }
 0x19c   : > { %v5456_v9 = vrot.slane %v1817_v30, 9  ;;  %v6141_v50 = vld [vmem:[#allocation2 + $0x10] sm:$0xf]  ;;  %v6011_v49 = vld [vmem:[#allocation2 + $0xb4] sm:$0xff]  ;;  %v2941_v7 = vshll.u32 %v2574_v42, 16  ;;  %v2947_v36 = vshll.u32 %v2575_v18, 16 }
 0x19d   : > { %v3277_v34 = vrot.slane %v6141_v50, 5  ;;  %v2951_v30 = vshrl.u32 %v2575_v18, 16 }
 0x19e   : > { %v2442_v45 = vpop.f32.mrf.mxu3 }
 0x19f   : > { %v2507_v39 = vadd.f32 %v2442_v45, %v2193_v52  ;;  %v2130_v2 = vpop.f32.mrf.mxu2  ;;  %v1754_v59 = vpop.f32.mrf.mxu1  ;;  %v2931_v52 = vrot.slane %v2930_v3, 4  ;;  %v1961_v45 = vsel %vm6906_vm13, %v5456_v9, %v1960_v14  ;;  %v3279_v60 = vrot.slane %v3277_v34, 4  ;;  %v6142_v3 = vld [vmem:[#allocation2 + $0x14] sm:$0x1] }
 0x1a0   : > { %v2194_v12 = vadd.f32 %v2130_v2, %v1750_v33  ;;  %v1964_v33 = vsel %vm6906_vm13, %v1962_v35, %v1963_v44  ;;  %v2926_v2 = vsel %vm6367_vm10, %v2921_v28, %v2925_v37  ;;  %v3280_v14 = vrot.slane %v6142_v3, 5  ;;  %v7275_v37 = vld [vmem:[#allocation2 + $0x1c] sm:$0xf] }
 0x1a1   : > { %v2936_v41 = vsel %vm6367_vm10, %v2931_v52, %v2935_v16  ;;  %v1755_v28 = vadd.f32 %v1754_v59, %v7056_v6  ;;  %v2943_v52 = vrot.slane %v2941_v7, 5  ;;  %v2949_v16 = vrot.slane %v2947_v36, 5 }
 0x1a2   : > { %v3124_v0 = vpop.f32.mrf.mxu0  ;;  %v3007_v9 = vunpack.c.l.b16 %v2936_v41  ;;  %v4010_v6 = vshll.u32 %v7275_v37, 16  ;;  %v4014_v7 = vshrl.u32 %v7275_v37, 16 }
 0x1a3   : > { %v7264_v63 = vadd.f32 %v3124_v0, %v2507_v39  ;;  %v2938_v39 = vshrl.u32 %v2574_v42, 16  ;;  %v3006_v0 = vunpack.c.l.b16 %v2926_v2  ;;  %v5665_v42 = vrot.slane %v3211_v31, 9 }
 0x1a4   : > { %2172 = vmatmul.bf16.gmra.mxu2 %v2028_v53  ;;  %v2013_v53 = vunpack.c.l.b16 %v1964_v33  ;;  %v4016_v31 = vrot.slane %v4014_v7, 4 }
 0x1a5   : > { %3163 = vmatmul.bf16.gmra.mxu0 %v3023_v19  ;;  %v3952_v19 = vld [vmem:[#allocation2 + $0x18] sm:$0xf]  ;;  %v2940_v35 = vrot.slane %v2938_v39, 4  ;;  %v3278_v39 = vsel %vm6906_vm13, %v5665_v42, %v3277_v34  ;;  %v4012_v34 = vrot.slane %v4010_v6, 5 }
 0x1a6   : > { %v2444_v24 = vpop.f32.mrf.mxu3  ;;  %v4001_v18 = vshrl.u32 %v3952_v19, 16  ;;  %v4004_v50 = vshll.u32 %v3952_v19, 16  ;;  %v3404_v2 = vunpack.c.l.b16 %v3278_v39 }
 0x1a7   : > { %v2508_v61 = vadd.f32 %v2444_v24, %v2194_v12  ;;  %v2133_v13 = vpop.f32.mrf.mxu2  ;;  %v1757_v27 = vpop.f32.mrf.mxu1  ;;  %v2012_v12 = vunpack.c.l.b16 %v1961_v45  ;;  %v2576_v45 = vld [vmem:[#allocation2 + $0xc8] sm:$0x1]  ;;  %v2944_v36 = vor.u32 %v2943_v52, %v2940_v35  ;;  %v6012_v52 = vld [vmem:[#allocation2 + $0xc0] sm:$0xff] }
 0x1a8   : > { %v2195_v58 = vadd.f32 %v2133_v13, %v1753_v47  ;;  %v4006_v19 = vrot.slane %v4004_v50, 5 }
 0x1a9   : > { %v2029_v47 = vpack.c.b16 %v2013_v53, %v2012_v12  ;;  %v3024_v12 = vpack.c.b16 %v3007_v9, %v3006_v0 }
 0x1aa   : > { %1796 = vmatmul.bf16.gmra.mxu1 %v5972_v20  ;;  %v3126_v38 = vpop.f32.mrf.mxu0  ;;  %v2953_v20 = vrot.slane %v2951_v30, 4 }
 0x1ab   : > { %2486 = vmatmul.bf16.gmra.mxu3 %v6011_v49  ;;  %v7277_v44 = vadd.f32 %v3126_v38, %v2508_v61  ;;  %v3281_v61 = vsel %vm6906_vm13, %v3279_v60, %v3280_v14  ;;  %v4003_v38 = vrot.slane %v4001_v18, 4  ;;  %v2945_v60 = vrot.slane %v2944_v36, 4  ;;  %v7288_v14 = vld [vmem:[#allocation2 + $0x20] sm:$0x1]  ;;  %v3212_v36 = vld [vmem:[#allocation2 + $0x18] sm:$0xe] }
 0x1ac   : > { %v3405_v41 = vunpack.c.l.b16 %v3281_v61  ;;  %v2954_v53 = vor.u32 %v2953_v20, %v2949_v16 }
 0x1ad   : > { %v4007_v18 = vor.u32 %v4006_v19, %v4003_v38  ;;  %v7298_v19 = vld [vmem:[#allocation2 + $0x28] sm:$0xf] }
 0x1ae   : > { %v2447_v24 = vpop.f32.mrf.mxu3  ;;  %v3436_v30 = vpack.c.b16 %v3405_v41, %v3404_v2  ;;  %v2955_v35 = vrot.slane %v2954_v53, 4 }
 0x1af   : > { %v2509_v49 = vadd.f32 %v2447_v24, %v2195_v58  ;;  %v2135_v13 = vpop.f32.mrf.mxu2  ;;  %v1759_v33 = vpop.f32.mrf.mxu1  ;;  %v2957_v58 = vshll.u32 %v2576_v45, 16  ;;  %v1758_v24 = vadd.f32 %v1757_v27, %v7066_v40  ;;  %v4020_v45 = vshll.u32 %v7288_v14, 16  ;;  %v6143_v27 = vld [vmem:[#allocation2 + $0x1c] sm:$0xf] }
 0x1b0   : > { %v2196_v59 = vadd.f32 %v2135_v13, %v1755_v28  ;;  %v4008_v40 = vrot.slane %v4007_v18, 4  ;;  %v3284_v6 = vrot.slane %v6143_v27, 5 }
 0x1b1   : > { %v2959_v0 = vrot.slane %v2957_v58, 5  ;;  %v4022_v7 = vrot.slane %v4020_v45, 5  ;;  %v5666_v58 = vrot.slane %v3212_v36, 9  ;;  %v4700_v36 = vrot.slane %v7275_v37, 5 }
 0x1b2   : > { %v3129_v3 = vpop.f32.mrf.mxu0 }
 0x1b3   : > { %v7286_v42 = vadd.f32 %v3129_v3, %v2509_v49  ;;  %v2950_v49 = vsel %vm6367_vm10, %v2945_v60, %v2949_v16  ;;  %v2960_v39 = vsel %vm6367_vm10, %v2955_v35, %v2959_v0  ;;  %v3286_v3 = vrot.slane %v3284_v6, 4  ;;  %v6144_v16 = vld [vmem:[#allocation2 + $0x20] sm:$0x1] }
 0x1b4   : > { %2177 = vmatmul.bf16.gmra.mxu2 %v2029_v47  ;;  %v4017_v47 = vor.u32 %v4016_v31, %v4012_v34  ;;  %v3008_v2 = vunpack.c.l.b16 %v2950_v49  ;;  %v3009_v53 = vunpack.c.l.b16 %v2960_v39  ;;  %v3287_v38 = vrot.slane %v6144_v16, 5 }
 0x1b5   : > { %3168 = vmatmul.bf16.gmra.mxu0 %v3024_v12  ;;  %v1760_v31 = vadd.f32 %v1759_v33, %v7082_v8  ;;  %v4013_v0 = vsel %vm6367_vm10, %v4008_v40, %v4012_v34  ;;  %v4034_v8 = vshll.u32 %v7298_v19, 16  ;;  %v4038_v33 = vshrl.u32 %v7298_v19, 16 }
 0x1b6   : > { %v2449_v28 = vpop.f32.mrf.mxu3  ;;  %v4018_v41 = vrot.slane %v4017_v47, 4  ;;  %v6037_v47 = vld [vmem:[#allocation2 + $0x18] sm:$0xff]  ;;  %v4401_v27 = vunpack.c.l.b16 %v4013_v0 }
 0x1b7   : > { %v2510_v9 = vadd.f32 %v2449_v28, %v2196_v59  ;;  %v2138_v20 = vpop.f32.mrf.mxu2  ;;  %v1762_v13 = vpop.f32.mrf.mxu1  ;;  %v3955_v59 = vld [vmem:[#allocation2 + $0x24] sm:$0xf] }
 0x1b8   : > { %v2197_v50 = vadd.f32 %v2138_v20, %v1758_v24  ;;  %v4025_v60 = vshrl.u32 %v3955_v59, 16  ;;  %v4028_v28 = vshll.u32 %v3955_v59, 16  ;;  %v3288_v20 = vsel %vm6906_vm13, %v3286_v3, %v3287_v38  ;;  %v4634_v59 = vld [vmem:[#allocation2 + $0x18] sm:$0xe] }
 0x1b9   : > { %v4023_v45 = vsel %vm6367_vm10, %v4018_v41, %v4022_v7  ;;  %v3407_v39 = vunpack.c.l.b16 %v3288_v20  ;;  %v4040_v3 = vrot.slane %v4038_v33, 4  ;;  %v7314_v41 = vld [vmem:[#allocation2 + $0x2c] sm:$0x1]  ;;  %v3958_v33 = vld [vmem:[#allocation2 + $0x30] sm:$0xf] }
 0x1ba   : > { %3524 = vmatmul.bf16.vlgmr.msra.gmra.mxu1 %v3436_v30  ;;  %v3131_v61 = vpop.f32.mrf.mxu0  ;;  %v4027_v34 = vrot.slane %v4025_v60, 4 }
 0x1bb   : > { %2491 = vmatmul.bf16.gmra.mxu3 %v6012_v52  ;;  %v7296_v12 = vadd.f32 %v3131_v61, %v2510_v9  ;;  %v3285_v9 = vsel %vm6906_vm13, %v5666_v58, %v3284_v6  ;;  %v4030_v61 = vrot.slane %v4028_v28, 5  ;;  %v4402_v6 = vunpack.c.l.b16 %v4023_v45 }
 0x1bc   : > { %v3406_v49 = vunpack.c.l.b16 %v3285_v9  ;;  %v4036_v58 = vrot.slane %v4034_v8, 5  ;;  %v4702_v28 = vrot.slane %v4700_v36, 4 }
 0x1bd   : > { %v4433_v60 = vpack.c.b16 %v4402_v6, %v4401_v27  ;;  %v6146_v27 = vld [vmem:[#allocation2 + $0x2c] sm:$0x1] }
 0x1be   : > { %v2452_v30 = vpop.f32.mrf.mxu3  ;;  %v3437_v38 = vpack.c.b16 %v3407_v39, %v3406_v49  ;;  %v4041_v20 = vor.u32 %v4040_v3, %v4036_v58  ;;  %v3213_v49 = vld [vmem:[#allocation2 + $0x24] sm:$0xe]  ;;  %v3294_v6 = vrot.slane %v6146_v27, 5 }
 0x1bf   : > { %v2511_v24 = vadd.f32 %v2452_v30, %v2197_v50  ;;  %v2140_v35 = vpop.f32.mrf.mxu2  ;;  %v1764_v52 = vpop.f32.mrf.mxu1  ;;  %v3025_v50 = vpack.c.b16 %v3009_v53, %v3008_v2  ;;  %v1763_v2 = vadd.f32 %v1762_v13, %v7002_v55  ;;  %v5889_v53 = vrot.slane %v4634_v59, 9  ;;  %v7325_v59 = vld [vmem:[#allocation2 + $0x34] sm:$0xf] }
 0x1c0   : > { %v2198_v18 = vadd.f32 %v2140_v35, %v1760_v31  ;;  %v4031_v30 = vor.u32 %v4030_v61, %v4027_v34  ;;  %v4703_v35 = vrot.slane %v7288_v14, 5  ;;  %v4042_v14 = vrot.slane %v4041_v20, 4  ;;  %v6038_v20 = vld [vmem:[#allocation2 + $0x24] sm:$0xff] }
 0x1c1   : > { %v5667_v61 = vrot.slane %v3213_v49, 9 }
 0x1c2   : > { %v3134_v40 = vpop.f32.mrf.mxu0  ;;  %v4032_v45 = vrot.slane %v4031_v30, 4  ;;  %v4704_v13 = vsel %vm6906_vm13, %v4702_v28, %v4703_v35  ;;  %v4052_v35 = vshll.u32 %v3958_v33, 16 }
 0x1c3   : > { %v7312_v16 = vadd.f32 %v3134_v40, %v2511_v24  ;;  %v4044_v24 = vshll.u32 %v7314_v41, 16 }
 0x1c4   : > { %3839 = vmatmul.bf16.vlgmr.msra.gmra.mxu2 %v6037_v47  ;;  %v4701_v47 = vsel %vm6906_vm13, %v5889_v53, %v4700_v36  ;;  %v4828_v36 = vunpack.c.l.b16 %v4704_v13  ;;  %v4049_v53 = vshrl.u32 %v3958_v33, 16  ;;  %v4054_v33 = vrot.slane %v4052_v35, 5 }
 0x1c5   : > { %3173 = vmatmul.bf16.gmra.mxu0 %v3025_v50  ;;  %v4046_v50 = vrot.slane %v4044_v24, 5  ;;  %v4827_v34 = vunpack.c.l.b16 %v4701_v47  ;;  %v4707_v47 = vrot.slane %v7298_v19, 5 }
 0x1c6   : > { %v2454_v7 = vpop.f32.mrf.mxu3  ;;  %v4051_v49 = vrot.slane %v4049_v53, 4 }
 0x1c7   : > { %v2512_v31 = vadd.f32 %v2454_v7, %v2198_v18  ;;  %v2143_v37 = vpop.f32.mrf.mxu2  ;;  %v1767_v0 = vpop.f32.mrf.mxu1  ;;  %v6145_v18 = vld [vmem:[#allocation2 + $0x28] sm:$0xf]  ;;  %v1765_v7 = vadd.f32 %v1764_v52, %v7008_v62  ;;  %v4047_v24 = vsel %vm6367_vm10, %v4042_v14, %v4046_v50  ;;  %v4058_v62 = vshll.u32 %v7325_v59, 16  ;;  %v7341_v50 = vld [vmem:[#allocation2 + $0x38] sm:$0x1] }
 0x1c8   : > { %v2199_v9 = vadd.f32 %v2143_v37, %v1763_v2  ;;  %v3291_v8 = vrot.slane %v6145_v18, 5  ;;  %v4037_v2 = vsel %vm6367_vm10, %v4032_v45, %v4036_v58  ;;  %v4062_v52 = vshrl.u32 %v7325_v59, 16 }
 0x1c9   : > { %v4859_v58 = vpack.c.b16 %v4828_v36, %v4827_v34  ;;  %v4403_v18 = vunpack.c.l.b16 %v4037_v2  ;;  %v4709_v19 = vrot.slane %v4707_v47, 4  ;;  %v4710_v36 = vrot.slane %v7314_v41, 5 }
 0x1ca   : > { %3529 = vmatmul.bf16.gmra.mxu1 %v3437_v38  ;;  %v3136_v55 = vpop.f32.mrf.mxu0  ;;  %v3293_v40 = vrot.slane %v3291_v8, 4 }
 0x1cb   : > { %4521 = vmatmul.bf16.vlgmr.msra.gmra.mxu3 %v4433_v60  ;;  %v7323_v39 = vadd.f32 %v3136_v55, %v2512_v31  ;;  %v3292_v31 = vsel %vm6906_vm13, %v5667_v61, %v3291_v8  ;;  %v4404_v8 = vunpack.c.l.b16 %v4047_v24  ;;  %v4060_v61 = vrot.slane %v4058_v62, 5  ;;  %v3961_v62 = vld [vmem:[#allocation2 + $0x3c] sm:$0xf] }
 0x1cc   : > { %v3295_v28 = vsel %vm6906_vm13, %v3293_v40, %v3294_v6  ;;  %v3408_v45 = vunpack.c.l.b16 %v3292_v31  ;;  %v4064_v40 = vrot.slane %v4062_v52, 4  ;;  %v1768_v6 = vadd.f32 %v1767_v0, %v7027_v15  ;;  %v6147_v0 = vld [vmem:[#allocation2 + $0x34] sm:$0xf] }
 0x1cd   : > { %v3409_v55 = vunpack.c.l.b16 %v3295_v28  ;;  %v4434_v2 = vpack.c.b16 %v4404_v8, %v4403_v18  ;;  %v4055_v31 = vor.u32 %v4054_v33, %v4051_v49  ;;  %v4711_v24 = vsel %vm6906_vm13, %v4709_v19, %v4710_v36  ;;  %v7352_v33 = vld [vmem:[#allocation2 + $0x40] sm:$0xf] }
 0x1ce   : > { %v2457_v3 = vpop.f32.mrf.mxu3  ;;  %v4065_v35 = vor.u32 %v4064_v40, %v4060_v61 }
 0x1cf   : > { %v2513_v38 = vadd.f32 %v2457_v3, %v2199_v9  ;;  %v2145_v30 = vpop.f32.mrf.mxu2  ;;  %v1769_v60 = vpop.f32.mrf.mxu1  ;;  %v4635_v9 = vld [vmem:[#allocation2 + $0x24] sm:$0xe]  ;;  %v3438_v3 = vpack.c.b16 %v3409_v55, %v3408_v45  ;;  %v4056_v41 = vrot.slane %v4055_v31, 4  ;;  %v3214_v45 = vld [vmem:[#allocation2 + $0x30] sm:$0xe] }
 0x1d0   : > { %v2200_v37 = vadd.f32 %v2145_v30, %v1765_v7  ;;  %v5890_v14 = vrot.slane %v4635_v9, 9  ;;  %v5668_v18 = vrot.slane %v3214_v45, 9  ;;  %v4714_v45 = vrot.slane %v7325_v59, 5 }
 0x1d2   : > { %v3139_v13 = vpop.f32.mrf.mxu0 }
 0x1d3   : > { %v7339_v27 = vadd.f32 %v3139_v13, %v2513_v38  ;;  %v4068_v38 = vshll.u32 %v7341_v50, 16  ;;  %v4830_v13 = vunpack.c.l.b16 %v4711_v24 }
 0x1d4   : > { %3844 = vmatmul.bf16.gmra.mxu2 %v6038_v20  ;;  %v4708_v20 = vsel %vm6906_vm13, %v5890_v14, %v4707_v47  ;;  %v6148_v47 = vld [vmem:[#allocation2 + $0x38] sm:$0x1]  ;;  %v1770_v14 = vadd.f32 %v1769_v60, %v7048_v57  ;;  %v4082_v57 = vshll.u32 %v7352_v33, 16  ;;  %v4086_v60 = vshrl.u32 %v7352_v33, 16 }
 0x1d5   : > { %4947 = vmatmul.bf16.vlgmr.msra.gmra.mxu0 %v4859_v58  ;;  %v4829_v52 = vunpack.c.l.b16 %v4708_v20  ;;  %v4066_v58 = vrot.slane %v4065_v35, 4  ;;  %v4070_v9 = vrot.slane %v4068_v38, 5  ;;  %v3301_v49 = vrot.slane %v6148_v47, 5  ;;  %v6039_v35 = vld [vmem:[#allocation2 + $0x30] sm:$0xff] }
 0x1d6   : > { %v2459_v34 = vpop.f32.mrf.mxu3 }
 0x1d7   : > { %v2514_v7 = vadd.f32 %v2459_v34, %v2200_v37  ;;  %v2148_v53 = vpop.f32.mrf.mxu2  ;;  %v1772_v30 = vpop.f32.mrf.mxu1  ;;  %v3298_v37 = vrot.slane %v6147_v0, 5  ;;  %v4073_v34 = vshrl.u32 %v3961_v62, 16  ;;  %v4071_v38 = vsel %vm6367_vm10, %v4066_v58, %v4070_v9  ;;  %v7368_v58 = vld [vmem:[#allocation2 + $0x44] sm:$0x1] }
 0x1d8   : > { %v2201_v28 = vadd.f32 %v2148_v53, %v1768_v6  ;;  %v4076_v6 = vshll.u32 %v3961_v62, 16  ;;  %v4636_v62 = vld [vmem:[#allocation2 + $0x30] sm:$0xe] }
 0x1d9   : > { %v3300_v8 = vrot.slane %v3298_v37, 4 }
 0x1da   : > { %3534 = vmatmul.bf16.gmra.mxu1 %v3438_v3  ;;  %v3141_v15 = vpop.f32.mrf.mxu0  ;;  %v4061_v3 = vsel %vm6367_vm10, %v4056_v41, %v4060_v61  ;;  %v4075_v61 = vrot.slane %v4073_v34, 4 }
 0x1db   : > { %4526 = vmatmul.bf16.gmra.mxu3 %v4434_v2  ;;  %v7350_v55 = vadd.f32 %v3141_v15, %v2514_v7  ;;  %v3299_v7 = vsel %vm6906_vm13, %v5668_v18, %v3298_v37  ;;  %v3302_v53 = vsel %vm6906_vm13, %v3300_v8, %v3301_v49  ;;  %v4078_v15 = vrot.slane %v4076_v6, 5 }
 0x1dc   : > { %v3410_v20 = vunpack.c.l.b16 %v3299_v7  ;;  %v3411_v24 = vunpack.c.l.b16 %v3302_v53  ;;  %v4405_v0 = vunpack.c.l.b16 %v4061_v3  ;;  %v4406_v37 = vunpack.c.l.b16 %v4071_v38 }
 0x1dd   : > { %v4084_v18 = vrot.slane %v4082_v57, 5  ;;  %v4088_v8 = vrot.slane %v4086_v60, 4  ;;  %v4716_v6 = vrot.slane %v4714_v45, 4  ;;  %v3964_v60 = vld [vmem:[#allocation2 + $0x48] sm:$0xf] }
 0x1de   : > { %v2462_v40 = vpop.f32.mrf.mxu3  ;;  %v3439_v49 = vpack.c.b16 %v3411_v24, %v3410_v20  ;;  %v4435_v34 = vpack.c.b16 %v4406_v37, %v4405_v0  ;;  %v3215_v20 = vld [vmem:[#allocation2 + $0x3c] sm:$0xe]  ;;  %v6150_v0 = vld [vmem:[#allocation2 + $0x44] sm:$0x1] }
 0x1df   : > { %v2515_v19 = vadd.f32 %v2462_v40, %v2201_v28  ;;  %v2150_v36 = vpop.f32.mrf.mxu2  ;;  %v1774_v2 = vpop.f32.mrf.mxu1  ;;  %v4860_v28 = vpack.c.b16 %v4830_v13, %v4829_v52  ;;  %v1773_v52 = vadd.f32 %v1772_v30, %v7061_v23  ;;  %v5891_v13 = vrot.slane %v4636_v62, 9  ;;  %v7379_v62 = vld [vmem:[#allocation2 + $0x4c] sm:$0xf] }
 0x1e0   : > { %v2202_v31 = vadd.f32 %v2150_v36, %v1770_v14  ;;  %v4079_v40 = vor.u32 %v4078_v15, %v4075_v61  ;;  %v4717_v36 = vrot.slane %v7341_v50, 5  ;;  %v4089_v53 = vor.u32 %v4088_v8, %v4084_v18 }
 0x1e1   : > { %v5669_v15 = vrot.slane %v3215_v20, 9  ;;  %v3308_v37 = vrot.slane %v6150_v0, 5 }
 0x1e2   : > { %v3144_v41 = vpop.f32.mrf.mxu0  ;;  %v4080_v38 = vrot.slane %v4079_v40, 4  ;;  %v4718_v30 = vsel %vm6906_vm13, %v4716_v6, %v4717_v36  ;;  %v4090_v50 = vrot.slane %v4089_v53, 4  ;;  %v4100_v36 = vshll.u32 %v3964_v60, 16  ;;  %v6040_v53 = vld [vmem:[#allocation2 + $0x3c] sm:$0xff] }
 0x1e3   : > { %v7366_v47 = vadd.f32 %v3144_v41, %v2515_v19  ;;  %v4092_v19 = vshll.u32 %v7368_v58, 16 }
 0x1e4   : > { %3849 = vmatmul.bf16.gmra.mxu2 %v6039_v35  ;;  %v4715_v35 = vsel %vm6906_vm13, %v5891_v13, %v4714_v45  ;;  %v4832_v45 = vunpack.c.l.b16 %v4718_v30  ;;  %v4097_v13 = vshrl.u32 %v3964_v60, 16  ;;  %v4102_v60 = vrot.slane %v4100_v36, 5 }
 0x1e5   : > { %4952 = vmatmul.bf16.gmra.mxu0 %v4860_v28  ;;  %v4094_v28 = vrot.slane %v4092_v19, 5  ;;  %v4831_v61 = vunpack.c.l.b16 %v4715_v35  ;;  %v4721_v35 = vrot.slane %v7352_v33, 5 }
 0x1e6   : > { %v2464_v9 = vpop.f32.mrf.mxu3  ;;  %v4099_v20 = vrot.slane %v4097_v13, 4 }
 0x1e7   : > { %v2516_v14 = vadd.f32 %v2464_v9, %v2202_v31  ;;  %v2153_v59 = vpop.f32.mrf.mxu2  ;;  %v1777_v3 = vpop.f32.mrf.mxu1  ;;  %v6149_v31 = vld [vmem:[#allocation2 + $0x40] sm:$0xf]  ;;  %v1775_v9 = vadd.f32 %v1774_v2, %v7078_v56  ;;  %v4095_v19 = vsel %vm6367_vm10, %v4090_v50, %v4094_v28  ;;  %v4106_v56 = vshll.u32 %v7379_v62, 16  ;;  %v7395_v28 = vld [vmem:[#allocation2 + $0x50] sm:$0x1] }
 0x1e8   : > { %v2203_v7 = vadd.f32 %v2153_v59, %v1773_v52  ;;  %v3305_v57 = vrot.slane %v6149_v31, 5  ;;  %v4085_v52 = vsel %vm6367_vm10, %v4080_v38, %v4084_v18  ;;  %v4110_v2 = vshrl.u32 %v7379_v62, 16 }
 0x1e9   : > { %v4861_v18 = vpack.c.b16 %v4832_v45, %v4831_v61  ;;  %v4407_v31 = vunpack.c.l.b16 %v4085_v52  ;;  %v4723_v33 = vrot.slane %v4721_v35, 4  ;;  %v4724_v45 = vrot.slane %v7368_v58, 5 }
 0x1ea   : > { %3539 = vmatmul.bf16.gmra.mxu1 %v3439_v49  ;;  %v3146_v23 = vpop.f32.mrf.mxu0  ;;  %v3307_v41 = vrot.slane %v3305_v57, 4 }
 0x1eb   : > { %4531 = vmatmul.bf16.gmra.mxu3 %v4435_v34  ;;  %v7377_v24 = vadd.f32 %v3146_v23, %v2516_v14  ;;  %v3306_v14 = vsel %vm6906_vm13, %v5669_v15, %v3305_v57  ;;  %v4408_v57 = vunpack.c.l.b16 %v4095_v19  ;;  %v4108_v15 = vrot.slane %v4106_v56, 5  ;;  %v3967_v56 = vld [vmem:[#allocation2 + $0x54] sm:$0xf] }
 0x1ec   : > { %v3309_v6 = vsel %vm6906_vm13, %v3307_v41, %v3308_v37  ;;  %v3412_v38 = vunpack.c.l.b16 %v3306_v14  ;;  %v4112_v41 = vrot.slane %v4110_v2, 4  ;;  %v1778_v37 = vadd.f32 %v1777_v3, %v7095_v5  ;;  %v6151_v3 = vld [vmem:[#allocation2 + $0x4c] sm:$0xf] }
 0x1ed   : > { %v3413_v23 = vunpack.c.l.b16 %v3309_v6  ;;  %v4436_v52 = vpack.c.b16 %v4408_v57, %v4407_v31  ;;  %v4103_v14 = vor.u32 %v4102_v60, %v4099_v20  ;;  %v4725_v19 = vsel %vm6906_vm13, %v4723_v33, %v4724_v45  ;;  %v7406_v60 = vld [vmem:[#allocation2 + $0x58] sm:$0xf] }
 0x1ee   : > { %v2467_v8 = vpop.f32.mrf.mxu3  ;;  %v4113_v36 = vor.u32 %v4112_v41, %v4108_v15 }
 0x1ef   : > { %v2517_v49 = vadd.f32 %v2467_v8, %v2203_v7  ;;  %v2155_v40 = vpop.f32.mrf.mxu2  ;;  %v1779_v34 = vpop.f32.mrf.mxu1  ;;  %v4637_v7 = vld [vmem:[#allocation2 + $0x3c] sm:$0xe]  ;;  %v3440_v8 = vpack.c.b16 %v3413_v23, %v3412_v38  ;;  %v4104_v58 = vrot.slane %v4103_v14, 4  ;;  %v3216_v38 = vld [vmem:[#allocation2 + $0x48] sm:$0xe] }
 0x1f0   : > { %v2204_v59 = vadd.f32 %v2155_v40, %v1775_v9  ;;  %v5892_v50 = vrot.slane %v4637_v7, 9  ;;  %v5670_v31 = vrot.slane %v3216_v38, 9  ;;  %v4728_v38 = vrot.slane %v7379_v62, 5 }
 0x1f2   : > { %v3149_v30 = vpop.f32.mrf.mxu0 }
 0x1f3   : > { %v7393_v0 = vadd.f32 %v3149_v30, %v2517_v49  ;;  %v4116_v49 = vshll.u32 %v7395_v28, 16  ;;  %v4834_v30 = vunpack.c.l.b16 %v4725_v19 }
 0x1f4   : > { %3854 = vmatmul.bf16.gmra.mxu2 %v6040_v53  ;;  %v4722_v53 = vsel %vm6906_vm13, %v5892_v50, %v4721_v35  ;;  %v6152_v35 = vld [vmem:[#allocation2 + $0x50] sm:$0x1]  ;;  %v1780_v50 = vadd.f32 %v1779_v34, %v7112_v4  ;;  %v4130_v4 = vshll.u32 %v7406_v60, 16  ;;  %v4134_v34 = vshrl.u32 %v7406_v60, 16 }
 0x1f5   : > { %4957 = vmatmul.bf16.gmra.mxu0 %v4861_v18  ;;  %v4833_v2 = vunpack.c.l.b16 %v4722_v53  ;;  %v4114_v18 = vrot.slane %v4113_v36, 4  ;;  %v4118_v7 = vrot.slane %v4116_v49, 5  ;;  %v3315_v20 = vrot.slane %v6152_v35, 5  ;;  %v6041_v36 = vld [vmem:[#allocation2 + $0x48] sm:$0xff] }
 0x1f6   : > { %v2469_v61 = vpop.f32.mrf.mxu3 }
 0x1f7   : > { %v2518_v9 = vadd.f32 %v2469_v61, %v2204_v59  ;;  %v2158_v13 = vpop.f32.mrf.mxu2  ;;  %v1782_v40 = vpop.f32.mrf.mxu1  ;;  %v3312_v59 = vrot.slane %v6151_v3, 5  ;;  %v4121_v61 = vshrl.u32 %v3967_v56, 16  ;;  %v4119_v49 = vsel %vm6367_vm10, %v4114_v18, %v4118_v7  ;;  %v7422_v18 = vld [vmem:[#allocation2 + $0x5c] sm:$0x1] }
 0x1f8   : > { %v2205_v6 = vadd.f32 %v2158_v13, %v1778_v37  ;;  %v4124_v37 = vshll.u32 %v3967_v56, 16  ;;  %v4638_v56 = vld [vmem:[#allocation2 + $0x48] sm:$0xe] }
 0x1f9   : > { %v3314_v57 = vrot.slane %v3312_v59, 4 }
 0x1fa   : > { %3544 = vmatmul.bf16.gmra.mxu1 %v3440_v8  ;;  %v3151_v5 = vpop.f32.mrf.mxu0  ;;  %v4109_v8 = vsel %vm6367_vm10, %v4104_v58, %v4108_v15  ;;  %v4123_v15 = vrot.slane %v4121_v61, 4 }
 0x1fb   : > { %4536 = vmatmul.bf16.gmra.mxu3 %v4436_v52  ;;  %v7404_v23 = vadd.f32 %v3151_v5, %v2518_v9  ;;  %v3313_v9 = vsel %vm6906_vm13, %v5670_v31, %v3312_v59  ;;  %v3316_v13 = vsel %vm6906_vm13, %v3314_v57, %v3315_v20  ;;  %v4126_v5 = vrot.slane %v4124_v37, 5 }
 0x1fc   : > { %v3414_v53 = vunpack.c.l.b16 %v3313_v9  ;;  %v3415_v19 = vunpack.c.l.b16 %v3316_v13  ;;  %v4409_v3 = vunpack.c.l.b16 %v4109_v8  ;;  %v4410_v59 = vunpack.c.l.b16 %v4119_v49 }
 0x1fd   : > { %v4132_v31 = vrot.slane %v4130_v4, 5  ;;  %v4136_v57 = vrot.slane %v4134_v34, 4  ;;  %v4730_v37 = vrot.slane %v4728_v38, 4  ;;  %v3970_v34 = vld [vmem:[#allocation2 + $0x60] sm:$0xf] }
 0x1fe   : > { %v2472_v41 = vpop.f32.mrf.mxu3  ;;  %v3441_v20 = vpack.c.b16 %v3415_v19, %v3414_v53  ;;  %v4437_v61 = vpack.c.b16 %v4410_v59, %v4409_v3  ;;  %v3217_v53 = vld [vmem:[#allocation2 + $0x54] sm:$0xe]  ;;  %v6154_v3 = vld [vmem:[#allocation2 + $0x5c] sm:$0x1] }
 0x1ff   : > { %v2519_v33 = vadd.f32 %v2472_v41, %v2205_v6  ;;  %v2160_v45 = vpop.f32.mrf.mxu2  ;;  %v1784_v52 = vpop.f32.mrf.mxu1  ;;  %v4862_v6 = vpack.c.b16 %v4834_v30, %v4833_v2  ;;  %v1783_v2 = vadd.f32 %v1782_v40, %v7006_v29  ;;  %v5893_v30 = vrot.slane %v4638_v56, 9  ;;  %v7433_v56 = vld [vmem:[#allocation2 + $0x64] sm:$0xf] }
 0x200   : > { %v2206_v14 = vadd.f32 %v2160_v45, %v1780_v50  ;;  %v4127_v41 = vor.u32 %v4126_v5, %v4123_v15  ;;  %v4731_v45 = vrot.slane %v7395_v28, 5  ;;  %v4137_v13 = vor.u32 %v4136_v57, %v4132_v31 }
 0x201   : > { %v5671_v5 = vrot.slane %v3217_v53, 9  ;;  %v3322_v59 = vrot.slane %v6154_v3, 5 }
 0x202   : > { %v3154_v58 = vpop.f32.mrf.mxu0  ;;  %v4128_v49 = vrot.slane %v4127_v41, 4  ;;  %v4732_v40 = vsel %vm6906_vm13, %v4730_v37, %v4731_v45  ;;  %v4138_v28 = vrot.slane %v4137_v13, 4  ;;  %v4148_v45 = vshll.u32 %v3970_v34, 16  ;;  %v6042_v13 = vld [vmem:[#allocation2 + $0x54] sm:$0xff] }
 0x203   : > { %v7420_v35 = vadd.f32 %v3154_v58, %v2519_v33  ;;  %v4140_v33 = vshll.u32 %v7422_v18, 16 }
 0x204   : > { %3859 = vmatmul.bf16.gmra.mxu2 %v6041_v36  ;;  %v4729_v36 = vsel %vm6906_vm13, %v5893_v30, %v4728_v38  ;;  %v4836_v38 = vunpack.c.l.b16 %v4732_v40  ;;  %v4145_v30 = vshrl.u32 %v3970_v34, 16  ;;  %v4150_v34 = vrot.slane %v4148_v45, 5 }
 0x205   : > { %4962 = vmatmul.bf16.gmra.mxu0 %v4862_v6  ;;  %v4142_v6 = vrot.slane %v4140_v33, 5  ;;  %v4835_v15 = vunpack.c.l.b16 %v4729_v36  ;;  %v4735_v36 = vrot.slane %v7406_v60, 5 }
 0x206   : > { %v2474_v7 = vpop.f32.mrf.mxu3  ;;  %v4147_v53 = vrot.slane %v4145_v30, 4 }
 0x207   : > { %v2520_v50 = vadd.f32 %v2474_v7, %v2206_v14  ;;  %v2163_v62 = vpop.f32.mrf.mxu2  ;;  %v1787_v8 = vpop.f32.mrf.mxu1  ;;  %v6153_v14 = vld [vmem:[#allocation2 + $0x58] sm:$0xf]  ;;  %v1785_v7 = vadd.f32 %v1784_v52, %v7025_v10  ;;  %v4143_v33 = vsel %vm6367_vm10, %v4138_v28, %v4142_v6  ;;  %v4154_v10 = vshll.u32 %v7433_v56, 16  ;;  %v7449_v6 = vld [vmem:[#allocation2 + $0x68] sm:$0x1] }
 0x208   : > { %v2207_v9 = vadd.f32 %v2163_v62, %v1783_v2  ;;  %v3319_v4 = vrot.slane %v6153_v14, 5  ;;  %v4133_v2 = vsel %vm6367_vm10, %v4128_v49, %v4132_v31  ;;  %v4158_v52 = vshrl.u32 %v7433_v56, 16 }
 0x209   : > { %v4863_v31 = vpack.c.b16 %v4836_v38, %v4835_v15  ;;  %v4411_v14 = vunpack.c.l.b16 %v4133_v2  ;;  %v4737_v60 = vrot.slane %v4735_v36, 4  ;;  %v4738_v38 = vrot.slane %v7422_v18, 5 }
 0x20a   : > { %3549 = vmatmul.bf16.gmra.mxu1 %v3441_v20  ;;  %v3156_v29 = vpop.f32.mrf.mxu0  ;;  %v3321_v58 = vrot.slane %v3319_v4, 4 }
 0x20b   : > { %4541 = vmatmul.bf16.gmra.mxu3 %v4437_v61  ;;  %v7431_v19 = vadd.f32 %v3156_v29, %v2520_v50  ;;  %v3320_v50 = vsel %vm6906_vm13, %v5671_v5, %v3319_v4  ;;  %v4412_v4 = vunpack.c.l.b16 %v4143_v33  ;;  %v4156_v5 = vrot.slane %v4154_v10, 5  ;;  %v3973_v10 = vld [vmem:[#allocation2 + $0x6c] sm:$0xf] }
 0x20c   : > { %v3323_v37 = vsel %vm6906_vm13, %v3321_v58, %v3322_v59  ;;  %v3416_v49 = vunpack.c.l.b16 %v3320_v50  ;;  %v4160_v58 = vrot.slane %v4158_v52, 4  ;;  %v1788_v59 = vadd.f32 %v1787_v8, %v7033_v46  ;;  %v6155_v8 = vld [vmem:[#allocation2 + $0x64] sm:$0xf] }
 0x20d   : > { %v3417_v29 = vunpack.c.l.b16 %v3323_v37  ;;  %v4438_v2 = vpack.c.b16 %v4412_v4, %v4411_v14  ;;  %v4151_v50 = vor.u32 %v4150_v34, %v4147_v53  ;;  %v4739_v33 = vsel %vm6906_vm13, %v4737_v60, %v4738_v38  ;;  %v7460_v34 = vld [vmem:[#allocation2 + $0x70] sm:$0xf] }
 0x20e   : > { %v2477_v57 = vpop.f32.mrf.mxu3  ;;  %v4161_v45 = vor.u32 %v4160_v58, %v4156_v5 }
 0x20f   : > { %v2521_v20 = vadd.f32 %v2477_v57, %v2207_v9  ;;  %v2165_v41 = vpop.f32.mrf.mxu2  ;;  %v1789_v61 = vpop.f32.mrf.mxu1  ;;  %v4639_v9 = vld [vmem:[#allocation2 + $0x54] sm:$0xe]  ;;  %v3442_v57 = vpack.c.b16 %v3417_v29, %v3416_v49  ;;  %v4152_v18 = vrot.slane %v4151_v50, 4  ;;  %v3218_v49 = vld [vmem:[#allocation2 + $0x60] sm:$0xe] }
 0x210   : > { %v2208_v62 = vadd.f32 %v2165_v41, %v1785_v7  ;;  %v5894_v28 = vrot.slane %v4639_v9, 9  ;;  %v5672_v14 = vrot.slane %v3218_v49, 9  ;;  %v4742_v49 = vrot.slane %v7433_v56, 5 }
 0x212   : > { %v3159_v40 = vpop.f32.mrf.mxu0 }
 0x213   : > { %v7447_v3 = vadd.f32 %v3159_v40, %v2521_v20  ;;  %v4164_v20 = vshll.u32 %v7449_v6, 16  ;;  %v4838_v40 = vunpack.c.l.b16 %v4739_v33 }
 0x214   : > { %3864 = vmatmul.bf16.gmra.mxu2 %v6042_v13  ;;  %v4736_v13 = vsel %vm6906_vm13, %v5894_v28, %v4735_v36  ;;  %v6156_v36 = vld [vmem:[#allocation2 + $0x68] sm:$0x1]  ;;  %v1790_v28 = vadd.f32 %v1789_v61, %v7058_v11  ;;  %v4178_v11 = vshll.u32 %v7460_v34, 16  ;;  %v4182_v61 = vshrl.u32 %v7460_v34, 16 }
 0x215   : > { %4967 = vmatmul.bf16.gmra.mxu0 %v4863_v31  ;;  %v4837_v52 = vunpack.c.l.b16 %v4736_v13  ;;  %v4162_v31 = vrot.slane %v4161_v45, 4  ;;  %v4166_v9 = vrot.slane %v4164_v20, 5  ;;  %v3329_v53 = vrot.slane %v6156_v36, 5  ;;  %v6043_v45 = vld [vmem:[#allocation2 + $0x60] sm:$0xff] }
 0x216   : > { %v2479_v15 = vpop.f32.mrf.mxu3 }
 0x217   : > { %v2522_v7 = vadd.f32 %v2479_v15, %v2208_v62  ;;  %v2168_v30 = vpop.f32.mrf.mxu2  ;;  %v1792_v41 = vpop.f32.mrf.mxu1  ;;  %v3326_v62 = vrot.slane %v6155_v8, 5  ;;  %v4169_v15 = vshrl.u32 %v3973_v10, 16  ;;  %v4167_v20 = vsel %vm6367_vm10, %v4162_v31, %v4166_v9  ;;  %v7476_v31 = vld [vmem:[#allocation2 + $0x74] sm:$0x1] }
 0x218   : > { %v2209_v37 = vadd.f32 %v2168_v30, %v1788_v59  ;;  %v4172_v59 = vshll.u32 %v3973_v10, 16  ;;  %v4640_v10 = vld [vmem:[#allocation2 + $0x60] sm:$0xe] }
 0x219   : > { %v3328_v4 = vrot.slane %v3326_v62, 4 }
 0x21a   : > { %3554 = vmatmul.bf16.gmra.mxu1 %v3442_v57  ;;  %v3161_v46 = vpop.f32.mrf.mxu0  ;;  %v4157_v57 = vsel %vm6367_vm10, %v4152_v18, %v4156_v5  ;;  %v4171_v5 = vrot.slane %v4169_v15, 4 }
 0x21b   : > { %4546 = vmatmul.bf16.gmra.mxu3 %v4438_v2  ;;  %v7458_v29 = vadd.f32 %v3161_v46, %v2522_v7  ;;  %v3327_v7 = vsel %vm6906_vm13, %v5672_v14, %v3326_v62  ;;  %v3330_v30 = vsel %vm6906_vm13, %v3328_v4, %v3329_v53  ;;  %v4174_v46 = vrot.slane %v4172_v59, 5 }
 0x21c   : > { %v3418_v13 = vunpack.c.l.b16 %v3327_v7  ;;  %v3419_v33 = vunpack.c.l.b16 %v3330_v30  ;;  %v4413_v8 = vunpack.c.l.b16 %v4157_v57  ;;  %v4414_v62 = vunpack.c.l.b16 %v4167_v20 }
 0x21d   : > { %v4180_v14 = vrot.slane %v4178_v11, 5  ;;  %v4184_v4 = vrot.slane %v4182_v61, 4  ;;  %v4744_v59 = vrot.slane %v4742_v49, 4  ;;  %v3976_v61 = vld [vmem:[#allocation2 + $0x78] sm:$0xf] }
 0x21e   : > { %v2482_v58 = vpop.f32.mrf.mxu3  ;;  %v3443_v53 = vpack.c.b16 %v3419_v33, %v3418_v13  ;;  %v4439_v15 = vpack.c.b16 %v4414_v62, %v4413_v8  ;;  %v3219_v13 = vld [vmem:[#allocation2 + $0x6c] sm:$0xe]  ;;  %v6158_v8 = vld [vmem:[#allocation2 + $0x74] sm:$0x1] }
 0x21f   : > { %v2523_v60 = vadd.f32 %v2482_v58, %v2209_v37  ;;  %v2170_v38 = vpop.f32.mrf.mxu2  ;;  %v1794_v2 = vpop.f32.mrf.mxu1  ;;  %v4864_v37 = vpack.c.b16 %v4838_v40, %v4837_v52  ;;  %v1793_v52 = vadd.f32 %v1792_v41, %v7076_v22  ;;  %v5895_v40 = vrot.slane %v4640_v10, 9  ;;  %v7487_v10 = vld [vmem:[#allocation2 + $0x7c] sm:$0xf] }
 0x220   : > { %v2210_v50 = vadd.f32 %v2170_v38, %v1790_v28  ;;  %v4175_v58 = vor.u32 %v4174_v46, %v4171_v5  ;;  %v4745_v38 = vrot.slane %v7449_v6, 5  ;;  %v4185_v30 = vor.u32 %v4184_v4, %v4180_v14 }
 0x221   : > { %v5673_v46 = vrot.slane %v3219_v13, 9  ;;  %v3336_v62 = vrot.slane %v6158_v8, 5 }
 0x222   : > { %v3164_v18 = vpop.f32.mrf.mxu0  ;;  %v4176_v20 = vrot.slane %v4175_v58, 4  ;;  %v4746_v41 = vsel %vm6906_vm13, %v4744_v59, %v4745_v38  ;;  %v4186_v6 = vrot.slane %v4185_v30, 4 }
 0x223   : > { %v7474_v36 = vadd.f32 %v3164_v18, %v2523_v60  ;;  %v4188_v60 = vshll.u32 %v7476_v31, 16 }
 0x224   : > { %3869 = vmatmul.bf16.gmra.mxu2 %v6043_v45  ;;  %v4743_v45 = vsel %vm6906_vm13, %v5895_v40, %v4742_v49  ;;  %v4840_v49 = vunpack.c.l.b16 %v4746_v41  ;;  %v4181_v40 = vsel %vm6367_vm10, %v4176_v20, %v4180_v14  ;;  %v4206_v14 = vshrl.u32 %v7487_v10, 16 }
 0x225   : > { %4972 = vmatmul.bf16.gmra.mxu0 %v4864_v37  ;;  %v4190_v37 = vrot.slane %v4188_v60, 5  ;;  %v4839_v5 = vunpack.c.l.b16 %v4743_v45  ;;  %v6044_v60 = vld [vmem:[#allocation2 + $0x6c] sm:$0xff]  ;;  %v4415_v13 = vunpack.c.l.b16 %v4181_v40 }
 0x226   : > { %v2484_v9 = vpop.f32.mrf.mxu3 }
 0x227   : > { %v2524_v28 = vadd.f32 %v2484_v9, %v2210_v50  ;;  %v2173_v56 = vpop.f32.mrf.mxu2  ;;  %v1797_v57 = vpop.f32.mrf.mxu1  ;;  %v6157_v50 = vld [vmem:[#allocation2 + $0x70] sm:$0xf]  ;;  %v7842_v9 = vld [vmem:[#allocation3_spill] sm:$0xff]  ;;  %v4191_v45 = vsel %vm6367_vm10, %v4186_v6, %v4190_v37  ;;  %v4865_v20 = vpack.c.b16 %v4840_v49, %v4839_v5  ;;  %v7503_v37 = vld [vmem:[#allocation2 + $0x80] sm:$0x1] }
 0x228   : > { %v2211_v7 = vadd.f32 %v2173_v56, %v1793_v52  ;;  %v3333_v11 = vrot.slane %v6157_v50, 5  ;;  %v1795_v52 = vadd.f32 %v1794_v2, %v7842_v9  ;;  %v4196_v56 = vshll.u32 %v3976_v61, 16  ;;  %v7843_v49 = vld [vmem:[#allocation4_spill] sm:$0xff] }
 0x229   : > { %v4202_v2 = vshll.u32 %v7487_v10, 16  ;;  %v1798_v9 = vadd.f32 %v1797_v57, %v7843_v49 }
 0x22a   : > { %3559 = vmatmul.bf16.gmra.mxu1 %v3443_v53  ;;  %v3166_v22 = vpop.f32.mrf.mxu0  ;;  %v3335_v18 = vrot.slane %v3333_v11, 4  ;;  %v4193_v53 = vshrl.u32 %v3976_v61, 16  ;;  %v4198_v61 = vrot.slane %v4196_v56, 5 }
 0x22b   : > { %4551 = vmatmul.bf16.gmra.mxu3 %v4439_v15  ;;  %v7485_v33 = vadd.f32 %v3166_v22, %v2524_v28  ;;  %v3334_v28 = vsel %vm6906_vm13, %v5673_v46, %v3333_v11  ;;  %v4749_v22 = vrot.slane %v7460_v34, 5  ;;  %v4416_v46 = vunpack.c.l.b16 %v4191_v45 }
 0x22c   : > { %v3337_v38 = vsel %vm6906_vm13, %v3335_v18, %v3336_v62  ;;  %v3420_v41 = vunpack.c.l.b16 %v3334_v28  ;;  %v4195_v18 = vrot.slane %v4193_v53, 4  ;;  %v4204_v8 = vrot.slane %v4202_v2, 5 }
 0x22d   : > { %v3421_v50 = vunpack.c.l.b16 %v3337_v38  ;;  %v4208_v62 = vrot.slane %v4206_v14, 4  ;;  %v4751_v34 = vrot.slane %v4749_v22, 4  ;;  %v4440_v28 = vpack.c.b16 %v4416_v46, %v4415_v13  ;;  %v3220_v13 = vld [vmem:[#allocation2 + $0x78] sm:$0xe] }
 0x22e   : > { %v2487_v4 = vpop.f32.mrf.mxu3  ;;  %v4199_v56 = vor.u32 %v4198_v61, %v4195_v18  ;;  %v4212_v45 = vshll.u32 %v7503_v37, 16  ;;  %v5674_v61 = vrot.slane %v3220_v13, 9 }
 0x22f   : > { %v2525_v58 = vadd.f32 %v2487_v4, %v2211_v7  ;;  %v2175_v15 = vpop.f32.mrf.mxu2  ;;  %v1799_v59 = vpop.f32.mrf.mxu1  ;;  %v4641_v7 = vld [vmem:[#allocation2 + $0x6c] sm:$0xe] }
 0x230   : > { %v2212_v30 = vadd.f32 %v2175_v15, %v1795_v52  ;;  %v5896_v6 = vrot.slane %v4641_v7, 9  ;;  %v4752_v52 = vrot.slane %v7476_v31, 5  ;;  %v3444_v15 = vpack.c.b16 %v3421_v50, %v3420_v41  ;;  %v3979_v7 = vld [vmem:[#allocation2 + $0x84] sm:$0xf] }
 0x231   : > { %v4200_v31 = vrot.slane %v4199_v56, 4 }
 0x232   : > { %v3169_v11 = vpop.f32.mrf.mxu0  ;;  %v4750_v2 = vsel %vm6906_vm13, %v5896_v6, %v4749_v22  ;;  %v4753_v57 = vsel %vm6906_vm13, %v4751_v34, %v4752_v52  ;;  %v6160_v22 = vld [vmem:[#allocation2 + $0x80] sm:$0x1]  ;;  %v4217_v52 = vshrl.u32 %v3979_v7, 16 }
 0x233   : > { %v7501_v4 = vadd.f32 %v3169_v11, %v2525_v58  ;;  %v4209_v58 = vor.u32 %v4208_v62, %v4204_v8  ;;  %v4841_v41 = vunpack.c.l.b16 %v4750_v2  ;;  %v4214_v11 = vrot.slane %v4212_v45, 5 }
 0x234   : > { %3874 = vmatmul.bf16.gmra.mxu2 %v6044_v60  ;;  %v4842_v18 = vunpack.c.l.b16 %v4753_v57  ;;  %v3343_v6 = vrot.slane %v6160_v22, 5  ;;  %v4205_v56 = vsel %vm6367_vm10, %v4200_v31, %v4204_v8  ;;  %v6045_v57 = vld [vmem:[#allocation2 + $0x78] sm:$0xff]  ;;  %v4756_v8 = vrot.slane %v7487_v10, 5 }
 0x235   : > { %4977 = vmatmul.bf16.gmra.mxu0 %v4865_v20  ;;  %v4210_v50 = vrot.slane %v4209_v58, 4  ;;  %v4219_v22 = vrot.slane %v4217_v52, 4  ;;  %v4759_v10 = vrot.slane %v7503_v37, 5 }
 0x236   : > { %v2489_v5 = vpop.f32.mrf.mxu3 }
 0x237   : > { %v2526_v40 = vadd.f32 %v2489_v5, %v2212_v30  ;;  %v2178_v53 = vpop.f32.mrf.mxu2  ;;  %v7507_v38 = vpop.f32.mrf.mxu1  ;;  %v6159_v30 = vld [vmem:[#allocation2 + $0x7c] sm:$0xf]  ;;  %v7516_v5 = vld [vmem:[#allocation2 + $0x88] sm:$0xf] }
 0x238   : > { %v2213_v60 = vadd.f32 %v2178_v53, %v1798_v9  ;;  %v3340_v20 = vrot.slane %v6159_v30, 5  ;;  %v7845_v9 = vld [vmem:[#allocation5_spill] sm:$0xff]  ;;  %v4866_v30 = vpack.c.b16 %v4842_v18, %v4841_v41  ;;  %v4758_v18 = vrot.slane %v4756_v8, 4 }
 0x239   : > { %v1800_v34 = vadd.f32 %v1799_v59, %v7845_v9  ;;  %v4215_v59 = vsel %vm6367_vm10, %v4210_v50, %v4214_v11  ;;  %v7534_v11 = vld [vmem:[#allocation2 + $0x8c] sm:$0x1] }
 0x23a   : > { %3564 = vmatmul.bf16.gmra.mxu1 %v3444_v15  ;;  %v3171_v14 = vpop.f32.mrf.mxu0  ;;  %v3342_v62 = vrot.slane %v3340_v20, 4  ;;  %v4220_v15 = vshll.u32 %v3979_v7, 16  ;;  %v4642_v7 = vld [vmem:[#allocation2 + $0x78] sm:$0xe] }
 0x23b   : > { %4556 = vmatmul.bf16.gmra.mxu3 %v4440_v28  ;;  %v7514_v46 = vadd.f32 %v3171_v14, %v2526_v40  ;;  %v3341_v40 = vsel %vm6906_vm13, %v5674_v61, %v3340_v20  ;;  %v4226_v14 = vshll.u32 %v7516_v5, 16 }
 0x23c   : > { %v3344_v45 = vsel %vm6906_vm13, %v3342_v62, %v3343_v6  ;;  %v3422_v31 = vunpack.c.l.b16 %v3341_v40  ;;  %v4222_v20 = vrot.slane %v4220_v15, 5  ;;  %v4418_v62 = vunpack.c.l.b16 %v4215_v59 }
 0x23d   : > { %7844 = vst [vmem:[#allocation3_spill] sm:$0xff] %v7514_v46  ;;  %v3423_v13 = vunpack.c.l.b16 %v3344_v45  ;;  %v5897_v6 = vrot.slane %v4642_v7, 9  ;;  %v4228_v9 = vrot.slane %v4226_v14, 5  ;;  %v3605_v14 = vadd.f32 %v7507_v38, %v7133_v54  ;;  %v6161_v7 = vld [vmem:[#allocation2 + $0x88] sm:$0xf] }
 0x23e   : > { %v2492_v49 = vpop.f32.mrf.mxu3  ;;  %v4223_v40 = vor.u32 %v4222_v20, %v4219_v22 }
 0x23f   : > { %v2527_v28 = vadd.f32 %v2492_v49, %v2213_v60  ;;  %v2180_v53 = vpop.f32.mrf.mxu2  ;;  %v7521_v58 = vpop.f32.mrf.mxu1  ;;  %v4230_v60 = vshrl.u32 %v7516_v5, 16  ;;  %v4417_v49 = vunpack.c.l.b16 %v4205_v56 }
 0x240   : > { %v2214_v2 = vadd.f32 %v2180_v53, %v1800_v34  ;;  %v3445_v53 = vpack.c.b16 %v3423_v13, %v3422_v31  ;;  %v4224_v37 = vrot.slane %v4223_v40, 4  ;;  %v3347_v31 = vrot.slane %v6161_v7, 5  ;;  %v3982_v13 = vld [vmem:[#allocation2 + $0x90] sm:$0xf] }
 0x241   : > { %v4232_v34 = vrot.slane %v4230_v60, 4  ;;  %v4441_v15 = vpack.c.b16 %v4418_v62, %v4417_v49  ;;  %v4760_v60 = vsel %vm6906_vm13, %v4758_v18, %v4759_v10  ;;  %v7546_v49 = vld [vmem:[#allocation2 + $0x94] sm:$0xf]  ;;  %v4244_v40 = vshll.u32 %v3982_v13, 16 }
 0x242   : > { %v3174_v61 = vpop.f32.mrf.mxu0  ;;  %v4844_v54 = vunpack.c.l.b16 %v4760_v60  ;;  %v4229_v10 = vsel %vm6367_vm10, %v4224_v37, %v4228_v9  ;;  %v6046_v60 = vld [vmem:[#allocation2 + $0x84] sm:$0xff]  ;;  %v3606_v7 = vadd.f32 %v7521_v58, %v7154_v17 }
 0x243   : > { %v7532_v50 = vadd.f32 %v3174_v61, %v2527_v28  ;;  %v4233_v59 = vor.u32 %v4232_v34, %v4228_v9  ;;  %v4236_v28 = vshll.u32 %v7534_v11, 16  ;;  %v3221_v61 = vld [vmem:[#allocation2 + $0x84] sm:$0xe]  ;;  %v6162_v34 = vld [vmem:[#allocation2 + $0x8c] sm:$0x1] }
 0x244   : > { %3879 = vmatmul.bf16.gmra.mxu2 %v6045_v57  ;;  %v4757_v57 = vsel %vm6906_vm13, %v5897_v6, %v4756_v8  ;;  %v5675_v38 = vrot.slane %v3221_v61, 9  ;;  %v3349_v6 = vrot.slane %v3347_v31, 4  ;;  %v4643_v37 = vld [vmem:[#allocation2 + $0x84] sm:$0xe] }
 0x245   : > { %7846 = vst [vmem:[#allocation4_spill] sm:$0xff] %v7532_v50  ;;  %4982 = vmatmul.bf16.gmra.mxu0 %v4866_v30  ;;  %v4234_v20 = vrot.slane %v4233_v59, 4  ;;  %v4238_v8 = vrot.slane %v4236_v28, 5  ;;  %v4250_v59 = vshll.u32 %v7546_v49, 16  ;;  %v4254_v28 = vshrl.u32 %v7546_v49, 16 }
 0x246   : > { %v2494_v41 = vpop.f32.mrf.mxu3 }
 0x247   : > { %v2528_v52 = vadd.f32 %v2494_v41, %v2214_v2  ;;  %v3840_v45 = vpop.f32.mrf.mxu2  ;;  %v7537_v56 = vpop.f32.mrf.mxu1  ;;  %v4843_v2 = vunpack.c.l.b16 %v4757_v57  ;;  %v3350_v41 = vrot.slane %v6162_v34, 5  ;;  %v3348_v57 = vsel %vm6906_vm13, %v5675_v38, %v3347_v31 }
 0x248   : > { %v3920_v22 = vadd.f32 %v3840_v45, %v3605_v14  ;;  %v4239_v9 = vsel %vm6367_vm10, %v4234_v20, %v4238_v8  ;;  %v4763_v31 = vrot.slane %v7516_v5, 5  ;;  %v3424_v61 = vunpack.c.l.b16 %v3348_v57  ;;  %v7574_v5 = vld [vmem:[#allocation2 + $0x98] sm:$0x1] }
 0x249   : > { %v4246_v34 = vrot.slane %v4244_v40, 5  ;;  %v7572_v20 = vrot.slane %v4250_v59, 5  ;;  %v4256_v17 = vrot.slane %v4254_v28, 4  ;;  %v4260_v28 = vshll.u32 %v7574_v5, 16 }
 0x24a   : > { %3569 = vmatmul.bf16.gmra.mxu1 %v3445_v53  ;;  %v3176_v30 = vpop.f32.mrf.mxu0  ;;  %v4241_v53 = vshrl.u32 %v3982_v13, 16  ;;  %v4419_v13 = vunpack.c.l.b16 %v4229_v10  ;;  %v4766_v10 = vrot.slane %v7534_v11, 5  ;;  %v3607_v11 = vadd.f32 %v7537_v56, %v7158_v21 }
 0x24b   : > { %4561 = vmatmul.bf16.gmra.mxu3 %v4441_v15  ;;  %v7548_v62 = vadd.f32 %v3176_v30, %v2528_v52  ;;  %v3351_v52 = vsel %vm6906_vm13, %v3349_v6, %v3350_v41  ;;  %v4867_v30 = vpack.c.b16 %v4844_v54, %v4843_v2  ;;  %v5898_v2 = vrot.slane %v4643_v37, 9  ;;  %v7584_v37 = vld [vmem:[#allocation2 + $0xa0] sm:$0xf] }
 0x24c   : > { %v3425_v38 = vunpack.c.l.b16 %v3351_v52  ;;  %v4243_v6 = vrot.slane %v4241_v53, 4  ;;  %v4274_v21 = vshll.u32 %v7584_v37, 16 }
 0x24d   : > { %7847 = vst [vmem:[#allocation5_spill] sm:$0xff] %v7548_v62  ;;  %v4764_v52 = vsel %vm6906_vm13, %v5898_v2, %v4763_v31 }
 0x24e   : > { %v4522_v18 = vpop.f32.mrf.mxu3  ;;  %v3446_v53 = vpack.c.b16 %v3425_v38, %v3424_v61  ;;  %v4247_v40 = vor.u32 %v4246_v34, %v4243_v6  ;;  %v4262_v38 = vrot.slane %v4260_v28, 5  ;;  %v6163_v6 = vld [vmem:[#allocation2 + $0x94] sm:$0xf]  ;;  %v7605_v50 = vrot.slane %v4274_v21, 5 }
 0x24f   : > { %v3842_v15 = vpop.f32.mrf.mxu2  ;;  %v7552_v45 = vpop.f32.mrf.mxu1  ;;  %v4602_v14 = vadd.f32 %v4522_v18, %v3920_v22  ;;  %v4420_v22 = vunpack.c.l.b16 %v4239_v9  ;;  %v4765_v18 = vrot.slane %v4763_v31, 4  ;;  %v3354_v34 = vrot.slane %v6163_v6, 5 }
 0x250   : > { %v3921_v8 = vadd.f32 %v3842_v15, %v3606_v7  ;;  %v4257_v15 = vor.u32 %v4256_v17, %v7572_v20  ;;  %v4845_v7 = vunpack.c.l.b16 %v4764_v52  ;;  %v3222_v17 = vld [vmem:[#allocation2 + $0x90] sm:$0xe] }
 0x251   : > { %v4442_v57 = vpack.c.b16 %v4420_v22, %v4419_v13  ;;  %v4248_v13 = vrot.slane %v4247_v40, 4  ;;  %v5676_v56 = vrot.slane %v3222_v17, 9 }
 0x252   : > { %v4948_v41 = vpop.f32.mrf.mxu0  ;;  %v4258_v61 = vrot.slane %v4257_v15, 4 }
 0x253   : > { %v5028_v58 = vadd.f32 %v4948_v41, %v4602_v14 }
 0x254   : > { %3884 = vmatmul.bf16.gmra.mxu2 %v6046_v60  ;;  %v3985_v60 = vld [vmem:[#allocation2 + $0x9c] sm:$0xf] }
 0x255   : > { %4987 = vmatmul.bf16.gmra.mxu0 %v4867_v30  ;;  %5060 = vst [vmem:[%s7570_s9] sm:$0xff] %v5028_v58  ;;  %v4767_v30 = vsel %vm6906_vm13, %v4765_v18, %v4766_v10  ;;  %v4265_v41 = vshrl.u32 %v3985_v60, 16  ;;  %v6164_v18 = vld [vmem:[#allocation2 + $0x98] sm:$0x1]  ;;  %v5130_v40 = vmul.f32 %v5028_v58, %v5028_v58 }
 0x256   : > { %v4524_v54 = vpop.f32.mrf.mxu3  ;;  %v3357_v10 = vrot.slane %v6164_v18, 5  ;;  %v4846_v15 = vunpack.c.l.b16 %v4767_v30  ;;  %v6047_v18 = vld [vmem:[#allocation2 + $0x90] sm:$0xff]  ;;  %v4263_v30 = vsel %vm6367_vm10, %v4258_v61, %v4262_v38 }
 0x257   : > { %v3845_v59 = vpop.f32.mrf.mxu2  ;;  %v7580_v9 = vpop.f32.mrf.mxu1  ;;  %v4603_v14 = vadd.f32 %v4524_v54, %v3921_v8  ;;  %v4268_v8 = vshll.u32 %v3985_v60, 16  ;;  %v3356_v54 = vrot.slane %v3354_v34, 4  ;;  %v3355_v60 = vsel %vm6906_vm13, %v5676_v56, %v3354_v34 }
 0x258   : > { %v3922_v2 = vadd.f32 %v3845_v59, %v3607_v11  ;;  %v4868_v34 = vpack.c.b16 %v4846_v15, %v4845_v7  ;;  %v3608_v56 = vadd.f32 %v7552_v45, %v7169_v51 }
 0x259   : > { %v3358_v11 = vsel %vm6906_vm13, %v3356_v54, %v3357_v10  ;;  %v4270_v62 = vrot.slane %v4268_v8, 5  ;;  %v4773_v8 = vrot.slane %v7574_v5, 5 }
 0x25a   : > { %3574 = vmatmul.bf16.gmra.mxu1 %v3446_v53  ;;  %v4950_v31 = vpop.f32.mrf.mxu0  ;;  %v4278_v53 = vshrl.u32 %v7584_v37, 16  ;;  %v3427_v54 = vunpack.c.l.b16 %v3358_v11 }
 0x25b   : > { %4566 = vmatmul.bf16.gmra.mxu3 %v4442_v57  ;;  %v5029_v22 = vadd.f32 %v4950_v31, %v4603_v14  ;;  %v4770_v14 = vrot.slane %v7546_v49, 5  ;;  %v4267_v49 = vrot.slane %v4265_v41, 4 }
 0x25c   : > { %v4280_v46 = vrot.slane %v4278_v53, 4 }
 0x25d   : > { %5061 = vst [vmem:[%s7570_s9 + $0x8] sm:$0xff] %v5029_v22  ;;  %v5092_v57 = vadd.f32 %v5029_v22, %v5028_v58  ;;  %v5131_v52 = vmul.f32 %v5029_v22, %v5029_v22  ;;  %v4253_v58 = vsel %vm6367_vm10, %v4248_v13, %v7572_v20  ;;  %v4644_v22 = vld [vmem:[#allocation2 + $0x90] sm:$0xe]  ;;  %v7609_v20 = vld [vmem:[#allocation2 + $0xa4] sm:$0x1]  ;;  %v4772_v41 = vrot.slane %v4770_v14, 4 }
 0x25e   : > { %v4527_v28 = vpop.f32.mrf.mxu3  ;;  %v5899_v38 = vrot.slane %v4644_v22, 9  ;;  %v4271_v21 = vor.u32 %v4270_v62, %v4267_v49  ;;  %v4281_v7 = vor.u32 %v4280_v46, %v7605_v50  ;;  %v6165_v49 = vld [vmem:[#allocation2 + $0xa0] sm:$0xf] }
 0x25f   : > { %v3847_v6 = vpop.f32.mrf.mxu2  ;;  %v7594_v59 = vpop.f32.mrf.mxu1  ;;  %v5162_v31 = vadd.f32 %v5131_v52, %v5130_v40  ;;  %v4604_v17 = vadd.f32 %v4527_v28, %v3922_v2  ;;  %v3426_v2 = vunpack.c.l.b16 %v3355_v60  ;;  %v4421_v40 = vunpack.c.l.b16 %v4253_v58 }
 0x260   : > { %v4422_v52 = vunpack.c.l.b16 %v4263_v30  ;;  %v3923_v61 = vadd.f32 %v3847_v6, %v3608_v56  ;;  %v4284_v28 = vshll.u32 %v7609_v20, 16  ;;  %v4771_v5 = vsel %vm6906_vm13, %v5899_v38, %v4770_v14  ;;  %v3223_v14 = vld [vmem:[#allocation2 + $0x9c] sm:$0xe] }
 0x261   : > { %v3447_v15 = vpack.c.b16 %v3427_v54, %v3426_v2  ;;  %v4774_v46 = vsel %vm6906_vm13, %v4772_v41, %v4773_v8  ;;  %v4272_v62 = vrot.slane %v4271_v21, 4  ;;  %v4282_v58 = vrot.slane %v4281_v7, 4 }
 0x262   : > { %v4953_v10 = vpop.f32.mrf.mxu0  ;;  %v4443_v60 = vpack.c.b16 %v4422_v52, %v4421_v40  ;;  %v4286_v30 = vrot.slane %v4284_v28, 5  ;;  %v4847_v56 = vunpack.c.l.b16 %v4771_v5  ;;  %v4848_v2 = vunpack.c.l.b16 %v4774_v46  ;;  %v6048_v5 = vld [vmem:[#allocation2 + $0x9c] sm:$0xff] }
 0x263   : > { %v5030_v13 = vadd.f32 %v4953_v10, %v4604_v17  ;;  %v3988_v10 = vld [vmem:[#allocation2 + $0xa8] sm:$0xf]  ;;  %v4277_v40 = vsel %vm6367_vm10, %v4272_v62, %v7605_v50  ;;  %v5677_v52 = vrot.slane %v3223_v14, 9  ;;  %v4777_v7 = vrot.slane %v7584_v37, 5 }
 0x264   : > { %3889 = vmatmul.bf16.gmra.mxu2 %v6047_v18  ;;  %v4287_v21 = vsel %vm6367_vm10, %v4282_v58, %v4286_v30  ;;  %v4869_v37 = vpack.c.b16 %v4848_v2, %v4847_v56  ;;  %v4423_v58 = vunpack.c.l.b16 %v4277_v40 }
 0x265   : > { %4992 = vmatmul.bf16.gmra.mxu0 %v4868_v34  ;;  %5062 = vst [vmem:[%s7570_s9 + $0x10] sm:$0xff] %v5030_v13  ;;  %v5093_v51 = vadd.f32 %v5092_v57, %v5030_v13  ;;  %v5132_v45 = vmul.f32 %v5030_v13, %v5030_v13  ;;  %v3609_v57 = vadd.f32 %v7580_v9, %v7175_v43  ;;  %v3361_v34 = vrot.slane %v6165_v49, 5  ;;  %v6166_v9 = vld [vmem:[#allocation2 + $0xa4] sm:$0x1] }
 0x266   : > { %v4529_v53 = vpop.f32.mrf.mxu3  ;;  %v3364_v13 = vrot.slane %v6166_v9, 5  ;;  %v4424_v30 = vunpack.c.l.b16 %v4287_v21  ;;  %v4779_v14 = vrot.slane %v4777_v7, 4  ;;  %v7643_v9 = vld [vmem:[#allocation2 + $0xb0] sm:$0x1] }
 0x267   : > { %v3850_v11 = vpop.f32.mrf.mxu2  ;;  %v7615_v17 = vpop.f32.mrf.mxu1  ;;  %v5163_v6 = vadd.f32 %v5162_v31, %v5132_v45  ;;  %v4605_v18 = vadd.f32 %v4529_v53, %v3923_v61  ;;  %v3363_v43 = vrot.slane %v3361_v34, 4  ;;  %v7626_v61 = vld [vmem:[#allocation2 + $0xac] sm:$0xf]  ;;  %v4645_v53 = vld [vmem:[#allocation2 + $0x9c] sm:$0xe]  ;;  %v3362_v50 = vsel %vm6906_vm13, %v5677_v52, %v3361_v34 }
 0x268   : > { %v3924_v54 = vadd.f32 %v3850_v11, %v3609_v57  ;;  %v4292_v11 = vshll.u32 %v3988_v10, 16  ;;  %v4298_v46 = vshll.u32 %v7626_v61, 16  ;;  %v4302_v62 = vshrl.u32 %v7626_v61, 16 }
 0x269   : > { %v3365_v28 = vsel %vm6906_vm13, %v3363_v43, %v3364_v13  ;;  %v3610_v57 = vadd.f32 %v7594_v59, %v7194_v1  ;;  %v3428_v49 = vunpack.c.l.b16 %v3362_v50 }
 0x26a   : > { %3579 = vmatmul.bf16.gmra.mxu1 %v3447_v15  ;;  %v4955_v22 = vpop.f32.mrf.mxu0  ;;  %v3429_v34 = vunpack.c.l.b16 %v3365_v28  ;;  %v7645_v56 = vrot.slane %v4298_v46, 5  ;;  %v4304_v1 = vrot.slane %v4302_v62, 4 }
 0x26b   : > { %4571 = vmatmul.bf16.gmra.mxu3 %v4443_v60  ;;  %v5031_v31 = vadd.f32 %v4955_v22, %v4605_v18  ;;  %v4289_v60 = vshrl.u32 %v3988_v10, 16  ;;  %v5900_v22 = vrot.slane %v4645_v53, 9  ;;  %v4294_v10 = vrot.slane %v4292_v11, 5  ;;  %v3991_v11 = vld [vmem:[#allocation2 + $0xb4] sm:$0xf] }
 0x26c   : > { %v3448_v13 = vpack.c.b16 %v3429_v34, %v3428_v49  ;;  %v4308_v53 = vshll.u32 %v7643_v9, 16  ;;  %v3224_v34 = vld [vmem:[#allocation2 + $0xa8] sm:$0xe] }
 0x26d   : > { %5063 = vst [vmem:[%s7570_s9 + $0x18] sm:$0xff] %v5031_v31  ;;  %v5094_v38 = vadd.f32 %v5093_v51, %v5031_v31  ;;  %v5133_v41 = vmul.f32 %v5031_v31, %v5031_v31 }
 0x26e   : > { %v4532_v8 = vpop.f32.mrf.mxu3 }
 0x26f   : > { %v3852_v45 = vpop.f32.mrf.mxu2  ;;  %v7632_v15 = vpop.f32.mrf.mxu1  ;;  %v5164_v51 = vadd.f32 %v5163_v6, %v5133_v41  ;;  %v4606_v18 = vadd.f32 %v4532_v8, %v3924_v54  ;;  %v4780_v6 = vrot.slane %v7609_v20, 5  ;;  %v4291_v54 = vrot.slane %v4289_v60, 4 }
 0x270   : > { %v3925_v43 = vadd.f32 %v3852_v45, %v3610_v57  ;;  %v4444_v41 = vpack.c.b16 %v4424_v30, %v4423_v58  ;;  %v4778_v20 = vsel %vm6906_vm13, %v5900_v22, %v4777_v7  ;;  %v4310_v57 = vrot.slane %v4308_v53, 5  ;;  %v6167_v58 = vld [vmem:[#allocation2 + $0xac] sm:$0xf] }
 0x271   : > { %v4295_v45 = vor.u32 %v4294_v10, %v4291_v54  ;;  %v4781_v60 = vsel %vm6906_vm13, %v4779_v14, %v4780_v6  ;;  %v4849_v46 = vunpack.c.l.b16 %v4778_v20  ;;  %v4313_v14 = vshrl.u32 %v3991_v11, 16 }
 0x272   : > { %v4958_v31 = vpop.f32.mrf.mxu0  ;;  %v4850_v62 = vunpack.c.l.b16 %v4781_v60  ;;  %v5678_v6 = vrot.slane %v3224_v34, 9  ;;  %v6049_v60 = vld [vmem:[#allocation2 + $0xa8] sm:$0xff] }
 0x273   : > { %v5032_v52 = vadd.f32 %v4958_v31, %v4606_v18  ;;  %v7848_v18 = vld [vmem:[#allocation6_spill] sm:$0xff]  ;;  %v7658_v31 = vld [vmem:[#allocation2 + $0xb8] sm:$0xf] }
 0x274   : > { %3894 = vmatmul.bf16.gmra.mxu2 %v6048_v5  ;;  %v3611_v5 = vadd.f32 %v7615_v17, %v7848_v18  ;;  %v6168_v17 = vld [vmem:[#allocation2 + $0xb0] sm:$0x1]  ;;  %v4315_v18 = vrot.slane %v4313_v14, 4 }
 0x275   : > { %4997 = vmatmul.bf16.gmra.mxu0 %v4869_v37  ;;  %5064 = vst [vmem:[%s7570_s9 + $0x20] sm:$0xff] %v5032_v52  ;;  %v5095_v59 = vadd.f32 %v5094_v38, %v5032_v52  ;;  %v5134_v2 = vmul.f32 %v5032_v52, %v5032_v52  ;;  %v4305_v38 = vor.u32 %v4304_v1, %v7645_v56  ;;  %v4296_v37 = vrot.slane %v4295_v45, 4 }
 0x276   : > { %v4534_v40 = vpop.f32.mrf.mxu3  ;;  %v3371_v10 = vrot.slane %v6168_v17, 5  ;;  %v4316_v52 = vshll.u32 %v3991_v11, 16  ;;  %v4326_v45 = vshrl.u32 %v7658_v31, 16  ;;  %v4870_v11 = vpack.c.b16 %v4850_v62, %v4849_v46  ;;  %v7679_v46 = vld [vmem:[#allocation2 + $0xbc] sm:$0x1] }
 0x277   : > { %v3855_v8 = vpop.f32.mrf.mxu2  ;;  %v7650_v21 = vpop.f32.mrf.mxu1  ;;  %v5165_v50 = vadd.f32 %v5164_v51, %v5134_v2  ;;  %v4607_v28 = vadd.f32 %v4534_v40, %v3925_v43  ;;  %v3368_v51 = vrot.slane %v6167_v58, 5  ;;  %v4306_v49 = vrot.slane %v4305_v38, 4 }
 0x278   : > { %v3926_v22 = vadd.f32 %v3855_v8, %v3611_v5  ;;  %v4322_v8 = vshll.u32 %v7658_v31, 16  ;;  %v4318_v5 = vrot.slane %v4316_v52, 5 }
 0x279   : > { %v3370_v54 = vrot.slane %v3368_v51, 4  ;;  %v4311_v38 = vsel %vm6367_vm10, %v4306_v49, %v4310_v57 }
 0x27a   : > { %3584 = vmatmul.bf16.gmra.mxu1 %v3448_v13  ;;  %v4960_v7 = vpop.f32.mrf.mxu0  ;;  %v7677_v17 = vrot.slane %v4322_v8, 5  ;;  %v4319_v49 = vor.u32 %v4318_v5, %v4315_v18  ;;  %v4332_v8 = vshll.u32 %v7679_v46, 16 }
 0x27b   : > { %4576 = vmatmul.bf16.gmra.mxu3 %v4444_v41  ;;  %v5033_v30 = vadd.f32 %v4960_v7, %v4607_v28  ;;  %v3369_v41 = vsel %vm6906_vm13, %v5678_v6, %v3368_v51  ;;  %v3372_v20 = vsel %vm6906_vm13, %v3370_v54, %v3371_v10  ;;  %v7849_v7 = vld [vmem:[#allocation7_spill] sm:$0xff]  ;;  %v4646_v51 = vld [vmem:[#allocation2 + $0xa8] sm:$0xe]  ;;  %v4426_v54 = vunpack.c.l.b16 %v4311_v38 }
 0x27c   : > { %v3612_v58 = vadd.f32 %v7632_v15, %v7849_v7  ;;  %v5901_v62 = vrot.slane %v4646_v51, 9  ;;  %v4787_v15 = vrot.slane %v7643_v9, 5  ;;  %v7687_v9 = vld [vmem:[#allocation2 + $0xc4] sm:$0xf]  ;;  %v6169_v7 = vld [vmem:[#allocation2 + $0xb8] sm:$0xf] }
 0x27d   : > { %5065 = vst [vmem:[%s7570_s9 + $0x28] sm:$0xff] %v5033_v30  ;;  %v5096_v43 = vadd.f32 %v5095_v59, %v5033_v30  ;;  %v5135_v1 = vmul.f32 %v5033_v30, %v5033_v30  ;;  %v4301_v59 = vsel %vm6367_vm10, %v4296_v37, %v7645_v56  ;;  %v4784_v30 = vrot.slane %v7626_v61, 5 }
 0x27e   : > { %v4537_v2 = vpop.f32.mrf.mxu3  ;;  %v4425_v6 = vunpack.c.l.b16 %v4301_v59  ;;  %v4328_v56 = vrot.slane %v4326_v45, 4 }
 0x27f   : > { %v3857_v40 = vpop.f32.mrf.mxu2  ;;  %v7661_v13 = vpop.f32.mrf.mxu1  ;;  %v5166_v53 = vadd.f32 %v5165_v50, %v5135_v1  ;;  %v4608_v28 = vadd.f32 %v4537_v2, %v3926_v22  ;;  %v3430_v50 = vunpack.c.l.b16 %v3369_v41  ;;  %v3431_v22 = vunpack.c.l.b16 %v3372_v20 }
 0x280   : > { %v3927_v57 = vadd.f32 %v3857_v40, %v3612_v58  ;;  %v4786_v52 = vrot.slane %v4784_v30, 4  ;;  %v4445_v2 = vpack.c.b16 %v4426_v54, %v4425_v6  ;;  %v4329_v40 = vor.u32 %v4328_v56, %v7677_v17  ;;  %v6170_v54 = vld [vmem:[#allocation2 + $0xbc] sm:$0x1] }
 0x281   : > { %v3449_v1 = vpack.c.b16 %v3431_v22, %v3430_v50  ;;  %v4785_v59 = vsel %vm6906_vm13, %v5901_v62, %v4784_v30  ;;  %v3375_v58 = vrot.slane %v6169_v7, 5  ;;  %v3378_v56 = vrot.slane %v6170_v54, 5 }
 0x282   : > { %v4963_v34 = vpop.f32.mrf.mxu0  ;;  %v4788_v38 = vsel %vm6906_vm13, %v4786_v52, %v4787_v15  ;;  %v4330_v5 = vrot.slane %v4329_v40, 4  ;;  %v4851_v15 = vunpack.c.l.b16 %v4785_v59  ;;  %v3614_v7 = vadd.f32 %v7661_v13, %v7260_v25 }
 0x283   : > { %v5034_v37 = vadd.f32 %v4963_v34, %v4608_v28  ;;  %v3225_v34 = vld [vmem:[#allocation2 + $0xb4] sm:$0xe]  ;;  %v3377_v6 = vrot.slane %v3375_v58, 4 }
 0x284   : > { %3899 = vmatmul.bf16.gmra.mxu2 %v6049_v60  ;;  %v3994_v60 = vld [vmem:[#allocation2 + $0xc0] sm:$0xf]  ;;  %v5679_v30 = vrot.slane %v3225_v34, 9 }
 0x285   : > { %5002 = vmatmul.bf16.gmra.mxu0 %v4870_v11  ;;  %5066 = vst [vmem:[%s7570_s9 + $0x30] sm:$0xff] %v5034_v37  ;;  %v5097_v61 = vadd.f32 %v5096_v43, %v5034_v37  ;;  %v5136_v14 = vmul.f32 %v5034_v37, %v5034_v37  ;;  %v3613_v43 = vadd.f32 %v7650_v21, %v7234_v26  ;;  %v4320_v11 = vrot.slane %v4319_v49, 4 }
 0x286   : > { %v4539_v10 = vpop.f32.mrf.mxu3  ;;  %v4337_v51 = vshrl.u32 %v3994_v60, 16  ;;  %v4340_v26 = vshll.u32 %v3994_v60, 16  ;;  %v4346_v21 = vshll.u32 %v7687_v9, 16  ;;  %v4350_v37 = vshrl.u32 %v7687_v9, 16 }
 0x287   : > { %v3860_v41 = vpop.f32.mrf.mxu2  ;;  %v7683_v20 = vpop.f32.mrf.mxu1  ;;  %v5167_v45 = vadd.f32 %v5166_v53, %v5136_v14  ;;  %v4609_v28 = vadd.f32 %v4539_v10, %v3927_v57  ;;  %v4334_v53 = vrot.slane %v4332_v8, 5  ;;  %v4852_v49 = vunpack.c.l.b16 %v4788_v38 }
 0x288   : > { %v3928_v22 = vadd.f32 %v3860_v41, %v3613_v43  ;;  %v4325_v52 = vsel %vm6367_vm10, %v4320_v11, %v7677_v17  ;;  %v3379_v41 = vsel %vm6906_vm13, %v3377_v6, %v3378_v56  ;;  %v4791_v60 = vrot.slane %v7658_v31, 5  ;;  %v4647_v43 = vld [vmem:[#allocation2 + $0xb4] sm:$0xe] }
 0x289   : > { %v4339_v59 = vrot.slane %v4337_v51, 4  ;;  %v4342_v38 = vrot.slane %v4340_v26, 5  ;;  %v7710_v17 = vrot.slane %v4346_v21, 5  ;;  %v4352_v11 = vrot.slane %v4350_v37, 4 }
 0x28a   : > { %3589 = vmatmul.bf16.gmra.mxu1 %v3449_v1  ;;  %v4965_v18 = vpop.f32.mrf.mxu0  ;;  %v4793_v51 = vrot.slane %v4791_v60, 4  ;;  %v4794_v26 = vrot.slane %v7679_v46, 5 }
 0x28b   : > { %4581 = vmatmul.bf16.gmra.mxu3 %v4445_v2  ;;  %v5035_v50 = vadd.f32 %v4965_v18, %v4609_v28  ;;  %v3376_v2 = vsel %vm6906_vm13, %v5679_v30, %v3375_v58  ;;  %v4335_v28 = vsel %vm6367_vm10, %v4330_v5, %v4334_v53  ;;  %v4871_v18 = vpack.c.b16 %v4852_v49, %v4851_v15  ;;  %v7714_v30 = vld [vmem:[#allocation2 + $0xc8] sm:$0x1] }
 0x28c   : > { %v3432_v58 = vunpack.c.l.b16 %v3376_v2  ;;  %v4428_v34 = vunpack.c.l.b16 %v4335_v28  ;;  %v5902_v53 = vrot.slane %v4647_v43, 9  ;;  %v4343_v21 = vor.u32 %v4342_v38, %v4339_v59  ;;  %v6171_v28 = vld [vmem:[#allocation2 + $0xc4] sm:$0xf] }
 0x28d   : > { %5067 = vst [vmem:[%s7570_s9 + $0x38] sm:$0xff] %v5035_v50  ;;  %v5098_v57 = vadd.f32 %v5097_v61, %v5035_v50  ;;  %v5137_v62 = vmul.f32 %v5035_v50, %v5035_v50  ;;  %v6050_v61 = vld [vmem:[#allocation2 + $0xb4] sm:$0xff]  ;;  %v4353_v6 = vor.u32 %v4352_v11, %v7710_v17  ;;  %v4356_v37 = vshll.u32 %v7714_v30, 16  ;;  %v3226_v11 = vld [vmem:[#allocation2 + $0xc0] sm:$0xe] }
 0x28e   : > { %v4542_v14 = vpop.f32.mrf.mxu3  ;;  %v4792_v46 = vsel %vm6906_vm13, %v5902_v53, %v4791_v60  ;;  %v4344_v2 = vrot.slane %v4343_v21, 4  ;;  %v3382_v43 = vrot.slane %v6171_v28, 5  ;;  %v3997_v60 = vld [vmem:[#allocation2 + $0xcc] sm:$0xf] }
 0x28f   : > { %v3862_v10 = vpop.f32.mrf.mxu2  ;;  %v7701_v1 = vpop.f32.mrf.mxu1  ;;  %v5168_v40 = vadd.f32 %v5167_v45, %v5137_v62  ;;  %v4610_v8 = vadd.f32 %v4542_v14, %v3928_v22  ;;  %v3433_v45 = vunpack.c.l.b16 %v3379_v41  ;;  %v4427_v22 = vunpack.c.l.b16 %v4325_v52 }
 0x290   : > { %v3929_v31 = vadd.f32 %v3862_v10, %v3614_v7  ;;  %v4795_v52 = vsel %vm6906_vm13, %v4793_v51, %v4794_v26  ;;  %v4354_v41 = vrot.slane %v4353_v6, 4  ;;  %v4853_v59 = vunpack.c.l.b16 %v4792_v46 }
 0x291   : > { %v3450_v56 = vpack.c.b16 %v3433_v45, %v3432_v58  ;;  %v4446_v62 = vpack.c.b16 %v4428_v34, %v4427_v22  ;;  %v5680_v7 = vrot.slane %v3226_v11, 9  ;;  %v3384_v58 = vrot.slane %v3382_v43, 4  ;;  %v6172_v45 = vld [vmem:[#allocation2 + $0xc8] sm:$0x1] }
 0x292   : > { %v4968_v50 = vpop.f32.mrf.mxu0  ;;  %v4361_v6 = vshrl.u32 %v3997_v60, 16 }
 0x293   : > { %v5036_v5 = vadd.f32 %v4968_v50, %v4610_v8  ;;  %v4358_v8 = vrot.slane %v4356_v37, 5  ;;  %v3385_v50 = vrot.slane %v6172_v45, 5  ;;  %v3383_v26 = vsel %vm6906_vm13, %v5680_v7, %v3382_v43 }
 0x294   : > { %3904 = vmatmul.bf16.gmra.mxu2 %v6050_v61  ;;  %v3434_v46 = vunpack.c.l.b16 %v3383_v26 }
 0x295   : > { %5007 = vmatmul.bf16.gmra.mxu0 %v4871_v18  ;;  %5068 = vst [vmem:[%s7570_s9 + $0x40] sm:$0xff] %v5036_v5  ;;  %v5099_v25 = vadd.f32 %v5098_v57, %v5036_v5  ;;  %v5138_v13 = vmul.f32 %v5036_v5, %v5036_v5  ;;  %v3615_v57 = vadd.f32 %v7683_v20, %v7264_v63  ;;  %v4854_v18 = vunpack.c.l.b16 %v4795_v52  ;;  %v7728_v63 = vld [vmem:[#allocation2 + $0xd0] sm:$0xf] }
 0x296   : > { %v4544_v54 = vpop.f32.mrf.mxu3  ;;  %v4349_v5 = vsel %vm6367_vm10, %v4344_v2, %v7710_v17  ;;  %v3386_v21 = vsel %vm6906_vm13, %v3384_v58, %v3385_v50  ;;  %v4370_v37 = vshll.u32 %v7728_v63, 16  ;;  %v4374_v17 = vshrl.u32 %v7728_v63, 16 }
 0x297   : > { %v3865_v15 = vpop.f32.mrf.mxu2  ;;  %v7720_v49 = vpop.f32.mrf.mxu1  ;;  %v5169_v14 = vadd.f32 %v5168_v40, %v5138_v13  ;;  %v4611_v10 = vadd.f32 %v4544_v54, %v3929_v31  ;;  %v4359_v31 = vsel %vm6367_vm10, %v4354_v41, %v4358_v8  ;;  %v3435_v52 = vunpack.c.l.b16 %v3386_v21  ;;  %v4648_v41 = vld [vmem:[#allocation2 + $0xc0] sm:$0xe] }
 0x298   : > { %v3930_v38 = vadd.f32 %v3865_v15, %v3615_v57  ;;  %v3616_v15 = vadd.f32 %v7701_v1, %v7277_v44  ;;  %v4430_v2 = vunpack.c.l.b16 %v4359_v31  ;;  %v4798_v8 = vrot.slane %v7687_v9, 5 }
 0x299   : > { %v4801_v9 = vrot.slane %v7714_v30, 5 }
 0x29a   : > { %3594 = vmatmul.bf16.gmra.mxu1 %v3450_v56  ;;  %v4970_v61 = vpop.f32.mrf.mxu0  ;;  %v6051_v56 = vld [vmem:[#allocation2 + $0xc0] sm:$0xff]  ;;  %v4800_v58 = vrot.slane %v4798_v8, 4 }
 0x29b   : > { %4586 = vmatmul.bf16.gmra.mxu3 %v4446_v62  ;;  %v5037_v40 = vadd.f32 %v4970_v61, %v4611_v10  ;;  %v4872_v62 = vpack.c.b16 %v4854_v18, %v4853_v59  ;;  %v4429_v10 = vunpack.c.l.b16 %v4349_v5  ;;  %v7747_v59 = vld [vmem:[#allocation2 + $0xd4] sm:$0x1]  ;;  %v3451_v18 = vpack.c.b16 %v3435_v52, %v3434_v46 }
 0x29c   : > { %v4802_v30 = vsel %vm6906_vm13, %v4800_v58, %v4801_v9 }
 0x29d   : > { %5069 = vst [vmem:[%s7570_s9 + $0x48] sm:$0xff] %v5037_v40  ;;  %v5100_v20 = vadd.f32 %v5099_v25, %v5037_v40  ;;  %v5139_v22 = vmul.f32 %v5037_v40, %v5037_v40  ;;  %v4364_v25 = vshll.u32 %v3997_v60, 16  ;;  %v4372_v40 = vrot.slane %v4370_v37, 5 }
 0x29e   : > { %v4547_v34 = vpop.f32.mrf.mxu3  ;;  %v5903_v60 = vrot.slane %v4648_v41, 9  ;;  %v4447_v7 = vpack.c.b16 %v4430_v2, %v4429_v10 }
 0x29f   : > { %v3867_v53 = vpop.f32.mrf.mxu2  ;;  %v7736_v51 = vpop.f32.mrf.mxu1  ;;  %v5170_v13 = vadd.f32 %v5169_v14, %v5139_v22  ;;  %v4612_v54 = vadd.f32 %v4547_v34, %v3930_v38  ;;  %v4363_v14 = vrot.slane %v4361_v6, 4  ;;  %v4366_v61 = vrot.slane %v4364_v25, 5 }
 0x2a0   : > { %v3931_v43 = vadd.f32 %v3867_v53, %v3616_v15  ;;  %v4376_v38 = vrot.slane %v4374_v17, 4  ;;  %v4380_v53 = vshll.u32 %v7747_v59, 16  ;;  %v4799_v21 = vsel %vm6906_vm13, %v5903_v60, %v4798_v8 }
 0x2a1   : > { %v4367_v22 = vor.u32 %v4366_v61, %v4363_v14  ;;  %v4856_v15 = vunpack.c.l.b16 %v4802_v30  ;;  %v3618_v14 = vadd.f32 %v7736_v51, %v7296_v12  ;;  %v4808_v12 = vrot.slane %v7747_v59, 5 }
 0x2a2   : > { %v4973_v57 = vpop.f32.mrf.mxu0  ;;  %v4377_v31 = vor.u32 %v4376_v38, %v4372_v40  ;;  %v4805_v38 = vrot.slane %v7728_v63, 5 }
 0x2a3   : > { %v5038_v28 = vadd.f32 %v4973_v57, %v4612_v54  ;;  %v4368_v6 = vrot.slane %v4367_v22, 4  ;;  %v6052_v57 = vld [vmem:[#allocation2 + $0xcc] sm:$0xff] }
 0x2a4   : > { %3909 = vmatmul.bf16.gmra.mxu2 %v6051_v56  ;;  %v4382_v56 = vrot.slane %v4380_v53, 5  ;;  %v4807_v58 = vrot.slane %v4805_v38, 4 }
 0x2a5   : > { %5012 = vmatmul.bf16.gmra.mxu0 %v4872_v62  ;;  %5070 = vst [vmem:[%s7570_s9 + $0x50] sm:$0xff] %v5038_v28  ;;  %v5101_v44 = vadd.f32 %v5100_v20, %v5038_v28  ;;  %v5140_v1 = vmul.f32 %v5038_v28, %v5038_v28  ;;  %v3617_v20 = vadd.f32 %v7720_v49, %v7286_v42  ;;  %v4855_v62 = vunpack.c.l.b16 %v4799_v21 }
 0x2a6   : > { %v4549_v11 = vpop.f32.mrf.mxu3  ;;  %v4373_v2 = vsel %vm6367_vm10, %v4368_v6, %v4372_v40 }
 0x2a7   : > { %v3870_v45 = vpop.f32.mrf.mxu2  ;;  %v3560_v50 = vpop.f32.mrf.mxu1  ;;  %v5171_v34 = vadd.f32 %v5170_v13, %v5140_v1  ;;  %v4613_v5 = vadd.f32 %v4549_v11, %v3931_v43  ;;  %v4378_v13 = vrot.slane %v4377_v31, 4  ;;  %v4873_v8 = vpack.c.b16 %v4856_v15, %v4855_v62  ;;  %v4649_v11 = vld [vmem:[#allocation2 + $0xcc] sm:$0xe] }
 0x2a8   : > { %v3932_v54 = vadd.f32 %v3870_v45, %v3617_v20  ;;  %v4431_v28 = vunpack.c.l.b16 %v4373_v2  ;;  %v3619_v63 = vadd.f32 %v3560_v50, %v7312_v16  ;;  %v4809_v31 = vsel %vm6906_vm13, %v4807_v58, %v4808_v12 }
 0x2a9   : > { %v4383_v41 = vsel %vm6367_vm10, %v4378_v13, %v4382_v56  ;;  %v4858_v30 = vunpack.c.l.b16 %v4809_v31 }
 0x2aa   : > { %3599 = vmatmul.bf16.gmra.mxu1 %v3451_v18  ;;  %v4975_v26 = vpop.f32.mrf.mxu0  ;;  %v4432_v43 = vunpack.c.l.b16 %v4383_v41 }
 0x2ab   : > { %4591 = vmatmul.bf16.gmra.mxu3 %v4447_v7  ;;  %v5039_v25 = vadd.f32 %v4975_v26, %v4613_v5  ;;  %v5904_v7 = vrot.slane %v4649_v11, 9 }
 0x2ac   : > { %v4448_v32 = vpack.c.b16 %v4432_v43, %v4431_v28 }
 0x2ad   : > { %5071 = vst [vmem:[%s7570_s9 + $0x58] sm:$0xff] %v5039_v25  ;;  %v5102_v37 = vadd.f32 %v5101_v44, %v5039_v25  ;;  %v5141_v17 = vmul.f32 %v5039_v25, %v5039_v25  ;;  %v4806_v5 = vsel %vm6906_vm13, %v5904_v7, %v4805_v38 }
 0x2ae   : > { %v4552_v42 = vpop.f32.mrf.mxu3  ;;  %v4857_v21 = vunpack.c.l.b16 %v4806_v5 }
 0x2af   : > { %v3872_v49 = vpop.f32.mrf.mxu2  ;;  %v3562_v10 = vpop.f32.mrf.mxu1  ;;  %v5172_v46 = vadd.f32 %v5171_v34, %v5141_v17  ;;  %v4614_v52 = vadd.f32 %v4552_v42, %v3932_v54 }
 0x2b0   : > { %v3933_v1 = vadd.f32 %v3872_v49, %v3618_v14  ;;  %v4874_v13 = vpack.c.b16 %v4858_v30, %v4857_v21  ;;  %v3620_v56 = vadd.f32 %v3562_v10, %v7323_v39 }
 0x2b2   : > { %v4978_v61 = vpop.f32.mrf.mxu0 }
 0x2b3   : > { %v5040_v44 = vadd.f32 %v4978_v61, %v4614_v52 }
 0x2b4   : > { %3914 = vmatmul.bf16.gmra.mxu2 %v6052_v57 }
 0x2b5   : > { %5017 = vmatmul.bf16.gmra.mxu0 %v4873_v8  ;;  %5072 = vst [vmem:[%s7570_s9 + $0x60] sm:$0xff] %v5040_v44  ;;  %v5103_v60 = vadd.f32 %v5102_v37, %v5040_v44  ;;  %v5142_v40 = vmul.f32 %v5040_v44, %v5040_v44 }
 0x2b6   : > { %v4554_v18 = vpop.f32.mrf.mxu3 }
 0x2b7   : > { %v3875_v51 = vpop.f32.mrf.mxu2  ;;  %v3565_v9 = vpop.f32.mrf.mxu1  ;;  %v5173_v45 = vadd.f32 %v5172_v46, %v5142_v40  ;;  %v4615_v22 = vadd.f32 %v4554_v18, %v3933_v1 }
 0x2b8   : > { %v3934_v20 = vadd.f32 %v3875_v51, %v3619_v63  ;;  %v3621_v2 = vadd.f32 %v3565_v9, %v7339_v27 }
 0x2ba   : > { %v4980_v34 = vpop.f32.mrf.mxu0 }
 0x2bb   : > { %4596 = vmatmul.bf16.gmra.mxu3 %v4448_v32  ;;  %v5041_v53 = vadd.f32 %v4980_v34, %v4615_v22 }
 0x2bd   : > { %5073 = vst [vmem:[%s7570_s9 + $0x68] sm:$0xff] %v5041_v53  ;;  %v5104_v26 = vadd.f32 %v5103_v60, %v5041_v53  ;;  %v5143_v59 = vmul.f32 %v5041_v53, %v5041_v53 }
 0x2be   : > { %v4557_v6 = vpop.f32.mrf.mxu3 }
 0x2bf   : > { %v3877_v25 = vpop.f32.mrf.mxu2  ;;  %v3567_v54 = vpop.f32.mrf.mxu1  ;;  %v5174_v16 = vadd.f32 %v5173_v45, %v5143_v59  ;;  %v4616_v50 = vadd.f32 %v4557_v6, %v3934_v20 }
 0x2c0   : > { %v3935_v17 = vadd.f32 %v3877_v25, %v3620_v56  ;;  %v3622_v1 = vadd.f32 %v3567_v54, %v7350_v55 }
 0x2c2   : > { %v4983_v37 = vpop.f32.mrf.mxu0 }
 0x2c3   : > { %v5042_v48 = vadd.f32 %v4983_v37, %v4616_v50 }
 0x2c5   : > { %5022 = vmatmul.bf16.gmra.mxu0 %v4874_v13  ;;  %5074 = vst [vmem:[%s7570_s9 + $0x70] sm:$0xff] %v5042_v48  ;;  %v5105_v62 = vadd.f32 %v5104_v26, %v5042_v48  ;;  %v5144_v15 = vmul.f32 %v5042_v48, %v5042_v48 }
 0x2c6   : > { %v4559_v42 = vpop.f32.mrf.mxu3 }
 0x2c7   : > { %v3880_v49 = vpop.f32.mrf.mxu2  ;;  %v3570_v46 = vpop.f32.mrf.mxu1  ;;  %v5175_v52 = vadd.f32 %v5174_v16, %v5144_v15  ;;  %v4617_v57 = vadd.f32 %v4559_v42, %v3935_v17 }
 0x2c8   : > { %v3936_v14 = vadd.f32 %v3880_v49, %v3621_v2  ;;  %v3623_v9 = vadd.f32 %v3570_v46, %v7366_v47 }
 0x2ca   : > { %v4985_v41 = vpop.f32.mrf.mxu0 }
 0x2cb   : > { %v5043_v8 = vadd.f32 %v4985_v41, %v4617_v57 }
 0x2cd   : > { %5075 = vst [vmem:[%s7570_s9 + $0x78] sm:$0xff] %v5043_v8  ;;  %v5106_v39 = vadd.f32 %v5105_v62, %v5043_v8  ;;  %v5145_v10 = vmul.f32 %v5043_v8, %v5043_v8 }
 0x2ce   : > { %v4562_v61 = vpop.f32.mrf.mxu3 }
 0x2cf   : > { %v3882_v28 = vpop.f32.mrf.mxu2  ;;  %v3572_v43 = vpop.f32.mrf.mxu1  ;;  %v5176_v38 = vadd.f32 %v5175_v52, %v5145_v10  ;;  %v4618_v44 = vadd.f32 %v4562_v61, %v3936_v14 }
 0x2d0   : > { %v3937_v40 = vadd.f32 %v3882_v28, %v3622_v1  ;;  %v3624_v59 = vadd.f32 %v3572_v43, %v7377_v24 }
 0x2d2   : > { %v4988_v11 = vpop.f32.mrf.mxu0 }
 0x2d3   : > { %v5044_v60 = vadd.f32 %v4988_v11, %v4618_v44 }
 0x2d5   : > { %5076 = vst [vmem:[%s7570_s9 + $0x80] sm:$0xff] %v5044_v60  ;;  %v5107_v27 = vadd.f32 %v5106_v39, %v5044_v60  ;;  %v5146_v18 = vmul.f32 %v5044_v60, %v5044_v60 }
 0x2d6   : > { %v4564_v32 = vpop.f32.mrf.mxu3 }
 0x2d7   : > { %v3885_v7 = vpop.f32.mrf.mxu2  ;;  %v3575_v58 = vpop.f32.mrf.mxu1  ;;  %v5177_v12 = vadd.f32 %v5176_v38, %v5146_v18  ;;  %v4619_v51 = vadd.f32 %v4564_v32, %v3937_v40 }
 0x2d8   : > { %v3938_v63 = vadd.f32 %v3885_v7, %v3623_v9  ;;  %v3625_v37 = vadd.f32 %v3575_v58, %v7393_v0 }
 0x2da   : > { %v4990_v45 = vpop.f32.mrf.mxu0 }
 0x2db   : > { %v5045_v22 = vadd.f32 %v4990_v45, %v4619_v51 }
 0x2dd   : > { %5077 = vst [vmem:[%s7570_s9 + $0x88] sm:$0xff] %v5045_v22  ;;  %v5108_v55 = vadd.f32 %v5107_v27, %v5045_v22  ;;  %v5147_v34 = vmul.f32 %v5045_v22, %v5045_v22 }
 0x2de   : > { %v4567_v5 = vpop.f32.mrf.mxu3 }
 0x2df   : > { %v3887_v31 = vpop.f32.mrf.mxu2  ;;  %v3577_v53 = vpop.f32.mrf.mxu1  ;;  %v5178_v20 = vadd.f32 %v5177_v12, %v5147_v34  ;;  %v4620_v26 = vadd.f32 %v4567_v5, %v3938_v63 }
 0x2e0   : > { %v3939_v6 = vadd.f32 %v3887_v31, %v3624_v59  ;;  %v3626_v2 = vadd.f32 %v3577_v53, %v7404_v23 }
 0x2e2   : > { %v4993_v21 = vpop.f32.mrf.mxu0 }
 0x2e3   : > { %v5046_v30 = vadd.f32 %v4993_v21, %v4620_v26 }
 0x2e5   : > { %5078 = vst [vmem:[%s7570_s9 + $0x90] sm:$0xff] %v5046_v30  ;;  %v5109_v47 = vadd.f32 %v5108_v55, %v5046_v30  ;;  %v5148_v25 = vmul.f32 %v5046_v30, %v5046_v30 }
 0x2e6   : > { %v4569_v54 = vpop.f32.mrf.mxu3 }
 0x2e7   : > { %v3890_v16 = vpop.f32.mrf.mxu2  ;;  %v3580_v50 = vpop.f32.mrf.mxu1  ;;  %v5179_v13 = vadd.f32 %v5178_v20, %v5148_v25  ;;  %v4621_v56 = vadd.f32 %v4569_v54, %v3939_v6 }
 0x2e8   : > { %v3940_v62 = vadd.f32 %v3890_v16, %v3625_v37  ;;  %v3627_v44 = vadd.f32 %v3580_v50, %v7420_v35 }
 0x2ea   : > { %v4995_v48 = vpop.f32.mrf.mxu0 }
 0x2eb   : > { %v5047_v17 = vadd.f32 %v4995_v48, %v4621_v56 }
 0x2ed   : > { %5079 = vst [vmem:[%s7570_s9 + $0x98] sm:$0xff] %v5047_v17  ;;  %v5110_v24 = vadd.f32 %v5109_v47, %v5047_v17  ;;  %v5149_v15 = vmul.f32 %v5047_v17, %v5047_v17 }
 0x2ee   : > { %v4572_v42 = vpop.f32.mrf.mxu3 }
 0x2ef   : > { %v3892_v49 = vpop.f32.mrf.mxu2  ;;  %v3582_v46 = vpop.f32.mrf.mxu1  ;;  %v5180_v52 = vadd.f32 %v5179_v13, %v5149_v15  ;;  %v4622_v57 = vadd.f32 %v4572_v42, %v3940_v62 }
 0x2f0   : > { %v3941_v14 = vadd.f32 %v3892_v49, %v3626_v2  ;;  %v3628_v58 = vadd.f32 %v3582_v46, %v7431_v19 }
 0x2f2   : > { %v4998_v41 = vpop.f32.mrf.mxu0 }
 0x2f3   : > { %v5048_v8 = vadd.f32 %v4998_v41, %v4622_v57 }
 0x2f5   : > { %5080 = vst [vmem:[%s7570_s9 + $0xa0] sm:$0xff] %v5048_v8  ;;  %v5111_v0 = vadd.f32 %v5110_v24, %v5048_v8  ;;  %v5150_v39 = vmul.f32 %v5048_v8, %v5048_v8 }
 0x2f6   : > { %v4574_v10 = vpop.f32.mrf.mxu3 }
 0x2f7   : > { %v3895_v61 = vpop.f32.mrf.mxu2  ;;  %v5181_v28 = vadd.f32 %v5180_v52, %v5150_v39  ;;  %v4623_v43 = vadd.f32 %v4574_v10, %v3941_v14  ;;  %v3585_v38 = vpop.f32.mrf.mxu1 }
 0x2f8   : > { %v3942_v60 = vadd.f32 %v3895_v61, %v3627_v44  ;;  %v3629_v31 = vadd.f32 %v3585_v38, %v7447_v3 }
 0x2fa   : > { %v5000_v1 = vpop.f32.mrf.mxu0 }
 0x2fb   : > { %v5049_v11 = vadd.f32 %v5000_v1, %v4623_v43 }
 0x2fd   : > { %5081 = vst [vmem:[%s7570_s9 + $0xa8] sm:$0xff] %v5049_v11  ;;  %v5112_v23 = vadd.f32 %v5111_v0, %v5049_v11  ;;  %v5151_v40 = vmul.f32 %v5049_v11, %v5049_v11 }
 0x2fe   : > { %v4577_v27 = vpop.f32.mrf.mxu3 }
 0x2ff   : > { %v3897_v18 = vpop.f32.mrf.mxu2  ;;  %v5182_v32 = vadd.f32 %v5181_v28, %v5151_v40  ;;  %v4624_v7 = vadd.f32 %v4577_v27, %v3942_v60  ;;  %v3587_v51 = vpop.f32.mrf.mxu1 }
 0x300   : > { %v3943_v45 = vadd.f32 %v3897_v18, %v3628_v58  ;;  %v3630_v54 = vadd.f32 %v3587_v51, %v7458_v29  ;;  %v7850_v51 = vld [vmem:[#allocation3_spill] sm:$0xff] }
 0x302   : > { %v5003_v12 = vpop.f32.mrf.mxu0 }
 0x303   : > { %v5050_v9 = vadd.f32 %v5003_v12, %v4624_v7 }
 0x305   : > { %5082 = vst [vmem:[%s7570_s9 + $0xb0] sm:$0xff] %v5050_v9  ;;  %v5113_v35 = vadd.f32 %v5112_v23, %v5050_v9  ;;  %v5152_v22 = vmul.f32 %v5050_v9, %v5050_v9 }
 0x306   : > { %v4579_v63 = vpop.f32.mrf.mxu3 }
 0x307   : > { %v3900_v55 = vpop.f32.mrf.mxu2  ;;  %v5183_v34 = vadd.f32 %v5182_v32, %v5152_v22  ;;  %v4625_v5 = vadd.f32 %v4579_v63, %v3943_v45  ;;  %v3590_v59 = vpop.f32.mrf.mxu1 }
 0x308   : > { %v3944_v26 = vadd.f32 %v3900_v55, %v3629_v31  ;;  %v3631_v15 = vadd.f32 %v3590_v59, %v7474_v36 }
 0x30a   : > { %v5005_v53 = vpop.f32.mrf.mxu0 }
 0x30b   : > { %v5051_v20 = vadd.f32 %v5005_v53, %v4625_v5 }
 0x30d   : > { %5083 = vst [vmem:[%s7570_s9 + $0xb8] sm:$0xff] %v5051_v20  ;;  %v5114_v19 = vadd.f32 %v5113_v35, %v5051_v20  ;;  %v5153_v21 = vmul.f32 %v5051_v20, %v5051_v20  ;;  %v7851_v20 = vld [vmem:[#allocation4_spill] sm:$0xff] }
 0x30e   : > { %v4582_v30 = vpop.f32.mrf.mxu3 }
 0x30f   : > { %v3902_v6 = vpop.f32.mrf.mxu2  ;;  %v5184_v47 = vadd.f32 %v5183_v34, %v5153_v21  ;;  %v4626_v25 = vadd.f32 %v4582_v30, %v3944_v26  ;;  %v3592_v17 = vpop.f32.mrf.mxu1 }
 0x310   : > { %v3945_v13 = vadd.f32 %v3902_v6, %v3630_v54  ;;  %v3632_v0 = vadd.f32 %v3592_v17, %v7485_v33  ;;  %v6182_v54 = vmov 0.0  }
 0x311   : > { %5200 = vst [vmem:[%s7810_s12 + $0x2] sm:$0x3f] %v6182_v54 }
 0x312   : > { %v5008_v16 = vpop.f32.mrf.mxu0 }
 0x313   : > { %v5052_v50 = vadd.f32 %v5008_v16, %v4626_v25 }
 0x315   : > { %5084 = vst [vmem:[%s7570_s9 + $0xc0] sm:$0xff] %v5052_v50  ;;  %v5115_v3 = vadd.f32 %v5114_v19, %v5052_v50  ;;  %v5154_v56 = vmul.f32 %v5052_v50, %v5052_v50 }
 0x316   : > { %v4584_v37 = vpop.f32.mrf.mxu3 }
 0x317   : > { %v3905_v48 = vpop.f32.mrf.mxu2  ;;  %v5185_v62 = vadd.f32 %v5184_v47, %v5154_v56  ;;  %v4627_v24 = vadd.f32 %v4584_v37, %v3945_v13  ;;  %v3595_v14 = vpop.f32.mrf.mxu1 }
 0x318   : > { %v3946_v46 = vadd.f32 %v3905_v48, %v3631_v15  ;;  %v3633_v11 = vadd.f32 %v3595_v14, %v7501_v4 }
 0x31a   : > { %v5010_v42 = vpop.f32.mrf.mxu0 }
 0x31b   : > { %v5053_v49 = vadd.f32 %v5010_v42, %v4627_v24 }
 0x31d   : > { %5085 = vst [vmem:[%s7570_s9 + $0xc8] sm:$0xff] %v5053_v49  ;;  %v5116_v29 = vadd.f32 %v5115_v3, %v5053_v49  ;;  %v5155_v52 = vmul.f32 %v5053_v49, %v5053_v49  ;;  %v7852_v3 = vld [vmem:[#allocation5_spill] sm:$0xff] }
 0x31e   : > { %v4587_v57 = vpop.f32.mrf.mxu3 }
 0x31f   : > { %v3907_v2 = vpop.f32.mrf.mxu2  ;;  %v5186_v41 = vadd.f32 %v5185_v62, %v5155_v52  ;;  %v4628_v8 = vadd.f32 %v4587_v57, %v3946_v46  ;;  %v3597_v23 = vpop.f32.mrf.mxu1 }
 0x320   : > { %v3947_v61 = vadd.f32 %v3907_v2, %v3632_v0  ;;  %v3634_v9 = vadd.f32 %v3597_v23, %v7850_v51 }
 0x322   : > { %v5013_v39 = vpop.f32.mrf.mxu0 }
 0x323   : > { %v5054_v10 = vadd.f32 %v5013_v39, %v4628_v8 }
 0x325   : > { %5086 = vst [vmem:[%s7570_s9 + $0xd0] sm:$0xff] %v5054_v10  ;;  %v5117_v36 = vadd.f32 %v5116_v29, %v5054_v10  ;;  %v5156_v28 = vmul.f32 %v5054_v10, %v5054_v10 }
 0x326   : > { %v4589_v43 = vpop.f32.mrf.mxu3 }
 0x327   : > { %v3910_v38 = vpop.f32.mrf.mxu2  ;;  %v5187_v44 = vadd.f32 %v5186_v41, %v5156_v28  ;;  %v4629_v1 = vadd.f32 %v4589_v43, %v3947_v61  ;;  %v3600_v4 = vpop.f32.mrf.mxu1 }
 0x328   : > { %v3948_v27 = vadd.f32 %v3910_v38, %v3633_v11  ;;  %v3635_v26 = vadd.f32 %v3600_v4, %v7851_v20 }
 0x32a   : > { %v5015_v60 = vpop.f32.mrf.mxu0 }
 0x32b   : > { %v5055_v40 = vadd.f32 %v5015_v60, %v4629_v1 }
 0x32d   : > { %5087 = vst [vmem:[%s7570_s9 + $0xd8] sm:$0xff] %v5055_v40  ;;  %v5118_v33 = vadd.f32 %v5117_v36, %v5055_v40  ;;  %v5157_v18 = vmul.f32 %v5055_v40, %v5055_v40 }
 0x32e   : > { %v4592_v32 = vpop.f32.mrf.mxu3 }
 0x32f   : > { %v3912_v7 = vpop.f32.mrf.mxu2  ;;  %v5188_v58 = vadd.f32 %v5187_v44, %v5157_v18  ;;  %v4630_v12 = vadd.f32 %v4592_v32, %v3948_v27  ;;  %v3602_v25 = vpop.f32.mrf.mxu1 }
 0x330   : > { %v3949_v22 = vadd.f32 %v3912_v7, %v3634_v9  ;;  %v3636_v56 = vadd.f32 %v3602_v25, %v7852_v3 }
 0x332   : > { %v5018_v45 = vpop.f32.mrf.mxu0 }
 0x333   : > { %v5056_v35 = vadd.f32 %v5018_v45, %v4630_v12 }
 0x335   : > { %5088 = vst [vmem:[%s7570_s9 + $0xe0] sm:$0xff] %v5056_v35  ;;  %v5119_v63 = vadd.f32 %v5118_v33, %v5056_v35  ;;  %v5158_v55 = vmul.f32 %v5056_v35, %v5056_v35 }
 0x336   : > { %v4594_v34 = vpop.f32.mrf.mxu3 }
 0x337   : > { %v3915_v5 = vpop.f32.mrf.mxu2  ;;  %v5189_v31 = vadd.f32 %v5188_v58, %v5158_v55  ;;  %v4631_v53 = vadd.f32 %v4594_v34, %v3949_v22 }
 0x338   : > { %v3950_v21 = vadd.f32 %v3915_v5, %v3635_v26 }
 0x33a   : > { %v5020_v59 = vpop.f32.mrf.mxu0 }
 0x33b   : > { %v5057_v19 = vadd.f32 %v5020_v59, %v4631_v53 }
 0x33d   : > { %5089 = vst [vmem:[%s7570_s9 + $0xe8] sm:$0xff] %v5057_v19  ;;  %v5120_v30 = vadd.f32 %v5119_v63, %v5057_v19  ;;  %v5159_v6 = vmul.f32 %v5057_v19, %v5057_v19 }
 0x33e   : > { %v4597_v47 = vpop.f32.mrf.mxu3 }
 0x33f   : > { %v5190_v16 = vadd.f32 %v5189_v31, %v5159_v6  ;;  %v4632_v50 = vadd.f32 %v4597_v47, %v3950_v21  ;;  %v3917_v13 = vpop.f32.mrf.mxu2 }
 0x340   : > { %v3951_v17 = vadd.f32 %v3917_v13, %v3636_v56 }
 0x342   : > { %v5023_v37 = vpop.f32.mrf.mxu0 }
 0x343   : > { %v5058_v48 = vadd.f32 %v5023_v37, %v4632_v50 }
 0x345   : > { %5090 = vst [vmem:[%s7570_s9 + $0xf0] sm:$0xff] %v5058_v48  ;;  %v5121_v62 = vadd.f32 %v5120_v30, %v5058_v48  ;;  %v5160_v24 = vmul.f32 %v5058_v48, %v5058_v48 }
 0x346   : > { %v4599_v15 = vpop.f32.mrf.mxu3 }
 0x347   : > { %v5191_v42 = vadd.f32 %v5190_v16, %v5160_v24  ;;  %v4633_v49 = vadd.f32 %v4599_v15, %v3951_v17 }
 0x34a   : > { %v5025_v46 = vpop.f32.mrf.mxu0 }
 0x34b   : > { %v5059_v29 = vadd.f32 %v5025_v46, %v4633_v49 }
 0x34d   : > { %5091 = vst [vmem:[%s7570_s9 + $0xf8] sm:$0xff] %v5059_v29  ;;  %v5122_v52 = vadd.f32 %v5121_v62, %v5059_v29  ;;  %v5161_v57 = vmul.f32 %v5059_v29, %v5059_v29 }
 0x34f   : > { %v5123_v2 = vrot.slane %v5122_v52, 4  ;;  %v5192_v41 = vadd.f32 %v5191_v42, %v5161_v57 }
 0x351   : > { %v5124_v8 = vadd.f32 %v5123_v2, %v5122_v52  ;;  %v5193_v14 = vrot.slane %v5192_v41, 4 }
 0x353   : > { %v5125_v0 = vrot.slane %v5124_v8, 2  ;;  %v5194_v39 = vadd.f32 %v5193_v14, %v5192_v41 }
 0x355   : > { %v5126_v10 = vadd.f32 %v5125_v0, %v5124_v8  ;;  %v5195_v61 = vrot.slane %v5194_v39, 2 }
 0x357   : > { %v5127_v36 = vrot.slane %v5126_v10, 1  ;;  %v5196_v28 = vadd.f32 %v5195_v61, %v5194_v39 }
 0x359   : > { %v5128_v43 = vadd.f32 %v5127_v36, %v5126_v10  ;;  %v5197_v38 = vrot.slane %v5196_v28, 1 }
 0x35b   : > { %5129 = vst [vmem:[%s7810_s12] sm:$0x1] %v5128_v43  ;;  %v5198_v44 = vadd.f32 %v5197_v38, %v5196_v28 }
 0x35d   : > { %5199 = vst [vmem:[%s7810_s12 + $0x1] sm:$0x1] %v5198_v44 }
 0x35e PF: > { %s16_s18 = sadd.s32 1, %s6179_s18  }
 0x35f   : > { %p13_p4 = scmp.ge.s32.totalorder %s16_s18, 4  }
 0x361   :  { %15 = sbr.rel (!%p13_p4) target bundleno = 1 (0x1), region = 88 }

</bundles_post_ra>
